<compile_context>
chip_gen: v6e
topology: v6e:2x2x1
jax: 0.10.0
libtpu: 0.0.40
codegen_flags: <defaults>
</compile_context>

<pallas_src>
import jax
import jax.numpy as jnp
from jax import lax
from jax.experimental import pallas as pl
from jax.experimental.pallas import tpu as pltpu


# --------------------------------------------------------------------------- reference glue

def _im2col3x3(x_nhwc):
    """(B, H, W, C) -> (B, H*W, 9*C) patches. Used by the pure-JAX reference only."""
    B, H, W, C = x_nhwc.shape
    xp = jnp.pad(x_nhwc, ((0, 0), (1, 1), (1, 1), (0, 0)))
    cols = []
    for dh in range(3):
        for dw in range(3):
            cols.append(xp[:, dh:dh + H, dw:dw + W, :])
    return jnp.concatenate(cols, axis=-1).reshape(B, H * W, 9 * C)


# --------------------------------------------------------------------------- fused kernel

def _danet_head_kernel(xp_ref, w5_ref, s5_ref, b5_ref,
                       wq_ref, bq_ref, wk_ref, bk_ref, wv_ref, bv_ref,
                       w51_ref, s51_ref, b51_ref, w52_ref, s52_ref, b52_ref,
                       g_ref, o_ref, pad1_ref, pad2_ref):
    Hp, Wp, Cin = xp_ref.shape[1], xp_ref.shape[2], xp_ref.shape[3]
    H, W = Hp - 2, Wp - 2
    HW = H * W
    inter = wv_ref.shape[0]

    # ---- conv5a | conv5c fused: identical 3x3 windows of x, Cout concatenated (BN+ReLU)
    acc = jnp.zeros((HW, 2 * inter), jnp.float32)
    for t in range(9):
        kh, kw = t // 3, t % 3
        win = xp_ref[0, kh:kh + H, kw:kw + W, :].reshape(HW, Cin)
        acc = acc + jnp.dot(win, w5_ref[t], preferred_element_type=jnp.float32)
    y = jnp.maximum(acc * s5_ref[...] + b5_ref[...], 0.0)      # folded BN (eval) + ReLU
    feat1 = y[:, :inter]                                       # PAM branch input
    feat2 = y[:, inter:]                                       # CAM branch input

    # ---- PAM: position attention over HW (wq/wk/bq/bk zero-padded to >=8 cols, exact)
    q = jnp.dot(feat1, wq_ref[...], preferred_element_type=jnp.float32) + bq_ref[...]
    k = jnp.dot(feat1, wk_ref[...], preferred_element_type=jnp.float32) + bk_ref[...]
    v = jnp.dot(feat1, wv_ref[...], preferred_element_type=jnp.float32) + bv_ref[...]
    energy = lax.dot_general(q, k, (((1,), (1,)), ((), ())),
                             preferred_element_type=jnp.float32)        # (HW, HW)
    energy = energy - jnp.max(energy, axis=-1, keepdims=True)
    e = jnp.exp(energy)
    att = e * pl.reciprocal(jnp.sum(e, axis=-1, keepdims=True), approx=True)
    sa = g_ref[0] * jnp.dot(att, v, preferred_element_type=jnp.float32) + feat1

    # ---- CAM: channel attention over C
    energy2 = lax.dot_general(feat2, feat2, (((0,), (0,)), ((), ())),
                              preferred_element_type=jnp.float32)       # (C, C)
    energy2 = jnp.max(energy2, axis=-1, keepdims=True) - energy2
    energy2 = energy2 - jnp.max(energy2, axis=-1, keepdims=True)
    e2 = jnp.exp(energy2)
    att2 = e2 * pl.reciprocal(jnp.sum(e2, axis=-1, keepdims=True), approx=True)
    out2 = lax.dot_general(feat2, att2, (((1,), (1,)), ((), ())),
                           preferred_element_type=jnp.float32)          # (HW, C)
    sc = g_ref[1] * out2 + feat2

    # ---- conv51(sa) + conv52(sc) + sum, via zero-padded VMEM scratch windows (BN+ReLU)
    def conv3x3(feat, pad_ref, w_ref, s_ref, b_ref):
        pad_ref[...] = jnp.zeros_like(pad_ref)
        pad_ref[1:H + 1, 1:W + 1, :] = feat.reshape(H, W, inter)
        a = jnp.zeros((HW, inter), jnp.float32)
        for t in range(9):
            kh, kw = t // 3, t % 3
            win = pad_ref[kh:kh + H, kw:kw + W, :].reshape(HW, inter)
            a = a + jnp.dot(win, w_ref[t], preferred_element_type=jnp.float32)
        return jnp.maximum(a * s_ref[...] + b_ref[...], 0.0)

    o_ref[0] = (conv3x3(sa, pad1_ref, w51_ref, s51_ref, b51_ref) +
                conv3x3(sc, pad2_ref, w52_ref, s52_ref, b52_ref))


# --------------------------------------------------------------------------- wrapper

def _pack_params(p):
    """Pack torch-style params into kernel-ready arrays (tap-major conv weights,
    merged conv5a|conv5c, zero-padded PAM q/k projections, stacked gammas)."""
    inter = p["w5a"].shape[-1]
    cin = p["w5a"].shape[0] // 9
    cq = p["wq"].shape[-1]
    cqp = max(8, ((cq + 7) // 8) * 8)

    w5 = jnp.concatenate([p["w5a"].reshape(9, cin, inter),
                          p["w5c"].reshape(9, cin, inter)], axis=-1)    # (9, Cin, 2*inter)
    s5 = jnp.concatenate([p["s5a"], p["s5c"]], axis=-1)
    b5 = jnp.concatenate([p["b5a"], p["b5c"]], axis=-1)

    wq = jnp.zeros((inter, cqp), jnp.float32).at[:, :cq].set(p["wq"])
    bq = jnp.zeros((1, cqp), jnp.float32).at[:, :cq].set(p["bq"])
    wk = jnp.zeros((inter, cqp), jnp.float32).at[:, :cq].set(p["wk"])
    bk = jnp.zeros((1, cqp), jnp.float32).at[:, :cq].set(p["bk"])

    return dict(
        w5=w5, s5=s5, b5=b5, wq=wq, bq=bq, wk=wk, bk=bk,
        wv=p["wv"], bv=p["bv"],
        w51=p["w51"].reshape(9, inter, inter), s51=p["s51"], b51=p["b51"],
        w52=p["w52"].reshape(9, inter, inter), s52=p["s52"], b52=p["b52"],
        gammas=jnp.concatenate([p["gamma_pam"], p["gamma_cam"]]),       # (2,)
    )


def danet_head(x_nchw, p):
    """Forward pass of DANetHead. x: (B, Cin, H, W) -> (B, inter, H, W)."""
    x = jnp.transpose(x_nchw, (0, 2, 3, 1))                             # NHWC
    B, H, W, Cin = x.shape
    inter = p["w5a"].shape[-1]
    HW = H * W
    kp = _pack_params(p)
    cqp = kp["wq"].shape[-1]
    xp = jnp.pad(x, ((0, 0), (1, 1), (1, 1), (0, 0)))                   # (B, H+2, W+2, Cin)

    def full(shape):
        return pl.BlockSpec(shape, lambda b, _s=len(shape): (0,) * _s)

    # TODO(synk): for realistic DANet sizes (large H*W, Cin up to 2048) tile PAM flash-style
    # over KV blocks and add a second "parallel" HW grid axis (v7x 64 MiB VMEM / dual-TC,
    # lane-dense packed stores); at this toy size whole-HW blocks fit comfortably.
    out = pl.pallas_call(
        _danet_head_kernel,
        out_shape=jax.ShapeDtypeStruct((B, HW, inter), jnp.float32),
        grid=(B,),
        in_specs=[
            pl.BlockSpec((1, H + 2, W + 2, Cin), lambda b: (b, 0, 0, 0)),
            full((9, Cin, 2 * inter)),
            full((1, 2 * inter)), full((1, 2 * inter)),
            full((inter, cqp)), full((1, cqp)),
            full((inter, cqp)), full((1, cqp)),
            full((inter, inter)), full((1, inter)),
            full((9, inter, inter)), full((1, inter)), full((1, inter)),
            full((9, inter, inter)), full((1, inter)), full((1, inter)),
            pl.BlockSpec(memory_space=pltpu.MemorySpace.SMEM),
        ],
        out_specs=pl.BlockSpec((1, HW, inter), lambda b: (b, 0, 0)),
        scratch_shapes=[pltpu.VMEM((H + 2, W + 2, inter), jnp.float32),
                        pltpu.VMEM((H + 2, W + 2, inter), jnp.float32)],
        compiler_params=pltpu.CompilerParams(dimension_semantics=("parallel",)),
    )(xp, kp["w5"], kp["s5"], kp["b5"],
      kp["wq"], kp["bq"], kp["wk"], kp["bk"], kp["wv"], kp["bv"],
      kp["w51"], kp["s51"], kp["b51"], kp["w52"], kp["s52"], kp["b52"],
      kp["gammas"])

    out = out.reshape(B, H, W, inter)
    return jnp.transpose(out, (0, 3, 1, 2))                             # back to NCHW


# --------------------------------------------------------------------------- reference (pure JAX)

def danet_head_ref(x_nchw, p):
    hp = jax.lax.Precision.HIGHEST
    x = jnp.transpose(x_nchw, (0, 2, 3, 1))
    B, H, W, _ = x.shape
    inter = p["w5a"].shape[-1]

    def conv(xin, w, s, b):
        pat = _im2col3x3(xin)
        y = jnp.einsum("bnk,ko->bno", pat, w, precision=hp) * s + b
        return jnp.maximum(y, 0.0)

    feat1 = conv(x, p["w5a"], p["s5a"], p["b5a"])
    q = jnp.einsum("bnc,co->bno", feat1, p["wq"], precision=hp) + p["bq"]
    k = jnp.einsum("bnc,co->bno", feat1, p["wk"], precision=hp) + p["bk"]
    v = jnp.einsum("bnc,co->bno", feat1, p["wv"], precision=hp) + p["bv"]
    energy = jnp.einsum("bnc,bmc->bnm", q, k, precision=hp)
    att = jax.nn.softmax(energy, axis=-1)
    sa = p["gamma_pam"][0] * jnp.einsum("bnm,bmc->bnc", att, v, precision=hp) + feat1

    feat2 = conv(x, p["w5c"], p["s5c"], p["b5c"])
    energy2 = jnp.einsum("bnc,bnd->bcd", feat2, feat2, precision=hp)
    energy2n = jnp.max(energy2, axis=-1, keepdims=True) - energy2
    att2 = jax.nn.softmax(energy2n, axis=-1)
    sc = p["gamma_cam"][0] * jnp.einsum("bcd,bnd->bnc", att2, feat2, precision=hp) + feat2

    sa_conv = conv(sa.reshape(B, H, W, inter), p["w51"], p["s51"], p["b51"])
    sc_conv = conv(sc.reshape(B, H, W, inter), p["w52"], p["s52"], p["b52"])
    out = (sa_conv + sc_conv).reshape(B, H, W, inter)
    return jnp.transpose(out, (0, 3, 1, 2))


# --------------------------------------------------------------------------- params

def init_params(key, in_ch, inter):
    keys = iter(jax.random.split(key, 32))

    def w3x3(cin, cout):
        # torch layout (Cout, Cin, 3, 3) -> (kh, kw, cin) x cout matrix
        w = jax.random.normal(next(keys), (cout, cin, 3, 3), jnp.float32) * 0.1
        return jnp.transpose(w, (2, 3, 1, 0)).reshape(9 * cin, cout)

    def bn(c):
        weight = 1.0 + 0.1 * jax.random.normal(next(keys), (c,), jnp.float32)
        bias = 0.1 * jax.random.normal(next(keys), (c,), jnp.float32)
        mean = 0.1 * jax.random.normal(next(keys), (c,), jnp.float32)
        var = jnp.abs(jax.random.normal(next(keys), (c,), jnp.float32)) + 1.0
        scale = weight / jnp.sqrt(var + 1e-5)          # BN in eval mode, folded
        shift = bias - mean * scale
        return scale.reshape(1, c), shift.reshape(1, c)

    cq = inter // 8
    p = {}
    p["w5a"] = w3x3(in_ch, inter); p["s5a"], p["b5a"] = bn(inter)
    p["w5c"] = w3x3(in_ch, inter); p["s5c"], p["b5c"] = bn(inter)
    p["w51"] = w3x3(inter, inter); p["s51"], p["b51"] = bn(inter)
    p["w52"] = w3x3(inter, inter); p["s52"], p["b52"] = bn(inter)
    # PAM 1x1 conv projections (stored as (Cin, Cout) matrices) + biases
    p["wq"] = jax.random.normal(next(keys), (inter, cq), jnp.float32) * 0.1
    p["bq"] = 0.1 * jax.random.normal(next(keys), (1, cq), jnp.float32)
    p["wk"] = jax.random.normal(next(keys), (inter, cq), jnp.float32) * 0.1
    p["bk"] = 0.1 * jax.random.normal(next(keys), (1, cq), jnp.float32)
    p["wv"] = jax.random.normal(next(keys), (inter, inter), jnp.float32) * 0.1
    p["bv"] = 0.1 * jax.random.normal(next(keys), (1, inter), jnp.float32)
    # torch init is zeros; use nonzero deterministic values so the attention path matters
    p["gamma_pam"] = jnp.array([0.5], jnp.float32)
    p["gamma_cam"] = jnp.array([0.7], jnp.float32)
    return p


# --------------------------------------------------------------------------- main

if __name__ == "__main__":
    B, Cin, H, W = 2, 64, 16, 16          # inter_channels = Cin // 4 = 16, q/k dim = 2
    inter = Cin // 4

    key = jax.random.PRNGKey(0)
    kx, kp = jax.random.split(key)
    x = jax.random.normal(kx, (B, Cin, H, W), jnp.float32)
    params = init_params(kp, Cin, inter)

    out = jax.jit(danet_head)(x, params)
    out = jax.block_until_ready(out)
    assert out.shape == (B, inter, H, W), out.shape

    ref = danet_head_ref(x, params)
    if not bool(jnp.allclose(out, ref, rtol=1e-2, atol=1e-2)):
        raise AssertionError(
            f"mismatch: max abs err = {float(jnp.max(jnp.abs(out - ref)))}")

    print("KERNEL_OK")
</pallas_src>

<mosaic_0001>
module attributes {stable_mosaic.version = 11 : i64} {
  func.func @_danet_head_kernel(%arg0: i32, %arg1: memref<1x18x18x64xf32, #tpu.memory_space<vmem>>, %arg2: memref<9x64x32xf32, #tpu.memory_space<vmem>>, %arg3: memref<1x32xf32, #tpu.memory_space<vmem>>, %arg4: memref<1x32xf32, #tpu.memory_space<vmem>>, %arg5: memref<16x8xf32, #tpu.memory_space<vmem>>, %arg6: memref<1x8xf32, #tpu.memory_space<vmem>>, %arg7: memref<16x8xf32, #tpu.memory_space<vmem>>, %arg8: memref<1x8xf32, #tpu.memory_space<vmem>>, %arg9: memref<16x16xf32, #tpu.memory_space<vmem>>, %arg10: memref<1x16xf32, #tpu.memory_space<vmem>>, %arg11: memref<9x16x16xf32, #tpu.memory_space<vmem>>, %arg12: memref<1x16xf32, #tpu.memory_space<vmem>>, %arg13: memref<1x16xf32, #tpu.memory_space<vmem>>, %arg14: memref<9x16x16xf32, #tpu.memory_space<vmem>>, %arg15: memref<1x16xf32, #tpu.memory_space<vmem>>, %arg16: memref<1x16xf32, #tpu.memory_space<vmem>>, %arg17: memref<2xf32, #tpu.memory_space<smem>>, %arg18: memref<1x256x16xf32, #tpu.memory_space<vmem>>, %arg19: memref<18x18x16xf32, #tpu.memory_space<vmem>>, %arg20: memref<18x18x16xf32, #tpu.memory_space<vmem>>) attributes {dimension_semantics = [#tpu.dimension_semantics<parallel>], iteration_bounds = array<i64: 2>, scalar_prefetch = 0 : i64, scratch_operands = 2 : i64, tpu.core_type = #tpu.core_type<tc>, window_params = [{transform_indices = @transform_0, window_bounds = array<i64: 1, 18, 18, 64>}, {pipeline_mode = #tpu.pipeline_mode<synchronous>, transform_indices = @transform_1, window_bounds = array<i64: 9, 64, 32>}, {pipeline_mode = #tpu.pipeline_mode<synchronous>, transform_indices = @transform_2, window_bounds = array<i64: 1, 32>}, {pipeline_mode = #tpu.pipeline_mode<synchronous>, transform_indices = @transform_3, window_bounds = array<i64: 1, 32>}, {pipeline_mode = #tpu.pipeline_mode<synchronous>, transform_indices = @transform_4, window_bounds = array<i64: 16, 8>}, {pipeline_mode = #tpu.pipeline_mode<synchronous>, transform_indices = @transform_5, window_bounds = array<i64: 1, 8>}, {pipeline_mode = #tpu.pipeline_mode<synchronous>, transform_indices = @transform_6, window_bounds = array<i64: 16, 8>}, {pipeline_mode = #tpu.pipeline_mode<synchronous>, transform_indices = @transform_7, window_bounds = array<i64: 1, 8>}, {pipeline_mode = #tpu.pipeline_mode<synchronous>, transform_indices = @transform_8, window_bounds = array<i64: 16, 16>}, {pipeline_mode = #tpu.pipeline_mode<synchronous>, transform_indices = @transform_9, window_bounds = array<i64: 1, 16>}, {pipeline_mode = #tpu.pipeline_mode<synchronous>, transform_indices = @transform_10, window_bounds = array<i64: 9, 16, 16>}, {pipeline_mode = #tpu.pipeline_mode<synchronous>, transform_indices = @transform_11, window_bounds = array<i64: 1, 16>}, {pipeline_mode = #tpu.pipeline_mode<synchronous>, transform_indices = @transform_12, window_bounds = array<i64: 1, 16>}, {pipeline_mode = #tpu.pipeline_mode<synchronous>, transform_indices = @transform_13, window_bounds = array<i64: 9, 16, 16>}, {pipeline_mode = #tpu.pipeline_mode<synchronous>, transform_indices = @transform_14, window_bounds = array<i64: 1, 16>}, {pipeline_mode = #tpu.pipeline_mode<synchronous>, transform_indices = @transform_15, window_bounds = array<i64: 1, 16>}, {transform_indices = @transform_16, window_bounds = array<i64: 2>}, {transform_indices = @transform_17, window_bounds = array<i64: 1, 256, 16>}]} {
    %cst = arith.constant 0.000000e+00 : f32
    %0 = vector.broadcast %cst : f32 to vector<256x32xf32>
    %c0 = arith.constant 0 : index
    %c0_0 = arith.constant 0 : index
    %c0_1 = arith.constant 0 : index
    %c0_2 = arith.constant 0 : index
    %1 = vector.load %arg1[%c0, %c0_0, %c0_1, %c0_2] : memref<1x18x18x64xf32, #tpu.memory_space<vmem>>, vector<1x16x16x64xf32>
    %2 = vector.shape_cast %1 : vector<1x16x16x64xf32> to vector<16x16x64xf32>
    %3 = vector.shape_cast %2 : vector<16x16x64xf32> to vector<256x64xf32>
    %c0_3 = arith.constant 0 : index
    %c0_4 = arith.constant 0 : index
    %c0_5 = arith.constant 0 : index
    %4 = vector.load %arg2[%c0_3, %c0_4, %c0_5] : memref<9x64x32xf32, #tpu.memory_space<vmem>>, vector<1x64x32xf32>
    %5 = vector.shape_cast %4 : vector<1x64x32xf32> to vector<64x32xf32>
    %cst_6 = arith.constant dense<0.000000e+00> : vector<256x32xf32>
    %6 = tpu.matmul %3, %5, %cst_6 {dimension_numbers = #tpu.dot_dimension_numbers<[1], [0], [0], [1], [0, 0, 1, 1], [], []>} : vector<256x64xf32>, vector<64x32xf32>, vector<256x32xf32> -> vector<256x32xf32>
    %7 = arith.addf %0, %6 : vector<256x32xf32>
    %c0_7 = arith.constant 0 : index
    %c0_8 = arith.constant 0 : index
    %c1 = arith.constant 1 : index
    %c0_9 = arith.constant 0 : index
    %8 = vector.load %arg1[%c0_7, %c0_8, %c1, %c0_9] : memref<1x18x18x64xf32, #tpu.memory_space<vmem>>, vector<1x16x16x64xf32>
    %9 = vector.shape_cast %8 : vector<1x16x16x64xf32> to vector<16x16x64xf32>
    %10 = vector.shape_cast %9 : vector<16x16x64xf32> to vector<256x64xf32>
    %c1_10 = arith.constant 1 : index
    %c0_11 = arith.constant 0 : index
    %c0_12 = arith.constant 0 : index
    %11 = vector.load %arg2[%c1_10, %c0_11, %c0_12] : memref<9x64x32xf32, #tpu.memory_space<vmem>>, vector<1x64x32xf32>
    %12 = vector.shape_cast %11 : vector<1x64x32xf32> to vector<64x32xf32>
    %cst_13 = arith.constant dense<0.000000e+00> : vector<256x32xf32>
    %13 = tpu.matmul %10, %12, %cst_13 {dimension_numbers = #tpu.dot_dimension_numbers<[1], [0], [0], [1], [0, 0, 1, 1], [], []>} : vector<256x64xf32>, vector<64x32xf32>, vector<256x32xf32> -> vector<256x32xf32>
    %14 = arith.addf %7, %13 : vector<256x32xf32>
    %c0_14 = arith.constant 0 : index
    %c0_15 = arith.constant 0 : index
    %c2 = arith.constant 2 : index
    %c0_16 = arith.constant 0 : index
    %15 = vector.load %arg1[%c0_14, %c0_15, %c2, %c0_16] : memref<1x18x18x64xf32, #tpu.memory_space<vmem>>, vector<1x16x16x64xf32>
    %16 = vector.shape_cast %15 : vector<1x16x16x64xf32> to vector<16x16x64xf32>
    %17 = vector.shape_cast %16 : vector<16x16x64xf32> to vector<256x64xf32>
    %c2_17 = arith.constant 2 : index
    %c0_18 = arith.constant 0 : index
    %c0_19 = arith.constant 0 : index
    %18 = vector.load %arg2[%c2_17, %c0_18, %c0_19] : memref<9x64x32xf32, #tpu.memory_space<vmem>>, vector<1x64x32xf32>
    %19 = vector.shape_cast %18 : vector<1x64x32xf32> to vector<64x32xf32>
    %cst_20 = arith.constant dense<0.000000e+00> : vector<256x32xf32>
    %20 = tpu.matmul %17, %19, %cst_20 {dimension_numbers = #tpu.dot_dimension_numbers<[1], [0], [0], [1], [0, 0, 1, 1], [], []>} : vector<256x64xf32>, vector<64x32xf32>, vector<256x32xf32> -> vector<256x32xf32>
    %21 = arith.addf %14, %20 : vector<256x32xf32>
    %c0_21 = arith.constant 0 : index
    %c1_22 = arith.constant 1 : index
    %c0_23 = arith.constant 0 : index
    %c0_24 = arith.constant 0 : index
    %22 = vector.load %arg1[%c0_21, %c1_22, %c0_23, %c0_24] : memref<1x18x18x64xf32, #tpu.memory_space<vmem>>, vector<1x16x16x64xf32>
    %23 = vector.shape_cast %22 : vector<1x16x16x64xf32> to vector<16x16x64xf32>
    %24 = vector.shape_cast %23 : vector<16x16x64xf32> to vector<256x64xf32>
    %c3 = arith.constant 3 : index
    %c0_25 = arith.constant 0 : index
    %c0_26 = arith.constant 0 : index
    %25 = vector.load %arg2[%c3, %c0_25, %c0_26] : memref<9x64x32xf32, #tpu.memory_space<vmem>>, vector<1x64x32xf32>
    %26 = vector.shape_cast %25 : vector<1x64x32xf32> to vector<64x32xf32>
    %cst_27 = arith.constant dense<0.000000e+00> : vector<256x32xf32>
    %27 = tpu.matmul %24, %26, %cst_27 {dimension_numbers = #tpu.dot_dimension_numbers<[1], [0], [0], [1], [0, 0, 1, 1], [], []>} : vector<256x64xf32>, vector<64x32xf32>, vector<256x32xf32> -> vector<256x32xf32>
    %28 = arith.addf %21, %27 : vector<256x32xf32>
    %c0_28 = arith.constant 0 : index
    %c1_29 = arith.constant 1 : index
    %c1_30 = arith.constant 1 : index
    %c0_31 = arith.constant 0 : index
    %29 = vector.load %arg1[%c0_28, %c1_29, %c1_30, %c0_31] : memref<1x18x18x64xf32, #tpu.memory_space<vmem>>, vector<1x16x16x64xf32>
    %30 = vector.shape_cast %29 : vector<1x16x16x64xf32> to vector<16x16x64xf32>
    %31 = vector.shape_cast %30 : vector<16x16x64xf32> to vector<256x64xf32>
    %c4 = arith.constant 4 : index
    %c0_32 = arith.constant 0 : index
    %c0_33 = arith.constant 0 : index
    %32 = vector.load %arg2[%c4, %c0_32, %c0_33] : memref<9x64x32xf32, #tpu.memory_space<vmem>>, vector<1x64x32xf32>
    %33 = vector.shape_cast %32 : vector<1x64x32xf32> to vector<64x32xf32>
    %cst_34 = arith.constant dense<0.000000e+00> : vector<256x32xf32>
    %34 = tpu.matmul %31, %33, %cst_34 {dimension_numbers = #tpu.dot_dimension_numbers<[1], [0], [0], [1], [0, 0, 1, 1], [], []>} : vector<256x64xf32>, vector<64x32xf32>, vector<256x32xf32> -> vector<256x32xf32>
    %35 = arith.addf %28, %34 : vector<256x32xf32>
    %c0_35 = arith.constant 0 : index
    %c1_36 = arith.constant 1 : index
    %c2_37 = arith.constant 2 : index
    %c0_38 = arith.constant 0 : index
    %36 = vector.load %arg1[%c0_35, %c1_36, %c2_37, %c0_38] : memref<1x18x18x64xf32, #tpu.memory_space<vmem>>, vector<1x16x16x64xf32>
    %37 = vector.shape_cast %36 : vector<1x16x16x64xf32> to vector<16x16x64xf32>
    %38 = vector.shape_cast %37 : vector<16x16x64xf32> to vector<256x64xf32>
    %c5 = arith.constant 5 : index
    %c0_39 = arith.constant 0 : index
    %c0_40 = arith.constant 0 : index
    %39 = vector.load %arg2[%c5, %c0_39, %c0_40] : memref<9x64x32xf32, #tpu.memory_space<vmem>>, vector<1x64x32xf32>
    %40 = vector.shape_cast %39 : vector<1x64x32xf32> to vector<64x32xf32>
    %cst_41 = arith.constant dense<0.000000e+00> : vector<256x32xf32>
    %41 = tpu.matmul %38, %40, %cst_41 {dimension_numbers = #tpu.dot_dimension_numbers<[1], [0], [0], [1], [0, 0, 1, 1], [], []>} : vector<256x64xf32>, vector<64x32xf32>, vector<256x32xf32> -> vector<256x32xf32>
    %42 = arith.addf %35, %41 : vector<256x32xf32>
    %c0_42 = arith.constant 0 : index
    %c2_43 = arith.constant 2 : index
    %c0_44 = arith.constant 0 : index
    %c0_45 = arith.constant 0 : index
    %43 = vector.load %arg1[%c0_42, %c2_43, %c0_44, %c0_45] : memref<1x18x18x64xf32, #tpu.memory_space<vmem>>, vector<1x16x16x64xf32>
    %44 = vector.shape_cast %43 : vector<1x16x16x64xf32> to vector<16x16x64xf32>
    %45 = vector.shape_cast %44 : vector<16x16x64xf32> to vector<256x64xf32>
    %c6 = arith.constant 6 : index
    %c0_46 = arith.constant 0 : index
    %c0_47 = arith.constant 0 : index
    %46 = vector.load %arg2[%c6, %c0_46, %c0_47] : memref<9x64x32xf32, #tpu.memory_space<vmem>>, vector<1x64x32xf32>
    %47 = vector.shape_cast %46 : vector<1x64x32xf32> to vector<64x32xf32>
    %cst_48 = arith.constant dense<0.000000e+00> : vector<256x32xf32>
    %48 = tpu.matmul %45, %47, %cst_48 {dimension_numbers = #tpu.dot_dimension_numbers<[1], [0], [0], [1], [0, 0, 1, 1], [], []>} : vector<256x64xf32>, vector<64x32xf32>, vector<256x32xf32> -> vector<256x32xf32>
    %49 = arith.addf %42, %48 : vector<256x32xf32>
    %c0_49 = arith.constant 0 : index
    %c2_50 = arith.constant 2 : index
    %c1_51 = arith.constant 1 : index
    %c0_52 = arith.constant 0 : index
    %50 = vector.load %arg1[%c0_49, %c2_50, %c1_51, %c0_52] : memref<1x18x18x64xf32, #tpu.memory_space<vmem>>, vector<1x16x16x64xf32>
    %51 = vector.shape_cast %50 : vector<1x16x16x64xf32> to vector<16x16x64xf32>
    %52 = vector.shape_cast %51 : vector<16x16x64xf32> to vector<256x64xf32>
    %c7 = arith.constant 7 : index
    %c0_53 = arith.constant 0 : index
    %c0_54 = arith.constant 0 : index
    %53 = vector.load %arg2[%c7, %c0_53, %c0_54] : memref<9x64x32xf32, #tpu.memory_space<vmem>>, vector<1x64x32xf32>
    %54 = vector.shape_cast %53 : vector<1x64x32xf32> to vector<64x32xf32>
    %cst_55 = arith.constant dense<0.000000e+00> : vector<256x32xf32>
    %55 = tpu.matmul %52, %54, %cst_55 {dimension_numbers = #tpu.dot_dimension_numbers<[1], [0], [0], [1], [0, 0, 1, 1], [], []>} : vector<256x64xf32>, vector<64x32xf32>, vector<256x32xf32> -> vector<256x32xf32>
    %56 = arith.addf %49, %55 : vector<256x32xf32>
    %c0_56 = arith.constant 0 : index
    %c2_57 = arith.constant 2 : index
    %c2_58 = arith.constant 2 : index
    %c0_59 = arith.constant 0 : index
    %57 = vector.load %arg1[%c0_56, %c2_57, %c2_58, %c0_59] : memref<1x18x18x64xf32, #tpu.memory_space<vmem>>, vector<1x16x16x64xf32>
    %58 = vector.shape_cast %57 : vector<1x16x16x64xf32> to vector<16x16x64xf32>
    %59 = vector.shape_cast %58 : vector<16x16x64xf32> to vector<256x64xf32>
    %c8 = arith.constant 8 : index
    %c0_60 = arith.constant 0 : index
    %c0_61 = arith.constant 0 : index
    %60 = vector.load %arg2[%c8, %c0_60, %c0_61] : memref<9x64x32xf32, #tpu.memory_space<vmem>>, vector<1x64x32xf32>
    %61 = vector.shape_cast %60 : vector<1x64x32xf32> to vector<64x32xf32>
    %cst_62 = arith.constant dense<0.000000e+00> : vector<256x32xf32>
    %62 = tpu.matmul %59, %61, %cst_62 {dimension_numbers = #tpu.dot_dimension_numbers<[1], [0], [0], [1], [0, 0, 1, 1], [], []>} : vector<256x64xf32>, vector<64x32xf32>, vector<256x32xf32> -> vector<256x32xf32>
    %63 = arith.addf %56, %62 : vector<256x32xf32>
    %c0_63 = arith.constant 0 : index
    %c0_64 = arith.constant 0 : index
    %64 = vector.load %arg3[%c0_63, %c0_64] : memref<1x32xf32, #tpu.memory_space<vmem>>, vector<1x32xf32>
    %65 = vector.broadcast %64 : vector<1x32xf32> to vector<256x32xf32>
    %66 = arith.mulf %63, %65 : vector<256x32xf32>
    %c0_65 = arith.constant 0 : index
    %c0_66 = arith.constant 0 : index
    %67 = vector.load %arg4[%c0_65, %c0_66] : memref<1x32xf32, #tpu.memory_space<vmem>>, vector<1x32xf32>
    %68 = vector.broadcast %67 : vector<1x32xf32> to vector<256x32xf32>
    %69 = arith.addf %66, %68 : vector<256x32xf32>
    %cst_67 = arith.constant 0.000000e+00 : f32
    %70 = vector.broadcast %cst_67 : f32 to vector<256x32xf32>
    %71 = arith.maximumf %69, %70 : vector<256x32xf32>
    %72 = vector.extract_strided_slice %71 {offsets = [0, 0], sizes = [256, 16], strides = [1, 1]} : vector<256x32xf32> to vector<256x16xf32>
    %73 = vector.extract_strided_slice %71 {offsets = [0, 16], sizes = [256, 16], strides = [1, 1]} : vector<256x32xf32> to vector<256x16xf32>
    %c0_68 = arith.constant 0 : index
    %c0_69 = arith.constant 0 : index
    %74 = vector.load %arg5[%c0_68, %c0_69] : memref<16x8xf32, #tpu.memory_space<vmem>>, vector<16x8xf32>
    %cst_70 = arith.constant dense<0.000000e+00> : vector<256x8xf32>
    %75 = tpu.matmul %72, %74, %cst_70 {dimension_numbers = #tpu.dot_dimension_numbers<[1], [0], [0], [1], [0, 0, 1, 1], [], []>} : vector<256x16xf32>, vector<16x8xf32>, vector<256x8xf32> -> vector<256x8xf32>
    %c0_71 = arith.constant 0 : index
    %c0_72 = arith.constant 0 : index
    %76 = vector.load %arg6[%c0_71, %c0_72] : memref<1x8xf32, #tpu.memory_space<vmem>>, vector<1x8xf32>
    %77 = vector.broadcast %76 : vector<1x8xf32> to vector<256x8xf32>
    %78 = arith.addf %75, %77 : vector<256x8xf32>
    %c0_73 = arith.constant 0 : index
    %c0_74 = arith.constant 0 : index
    %79 = vector.load %arg7[%c0_73, %c0_74] : memref<16x8xf32, #tpu.memory_space<vmem>>, vector<16x8xf32>
    %cst_75 = arith.constant dense<0.000000e+00> : vector<256x8xf32>
    %80 = tpu.matmul %72, %79, %cst_75 {dimension_numbers = #tpu.dot_dimension_numbers<[1], [0], [0], [1], [0, 0, 1, 1], [], []>} : vector<256x16xf32>, vector<16x8xf32>, vector<256x8xf32> -> vector<256x8xf32>
    %c0_76 = arith.constant 0 : index
    %c0_77 = arith.constant 0 : index
    %81 = vector.load %arg8[%c0_76, %c0_77] : memref<1x8xf32, #tpu.memory_space<vmem>>, vector<1x8xf32>
    %82 = vector.broadcast %81 : vector<1x8xf32> to vector<256x8xf32>
    %83 = arith.addf %80, %82 : vector<256x8xf32>
    %c0_78 = arith.constant 0 : index
    %c0_79 = arith.constant 0 : index
    %84 = vector.load %arg9[%c0_78, %c0_79] : memref<16x16xf32, #tpu.memory_space<vmem>>, vector<16x16xf32>
    %cst_80 = arith.constant dense<0.000000e+00> : vector<256x16xf32>
    %85 = tpu.matmul %72, %84, %cst_80 {dimension_numbers = #tpu.dot_dimension_numbers<[1], [0], [0], [1], [0, 0, 1, 1], [], []>} : vector<256x16xf32>, vector<16x16xf32>, vector<256x16xf32> -> vector<256x16xf32>
    %c0_81 = arith.constant 0 : index
    %c0_82 = arith.constant 0 : index
    %86 = vector.load %arg10[%c0_81, %c0_82] : memref<1x16xf32, #tpu.memory_space<vmem>>, vector<1x16xf32>
    %87 = vector.broadcast %86 : vector<1x16xf32> to vector<256x16xf32>
    %88 = arith.addf %85, %87 : vector<256x16xf32>
    %cst_83 = arith.constant dense<0.000000e+00> : vector<256x256xf32>
    %89 = tpu.matmul %78, %83, %cst_83 {dimension_numbers = #tpu.dot_dimension_numbers<[1], [1], [0], [0], [0, 0, 1, 0], [], []>} : vector<256x8xf32>, vector<256x8xf32>, vector<256x256xf32> -> vector<256x256xf32>
    %cst_84 = arith.constant dense<0xFF800000> : vector<256xf32>
    %90 = vector.multi_reduction <maximumf>, %89, %cst_84 [1] : vector<256x256xf32> to vector<256xf32>
    %91 = vector.shape_cast %90 : vector<256xf32> to vector<256x1xf32>
    %92 = vector.broadcast %91 : vector<256x1xf32> to vector<256x256xf32>
    %93 = arith.subf %89, %92 : vector<256x256xf32>
    %94 = math.exp %93 : vector<256x256xf32>
    %cst_85 = arith.constant dense<0.000000e+00> : vector<256xf32>
    %95 = vector.multi_reduction <add>, %94, %cst_85 [1] : vector<256x256xf32> to vector<256xf32>
    %96 = vector.shape_cast %95 : vector<256xf32> to vector<256x1xf32>
    %97 = tpu.reciprocal %96 {approx = true} : vector<256x1xf32> -> vector<256x1xf32>
    %98 = vector.broadcast %97 : vector<256x1xf32> to vector<256x256xf32>
    %99 = arith.mulf %94, %98 : vector<256x256xf32>
    %c0_86 = arith.constant 0 : index
    %100 = memref.load %arg17[%c0_86] : memref<2xf32, #tpu.memory_space<smem>>
    %cst_87 = arith.constant dense<0.000000e+00> : vector<256x16xf32>
    %101 = tpu.matmul %99, %88, %cst_87 {dimension_numbers = #tpu.dot_dimension_numbers<[1], [0], [0], [1], [0, 0, 1, 1], [], []>} : vector<256x256xf32>, vector<256x16xf32>, vector<256x16xf32> -> vector<256x16xf32>
    %102 = vector.broadcast %100 : f32 to vector<256x16xf32>
    %103 = arith.mulf %102, %101 : vector<256x16xf32>
    %104 = arith.addf %103, %72 : vector<256x16xf32>
    %cst_88 = arith.constant dense<0.000000e+00> : vector<16x16xf32>
    %105 = tpu.matmul %73, %73, %cst_88 {dimension_numbers = #tpu.dot_dimension_numbers<[0], [0], [1], [1], [0, 1, 1, 1], [], []>} : vector<256x16xf32>, vector<256x16xf32>, vector<16x16xf32> -> vector<16x16xf32>
    %cst_89 = arith.constant dense<0xFF800000> : vector<16xf32>
    %106 = vector.multi_reduction <maximumf>, %105, %cst_89 [1] : vector<16x16xf32> to vector<16xf32>
    %107 = vector.shape_cast %106 : vector<16xf32> to vector<16x1xf32>
    %108 = vector.broadcast %107 : vector<16x1xf32> to vector<16x16xf32>
    %109 = arith.subf %108, %105 : vector<16x16xf32>
    %cst_90 = arith.constant dense<0xFF800000> : vector<16xf32>
    %110 = vector.multi_reduction <maximumf>, %109, %cst_90 [1] : vector<16x16xf32> to vector<16xf32>
    %111 = vector.shape_cast %110 : vector<16xf32> to vector<16x1xf32>
    %112 = vector.broadcast %111 : vector<16x1xf32> to vector<16x16xf32>
    %113 = arith.subf %109, %112 : vector<16x16xf32>
    %114 = math.exp %113 : vector<16x16xf32>
    %cst_91 = arith.constant dense<0.000000e+00> : vector<16xf32>
    %115 = vector.multi_reduction <add>, %114, %cst_91 [1] : vector<16x16xf32> to vector<16xf32>
    %116 = vector.shape_cast %115 : vector<16xf32> to vector<16x1xf32>
    %117 = tpu.reciprocal %116 {approx = true} : vector<16x1xf32> -> vector<16x1xf32>
    %118 = vector.broadcast %117 : vector<16x1xf32> to vector<16x16xf32>
    %119 = arith.mulf %114, %118 : vector<16x16xf32>
    %cst_92 = arith.constant dense<0.000000e+00> : vector<256x16xf32>
    %120 = tpu.matmul %73, %119, %cst_92 {dimension_numbers = #tpu.dot_dimension_numbers<[1], [1], [0], [0], [0, 0, 1, 0], [], []>} : vector<256x16xf32>, vector<16x16xf32>, vector<256x16xf32> -> vector<256x16xf32>
    %c1_93 = arith.constant 1 : index
    %121 = memref.load %arg17[%c1_93] : memref<2xf32, #tpu.memory_space<smem>>
    %122 = vector.broadcast %121 : f32 to vector<256x16xf32>
    %123 = arith.mulf %122, %120 : vector<256x16xf32>
    %124 = arith.addf %123, %73 : vector<256x16xf32>
    %cst_94 = arith.constant 0.000000e+00 : f32
    %125 = vector.broadcast %cst_94 : f32 to vector<18x18x16xf32>
    %c0_95 = arith.constant 0 : index
    %c0_96 = arith.constant 0 : index
    %c0_97 = arith.constant 0 : index
    %126 = vector.load %arg19[%c0_95, %c0_96, %c0_97] : memref<18x18x16xf32, #tpu.memory_space<vmem>>, vector<18x18x16xf32>
    tpu.vector_store %arg19[%c0_95, %c0_96, %c0_97], %125 {strides = array<i32>} : memref<18x18x16xf32, #tpu.memory_space<vmem>>, vector<18x18x16xf32>,
    %127 = vector.shape_cast %104 : vector<256x16xf32> to vector<16x16x16xf32>
    %c1_98 = arith.constant 1 : index
    %c1_99 = arith.constant 1 : index
    %c0_100 = arith.constant 0 : index
    %128 = vector.load %arg19[%c1_98, %c1_99, %c0_100] : memref<18x18x16xf32, #tpu.memory_space<vmem>>, vector<16x16x16xf32>
    tpu.vector_store %arg19[%c1_98, %c1_99, %c0_100], %127 {strides = array<i32>} : memref<18x18x16xf32, #tpu.memory_space<vmem>>, vector<16x16x16xf32>,
    %cst_101 = arith.constant 0.000000e+00 : f32
    %129 = vector.broadcast %cst_101 : f32 to vector<256x16xf32>
    %c0_102 = arith.constant 0 : index
    %c0_103 = arith.constant 0 : index
    %c0_104 = arith.constant 0 : index
    %130 = vector.load %arg19[%c0_102, %c0_103, %c0_104] : memref<18x18x16xf32, #tpu.memory_space<vmem>>, vector<16x16x16xf32>
    %131 = vector.shape_cast %130 : vector<16x16x16xf32> to vector<256x16xf32>
    %c0_105 = arith.constant 0 : index
    %c0_106 = arith.constant 0 : index
    %c0_107 = arith.constant 0 : index
    %132 = vector.load %arg11[%c0_105, %c0_106, %c0_107] : memref<9x16x16xf32, #tpu.memory_space<vmem>>, vector<1x16x16xf32>
    %133 = vector.shape_cast %132 : vector<1x16x16xf32> to vector<16x16xf32>
    %cst_108 = arith.constant dense<0.000000e+00> : vector<256x16xf32>
    %134 = tpu.matmul %131, %133, %cst_108 {dimension_numbers = #tpu.dot_dimension_numbers<[1], [0], [0], [1], [0, 0, 1, 1], [], []>} : vector<256x16xf32>, vector<16x16xf32>, vector<256x16xf32> -> vector<256x16xf32>
    %135 = arith.addf %129, %134 : vector<256x16xf32>
    %c0_109 = arith.constant 0 : index
    %c1_110 = arith.constant 1 : index
    %c0_111 = arith.constant 0 : index
    %136 = vector.load %arg19[%c0_109, %c1_110, %c0_111] : memref<18x18x16xf32, #tpu.memory_space<vmem>>, vector<16x16x16xf32>
    %137 = vector.shape_cast %136 : vector<16x16x16xf32> to vector<256x16xf32>
    %c1_112 = arith.constant 1 : index
    %c0_113 = arith.constant 0 : index
    %c0_114 = arith.constant 0 : index
    %138 = vector.load %arg11[%c1_112, %c0_113, %c0_114] : memref<9x16x16xf32, #tpu.memory_space<vmem>>, vector<1x16x16xf32>
    %139 = vector.shape_cast %138 : vector<1x16x16xf32> to vector<16x16xf32>
    %cst_115 = arith.constant dense<0.000000e+00> : vector<256x16xf32>
    %140 = tpu.matmul %137, %139, %cst_115 {dimension_numbers = #tpu.dot_dimension_numbers<[1], [0], [0], [1], [0, 0, 1, 1], [], []>} : vector<256x16xf32>, vector<16x16xf32>, vector<256x16xf32> -> vector<256x16xf32>
    %141 = arith.addf %135, %140 : vector<256x16xf32>
    %c0_116 = arith.constant 0 : index
    %c2_117 = arith.constant 2 : index
    %c0_118 = arith.constant 0 : index
    %142 = vector.load %arg19[%c0_116, %c2_117, %c0_118] : memref<18x18x16xf32, #tpu.memory_space<vmem>>, vector<16x16x16xf32>
    %143 = vector.shape_cast %142 : vector<16x16x16xf32> to vector<256x16xf32>
    %c2_119 = arith.constant 2 : index
    %c0_120 = arith.constant 0 : index
    %c0_121 = arith.constant 0 : index
    %144 = vector.load %arg11[%c2_119, %c0_120, %c0_121] : memref<9x16x16xf32, #tpu.memory_space<vmem>>, vector<1x16x16xf32>
    %145 = vector.shape_cast %144 : vector<1x16x16xf32> to vector<16x16xf32>
    %cst_122 = arith.constant dense<0.000000e+00> : vector<256x16xf32>
    %146 = tpu.matmul %143, %145, %cst_122 {dimension_numbers = #tpu.dot_dimension_numbers<[1], [0], [0], [1], [0, 0, 1, 1], [], []>} : vector<256x16xf32>, vector<16x16xf32>, vector<256x16xf32> -> vector<256x16xf32>
    %147 = arith.addf %141, %146 : vector<256x16xf32>
    %c1_123 = arith.constant 1 : index
    %c0_124 = arith.constant 0 : index
    %c0_125 = arith.constant 0 : index
    %148 = vector.load %arg19[%c1_123, %c0_124, %c0_125] : memref<18x18x16xf32, #tpu.memory_space<vmem>>, vector<16x16x16xf32>
    %149 = vector.shape_cast %148 : vector<16x16x16xf32> to vector<256x16xf32>
    %c3_126 = arith.constant 3 : index
    %c0_127 = arith.constant 0 : index
    %c0_128 = arith.constant 0 : index
    %150 = vector.load %arg11[%c3_126, %c0_127, %c0_128] : memref<9x16x16xf32, #tpu.memory_space<vmem>>, vector<1x16x16xf32>
    %151 = vector.shape_cast %150 : vector<1x16x16xf32> to vector<16x16xf32>
    %cst_129 = arith.constant dense<0.000000e+00> : vector<256x16xf32>
    %152 = tpu.matmul %149, %151, %cst_129 {dimension_numbers = #tpu.dot_dimension_numbers<[1], [0], [0], [1], [0, 0, 1, 1], [], []>} : vector<256x16xf32>, vector<16x16xf32>, vector<256x16xf32> -> vector<256x16xf32>
    %153 = arith.addf %147, %152 : vector<256x16xf32>
    %c1_130 = arith.constant 1 : index
    %c1_131 = arith.constant 1 : index
    %c0_132 = arith.constant 0 : index
    %154 = vector.load %arg19[%c1_130, %c1_131, %c0_132] : memref<18x18x16xf32, #tpu.memory_space<vmem>>, vector<16x16x16xf32>
    %155 = vector.shape_cast %154 : vector<16x16x16xf32> to vector<256x16xf32>
    %c4_133 = arith.constant 4 : index
    %c0_134 = arith.constant 0 : index
    %c0_135 = arith.constant 0 : index
    %156 = vector.load %arg11[%c4_133, %c0_134, %c0_135] : memref<9x16x16xf32, #tpu.memory_space<vmem>>, vector<1x16x16xf32>
    %157 = vector.shape_cast %156 : vector<1x16x16xf32> to vector<16x16xf32>
    %cst_136 = arith.constant dense<0.000000e+00> : vector<256x16xf32>
    %158 = tpu.matmul %155, %157, %cst_136 {dimension_numbers = #tpu.dot_dimension_numbers<[1], [0], [0], [1], [0, 0, 1, 1], [], []>} : vector<256x16xf32>, vector<16x16xf32>, vector<256x16xf32> -> vector<256x16xf32>
    %159 = arith.addf %153, %158 : vector<256x16xf32>
    %c1_137 = arith.constant 1 : index
    %c2_138 = arith.constant 2 : index
    %c0_139 = arith.constant 0 : index
    %160 = vector.load %arg19[%c1_137, %c2_138, %c0_139] : memref<18x18x16xf32, #tpu.memory_space<vmem>>, vector<16x16x16xf32>
    %161 = vector.shape_cast %160 : vector<16x16x16xf32> to vector<256x16xf32>
    %c5_140 = arith.constant 5 : index
    %c0_141 = arith.constant 0 : index
    %c0_142 = arith.constant 0 : index
    %162 = vector.load %arg11[%c5_140, %c0_141, %c0_142] : memref<9x16x16xf32, #tpu.memory_space<vmem>>, vector<1x16x16xf32>
    %163 = vector.shape_cast %162 : vector<1x16x16xf32> to vector<16x16xf32>
    %cst_143 = arith.constant dense<0.000000e+00> : vector<256x16xf32>
    %164 = tpu.matmul %161, %163, %cst_143 {dimension_numbers = #tpu.dot_dimension_numbers<[1], [0], [0], [1], [0, 0, 1, 1], [], []>} : vector<256x16xf32>, vector<16x16xf32>, vector<256x16xf32> -> vector<256x16xf32>
    %165 = arith.addf %159, %164 : vector<256x16xf32>
    %c2_144 = arith.constant 2 : index
    %c0_145 = arith.constant 0 : index
    %c0_146 = arith.constant 0 : index
    %166 = vector.load %arg19[%c2_144, %c0_145, %c0_146] : memref<18x18x16xf32, #tpu.memory_space<vmem>>, vector<16x16x16xf32>
    %167 = vector.shape_cast %166 : vector<16x16x16xf32> to vector<256x16xf32>
    %c6_147 = arith.constant 6 : index
    %c0_148 = arith.constant 0 : index
    %c0_149 = arith.constant 0 : index
    %168 = vector.load %arg11[%c6_147, %c0_148, %c0_149] : memref<9x16x16xf32, #tpu.memory_space<vmem>>, vector<1x16x16xf32>
    %169 = vector.shape_cast %168 : vector<1x16x16xf32> to vector<16x16xf32>
    %cst_150 = arith.constant dense<0.000000e+00> : vector<256x16xf32>
    %170 = tpu.matmul %167, %169, %cst_150 {dimension_numbers = #tpu.dot_dimension_numbers<[1], [0], [0], [1], [0, 0, 1, 1], [], []>} : vector<256x16xf32>, vector<16x16xf32>, vector<256x16xf32> -> vector<256x16xf32>
    %171 = arith.addf %165, %170 : vector<256x16xf32>
    %c2_151 = arith.constant 2 : index
    %c1_152 = arith.constant 1 : index
    %c0_153 = arith.constant 0 : index
    %172 = vector.load %arg19[%c2_151, %c1_152, %c0_153] : memref<18x18x16xf32, #tpu.memory_space<vmem>>, vector<16x16x16xf32>
    %173 = vector.shape_cast %172 : vector<16x16x16xf32> to vector<256x16xf32>
    %c7_154 = arith.constant 7 : index
    %c0_155 = arith.constant 0 : index
    %c0_156 = arith.constant 0 : index
    %174 = vector.load %arg11[%c7_154, %c0_155, %c0_156] : memref<9x16x16xf32, #tpu.memory_space<vmem>>, vector<1x16x16xf32>
    %175 = vector.shape_cast %174 : vector<1x16x16xf32> to vector<16x16xf32>
    %cst_157 = arith.constant dense<0.000000e+00> : vector<256x16xf32>
    %176 = tpu.matmul %173, %175, %cst_157 {dimension_numbers = #tpu.dot_dimension_numbers<[1], [0], [0], [1], [0, 0, 1, 1], [], []>} : vector<256x16xf32>, vector<16x16xf32>, vector<256x16xf32> -> vector<256x16xf32>
    %177 = arith.addf %171, %176 : vector<256x16xf32>
    %c2_158 = arith.constant 2 : index
    %c2_159 = arith.constant 2 : index
    %c0_160 = arith.constant 0 : index
    %178 = vector.load %arg19[%c2_158, %c2_159, %c0_160] : memref<18x18x16xf32, #tpu.memory_space<vmem>>, vector<16x16x16xf32>
    %179 = vector.shape_cast %178 : vector<16x16x16xf32> to vector<256x16xf32>
    %c8_161 = arith.constant 8 : index
    %c0_162 = arith.constant 0 : index
    %c0_163 = arith.constant 0 : index
    %180 = vector.load %arg11[%c8_161, %c0_162, %c0_163] : memref<9x16x16xf32, #tpu.memory_space<vmem>>, vector<1x16x16xf32>
    %181 = vector.shape_cast %180 : vector<1x16x16xf32> to vector<16x16xf32>
    %cst_164 = arith.constant dense<0.000000e+00> : vector<256x16xf32>
    %182 = tpu.matmul %179, %181, %cst_164 {dimension_numbers = #tpu.dot_dimension_numbers<[1], [0], [0], [1], [0, 0, 1, 1], [], []>} : vector<256x16xf32>, vector<16x16xf32>, vector<256x16xf32> -> vector<256x16xf32>
    %183 = arith.addf %177, %182 : vector<256x16xf32>
    %c0_165 = arith.constant 0 : index
    %c0_166 = arith.constant 0 : index
    %184 = vector.load %arg12[%c0_165, %c0_166] : memref<1x16xf32, #tpu.memory_space<vmem>>, vector<1x16xf32>
    %185 = vector.broadcast %184 : vector<1x16xf32> to vector<256x16xf32>
    %186 = arith.mulf %183, %185 : vector<256x16xf32>
    %c0_167 = arith.constant 0 : index
    %c0_168 = arith.constant 0 : index
    %187 = vector.load %arg13[%c0_167, %c0_168] : memref<1x16xf32, #tpu.memory_space<vmem>>, vector<1x16xf32>
    %188 = vector.broadcast %187 : vector<1x16xf32> to vector<256x16xf32>
    %189 = arith.addf %186, %188 : vector<256x16xf32>
    %cst_169 = arith.constant 0.000000e+00 : f32
    %190 = vector.broadcast %cst_169 : f32 to vector<256x16xf32>
    %191 = arith.maximumf %189, %190 : vector<256x16xf32>
    %cst_170 = arith.constant 0.000000e+00 : f32
    %192 = vector.broadcast %cst_170 : f32 to vector<18x18x16xf32>
    %c0_171 = arith.constant 0 : index
    %c0_172 = arith.constant 0 : index
    %c0_173 = arith.constant 0 : index
    %193 = vector.load %arg20[%c0_171, %c0_172, %c0_173] : memref<18x18x16xf32, #tpu.memory_space<vmem>>, vector<18x18x16xf32>
    tpu.vector_store %arg20[%c0_171, %c0_172, %c0_173], %192 {strides = array<i32>} : memref<18x18x16xf32, #tpu.memory_space<vmem>>, vector<18x18x16xf32>,
    %194 = vector.shape_cast %124 : vector<256x16xf32> to vector<16x16x16xf32>
    %c1_174 = arith.constant 1 : index
    %c1_175 = arith.constant 1 : index
    %c0_176 = arith.constant 0 : index
    %195 = vector.load %arg20[%c1_174, %c1_175, %c0_176] : memref<18x18x16xf32, #tpu.memory_space<vmem>>, vector<16x16x16xf32>
    tpu.vector_store %arg20[%c1_174, %c1_175, %c0_176], %194 {strides = array<i32>} : memref<18x18x16xf32, #tpu.memory_space<vmem>>, vector<16x16x16xf32>,
    %cst_177 = arith.constant 0.000000e+00 : f32
    %196 = vector.broadcast %cst_177 : f32 to vector<256x16xf32>
    %c0_178 = arith.constant 0 : index
    %c0_179 = arith.constant 0 : index
    %c0_180 = arith.constant 0 : index
    %197 = vector.load %arg20[%c0_178, %c0_179, %c0_180] : memref<18x18x16xf32, #tpu.memory_space<vmem>>, vector<16x16x16xf32>
    %198 = vector.shape_cast %197 : vector<16x16x16xf32> to vector<256x16xf32>
    %c0_181 = arith.constant 0 : index
    %c0_182 = arith.constant 0 : index
    %c0_183 = arith.constant 0 : index
    %199 = vector.load %arg14[%c0_181, %c0_182, %c0_183] : memref<9x16x16xf32, #tpu.memory_space<vmem>>, vector<1x16x16xf32>
    %200 = vector.shape_cast %199 : vector<1x16x16xf32> to vector<16x16xf32>
    %cst_184 = arith.constant dense<0.000000e+00> : vector<256x16xf32>
    %201 = tpu.matmul %198, %200, %cst_184 {dimension_numbers = #tpu.dot_dimension_numbers<[1], [0], [0], [1], [0, 0, 1, 1], [], []>} : vector<256x16xf32>, vector<16x16xf32>, vector<256x16xf32> -> vector<256x16xf32>
    %202 = arith.addf %196, %201 : vector<256x16xf32>
    %c0_185 = arith.constant 0 : index
    %c1_186 = arith.constant 1 : index
    %c0_187 = arith.constant 0 : index
    %203 = vector.load %arg20[%c0_185, %c1_186, %c0_187] : memref<18x18x16xf32, #tpu.memory_space<vmem>>, vector<16x16x16xf32>
    %204 = vector.shape_cast %203 : vector<16x16x16xf32> to vector<256x16xf32>
    %c1_188 = arith.constant 1 : index
    %c0_189 = arith.constant 0 : index
    %c0_190 = arith.constant 0 : index
    %205 = vector.load %arg14[%c1_188, %c0_189, %c0_190] : memref<9x16x16xf32, #tpu.memory_space<vmem>>, vector<1x16x16xf32>
    %206 = vector.shape_cast %205 : vector<1x16x16xf32> to vector<16x16xf32>
    %cst_191 = arith.constant dense<0.000000e+00> : vector<256x16xf32>
    %207 = tpu.matmul %204, %206, %cst_191 {dimension_numbers = #tpu.dot_dimension_numbers<[1], [0], [0], [1], [0, 0, 1, 1], [], []>} : vector<256x16xf32>, vector<16x16xf32>, vector<256x16xf32> -> vector<256x16xf32>
    %208 = arith.addf %202, %207 : vector<256x16xf32>
    %c0_192 = arith.constant 0 : index
    %c2_193 = arith.constant 2 : index
    %c0_194 = arith.constant 0 : index
    %209 = vector.load %arg20[%c0_192, %c2_193, %c0_194] : memref<18x18x16xf32, #tpu.memory_space<vmem>>, vector<16x16x16xf32>
    %210 = vector.shape_cast %209 : vector<16x16x16xf32> to vector<256x16xf32>
    %c2_195 = arith.constant 2 : index
    %c0_196 = arith.constant 0 : index
    %c0_197 = arith.constant 0 : index
    %211 = vector.load %arg14[%c2_195, %c0_196, %c0_197] : memref<9x16x16xf32, #tpu.memory_space<vmem>>, vector<1x16x16xf32>
    %212 = vector.shape_cast %211 : vector<1x16x16xf32> to vector<16x16xf32>
    %cst_198 = arith.constant dense<0.000000e+00> : vector<256x16xf32>
    %213 = tpu.matmul %210, %212, %cst_198 {dimension_numbers = #tpu.dot_dimension_numbers<[1], [0], [0], [1], [0, 0, 1, 1], [], []>} : vector<256x16xf32>, vector<16x16xf32>, vector<256x16xf32> -> vector<256x16xf32>
    %214 = arith.addf %208, %213 : vector<256x16xf32>
    %c1_199 = arith.constant 1 : index
    %c0_200 = arith.constant 0 : index
    %c0_201 = arith.constant 0 : index
    %215 = vector.load %arg20[%c1_199, %c0_200, %c0_201] : memref<18x18x16xf32, #tpu.memory_space<vmem>>, vector<16x16x16xf32>
    %216 = vector.shape_cast %215 : vector<16x16x16xf32> to vector<256x16xf32>
    %c3_202 = arith.constant 3 : index
    %c0_203 = arith.constant 0 : index
    %c0_204 = arith.constant 0 : index
    %217 = vector.load %arg14[%c3_202, %c0_203, %c0_204] : memref<9x16x16xf32, #tpu.memory_space<vmem>>, vector<1x16x16xf32>
    %218 = vector.shape_cast %217 : vector<1x16x16xf32> to vector<16x16xf32>
    %cst_205 = arith.constant dense<0.000000e+00> : vector<256x16xf32>
    %219 = tpu.matmul %216, %218, %cst_205 {dimension_numbers = #tpu.dot_dimension_numbers<[1], [0], [0], [1], [0, 0, 1, 1], [], []>} : vector<256x16xf32>, vector<16x16xf32>, vector<256x16xf32> -> vector<256x16xf32>
    %220 = arith.addf %214, %219 : vector<256x16xf32>
    %c1_206 = arith.constant 1 : index
    %c1_207 = arith.constant 1 : index
    %c0_208 = arith.constant 0 : index
    %221 = vector.load %arg20[%c1_206, %c1_207, %c0_208] : memref<18x18x16xf32, #tpu.memory_space<vmem>>, vector<16x16x16xf32>
    %222 = vector.shape_cast %221 : vector<16x16x16xf32> to vector<256x16xf32>
    %c4_209 = arith.constant 4 : index
    %c0_210 = arith.constant 0 : index
    %c0_211 = arith.constant 0 : index
    %223 = vector.load %arg14[%c4_209, %c0_210, %c0_211] : memref<9x16x16xf32, #tpu.memory_space<vmem>>, vector<1x16x16xf32>
    %224 = vector.shape_cast %223 : vector<1x16x16xf32> to vector<16x16xf32>
    %cst_212 = arith.constant dense<0.000000e+00> : vector<256x16xf32>
    %225 = tpu.matmul %222, %224, %cst_212 {dimension_numbers = #tpu.dot_dimension_numbers<[1], [0], [0], [1], [0, 0, 1, 1], [], []>} : vector<256x16xf32>, vector<16x16xf32>, vector<256x16xf32> -> vector<256x16xf32>
    %226 = arith.addf %220, %225 : vector<256x16xf32>
    %c1_213 = arith.constant 1 : index
    %c2_214 = arith.constant 2 : index
    %c0_215 = arith.constant 0 : index
    %227 = vector.load %arg20[%c1_213, %c2_214, %c0_215] : memref<18x18x16xf32, #tpu.memory_space<vmem>>, vector<16x16x16xf32>
    %228 = vector.shape_cast %227 : vector<16x16x16xf32> to vector<256x16xf32>
    %c5_216 = arith.constant 5 : index
    %c0_217 = arith.constant 0 : index
    %c0_218 = arith.constant 0 : index
    %229 = vector.load %arg14[%c5_216, %c0_217, %c0_218] : memref<9x16x16xf32, #tpu.memory_space<vmem>>, vector<1x16x16xf32>
    %230 = vector.shape_cast %229 : vector<1x16x16xf32> to vector<16x16xf32>
    %cst_219 = arith.constant dense<0.000000e+00> : vector<256x16xf32>
    %231 = tpu.matmul %228, %230, %cst_219 {dimension_numbers = #tpu.dot_dimension_numbers<[1], [0], [0], [1], [0, 0, 1, 1], [], []>} : vector<256x16xf32>, vector<16x16xf32>, vector<256x16xf32> -> vector<256x16xf32>
    %232 = arith.addf %226, %231 : vector<256x16xf32>
    %c2_220 = arith.constant 2 : index
    %c0_221 = arith.constant 0 : index
    %c0_222 = arith.constant 0 : index
    %233 = vector.load %arg20[%c2_220, %c0_221, %c0_222] : memref<18x18x16xf32, #tpu.memory_space<vmem>>, vector<16x16x16xf32>
    %234 = vector.shape_cast %233 : vector<16x16x16xf32> to vector<256x16xf32>
    %c6_223 = arith.constant 6 : index
    %c0_224 = arith.constant 0 : index
    %c0_225 = arith.constant 0 : index
    %235 = vector.load %arg14[%c6_223, %c0_224, %c0_225] : memref<9x16x16xf32, #tpu.memory_space<vmem>>, vector<1x16x16xf32>
    %236 = vector.shape_cast %235 : vector<1x16x16xf32> to vector<16x16xf32>
    %cst_226 = arith.constant dense<0.000000e+00> : vector<256x16xf32>
    %237 = tpu.matmul %234, %236, %cst_226 {dimension_numbers = #tpu.dot_dimension_numbers<[1], [0], [0], [1], [0, 0, 1, 1], [], []>} : vector<256x16xf32>, vector<16x16xf32>, vector<256x16xf32> -> vector<256x16xf32>
    %238 = arith.addf %232, %237 : vector<256x16xf32>
    %c2_227 = arith.constant 2 : index
    %c1_228 = arith.constant 1 : index
    %c0_229 = arith.constant 0 : index
    %239 = vector.load %arg20[%c2_227, %c1_228, %c0_229] : memref<18x18x16xf32, #tpu.memory_space<vmem>>, vector<16x16x16xf32>
    %240 = vector.shape_cast %239 : vector<16x16x16xf32> to vector<256x16xf32>
    %c7_230 = arith.constant 7 : index
    %c0_231 = arith.constant 0 : index
    %c0_232 = arith.constant 0 : index
    %241 = vector.load %arg14[%c7_230, %c0_231, %c0_232] : memref<9x16x16xf32, #tpu.memory_space<vmem>>, vector<1x16x16xf32>
    %242 = vector.shape_cast %241 : vector<1x16x16xf32> to vector<16x16xf32>
    %cst_233 = arith.constant dense<0.000000e+00> : vector<256x16xf32>
    %243 = tpu.matmul %240, %242, %cst_233 {dimension_numbers = #tpu.dot_dimension_numbers<[1], [0], [0], [1], [0, 0, 1, 1], [], []>} : vector<256x16xf32>, vector<16x16xf32>, vector<256x16xf32> -> vector<256x16xf32>
    %244 = arith.addf %238, %243 : vector<256x16xf32>
    %c2_234 = arith.constant 2 : index
    %c2_235 = arith.constant 2 : index
    %c0_236 = arith.constant 0 : index
    %245 = vector.load %arg20[%c2_234, %c2_235, %c0_236] : memref<18x18x16xf32, #tpu.memory_space<vmem>>, vector<16x16x16xf32>
    %246 = vector.shape_cast %245 : vector<16x16x16xf32> to vector<256x16xf32>
    %c8_237 = arith.constant 8 : index
    %c0_238 = arith.constant 0 : index
    %c0_239 = arith.constant 0 : index
    %247 = vector.load %arg14[%c8_237, %c0_238, %c0_239] : memref<9x16x16xf32, #tpu.memory_space<vmem>>, vector<1x16x16xf32>
    %248 = vector.shape_cast %247 : vector<1x16x16xf32> to vector<16x16xf32>
    %cst_240 = arith.constant dense<0.000000e+00> : vector<256x16xf32>
    %249 = tpu.matmul %246, %248, %cst_240 {dimension_numbers = #tpu.dot_dimension_numbers<[1], [0], [0], [1], [0, 0, 1, 1], [], []>} : vector<256x16xf32>, vector<16x16xf32>, vector<256x16xf32> -> vector<256x16xf32>
    %250 = arith.addf %244, %249 : vector<256x16xf32>
    %c0_241 = arith.constant 0 : index
    %c0_242 = arith.constant 0 : index
    %251 = vector.load %arg15[%c0_241, %c0_242] : memref<1x16xf32, #tpu.memory_space<vmem>>, vector<1x16xf32>
    %252 = vector.broadcast %251 : vector<1x16xf32> to vector<256x16xf32>
    %253 = arith.mulf %250, %252 : vector<256x16xf32>
    %c0_243 = arith.constant 0 : index
    %c0_244 = arith.constant 0 : index
    %254 = vector.load %arg16[%c0_243, %c0_244] : memref<1x16xf32, #tpu.memory_space<vmem>>, vector<1x16xf32>
    %255 = vector.broadcast %254 : vector<1x16xf32> to vector<256x16xf32>
    %256 = arith.addf %253, %255 : vector<256x16xf32>
    %cst_245 = arith.constant 0.000000e+00 : f32
    %257 = vector.broadcast %cst_245 : f32 to vector<256x16xf32>
    %258 = arith.maximumf %256, %257 : vector<256x16xf32>
    %259 = arith.addf %191, %258 : vector<256x16xf32>
    %c0_246 = arith.constant 0 : index
    %c0_247 = arith.constant 0 : index
    %c0_248 = arith.constant 0 : index
    %260 = vector.load %arg18[%c0_246, %c0_247, %c0_248] : memref<1x256x16xf32, #tpu.memory_space<vmem>>, vector<1x256x16xf32>
    %261 = vector.shape_cast %260 : vector<1x256x16xf32> to vector<256x16xf32>
    %262 = vector.shape_cast %259 : vector<256x16xf32> to vector<1x256x16xf32>
    tpu.vector_store %arg18[%c0_246, %c0_247, %c0_248], %262 {strides = array<i32>} : memref<1x256x16xf32, #tpu.memory_space<vmem>>, vector<1x256x16xf32>,
    return
  }
  func.func @transform_0(%arg0: i32) -> (i32, i32, i32, i32) {
    %c0_i32 = arith.constant 0 : i32
    %c0_i32_0 = arith.constant 0 : i32
    %c0_i32_1 = arith.constant 0 : i32
    %c0_i32_2 = arith.constant 0 : i32
    return %arg0, %c0_i32, %c0_i32_0, %c0_i32_1 : i32, i32, i32, i32
  }
  func.func @transform_1(%arg0: i32) -> (i32, i32, i32) {
    %c0_i32 = arith.constant 0 : i32
    %c0_i32_0 = arith.constant 0 : i32
    %c0_i32_1 = arith.constant 0 : i32
    %c0_i32_2 = arith.constant 0 : i32
    return %c0_i32, %c0_i32_0, %c0_i32_1 : i32, i32, i32
  }
  func.func @transform_2(%arg0: i32) -> (i32, i32) {
    %c0_i32 = arith.constant 0 : i32
    %c0_i32_0 = arith.constant 0 : i32
    %c0_i32_1 = arith.constant 0 : i32
    return %c0_i32, %c0_i32_0 : i32, i32
  }
  func.func @transform_3(%arg0: i32) -> (i32, i32) {
    %c0_i32 = arith.constant 0 : i32
    %c0_i32_0 = arith.constant 0 : i32
    %c0_i32_1 = arith.constant 0 : i32
    return %c0_i32, %c0_i32_0 : i32, i32
  }
  func.func @transform_4(%arg0: i32) -> (i32, i32) {
    %c0_i32 = arith.constant 0 : i32
    %c0_i32_0 = arith.constant 0 : i32
    %c0_i32_1 = arith.constant 0 : i32
    return %c0_i32, %c0_i32_0 : i32, i32
  }
  func.func @transform_5(%arg0: i32) -> (i32, i32) {
    %c0_i32 = arith.constant 0 : i32
    %c0_i32_0 = arith.constant 0 : i32
    %c0_i32_1 = arith.constant 0 : i32
    return %c0_i32, %c0_i32_0 : i32, i32
  }
  func.func @transform_6(%arg0: i32) -> (i32, i32) {
    %c0_i32 = arith.constant 0 : i32
    %c0_i32_0 = arith.constant 0 : i32
    %c0_i32_1 = arith.constant 0 : i32
    return %c0_i32, %c0_i32_0 : i32, i32
  }
  func.func @transform_7(%arg0: i32) -> (i32, i32) {
    %c0_i32 = arith.constant 0 : i32
    %c0_i32_0 = arith.constant 0 : i32
    %c0_i32_1 = arith.constant 0 : i32
    return %c0_i32, %c0_i32_0 : i32, i32
  }
  func.func @transform_8(%arg0: i32) -> (i32, i32) {
    %c0_i32 = arith.constant 0 : i32
    %c0_i32_0 = arith.constant 0 : i32
    %c0_i32_1 = arith.constant 0 : i32
    return %c0_i32, %c0_i32_0 : i32, i32
  }
  func.func @transform_9(%arg0: i32) -> (i32, i32) {
    %c0_i32 = arith.constant 0 : i32
    %c0_i32_0 = arith.constant 0 : i32
    %c0_i32_1 = arith.constant 0 : i32
    return %c0_i32, %c0_i32_0 : i32, i32
  }
  func.func @transform_10(%arg0: i32) -> (i32, i32, i32) {
    %c0_i32 = arith.constant 0 : i32
    %c0_i32_0 = arith.constant 0 : i32
    %c0_i32_1 = arith.constant 0 : i32
    %c0_i32_2 = arith.constant 0 : i32
    return %c0_i32, %c0_i32_0, %c0_i32_1 : i32, i32, i32
  }
  func.func @transform_11(%arg0: i32) -> (i32, i32) {
    %c0_i32 = arith.constant 0 : i32
    %c0_i32_0 = arith.constant 0 : i32
    %c0_i32_1 = arith.constant 0 : i32
    return %c0_i32, %c0_i32_0 : i32, i32
  }
  func.func @transform_12(%arg0: i32) -> (i32, i32) {
    %c0_i32 = arith.constant 0 : i32
    %c0_i32_0 = arith.constant 0 : i32
    %c0_i32_1 = arith.constant 0 : i32
    return %c0_i32, %c0_i32_0 : i32, i32
  }
  func.func @transform_13(%arg0: i32) -> (i32, i32, i32) {
    %c0_i32 = arith.constant 0 : i32
    %c0_i32_0 = arith.constant 0 : i32
    %c0_i32_1 = arith.constant 0 : i32
    %c0_i32_2 = arith.constant 0 : i32
    return %c0_i32, %c0_i32_0, %c0_i32_1 : i32, i32, i32
  }
  func.func @transform_14(%arg0: i32) -> (i32, i32) {
    %c0_i32 = arith.constant 0 : i32
    %c0_i32_0 = arith.constant 0 : i32
    %c0_i32_1 = arith.constant 0 : i32
    return %c0_i32, %c0_i32_0 : i32, i32
  }
  func.func @transform_15(%arg0: i32) -> (i32, i32) {
    %c0_i32 = arith.constant 0 : i32
    %c0_i32_0 = arith.constant 0 : i32
    %c0_i32_1 = arith.constant 0 : i32
    return %c0_i32, %c0_i32_0 : i32, i32
  }
  func.func @transform_16(%arg0: i32) -> i32 {
    %c0_i32 = arith.constant 0 : i32
    %c0_i32_0 = arith.constant 0 : i32
    return %c0_i32 : i32
  }
  func.func @transform_17(%arg0: i32) -> (i32, i32, i32) {
    %c0_i32 = arith.constant 0 : i32
    %c0_i32_0 = arith.constant 0 : i32
    %c0_i32_1 = arith.constant 0 : i32
    return %arg0, %c0_i32, %c0_i32_0 : i32, i32, i32
  }
}

</mosaic_0001>

<bundles_post_ra>
// kernel: danet_head.1
= control target key start
LH: loop header
LB: loop body
LE: loop exit
PB: predicated region body
PF: predicated region fallthrough
CT: control target
= control target key end

     0   :  { %s25729_s0 = inlined_call_operand.vmem [shape: f32[2,18,18,64], index: 0, kind: input, shape index: {}]   ;;  %s25730_s1 = inlined_call_operand.vmem [shape: f32[9,64,32], index: 1, kind: input, shape index: {}]   ;;  %s25731_s2 = inlined_call_operand.vmem [shape: f32[1,32], index: 2, kind: input, shape index: {}]   ;;  %s25732_s3 = inlined_call_operand.vmem [shape: f32[1,32], index: 3, kind: input, shape index: {}]   ;;  %s25733_s4 = inlined_call_operand.vmem [shape: f32[16,8], index: 4, kind: input, shape index: {}]   ;;  %s25734_s5 = inlined_call_operand.vmem [shape: f32[1,8], index: 5, kind: input, shape index: {}]   ;;  %s25735_s6 = inlined_call_operand.vmem [shape: f32[16,8], index: 6, kind: input, shape index: {}]   ;;  %s25736_s7 = inlined_call_operand.vmem [shape: f32[1,8], index: 7, kind: input, shape index: {}]   ;;  %s25737_s8 = inlined_call_operand.vmem [shape: f32[16,16], index: 8, kind: input, shape index: {}]   ;;  %s25738_s9 = inlined_call_operand.vmem [shape: f32[1,16], index: 9, kind: input, shape index: {}]   ;;  %s25739_s10 = inlined_call_operand.vmem [shape: f32[9,16,16], index: 10, kind: input, shape index: {}]   ;;  %s25740_s11 = inlined_call_operand.vmem [shape: f32[1,16], index: 11, kind: input, shape index: {}]   ;;  %s25741_s12 = inlined_call_operand.vmem [shape: f32[1,16], index: 12, kind: input, shape index: {}]   ;;  %s25742_s13 = inlined_call_operand.vmem [shape: f32[9,16,16], index: 13, kind: input, shape index: {}]   ;;  %s25743_s14 = inlined_call_operand.vmem [shape: f32[1,16], index: 14, kind: input, shape index: {}]   ;;  %s25744_s15 = inlined_call_operand.vmem [shape: f32[1,16], index: 15, kind: input, shape index: {}]   ;;  %s25745_s16 = inlined_call_operand.vmem [shape: f32[2], index: 16, kind: input, shape index: {}]   ;;  %s25746_s17 = inlined_call_operand.vmem [shape: f32[2,256,16], index: 17, kind: output, shape index: {}]  }
   0x1   :  { %25931 = sst [smem:[#allocation109_spill]] %s25729_s0 }
   0x2   :  { %25932 = sst [smem:[#allocation110_spill]] %s25730_s1 }
   0x3   :  { %22 = vsyncpa [#allocation5], 0  ;;  %s18916_s24 = smov 0  }
   0x4 LB: > { %s18922_s25 = sadd.s32 4294967295, %s18821_s24   ;;  %p14187_p0 = scmp.ge.s32.totalorder %s18821_s24, 1  ;;  %s18821_s24 = sphi %s18916_s24, %s28_s24  }
   0x5   : > { %p421_p1 = scmp.lt.s32.totalorder %s18821_s24, 3  ;;  %s479_s28 = sshll.u32 %s25745_s16, 4  ;;  %s480_s28 = int_to_ptr.vmem [resolvable:$true] %s479_s28 }
   0x6   : > { %p18541_p3 = scmp.eq.s32.totalorder %s18922_s25, 0  ;;  %s18796_s0 = scalar_lea.vmem %s480_s28, 16 }
   0x7   : > { %p18929_p2 = pnand %p14187_p0, %p421_p1  ;;  %p18797_p6 = scmp.ne.s32.totalorder %s480_s28, %s18796_s0 }
   0x8   : > { %p18804_p10 = scmp.lt.s32.totalorder %s480_s28, %s480_s28  ;;  %p18805_p11 = scmp.lt.s32.totalorder %s18796_s0, %s18796_s0 }
   0x9   : > { %p18537_p4 = pneg %p18929_p2 }
   0xa   : > { %p18806_p12 = por %p18805_p11, %p18804_p10 }
   0xb   : > { %p18538_p5 = pnand %p18541_p3, %p18537_p4 }
   0xd   : > { %p18798_p7 = pneg %p18538_p5 }
   0xf   : > { %p18799_p8 = pnand %p18798_p7, %p18797_p6 }
  0x11   : > { %p18800_p9 = pneg %p18799_p8 }
  0x13   : > { %p18807_p13 = pnand %p18806_p12, %p18800_p9 }
  0x15   : > { %18810 = shalt.err (!%p18807_p13)
}
  0x16   : > { %s18823_s30 = smov [#allocation4]   ;;  %500 = sbr.rel (%p18929_p2) target bundleno = 2557 (0x9fd), region = 88 }
  0x17   : > { %18540 = dma.vmem_to_smem (!%p18538_p5), %s480_s28, 16, %s18823_s30, [#allocation5]  }
  0x1b   : > { %18816 = dma.done.wait (%p18541_p3), [#allocation5], 16  }
  0x1c   : > { %18818 = vsyncadd (%p18541_p3), [#allocation5], 4294967280 }
  0x1d   : > { %506 = sfence }
  0x1e   : > { %s25934_s1 = sld [smem:[#allocation110_spill]]  ;;  %p553_p0 = scmp.lt.s32.totalorder %s18922_s25, 1  ;;  %vm644_vm0 = vcmask 523264   ;;  %vm4166_vm1 = vcmask 130048   ;;  %vm4956_vm2 = vcmask 64512   ;;  %vm6805_vm3 = vcmask 123904  }
  0x1f   : > { %s25935_s27 = sld [smem:[#allocation109_spill]]  ;;  %s18824_s23 = smov 112  }
  0x20   : > { %s26760_s25 = smov (!%p553_p0, %s18922_s25), 1  ;;  %s5886_s26 = sld [smem:[#allocation4]] }
  0x21   : > { %s18532_s18 = smul.u32 432, %s26760_s25  ;;  %s14938_s19 = sld [smem:[#allocation4 + $0x1]] }
  0x24   : > { %v14202_v0 = vld [vmem:[%s25934_s1 + $0x78] sm:$0xff]  ;;  %v14201_v1 = vld [vmem:[%s25934_s1 + $0x70] sm:$0xff]  ;;  %v14200_v2 = vld [vmem:[%s25934_s1 + $0x68] sm:$0xff] }
  0x25   : > { %16796 = vmatprep.subr.mxu0 %v14202_v0  ;;  %v18960_v3 = vld [vmem:[%s25934_s1 + $0x38] sm:$0xff]  ;;  %v18966_v4 = vld [vmem:[%s25934_s1 + $0x30] sm:$0xff]  ;;  %v14199_v5 = vld [vmem:[%s25934_s1 + $0x60] sm:$0xff]  ;;  %s18985_s28 = scalar_lea.vmem %s25935_s27, %s18532_s18  ;;  %s15553_s18 = sshll.u32 %s26760_s25, 8 }
  0x26   : > { %16797 = vmatpush3.msra.mxu0 %v14202_v0  ;;  %18516 = vmatprep.subr.mxu1 %v18960_v3  ;;  %v18976_v6 = vld [vmem:[%s25934_s1 + $0x28] sm:$0xff]  ;;  %v14198_v7 = vld [vmem:[%s25934_s1 + $0x58] sm:$0xff]  ;;  %v18993_v9 = vld [vmem:[%s25934_s1 + $0x20] sm:$0xff]  ;;  %s25429_s21 = scalar_lea.vmem %s25746_s17, %s15553_s18 }
  0x27   : > { %16798 = vmatprep.subr.mxu0 %v14201_v1  ;;  %18524 = vmatpush3.msra.mxu1 %v18960_v3  ;;  %v603_v8 = vld [vmem:[%s18985_s28 + $0x1] sm:$0xff]  ;;  %v14197_v10 = vld [vmem:[%s25934_s1 + $0x50] sm:$0xff]  ;;  %v19003_v11 = vld [vmem:[%s25934_s1 + $0x18] sm:$0xff] }
  0x28   : > { %16799 = vmatpush3.msra.mxu0 %v14201_v1  ;;  %18517 = vmatprep.subr.mxu1 %v18966_v4  ;;  %v14196_v12 = vld [vmem:[%s25934_s1 + $0x48] sm:$0xff]  ;;  %v19013_v13 = vld [vmem:[%s25934_s1 + $0x10] sm:$0xff]  ;;  %v14195_v14 = vld [vmem:[%s25934_s1 + $0x40] sm:$0xff] }
  0x29   : > { %16800 = vmatprep.subr.mxu0 %v14200_v2  ;;  %18525 = vmatpush3.msra.mxu1 %v18966_v4  ;;  %v19023_v15 = vld [vmem:[%s25934_s1 + $0x8] sm:$0xff]  ;;  %v19028_v17 = vld [vmem:[%s18985_s28 + $0x19] sm:$0xff]  ;;  %v19043_v20 = vld [vmem:[%s18985_s28 + $0xb0] sm:$0xff] }
  0x2a   : > { %16801 = vmatpush3.msra.mxu0 %v14200_v2  ;;  %18518 = vmatprep.subr.mxu1 %v18976_v6  ;;  %v604_v16 = vld [vmem:[%s18985_s28 + $0x9] sm:$0xff]  ;;  %v19034_v18 = vld [vmem:[%s25934_s1] sm:$0xff]  ;;  %v19055_v23 = vld [vmem:[%s18985_s28 + $0x31] sm:$0xff] }
  0x2b   : > { %16802 = vmatprep.subr.mxu0 %v14199_v5  ;;  %16812 = vmatprep.mubr.msk.f32.mxu0 %vm644_vm0, %v603_v8  ;;  %v19038_v19 = vld [vmem:[%s18985_s28 + $0xa8] sm:$0xff]  ;;  %v19052_v22 = vld [vmem:[%s18985_s28 + $0xc0] sm:$0xff]  ;;  %v14346_v24 = vld [vmem:[%s25934_s1 + $0xf8] sm:$0xff] }
  0x2c   : > { %16803 = vmatpush3.msra.mxu0 %v14199_v5  ;;  %18526 = vmatpush3.msra.mxu1 %v18976_v6  ;;  %v19048_v21 = vld [vmem:[%s18985_s28 + $0x21] sm:$0xff]  ;;  %v19076_v26 = vld [vmem:[%s18985_s28 + $0x39] sm:$0xff]  ;;  %v19083_v28 = vld [vmem:[%s18985_s28 + $0x49] sm:$0xff] }
  0x2d   : > { %16804 = vmatprep.subr.mxu0 %v14198_v7  ;;  %18519 = vmatprep.subr.mxu1 %v18993_v9  ;;  %v19071_v25 = vld [vmem:[%s18985_s28 + $0xc8] sm:$0xff]  ;;  %v19079_v27 = vld [vmem:[%s18985_s28 + $0xd8] sm:$0xff]  ;;  %v19094_v29 = vld [vmem:[%s18985_s28 + $0xe0] sm:$0xff] }
  0x2e   : > { %16805 = vmatpush3.msra.mxu0 %v14198_v7  ;;  %18527 = vmatpush3.msra.mxu1 %v18993_v9  ;;  %v19099_v30 = vld [vmem:[%s18985_s28 + $0x51] sm:$0xff]  ;;  %v19106_v32 = vld [vmem:[%s18985_s28 + $0x61] sm:$0xff]  ;;  %v19125_v35 = vld [vmem:[%s18985_s28 + $0x69] sm:$0xff] }
  0x2f   : > { %16806 = vmatprep.subr.mxu0 %v14197_v10  ;;  %18520 = vmatprep.subr.mxu1 %v19003_v11  ;;  %v19102_v31 = vld [vmem:[%s18985_s28 + $0xf0] sm:$0xff]  ;;  %v19120_v34 = vld [vmem:[%s18985_s28 + $0xf8] sm:$0xff]  ;;  %v19128_v36 = vld [vmem:[%s18985_s28 + $0x108] sm:$0xff] }
  0x30   : > { %16807 = vmatpush3.msra.mxu0 %v14197_v10  ;;  %18528 = vmatpush3.msra.mxu1 %v19003_v11  ;;  %v14345_v33 = vld [vmem:[%s25934_s1 + $0xf0] sm:$0xff]  ;;  %v19132_v37 = vld [vmem:[%s18985_s28 + $0x79] sm:$0xff]  ;;  %v19148_v39 = vld [vmem:[%s18985_s28 + $0x81] sm:$0xff] }
  0x31   : > { %16808 = vmatprep.subr.mxu0 %v14196_v12  ;;  %18521 = vmatprep.subr.mxu1 %v19013_v13  ;;  %v19143_v38 = vld [vmem:[%s18985_s28 + $0x110] sm:$0xff]  ;;  %v19151_v40 = vld [vmem:[%s18985_s28 + $0x120] sm:$0xff]  ;;  %v14344_v42 = vld [vmem:[%s25934_s1 + $0xe8] sm:$0xff] }
  0x32   : > { %16809 = vmatpush3.msra.mxu0 %v14196_v12  ;;  %18529 = vmatpush3.msra.mxu1 %v19013_v13  ;;  %v19155_v41 = vld [vmem:[%s18985_s28 + $0x91] sm:$0xff]  ;;  %v19169_v43 = vld [vmem:[%s18985_s28 + $0x128] sm:$0xff]  ;;  %v19174_v44 = vld [vmem:[%s18985_s28 + $0x99] sm:$0xff] }
  0x33   : > { %16810 = vmatprep.subr.mxu0 %v14195_v14  ;;  %18522 = vmatprep.subr.mxu1 %v19023_v15  ;;  %v19177_v45 = vld [vmem:[%s18985_s28 + $0x138] sm:$0xff]  ;;  %v19181_v46 = vld [vmem:[%s18985_s28 + $0xa9] sm:$0xff]  ;;  %v19197_v48 = vld [vmem:[%s18985_s28 + $0x140] sm:$0xff] }
  0x34   : > { %16811 = vmatpush3.msra.mxu0 %v14195_v14  ;;  %18530 = vmatpush3.msra.mxu1 %v19023_v15  ;;  %v19187_v47 = vld [vmem:[%s25934_s1 + $0xb8] sm:$0xff]  ;;  %v14343_v49 = vld [vmem:[%s25934_s1 + $0xe0] sm:$0xff]  ;;  %v19208_v51 = vld [vmem:[%s18985_s28 + $0x150] sm:$0xff] }
  0x35   : > { %16813 = vmatmul.mubr.msk.f32.vlgmr.msra.gmra.mxu0 %vm644_vm0, %v604_v16  ;;  %18523 = vmatprep.subr.mxu1 %v19034_v18  ;;  %v19205_v50 = vld [vmem:[%s18985_s28 + $0xb1] sm:$0xff]  ;;  %v19212_v52 = vld [vmem:[%s18985_s28 + $0xc1] sm:$0xff]  ;;  %v19229_v55 = vld [vmem:[%s18985_s28 + $0xc9] sm:$0xff] }
  0x36   : > { %16815 = vmatprep.mubr.msk.f32.mxu0 %vm644_vm0, %v19028_v17  ;;  %18531 = vmatpush3.msra.mxu1 %v19034_v18  ;;  %v14342_v53 = vld [vmem:[%s25934_s1 + $0xd8] sm:$0xff]  ;;  %v19232_v56 = vld [vmem:[%s18985_s28 + $0x168] sm:$0xff]  ;;  %v14341_v58 = vld [vmem:[%s25934_s1 + $0xd0] sm:$0xff] }
  0x37   : > { %16897 = vmatprep.mubr.msk.f32.mxu1 %vm644_vm0, %v19038_v19  ;;  %16860 = vmatprep.subr.mxu0 %v18960_v3  ;;  %v19224_v54 = vld [vmem:[%s18985_s28 + $0x158] sm:$0xff]  ;;  %v19247_v59 = vld [vmem:[%s18985_s28 + $0x170] sm:$0xff]  ;;  %v19252_v60 = vld [vmem:[%s18985_s28 + $0xe1] sm:$0xff] }
  0x38   : > { %16898 = vmatmul.mubr.msk.f32.vlgmr.msra.gmra.mxu1 %vm644_vm0, %v19043_v20  ;;  %16861 = vmatpush3.msra.mxu0 %v18960_v3  ;;  %v19235_v57 = vld [vmem:[%s18985_s28 + $0xd9] sm:$0xff]  ;;  %v19255_v61 = vld [vmem:[%s18985_s28 + $0xf1] sm:$0xff]  ;;  %v14340_v62 = vld [vmem:[%s25934_s1 + $0xc8] sm:$0xff] }
  0x39   : > { %16816 = vmatmul.mubr.msk.f32.gmra.mxu0 %vm644_vm0, %v19048_v21  ;;  %16900 = vmatprep.mubr.msk.f32.mxu1 %vm644_vm0, %v19052_v22  ;;  %v14339_v63 = vld [vmem:[%s25934_s1 + $0xc0] sm:$0xff]  ;;  %v19273_v1 = vld [vmem:[%s18985_s28 + $0x18] sm:$0xff]  ;;  %v19276_v2 = vld [vmem:[%s18985_s28 + $0x109] sm:$0xff] }
  0x3a   : > { %16818 = vmatprep.mubr.msk.f32.mxu0 %vm644_vm0, %v19055_v23  ;;  %16862 = vmatprep.subr.mxu0 %v18966_v4  ;;  %v19270_v0 = vld [vmem:[%s18985_s28 + $0xf9] sm:$0xff]  ;;  %v19291_v5 = vld [vmem:[%s18985_s28 + $0x111] sm:$0xff]  ;;  %v19302_v8 = vld [vmem:[%s18985_s28 + $0x121] sm:$0xff] }
  0x3b   : > { %16988 = vmatprep.subr.mxu1 %v14346_v24  ;;  %16863 = vmatpush3.msra.mxu0 %v18966_v4  ;;  %v14490_v3 = vld [vmem:[%s25934_s1 + $0x178] sm:$0xff]  ;;  %v19286_v4 = vld [vmem:[%s18985_s28 + $0x20] sm:$0xff]  ;;  %v14489_v7 = vld [vmem:[%s25934_s1 + $0x170] sm:$0xff] }
  0x3c   : > { %16901 = vmatmul.mubr.msk.f32.gmra.mxu1 %vm644_vm0, %v19071_v25  ;;  %16864 = vmatprep.subr.mxu0 %v18976_v6  ;;  %v14488_v10 = vld [vmem:[%s25934_s1 + $0x168] sm:$0xff]  ;;  %v14487_v14 = vld [vmem:[%s25934_s1 + $0x160] sm:$0xff] }
  0x3d   : > { %16819 = vmatmul.mubr.msk.f32.gmra.mxu0 %vm644_vm0, %v19076_v26  ;;  %16903 = vmatprep.mubr.msk.f32.mxu1 %vm644_vm0, %v19079_v27  ;;  %v19320_v12 = vld [vmem:[%s18985_s28 + $0x48] sm:$0xff] }
  0x3e   : > { %16821 = vmatprep.mubr.msk.f32.mxu0 %vm644_vm0, %v19083_v28  ;;  %16865 = vmatpush3.msra.mxu0 %v18976_v6  ;;  %v19294_v6 = vld [vmem:[%s18985_s28 + $0x30] sm:$0xff]  ;;  %v19340_v16 = vld [vmem:[%s18985_s28 + $0x141] sm:$0xff] }
  0x3f   : > { %16989 = vmatpush3.msra.mxu1 %v14346_v24  ;;  %16866 = vmatprep.subr.mxu0 %v18993_v9  ;;  %v14486_v24 = vld [vmem:[%s25934_s1 + $0x158] sm:$0xff] }
  0x40   : > { %16904 = vmatmul.mubr.msk.f32.gmra.mxu1 %vm644_vm0, %v19094_v29  ;;  %16867 = vmatpush3.msra.mxu0 %v18993_v9  ;;  %v19309_v9 = vld [vmem:[%s18985_s28 + $0x38] sm:$0xff] }
  0x41   : > { %16822 = vmatmul.mubr.msk.f32.gmra.mxu0 %vm644_vm0, %v19099_v30  ;;  %16906 = vmatprep.mubr.msk.f32.mxu1 %vm644_vm0, %v19102_v31 }
  0x42   : > { %16824 = vmatprep.mubr.msk.f32.mxu0 %vm644_vm0, %v19106_v32  ;;  %16868 = vmatprep.subr.mxu0 %v19003_v11 }
  0x43   : > { %16990 = vmatprep.subr.mxu1 %v14345_v33  ;;  %16869 = vmatpush3.msra.mxu0 %v19003_v11  ;;  %v19317_v11 = vld [vmem:[%s18985_s28 + $0x129] sm:$0xff] }
  0x44   : > { %16907 = vmatmul.mubr.msk.f32.gmra.mxu1 %vm644_vm0, %v19120_v34  ;;  %16870 = vmatprep.subr.mxu0 %v19013_v13 }
  0x45   : > { %16825 = vmatmul.mubr.msk.f32.gmra.mxu0 %vm644_vm0, %v19125_v35  ;;  %16909 = vmatprep.mubr.msk.f32.mxu1 %vm644_vm0, %v19128_v36 }
  0x46   : > { %16827 = vmatprep.mubr.msk.f32.mxu0 %vm644_vm0, %v19132_v37  ;;  %16871 = vmatpush3.msra.mxu0 %v19013_v13  ;;  %v19325_v13 = vld [vmem:[%s18985_s28 + $0x139] sm:$0xff] }
  0x47   : > { %16991 = vmatpush3.msra.mxu1 %v14345_v33  ;;  %16872 = vmatprep.subr.mxu0 %v19023_v15  ;;  %v19351_v33 = vld [vmem:[%s18985_s28 + $0x151] sm:$0xff] }
  0x48   : > { %16910 = vmatmul.mubr.msk.f32.gmra.mxu1 %vm644_vm0, %v19143_v38  ;;  %16873 = vmatpush3.msra.mxu0 %v19023_v15  ;;  %v19335_v15 = vld [vmem:[%s18985_s28 + $0x50] sm:$0xff] }
  0x49   : > { %16828 = vmatmul.mubr.msk.f32.gmra.mxu0 %vm644_vm0, %v19148_v39  ;;  %16912 = vmatprep.mubr.msk.f32.mxu1 %vm644_vm0, %v19151_v40 }
  0x4a   : > { %16830 = vmatprep.mubr.msk.f32.mxu0 %vm644_vm0, %v19155_v41  ;;  %16874 = vmatprep.subr.mxu0 %v19034_v18 }
  0x4b   : > { %16992 = vmatprep.subr.mxu1 %v14344_v42  ;;  %16875 = vmatpush3.msra.mxu0 %v19034_v18  ;;  %v19343_v18 = vld [vmem:[%s18985_s28 + $0x60] sm:$0xff] }
  0x4c   : > { %16913 = vmatmul.mubr.msk.f32.gmra.mxu1 %vm644_vm0, %v19169_v43  ;;  %16924 = vmatprep.subr.mxu0 %v19187_v47 }
  0x4d   : > { %16831 = vmatmul.mubr.msk.f32.gmra.mxu0 %vm644_vm0, %v19174_v44  ;;  %16915 = vmatprep.mubr.msk.f32.mxu1 %vm644_vm0, %v19177_v45 }
  0x4e   : > { %16833 = vmatprep.mubr.msk.f32.mxu0 %vm644_vm0, %v19181_v46  ;;  %16993 = vmatpush3.msra.mxu1 %v14344_v42  ;;  %v19358_v42 = vld [vmem:[%s18985_s28 + $0x68] sm:$0xff] }
  0x4f   : > { %16994 = vmatprep.subr.mxu1 %v14343_v49 }
  0x50   : > { %16916 = vmatmul.mubr.msk.f32.gmra.mxu1 %vm644_vm0, %v19197_v48 }
  0x51   : > { %16834 = vmatmul.mubr.msk.f32.gmra.mxu0 %vm644_vm0, %v19205_v50  ;;  %16918 = vmatprep.mubr.msk.f32.mxu1 %vm644_vm0, %v19208_v51 }
  0x52   : > { %16836 = vmatprep.mubr.msk.f32.mxu0 %vm644_vm0, %v19212_v52  ;;  %16995 = vmatpush3.msra.mxu1 %v14343_v49  ;;  %v14485_v49 = vld [vmem:[%s25934_s1 + $0x150] sm:$0xff] }
  0x53   : > { %16996 = vmatprep.subr.mxu1 %v14342_v53 }
  0x54   : > { %16919 = vmatmul.mubr.msk.f32.gmra.mxu1 %vm644_vm0, %v19224_v54 }
  0x55   : > { %16837 = vmatmul.mubr.msk.f32.gmra.mxu0 %vm644_vm0, %v19229_v55  ;;  %16921 = vmatprep.mubr.msk.f32.mxu1 %vm644_vm0, %v19232_v56 }
  0x56   : > { %16839 = vmatprep.mubr.msk.f32.mxu0 %vm644_vm0, %v19235_v57  ;;  %16997 = vmatpush3.msra.mxu1 %v14342_v53  ;;  %v19366_v53 = vld [vmem:[%s18985_s28 + $0x159] sm:$0xff] }
  0x57   : > { %16998 = vmatprep.subr.mxu1 %v14341_v58 }
  0x58   : > { %16922 = vmatmul.mubr.msk.f32.gmra.mxu1 %vm644_vm0, %v19247_v59 }
  0x59   : > { %16840 = vmatmul.mubr.msk.f32.gmra.mxu0 %vm644_vm0, %v19252_v60  ;;  %16999 = vmatpush3.msra.mxu1 %v14341_v58  ;;  %v19369_v58 = vld [vmem:[%s18985_s28 + $0x78] sm:$0xff] }
  0x5a   : > { %16842 = vmatprep.mubr.msk.f32.mxu0 %vm644_vm0, %v19255_v61  ;;  %17000 = vmatprep.subr.mxu1 %v14340_v62 }
  0x5b   : > { %17001 = vmatpush3.msra.mxu1 %v14340_v62  ;;  %17004 = vmatprep.mubr.msk.f32.mxu1 %vm644_vm0, %v19273_v1  ;;  %v19374_v62 = vld [vmem:[%s18985_s28 + $0x169] sm:$0xff] }
  0x5c   : > { %17002 = vmatprep.subr.mxu1 %v14339_v63  ;;  %25936 = vst [vmem:[#allocation7_spill] sm:$0xff] %v19374_v62 }
  0x5d   : > { %16843 = vmatmul.mubr.msk.f32.gmra.mxu0 %vm644_vm0, %v19270_v0  ;;  %17003 = vmatpush3.msra.mxu1 %v14339_v63  ;;  %v14484_v63 = vld [vmem:[%s25934_s1 + $0x148] sm:$0xff] }
  0x5e   : > { %16845 = vmatprep.mubr.msk.f32.mxu0 %vm644_vm0, %v19276_v2  ;;  %17005 = vmatmul.mubr.msk.f32.vlgmr.msra.gmra.mxu1 %vm644_vm0, %v19286_v4 }
  0x5f   : > { %17007 = vmatprep.mubr.msk.f32.mxu1 %vm644_vm0, %v19294_v6  ;;  %17116 = vmatprep.subr.mxu1 %v14490_v3 }
  0x60   : > { %17117 = vmatpush3.msra.mxu1 %v14490_v3  ;;  %v19384_v3 = vld [vmem:[%s18985_s28 + $0x80] sm:$0xff] }
  0x61   : > { %16846 = vmatmul.mubr.msk.f32.gmra.mxu0 %vm644_vm0, %v19291_v5  ;;  %17118 = vmatprep.subr.mxu1 %v14489_v7 }
  0x62   : > { %16848 = vmatprep.mubr.msk.f32.mxu0 %vm644_vm0, %v19302_v8  ;;  %17008 = vmatmul.mubr.msk.f32.gmra.mxu1 %vm644_vm0, %v19309_v9 }
  0x63   : > { %17010 = vmatprep.mubr.msk.f32.mxu1 %vm644_vm0, %v19320_v12  ;;  %17119 = vmatpush3.msra.mxu1 %v14489_v7  ;;  %v19389_v7 = vld [vmem:[%s18985_s28 + $0x171] sm:$0xff] }
  0x64   : > { %17120 = vmatprep.subr.mxu1 %v14488_v10 }
  0x65   : > { %16849 = vmatmul.mubr.msk.f32.gmra.mxu0 %vm644_vm0, %v19317_v11  ;;  %17121 = vmatpush3.msra.mxu1 %v14488_v10  ;;  %v19392_v10 = vld [vmem:[%s18985_s28 + $0x90] sm:$0xff] }
  0x66   : > { %16851 = vmatprep.mubr.msk.f32.mxu0 %vm644_vm0, %v19325_v13  ;;  %17011 = vmatmul.mubr.msk.f32.gmra.mxu1 %vm644_vm0, %v19335_v15 }
  0x67   : > { %17013 = vmatprep.mubr.msk.f32.mxu1 %vm644_vm0, %v19343_v18  ;;  %17122 = vmatprep.subr.mxu1 %v14487_v14 }
  0x68   : > { %17123 = vmatpush3.msra.mxu1 %v14487_v14  ;;  %v14483_v14 = vld [vmem:[%s25934_s1 + $0x140] sm:$0xff] }
  0x69   : > { %16852 = vmatmul.mubr.msk.f32.gmra.mxu0 %vm644_vm0, %v19340_v16  ;;  %17124 = vmatprep.subr.mxu1 %v14486_v24 }
  0x6a   : > { %16854 = vmatprep.mubr.msk.f32.mxu0 %vm644_vm0, %v19351_v33  ;;  %17014 = vmatmul.mubr.msk.f32.gmra.mxu1 %vm644_vm0, %v19358_v42 }
  0x6b   : > { %17016 = vmatprep.mubr.msk.f32.mxu1 %vm644_vm0, %v19369_v58  ;;  %17125 = vmatpush3.msra.mxu1 %v14486_v24  ;;  %v563_v24 = vld [vmem:[%s18985_s28] sm:$0xff] }
  0x6c   : > { %17126 = vmatprep.subr.mxu1 %v14485_v49 }
  0x6d   : > { %16855 = vmatmul.mubr.msk.f32.gmra.mxu0 %vm644_vm0, %v19366_v53  ;;  %17127 = vmatpush3.msra.mxu1 %v14485_v49  ;;  %v19405_v49 = vld [vmem:[%s18985_s28 + $0x98] sm:$0xff] }
  0x6e   : > { %16857 = vmatprep.mubr.msk.f32.mxu0 %vm644_vm0, %v19374_v62  ;;  %17017 = vmatmul.mubr.msk.f32.gmra.mxu1 %vm644_vm0, %v19384_v3  ;;  %v564_v62 = vld [vmem:[%s18985_s28 + $0x8] sm:$0xff] }
  0x6f   : > { %17019 = vmatprep.mubr.msk.f32.mxu1 %vm644_vm0, %v19392_v10  ;;  %17128 = vmatprep.subr.mxu1 %v14484_v63 }
  0x70   : > { %17129 = vmatpush3.msra.mxu1 %v14484_v63  ;;  %v14273_v63 = vld [vmem:[%s25934_s1 + $0xb0] sm:$0xff] }
  0x71   : > { %16858 = vmatmul.mubr.msk.f32.gmra.mxu0 %vm644_vm0, %v19389_v7  ;;  %17130 = vmatprep.subr.mxu1 %v14483_v14 }
  0x72   : > { %16876 = vmatprep.mubr.msk.f32.mxu0 %vm644_vm0, %v563_v24  ;;  %17020 = vmatmul.mubr.msk.f32.gmra.mxu1 %vm644_vm0, %v19405_v49  ;;  %v14272_v24 = vld [vmem:[%s25934_s1 + $0xa8] sm:$0xff] }
  0x73   : > { %17022 = vmatprep.mubr.msk.f32.mxu1 %vm644_vm0, %v19038_v19  ;;  %17131 = vmatpush3.msra.mxu1 %v14483_v14  ;;  %v14271_v19 = vld [vmem:[%s25934_s1 + $0xa0] sm:$0xff]  ;;  %v1294_v14 = vld [vmem:[%s18985_s28 + $0x52] sm:$0xff] }
  0x75   : > { %16877 = vmatmul.mubr.msk.f32.vlgmr.msra.gmra.mxu0 %vm644_vm0, %v564_v62  ;;  %v19536_v62 = vld [vmem:[%s18985_s28 + $0x188] sm:$0xff] }
  0x76   : > { %16879 = vmatprep.mubr.msk.f32.mxu0 %vm644_vm0, %v19273_v1  ;;  %16925 = vmatpush3.msra.mxu0 %v19187_v47  ;;  %v1291_v47 = vld [vmem:[%s18985_s28 + $0x32] sm:$0xff]  ;;  %v1292_v1 = vld [vmem:[%s18985_s28 + $0x3a] sm:$0xff] }
  0x77   : > { %16926 = vmatprep.subr.mxu0 %v14273_v63  ;;  %17023 = vmatmul.mubr.msk.f32.gmra.mxu1 %vm644_vm0, %v19043_v20  ;;  %v14270_v20 = vld [vmem:[%s25934_s1 + $0x98] sm:$0xff] }
  0x78   : > { %16927 = vmatpush3.msra.mxu0 %v14273_v63  ;;  %17025 = vmatprep.mubr.msk.f32.mxu1 %vm644_vm0, %v19052_v22  ;;  %v14269_v22 = vld [vmem:[%s25934_s1 + $0x90] sm:$0xff]  ;;  %v1295_v63 = vld [vmem:[%s18985_s28 + $0x62] sm:$0xff] }
  0x79   : > { %16880 = vmatmul.mubr.msk.f32.gmra.mxu0 %vm644_vm0, %v19286_v4  ;;  %16928 = vmatprep.subr.mxu0 %v14272_v24  ;;  %v1293_v4 = vld [vmem:[%s18985_s28 + $0x4a] sm:$0xff] }
  0x7a   : > { %16882 = vmatprep.mubr.msk.f32.mxu0 %vm644_vm0, %v19294_v6  ;;  %16929 = vmatpush3.msra.mxu0 %v14272_v24  ;;  %v14411_v24 = vld [vmem:[%s25934_s1 + $0x100] sm:$0xff] }
  0x7b   : > { %16930 = vmatprep.subr.mxu0 %v14271_v19  ;;  %17026 = vmatmul.mubr.msk.f32.gmra.mxu1 %vm644_vm0, %v19071_v25  ;;  %v14268_v25 = vld [vmem:[%s25934_s1 + $0x88] sm:$0xff] }
  0x7c   : > { %16931 = vmatpush3.msra.mxu0 %v14271_v19  ;;  %17028 = vmatprep.mubr.msk.f32.mxu1 %vm644_vm0, %v19079_v27  ;;  %v14267_v27 = vld [vmem:[%s25934_s1 + $0x80] sm:$0xff]  ;;  %v1296_v19 = vld [vmem:[%s18985_s28 + $0x6a] sm:$0xff] }
  0x7d   : > { %16883 = vmatmul.mubr.msk.f32.gmra.mxu0 %vm644_vm0, %v19309_v9  ;;  %16932 = vmatprep.subr.mxu0 %v14270_v20 }
  0x7e   : > { %16885 = vmatprep.mubr.msk.f32.mxu0 %vm644_vm0, %v19320_v12  ;;  %16933 = vmatpush3.msra.mxu0 %v14270_v20  ;;  %v19557_v20 = vld [vmem:[%s25934_s1 + $0x1b8] sm:$0xff] }
  0x7f   : > { %16934 = vmatprep.subr.mxu0 %v14269_v22  ;;  %17029 = vmatmul.mubr.msk.f32.gmra.mxu1 %vm644_vm0, %v19094_v29  ;;  %v14418_v29 = vld [vmem:[%s25934_s1 + $0x138] sm:$0xff] }
  0x80   : > { %16935 = vmatpush3.msra.mxu0 %v14269_v22  ;;  %17031 = vmatprep.mubr.msk.f32.mxu1 %vm644_vm0, %v19102_v31  ;;  %v19470_v31 = vld [vmem:[%s25934_s1 + $0x1f8] sm:$0xff] }
  0x81   : > { %16886 = vmatmul.mubr.msk.f32.gmra.mxu0 %vm644_vm0, %v19335_v15  ;;  %16936 = vmatprep.subr.mxu0 %v14268_v25  ;;  %v1297_v22 = vld [vmem:[%s18985_s28 + $0x7a] sm:$0xff] }
  0x82   : > { %16888 = vmatprep.mubr.msk.f32.mxu0 %vm644_vm0, %v19343_v18  ;;  %16937 = vmatpush3.msra.mxu0 %v14268_v25  ;;  %v14633_v25 = vld [vmem:[%s25934_s1 + $0x1f0] sm:$0xff] }
  0x83   : > { %16938 = vmatprep.subr.mxu0 %v14267_v27  ;;  %17032 = vmatmul.mubr.msk.f32.gmra.mxu1 %vm644_vm0, %v19120_v34  ;;  %v1287_v34 = vld [vmem:[%s18985_s28 + $0x2] sm:$0xff] }
  0x84   : > { %16939 = vmatpush3.msra.mxu0 %v14267_v27  ;;  %17034 = vmatprep.mubr.msk.f32.mxu1 %vm644_vm0, %v19128_v36  ;;  %v1288_v36 = vld [vmem:[%s18985_s28 + $0xa] sm:$0xff]  ;;  %v1298_v27 = vld [vmem:[%s18985_s28 + $0x82] sm:$0xff] }
  0x85   : > { %16889 = vmatmul.mubr.msk.f32.gmra.mxu0 %vm644_vm0, %v19358_v42  ;;  %17052 = vmatprep.subr.mxu0 %v14418_v29 }
  0x86   : > { %16891 = vmatprep.mubr.msk.f32.mxu0 %vm644_vm0, %v19369_v58  ;;  %17244 = vmatprep.subr.mxu1 %v19470_v31 }
  0x87   : > { %17035 = vmatmul.mubr.msk.f32.gmra.mxu1 %vm644_vm0, %v19143_v38  ;;  %v1289_v38 = vld [vmem:[%s18985_s28 + $0x1a] sm:$0xff] }
  0x88   : > { %17037 = vmatprep.mubr.msk.f32.mxu1 %vm644_vm0, %v19151_v40  ;;  %v14417_v40 = vld [vmem:[%s25934_s1 + $0x130] sm:$0xff] }
  0x89   : > { %16892 = vmatmul.mubr.msk.f32.gmra.mxu0 %vm644_vm0, %v19384_v3 }
  0x8a   : > { %16894 = vmatprep.mubr.msk.f32.mxu0 %vm644_vm0, %v19392_v10 }
  0x8b   : > { %17038 = vmatmul.mubr.msk.f32.gmra.mxu1 %vm644_vm0, %v19169_v43  ;;  %v1290_v43 = vld [vmem:[%s18985_s28 + $0x22] sm:$0xff] }
  0x8c   : > { %17040 = vmatprep.mubr.msk.f32.mxu1 %vm644_vm0, %v19177_v45  ;;  %v14416_v45 = vld [vmem:[%s25934_s1 + $0x128] sm:$0xff] }
  0x8d   : > { %16895 = vmatmul.mubr.msk.f32.gmra.mxu0 %vm644_vm0, %v19405_v49 }
  0x8e   : > { %16940 = vmatprep.mubr.msk.f32.mxu0 %vm644_vm0, %v1287_v34  ;;  %v1299_v34 = vld [vmem:[%s18985_s28 + $0x92] sm:$0xff] }
  0x8f   : > { %17041 = vmatmul.mubr.msk.f32.gmra.mxu1 %vm644_vm0, %v19197_v48  ;;  %v14415_v48 = vld [vmem:[%s25934_s1 + $0x120] sm:$0xff] }
  0x90   : > { %17043 = vmatprep.mubr.msk.f32.mxu1 %vm644_vm0, %v19208_v51  ;;  %v19520_v51 = vld [vmem:[%s18985_s28 + $0x180] sm:$0xff] }
  0x91   : > { %16941 = vmatmul.mubr.msk.f32.vlgmr.msra.gmra.mxu0 %vm644_vm0, %v1288_v36  ;;  %v14631_v36 = vld [vmem:[%s25934_s1 + $0x1e0] sm:$0xff] }
  0x92   : > { %16943 = vmatprep.mubr.msk.f32.mxu0 %vm644_vm0, %v1289_v38  ;;  %17053 = vmatpush3.msra.mxu0 %v14418_v29  ;;  %v14632_v29 = vld [vmem:[%s25934_s1 + $0x1e8] sm:$0xff] }
  0x93   : > { %17054 = vmatprep.subr.mxu0 %v14417_v40  ;;  %17044 = vmatmul.mubr.msk.f32.gmra.mxu1 %vm644_vm0, %v19224_v54  ;;  %v14414_v54 = vld [vmem:[%s25934_s1 + $0x118] sm:$0xff] }
  0x94   : > { %17055 = vmatpush3.msra.mxu0 %v14417_v40  ;;  %17046 = vmatprep.mubr.msk.f32.mxu1 %vm644_vm0, %v19232_v56  ;;  %v14413_v56 = vld [vmem:[%s25934_s1 + $0x110] sm:$0xff] }
  0x95   : > { %16944 = vmatmul.mubr.msk.f32.gmra.mxu0 %vm644_vm0, %v1290_v43  ;;  %17056 = vmatprep.subr.mxu0 %v14416_v45  ;;  %v1301_v40 = vld [vmem:[%s18985_s28 + $0xaa] sm:$0xff] }
  0x96   : > { %16946 = vmatprep.mubr.msk.f32.mxu0 %vm644_vm0, %v1291_v47  ;;  %17057 = vmatpush3.msra.mxu0 %v14416_v45  ;;  %v1302_v45 = vld [vmem:[%s18985_s28 + $0xb2] sm:$0xff] }
  0x97   : > { %17058 = vmatprep.subr.mxu0 %v14415_v48  ;;  %17047 = vmatmul.mubr.msk.f32.gmra.mxu1 %vm644_vm0, %v19247_v59  ;;  %v14412_v59 = vld [vmem:[%s25934_s1 + $0x108] sm:$0xff] }
  0x98   : > { %17059 = vmatpush3.msra.mxu0 %v14415_v48  ;;  %17049 = vmatprep.mubr.msk.f32.mxu1 %vm644_vm0, %v19520_v51  ;;  %v1303_v48 = vld [vmem:[%s18985_s28 + $0xc2] sm:$0xff] }
  0x99   : > { %16947 = vmatmul.mubr.msk.f32.gmra.mxu0 %vm644_vm0, %v1292_v1  ;;  %17060 = vmatprep.subr.mxu0 %v14414_v54 }
  0x9a   : > { %16949 = vmatprep.mubr.msk.f32.mxu0 %vm644_vm0, %v1293_v4  ;;  %17061 = vmatpush3.msra.mxu0 %v14414_v54  ;;  %v1304_v54 = vld [vmem:[%s18985_s28 + $0xca] sm:$0xff] }
  0x9b   : > { %17062 = vmatprep.subr.mxu0 %v14413_v56  ;;  %17050 = vmatmul.mubr.msk.f32.gmra.mxu1 %vm644_vm0, %v19536_v62 }
  0x9c   : > { %17063 = vmatpush3.msra.mxu0 %v14413_v56  ;;  %17132 = vmatprep.mubr.msk.f32.mxu1 %vm644_vm0, %v1289_v38  ;;  %v14630_v38 = vld [vmem:[%s25934_s1 + $0x1d8] sm:$0xff]  ;;  %v1306_v56 = vld [vmem:[%s18985_s28 + $0xe2] sm:$0xff] }
  0x9d   : > { %16950 = vmatmul.mubr.msk.f32.gmra.mxu0 %vm644_vm0, %v1294_v14  ;;  %17064 = vmatprep.subr.mxu0 %v14412_v59 }
  0x9e   : > { %16952 = vmatprep.mubr.msk.f32.mxu0 %vm644_vm0, %v1295_v63  ;;  %17065 = vmatpush3.msra.mxu0 %v14412_v59  ;;  %v1308_v59 = vld [vmem:[%s18985_s28 + $0xfa] sm:$0xff] }
  0x9f   : > { %17066 = vmatprep.subr.mxu0 %v14411_v24  ;;  %17133 = vmatmul.mubr.msk.f32.vlgmr.msra.gmra.mxu1 %vm644_vm0, %v1290_v43  ;;  %v14629_v43 = vld [vmem:[%s25934_s1 + $0x1d0] sm:$0xff] }
  0xa0   : > { %17067 = vmatpush3.msra.mxu0 %v14411_v24  ;;  %17135 = vmatprep.mubr.msk.f32.mxu1 %vm644_vm0, %v1291_v47  ;;  %v14628_v47 = vld [vmem:[%s25934_s1 + $0x1c8] sm:$0xff]  ;;  %v1310_v24 = vld [vmem:[%s18985_s28 + $0x112] sm:$0xff] }
  0xa1   : > { %16953 = vmatmul.mubr.msk.f32.gmra.mxu0 %vm644_vm0, %v1296_v19  ;;  %17180 = vmatprep.subr.mxu0 %v19557_v20 }
  0xa2   : > { %16955 = vmatprep.mubr.msk.f32.mxu0 %vm644_vm0, %v1297_v22  ;;  %17245 = vmatpush3.msra.mxu1 %v19470_v31  ;;  %v1300_v31 = vld [vmem:[%s18985_s28 + $0x9a] sm:$0xff] }
  0xa3   : > { %17136 = vmatmul.mubr.msk.f32.gmra.mxu1 %vm644_vm0, %v1292_v1  ;;  %17246 = vmatprep.subr.mxu1 %v14633_v25  ;;  %v14627_v1 = vld [vmem:[%s25934_s1 + $0x1c0] sm:$0xff] }
  0xa4   : > { %17138 = vmatprep.mubr.msk.f32.mxu1 %vm644_vm0, %v1293_v4  ;;  %17247 = vmatpush3.msra.mxu1 %v14633_v25  ;;  %v1305_v4 = vld [vmem:[%s18985_s28 + $0xda] sm:$0xff] }
  0xa5   : > { %16956 = vmatmul.mubr.msk.f32.gmra.mxu0 %vm644_vm0, %v1298_v27  ;;  %17248 = vmatprep.subr.mxu1 %v14632_v29  ;;  %v1313_v25 = vld [vmem:[%s18985_s28 + $0x13a] sm:$0xff] }
  0xa6   : > { %16958 = vmatprep.mubr.msk.f32.mxu0 %vm644_vm0, %v1299_v34  ;;  %17249 = vmatpush3.msra.mxu1 %v14632_v29  ;;  %v1315_v29 = vld [vmem:[%s18985_s28 + $0x152] sm:$0xff] }
  0xa7   : > { %17139 = vmatmul.mubr.msk.f32.gmra.mxu1 %vm644_vm0, %v1294_v14  ;;  %17250 = vmatprep.subr.mxu1 %v14631_v36  ;;  %v1307_v14 = vld [vmem:[%s18985_s28 + $0xf2] sm:$0xff] }
  0xa8   : > { %17141 = vmatprep.mubr.msk.f32.mxu1 %vm644_vm0, %v1295_v63  ;;  %17251 = vmatpush3.msra.mxu1 %v14631_v36  ;;  %v1309_v63 = vld [vmem:[%s18985_s28 + $0x10a] sm:$0xff] }
  0xa9   : > { %16959 = vmatmul.mubr.msk.f32.gmra.mxu0 %vm644_vm0, %v1300_v31  ;;  %17252 = vmatprep.subr.mxu1 %v14630_v38  ;;  %v1317_v36 = vld [vmem:[%s18985_s28 + $0x16a] sm:$0xff] }
  0xaa   : > { %16961 = vmatprep.mubr.msk.f32.mxu0 %vm644_vm0, %v1301_v40  ;;  %17253 = vmatpush3.msra.mxu1 %v14630_v38  ;;  %v14561_v38 = vld [vmem:[%s25934_s1 + $0x1b0] sm:$0xff] }
  0xab   : > { %17142 = vmatmul.mubr.msk.f32.gmra.mxu1 %vm644_vm0, %v1296_v19  ;;  %17254 = vmatprep.subr.mxu1 %v14629_v43  ;;  %v1311_v19 = vld [vmem:[%s18985_s28 + $0x122] sm:$0xff] }
  0xac   : > { %17144 = vmatprep.mubr.msk.f32.mxu1 %vm644_vm0, %v1297_v22  ;;  %17255 = vmatpush3.msra.mxu1 %v14629_v43  ;;  %v1312_v22 = vld [vmem:[%s18985_s28 + $0x12a] sm:$0xff] }
  0xad   : > { %16962 = vmatmul.mubr.msk.f32.gmra.mxu0 %vm644_vm0, %v1302_v45  ;;  %17256 = vmatprep.subr.mxu1 %v14628_v47  ;;  %v14556_v43 = vld [vmem:[%s25934_s1 + $0x188] sm:$0xff] }
  0xae   : > { %16964 = vmatprep.mubr.msk.f32.mxu0 %vm644_vm0, %v1303_v48  ;;  %17257 = vmatpush3.msra.mxu1 %v14628_v47  ;;  %v19713_v47 = vld [vmem:[%s25934_s1 + $0x238] sm:$0xff] }
  0xaf   : > { %17145 = vmatmul.mubr.msk.f32.gmra.mxu1 %vm644_vm0, %v1298_v27  ;;  %17258 = vmatprep.subr.mxu1 %v14627_v1  ;;  %v1314_v27 = vld [vmem:[%s18985_s28 + $0x142] sm:$0xff] }
  0xb0   : > { %17147 = vmatprep.mubr.msk.f32.mxu1 %vm644_vm0, %v1299_v34  ;;  %17259 = vmatpush3.msra.mxu1 %v14627_v1  ;;  %v1316_v34 = vld [vmem:[%s18985_s28 + $0x15a] sm:$0xff] }
  0xb1   : > { %16965 = vmatmul.mubr.msk.f32.gmra.mxu0 %vm644_vm0, %v1304_v54  ;;  %v14601_v1 = vld [vmem:[%s18985_s28 + $0x79] sm:$0xff] }
  0xb2   : > { %16967 = vmatprep.mubr.msk.f32.mxu0 %vm644_vm0, %v1305_v4 }
  0xb3   : > { %17148 = vmatmul.mubr.msk.f32.gmra.mxu1 %vm644_vm0, %v1300_v31  ;;  %v1318_v31 = vld [vmem:[%s18985_s28 + $0x172] sm:$0xff] }
  0xb4   : > { %17150 = vmatprep.mubr.msk.f32.mxu1 %vm644_vm0, %v1301_v40  ;;  %v14559_v40 = vld [vmem:[%s25934_s1 + $0x1a0] sm:$0xff] }
  0xb5   : > { %16968 = vmatmul.mubr.msk.f32.gmra.mxu0 %vm644_vm0, %v1306_v56 }
  0xb6   : > { %16970 = vmatprep.mubr.msk.f32.mxu0 %vm644_vm0, %v1307_v14 }
  0xb7   : > { %17151 = vmatmul.mubr.msk.f32.gmra.mxu1 %vm644_vm0, %v1302_v45  ;;  %v14596_v45 = vld [vmem:[%s18985_s28 + $0x39] sm:$0xff] }
  0xb8   : > { %17153 = vmatprep.mubr.msk.f32.mxu1 %vm644_vm0, %v1303_v48  ;;  %v14600_v48 = vld [vmem:[%s18985_s28 + $0x69] sm:$0xff] }
  0xb9   : > { %16971 = vmatmul.mubr.msk.f32.gmra.mxu0 %vm644_vm0, %v1308_v59 }
  0xba   : > { %16973 = vmatprep.mubr.msk.f32.mxu0 %vm644_vm0, %v1309_v63 }
  0xbb   : > { %17154 = vmatmul.mubr.msk.f32.gmra.mxu1 %vm644_vm0, %v1304_v54  ;;  %v14609_v54 = vld [vmem:[%s18985_s28 + $0xd9] sm:$0xff] }
  0xbc   : > { %17156 = vmatprep.mubr.msk.f32.mxu1 %vm644_vm0, %v1305_v4  ;;  %v14610_v4 = vld [vmem:[%s18985_s28 + $0xe1] sm:$0xff] }
  0xbd   : > { %16974 = vmatmul.mubr.msk.f32.gmra.mxu0 %vm644_vm0, %v1310_v24 }
  0xbe   : > { %16976 = vmatprep.mubr.msk.f32.mxu0 %vm644_vm0, %v1311_v19 }
  0xbf   : > { %17157 = vmatmul.mubr.msk.f32.gmra.mxu1 %vm644_vm0, %v1306_v56 }
  0xc0   : > { %17159 = vmatprep.mubr.msk.f32.mxu1 %vm644_vm0, %v1307_v14 }
  0xc1   : > { %16977 = vmatmul.mubr.msk.f32.gmra.mxu0 %vm644_vm0, %v1312_v22 }
  0xc2   : > { %16979 = vmatprep.mubr.msk.f32.mxu0 %vm644_vm0, %v1313_v25 }
  0xc3   : > { %17160 = vmatmul.mubr.msk.f32.gmra.mxu1 %vm644_vm0, %v1308_v59 }
  0xc4   : > { %17162 = vmatprep.mubr.msk.f32.mxu1 %vm644_vm0, %v1309_v63  ;;  %v14612_v63 = vld [vmem:[%s18985_s28 + $0xf9] sm:$0xff] }
  0xc5   : > { %16980 = vmatmul.mubr.msk.f32.gmra.mxu0 %vm644_vm0, %v1314_v27 }
  0xc6   : > { %16982 = vmatprep.mubr.msk.f32.mxu0 %vm644_vm0, %v1315_v29 }
  0xc7   : > { %17163 = vmatmul.mubr.msk.f32.gmra.mxu1 %vm644_vm0, %v1310_v24 }
  0xc8   : > { %17165 = vmatprep.mubr.msk.f32.mxu1 %vm644_vm0, %v1311_v19 }
  0xc9   : > { %16983 = vmatmul.mubr.msk.f32.gmra.mxu0 %vm644_vm0, %v1316_v34 }
  0xca   : > { %16985 = vmatprep.mubr.msk.f32.mxu0 %vm644_vm0, %v1317_v36 }
  0xcb   : > { %17166 = vmatmul.mubr.msk.f32.gmra.mxu1 %vm644_vm0, %v1312_v22 }
  0xcc   : > { %17168 = vmatprep.mubr.msk.f32.mxu1 %vm644_vm0, %v1313_v25  ;;  %v14614_v25 = vld [vmem:[%s18985_s28 + $0x111] sm:$0xff] }
  0xcd   : > { %16986 = vmatmul.mubr.msk.f32.gmra.mxu0 %vm644_vm0, %v1318_v31 }
  0xce   : > { %17068 = vmatprep.mubr.msk.f32.mxu0 %vm644_vm0, %v19028_v17  ;;  %v14560_v17 = vld [vmem:[%s25934_s1 + $0x1a8] sm:$0xff] }
  0xcf   : > { %17169 = vmatmul.mubr.msk.f32.gmra.mxu1 %vm644_vm0, %v1314_v27 }
  0xd0   : > { %17171 = vmatprep.mubr.msk.f32.mxu1 %vm644_vm0, %v1315_v29 }
  0xd1   : > { %17069 = vmatmul.mubr.msk.f32.vlgmr.msra.gmra.mxu0 %vm644_vm0, %v19048_v21  ;;  %v19674_v21 = vld [vmem:[%s18985_s28 + $0x182] sm:$0xff] }
  0xd2   : > { %17071 = vmatprep.mubr.msk.f32.mxu0 %vm644_vm0, %v19055_v23  ;;  %17181 = vmatpush3.msra.mxu0 %v19557_v20  ;;  %v14558_v23 = vld [vmem:[%s25934_s1 + $0x198] sm:$0xff]  ;;  %v19688_v20 = vld [vmem:[%s18985_s28 + $0x18a] sm:$0xff] }
  0xd3   : > { %17182 = vmatprep.subr.mxu0 %v14561_v38  ;;  %17172 = vmatmul.mubr.msk.f32.gmra.mxu1 %vm644_vm0, %v1316_v34 }
  0xd4   : > { %17183 = vmatpush3.msra.mxu0 %v14561_v38  ;;  %17174 = vmatprep.mubr.msk.f32.mxu1 %vm644_vm0, %v1317_v36  ;;  %v14616_v36 = vld [vmem:[%s18985_s28 + $0x129] sm:$0xff] }
  0xd5   : > { %17072 = vmatmul.mubr.msk.f32.gmra.mxu0 %vm644_vm0, %v19076_v26  ;;  %17184 = vmatprep.subr.mxu0 %v14560_v17  ;;  %v14557_v26 = vld [vmem:[%s25934_s1 + $0x190] sm:$0xff] }
  0xd6   : > { %17074 = vmatprep.mubr.msk.f32.mxu0 %vm644_vm0, %v19083_v28  ;;  %17185 = vmatpush3.msra.mxu0 %v14560_v17  ;;  %v14595_v28 = vld [vmem:[%s18985_s28 + $0x31] sm:$0xff] }
  0xd7   : > { %17186 = vmatprep.subr.mxu0 %v14559_v40  ;;  %17175 = vmatmul.mubr.msk.f32.gmra.mxu1 %vm644_vm0, %v1318_v31 }
  0xd8   : > { %17187 = vmatpush3.msra.mxu0 %v14559_v40  ;;  %17177 = vmatprep.mubr.msk.f32.mxu1 %vm644_vm0, %v19674_v21  ;;  %v14409_v40 = vld [vmem:[%s18985_s28 + $0x181] sm:$0xff] }
  0xd9   : > { %17075 = vmatmul.mubr.msk.f32.gmra.mxu0 %vm644_vm0, %v19099_v30  ;;  %17188 = vmatprep.subr.mxu0 %v14558_v23  ;;  %v14555_v30 = vld [vmem:[%s25934_s1 + $0x180] sm:$0xff] }
  0xda   : > { %17077 = vmatprep.mubr.msk.f32.mxu0 %vm644_vm0, %v19106_v32  ;;  %17189 = vmatpush3.msra.mxu0 %v14558_v23  ;;  %v14597_v32 = vld [vmem:[%s18985_s28 + $0x49] sm:$0xff] }
  0xdb   : > { %17190 = vmatprep.subr.mxu0 %v14557_v26  ;;  %17178 = vmatmul.mubr.msk.f32.gmra.mxu1 %vm644_vm0, %v19688_v20 }
  0xdc   : > { %17191 = vmatpush3.msra.mxu0 %v14557_v26  ;;  %17260 = vmatprep.mubr.msk.f32.mxu1 %vm644_vm0, %v14595_v28  ;;  %v14618_v26 = vld [vmem:[%s18985_s28 + $0x141] sm:$0xff] }
  0xdd   : > { %17078 = vmatmul.mubr.msk.f32.gmra.mxu0 %vm644_vm0, %v19125_v35  ;;  %17192 = vmatprep.subr.mxu0 %v14556_v43  ;;  %v14598_v35 = vld [vmem:[%s18985_s28 + $0x51] sm:$0xff] }
  0xde   : > { %17080 = vmatprep.mubr.msk.f32.mxu0 %vm644_vm0, %v19132_v37  ;;  %17193 = vmatpush3.msra.mxu0 %v14556_v43  ;;  %v14599_v37 = vld [vmem:[%s18985_s28 + $0x61] sm:$0xff]  ;;  %v14410_v43 = vld [vmem:[%s18985_s28 + $0x189] sm:$0xff] }
  0xdf   : > { %17194 = vmatprep.subr.mxu0 %v14555_v30  ;;  %17261 = vmatmul.mubr.msk.f32.vlgmr.msra.gmra.mxu1 %vm644_vm0, %v14596_v45 }
  0xe0   : > { %17195 = vmatpush3.msra.mxu0 %v14555_v30  ;;  %17263 = vmatprep.mubr.msk.f32.mxu1 %vm644_vm0, %v14597_v32 }
  0xe1   : > { %17081 = vmatmul.mubr.msk.f32.gmra.mxu0 %vm644_vm0, %v19148_v39  ;;  %17308 = vmatprep.subr.mxu0 %v19713_v47  ;;  %v14602_v39 = vld [vmem:[%s18985_s28 + $0x81] sm:$0xff] }
  0xe2   : > { %17083 = vmatprep.mubr.msk.f32.mxu0 %vm644_vm0, %v19155_v41  ;;  %v14603_v41 = vld [vmem:[%s18985_s28 + $0x91] sm:$0xff] }
  0xe3   : > { %17264 = vmatmul.mubr.msk.f32.gmra.mxu1 %vm644_vm0, %v14598_v35  ;;  %v14620_v35 = vld [vmem:[%s18985_s28 + $0x159] sm:$0xff] }
  0xe4   : > { %17266 = vmatprep.mubr.msk.f32.mxu1 %vm644_vm0, %v14599_v37 }
  0xe5   : > { %17084 = vmatmul.mubr.msk.f32.gmra.mxu0 %vm644_vm0, %v19174_v44  ;;  %v14604_v44 = vld [vmem:[%s18985_s28 + $0x99] sm:$0xff] }
  0xe6   : > { %17086 = vmatprep.mubr.msk.f32.mxu0 %vm644_vm0, %v19181_v46  ;;  %v14605_v46 = vld [vmem:[%s18985_s28 + $0xa9] sm:$0xff] }
  0xe7   : > { %17267 = vmatmul.mubr.msk.f32.gmra.mxu1 %vm644_vm0, %v14600_v48 }
  0xe8   : > { %17269 = vmatprep.mubr.msk.f32.mxu1 %vm644_vm0, %v14601_v1 }
  0xe9   : > { %17087 = vmatmul.mubr.msk.f32.gmra.mxu0 %vm644_vm0, %v19205_v50  ;;  %v14606_v50 = vld [vmem:[%s18985_s28 + $0xb1] sm:$0xff] }
  0xea   : > { %17089 = vmatprep.mubr.msk.f32.mxu0 %vm644_vm0, %v19212_v52  ;;  %v14607_v52 = vld [vmem:[%s18985_s28 + $0xc1] sm:$0xff] }
  0xeb   : > { %17270 = vmatmul.mubr.msk.f32.gmra.mxu1 %vm644_vm0, %v14602_v39 }
  0xec   : > { %17272 = vmatprep.mubr.msk.f32.mxu1 %vm644_vm0, %v14603_v41  ;;  %v14705_v41 = vld [vmem:[%s25934_s1 + $0x230] sm:$0xff] }
  0xed   : > { %17090 = vmatmul.mubr.msk.f32.gmra.mxu0 %vm644_vm0, %v19229_v55  ;;  %v14608_v55 = vld [vmem:[%s18985_s28 + $0xc9] sm:$0xff] }
  0xee   : > { %17092 = vmatprep.mubr.msk.f32.mxu0 %vm644_vm0, %v19235_v57 }
  0xef   : > { %17273 = vmatmul.mubr.msk.f32.gmra.mxu1 %vm644_vm0, %v14604_v44  ;;  %v14622_v44 = vld [vmem:[%s18985_s28 + $0x171] sm:$0xff] }
  0xf0   : > { %17275 = vmatprep.mubr.msk.f32.mxu1 %vm644_vm0, %v14605_v46 }
  0xf1   : > { %17093 = vmatmul.mubr.msk.f32.gmra.mxu0 %vm644_vm0, %v19252_v60 }
  0xf2   : > { %17095 = vmatprep.mubr.msk.f32.mxu0 %vm644_vm0, %v19255_v61 }
  0xf3   : > { %17276 = vmatmul.mubr.msk.f32.gmra.mxu1 %vm644_vm0, %v14606_v50 }
  0xf4   : > { %17278 = vmatprep.mubr.msk.f32.mxu1 %vm644_vm0, %v14607_v52  ;;  %v14704_v52 = vld [vmem:[%s25934_s1 + $0x228] sm:$0xff] }
  0xf5   : > { %v19759_v57 = vpop.f32.mrf.mxu0  ;;  %17096 = vmatmul.mubr.msk.f32.gmra.mxu0 %vm644_vm0, %v19270_v0  ;;  %v14611_v0 = vld [vmem:[%s18985_s28 + $0xf1] sm:$0xff] }
  0xf6   : > { %17098 = vmatprep.mubr.msk.f32.mxu0 %vm644_vm0, %v19276_v2 }
  0xf7   : > { %v19766_v60 = vpop.f32.mrf.mxu0  ;;  %17279 = vmatmul.mubr.msk.f32.gmra.mxu1 %vm644_vm0, %v14608_v55 }
  0xf8   : > { %v19769_v61 = vpop.f32.mrf.mxu1  ;;  %17281 = vmatprep.mubr.msk.f32.mxu1 %vm644_vm0, %v14609_v54 }
  0xf9   : > { %v19773_v56 = vpop.f32.mrf.mxu0  ;;  %17099 = vmatmul.mubr.msk.f32.gmra.mxu0 %vm644_vm0, %v19291_v5  ;;  %v14613_v5 = vld [vmem:[%s18985_s28 + $0x109] sm:$0xff] }
  0xfa   : > { %17101 = vmatprep.mubr.msk.f32.mxu0 %vm644_vm0, %v19302_v8  ;;  %v19780_v2 = vpop.f32.mrf.mxu1 }
  0xfb   : > { %v19782_v14 = vpop.f32.mrf.mxu0  ;;  %17282 = vmatmul.mubr.msk.f32.gmra.mxu1 %vm644_vm0, %v14610_v4 }
  0xfc   : > { %v19785_v59 = vpop.f32.mrf.mxu1  ;;  %17284 = vmatprep.mubr.msk.f32.mxu1 %vm644_vm0, %v14611_v0 }
  0xfd   : > { %v19789_v24 = vpop.f32.mrf.mxu0  ;;  %17102 = vmatmul.mubr.msk.f32.gmra.mxu0 %vm644_vm0, %v19317_v11  ;;  %v14615_v11 = vld [vmem:[%s18985_s28 + $0x121] sm:$0xff] }
  0xfe   : > { %17104 = vmatprep.mubr.msk.f32.mxu0 %vm644_vm0, %v19325_v13  ;;  %v19796_v8 = vpop.f32.mrf.mxu1 }
  0xff   : > { %v19798_v19 = vpop.f32.mrf.mxu0  ;;  %17285 = vmatmul.mubr.msk.f32.gmra.mxu1 %vm644_vm0, %v14612_v63 }
 0x100   : > { %v19801_v22 = vpop.f32.mrf.mxu1  ;;  %17287 = vmatprep.mubr.msk.f32.mxu1 %vm644_vm0, %v14613_v5 }
 0x101   : > { %v19805_v27 = vpop.f32.mrf.mxu0  ;;  %17105 = vmatmul.mubr.msk.f32.gmra.mxu0 %vm644_vm0, %v19340_v16  ;;  %v14617_v16 = vld [vmem:[%s18985_s28 + $0x139] sm:$0xff] }
 0x102   : > { %17107 = vmatprep.mubr.msk.f32.mxu0 %vm644_vm0, %v19351_v33  ;;  %v19812_v13 = vpop.f32.mrf.mxu1  ;;  %v25937_v33 = vld [vmem:[#allocation7_spill] sm:$0xff] }
 0x103   : > { %v19814_v29 = vpop.f32.mrf.mxu0  ;;  %17288 = vmatmul.mubr.msk.f32.gmra.mxu1 %vm644_vm0, %v14614_v25 }
 0x104   : > { %v19817_v34 = vpop.f32.mrf.mxu1  ;;  %17290 = vmatprep.mubr.msk.f32.mxu1 %vm644_vm0, %v14615_v11  ;;  %v14700_v11 = vld [vmem:[%s25934_s1 + $0x208] sm:$0xff] }
 0x105   : > { %v19821_v31 = vpop.f32.mrf.mxu0  ;;  %17108 = vmatmul.mubr.msk.f32.gmra.mxu0 %vm644_vm0, %v19366_v53  ;;  %v14619_v53 = vld [vmem:[%s18985_s28 + $0x151] sm:$0xff] }
 0x106   : > { %17110 = vmatprep.mubr.msk.f32.mxu0 %vm644_vm0, %v25937_v33  ;;  %v19828_v38 = vpop.f32.mrf.mxu1 }
 0x107   : > { %v19830_v17 = vpop.f32.mrf.mxu0  ;;  %17291 = vmatmul.mubr.msk.f32.gmra.mxu1 %vm644_vm0, %v14616_v36 }
 0x108   : > { %v19834_v23 = vpop.f32.mrf.mxu1  ;;  %17293 = vmatprep.mubr.msk.f32.mxu1 %vm644_vm0, %v14617_v16 }
 0x109   : > { %v19838_v28 = vpop.f32.mrf.mxu0  ;;  %17111 = vmatmul.mubr.msk.f32.gmra.mxu0 %vm644_vm0, %v19389_v7  ;;  %v14621_v7 = vld [vmem:[%s18985_s28 + $0x169] sm:$0xff] }
 0x10a   : > { %17113 = vmatprep.mubr.msk.f32.mxu0 %vm644_vm0, %v14409_v40  ;;  %v19845_v30 = vpop.f32.mrf.mxu1 }
 0x10b   : > { %v19847_v45 = vpop.f32.mrf.mxu0  ;;  %17294 = vmatmul.mubr.msk.f32.gmra.mxu1 %vm644_vm0, %v14618_v26  ;;  %v14533_v26 = vld [vmem:[%s18985_s28 + $0xa8] sm:$0xff] }
 0x10c   : > { %v19850_v32 = vpop.f32.mrf.mxu1  ;;  %17296 = vmatprep.mubr.msk.f32.mxu1 %vm644_vm0, %v14619_v53 }
 0x10d   : > { %v19854_v37 = vpop.f32.mrf.mxu0  ;;  %17114 = vmatmul.mubr.msk.f32.gmra.mxu0 %vm644_vm0, %v14410_v43 }
 0x10e   : > { %17196 = vmatprep.mubr.msk.f32.mxu0 %vm644_vm0, %v19294_v6  ;;  %v19860_v48 = vpop.f32.mrf.mxu1 }
 0x10f   : > { %v19862_v1 = vpop.f32.mrf.mxu0  ;;  %17297 = vmatmul.mubr.msk.f32.gmra.mxu1 %vm644_vm0, %v14620_v35 }
 0x110   : > { %v19865_v39 = vpop.f32.mrf.mxu1  ;;  %17299 = vmatprep.mubr.msk.f32.mxu1 %vm644_vm0, %v14621_v7  ;;  %v14535_v7 = vld [vmem:[%s18985_s28 + $0xc0] sm:$0xff] }
 0x111   : > { %v16835_v46 = vpop.f32.mrf.mxu0  ;;  %17197 = vmatmul.mubr.msk.f32.vlgmr.msra.gmra.mxu0 %vm644_vm0, %v19309_v9 }
 0x112   : > { %v19875_v6 = vadd.f32 %v19769_v61, %v16835_v46  ;;  %17199 = vmatprep.mubr.msk.f32.mxu0 %vm644_vm0, %v19320_v12  ;;  %v19879_v50 = vpop.f32.mrf.mxu1  ;;  %17309 = vmatpush3.msra.mxu0 %v19713_v47  ;;  %v14703_v12 = vld [vmem:[%s25934_s1 + $0x220] sm:$0xff] }
 0x113   : > { %25938 = vst [vmem:[#allocation7_spill] sm:$0xff] %v19879_v50  ;;  %v877_v55 = vpop.f32.mrf.mxu0  ;;  %17310 = vmatprep.subr.mxu0 %v14705_v41  ;;  %17300 = vmatmul.mubr.msk.f32.gmra.mxu1 %vm644_vm0, %v14622_v44  ;;  %v14625_v61 = vld [vmem:[%s18985_s28 + $0x199] sm:$0xff] }
 0x114   : > { %v19887_v9 = vadd.f32 %v19780_v2, %v877_v55  ;;  %v19889_v54 = vpop.f32.mrf.mxu1  ;;  %17311 = vmatpush3.msra.mxu0 %v14705_v41  ;;  %17302 = vmatprep.mubr.msk.f32.mxu1 %vm644_vm0, %v14409_v40  ;;  %v14702_v2 = vld [vmem:[%s25934_s1 + $0x218] sm:$0xff] }
 0x115   : > { %v16838_v47 = vpop.f32.mrf.mxu0  ;;  %17200 = vmatmul.mubr.msk.f32.gmra.mxu0 %vm644_vm0, %v19335_v15  ;;  %17312 = vmatprep.subr.mxu0 %v14704_v52  ;;  %v14537_v55 = vld [vmem:[%s18985_s28 + $0xd8] sm:$0xff] }
 0x116   : > { %v19899_v4 = vadd.f32 %v19785_v59, %v16838_v47  ;;  %17202 = vmatprep.mubr.msk.f32.mxu0 %vm644_vm0, %v19343_v18  ;;  %v19903_v0 = vpop.f32.mrf.mxu1  ;;  %17313 = vmatpush3.msra.mxu0 %v14704_v52  ;;  %v14701_v59 = vld [vmem:[%s25934_s1 + $0x210] sm:$0xff]  ;;  %v14626_v18 = vld [vmem:[%s18985_s28 + $0x1a1] sm:$0xff] }
 0x117   : > { %25939 = vst [vmem:[#allocation8_spill] sm:$0xff] %v19903_v0  ;;  %v19908_v63 = vpop.f32.mrf.mxu0  ;;  %17314 = vmatprep.subr.mxu0 %v14703_v12  ;;  %17303 = vmatmul.mubr.msk.f32.gmra.mxu1 %vm644_vm0, %v14410_v43 }
 0x118   : > { %v19911_v15 = vpop.f32.mrf.mxu1  ;;  %17315 = vmatpush3.msra.mxu0 %v14703_v12  ;;  %17305 = vmatprep.mubr.msk.f32.mxu1 %vm644_vm0, %v14625_v61 }
 0x119   : > { %v16841_v5 = vpop.f32.mrf.mxu0  ;;  %17203 = vmatmul.mubr.msk.f32.gmra.mxu0 %vm644_vm0, %v19358_v42  ;;  %17316 = vmatprep.subr.mxu0 %v14702_v2  ;;  %v14699_v42 = vld [vmem:[%s25934_s1 + $0x200] sm:$0xff] }
 0x11a   : > { %v19921_v25 = vadd.f32 %v19801_v22, %v16841_v5  ;;  %17205 = vmatprep.mubr.msk.f32.mxu0 %vm644_vm0, %v19369_v58  ;;  %17317 = vmatpush3.msra.mxu0 %v14702_v2  ;;  %v19931_v16 = vpop.f32.mrf.mxu1 }
 0x11b   : > { %v19928_v36 = vpop.f32.mrf.mxu0  ;;  %17318 = vmatprep.subr.mxu0 %v14701_v59  ;;  %17306 = vmatmul.mubr.msk.f32.gmra.mxu1 %vm644_vm0, %v14626_v18  ;;  %25940 = vst [vmem:[#allocation9_spill] sm:$0xff] %v19931_v16  ;;  %v14539_v18 = vld [vmem:[%s18985_s28 + $0xf0] sm:$0xff] }
 0x11c   : > { %17319 = vmatpush3.msra.mxu0 %v14701_v59 }
 0x11d   : > { %v16844_v22 = vpop.f32.mrf.mxu0  ;;  %17206 = vmatmul.mubr.msk.f32.gmra.mxu0 %vm644_vm0, %v19384_v3  ;;  %17320 = vmatprep.subr.mxu0 %v14700_v11 }
 0x11e   : > { %v19939_v58 = vadd.f32 %v19817_v34, %v16844_v22  ;;  %17208 = vmatprep.mubr.msk.f32.mxu0 %vm644_vm0, %v19392_v10  ;;  %17321 = vmatpush3.msra.mxu0 %v14700_v11  ;;  %v19943_v33 = vpop.f32.mrf.mxu1  ;;  %v14534_v10 = vld [vmem:[%s18985_s28 + $0xb0] sm:$0xff] }
 0x11f   : > { %v19945_v40 = vpop.f32.mrf.mxu0  ;;  %17322 = vmatprep.subr.mxu0 %v14699_v42 }
 0x120   : > { %17323 = vmatpush3.msra.mxu0 %v14699_v42  ;;  %v19948_v53 = vpop.f32.mrf.mxu1 }
 0x121   : > { %v16847_v3 = vpop.f32.mrf.mxu0  ;;  %17209 = vmatmul.mubr.msk.f32.gmra.mxu0 %vm644_vm0, %v19405_v49 }
 0x122   : > { %v19953_v34 = vadd.f32 %v19834_v23, %v16847_v3  ;;  %17211 = vmatprep.mubr.msk.f32.mxu0 %vm644_vm0, %v14533_v26  ;;  %v19957_v43 = vpop.f32.mrf.mxu1  ;;  %v14536_v23 = vld [vmem:[%s18985_s28 + $0xc8] sm:$0xff] }
 0x123   : > { %v19959_v35 = vpop.f32.mrf.mxu0  ;;  %v14541_v3 = vld [vmem:[%s18985_s28 + $0x108] sm:$0xff] }
 0x124   : > { %v19962_v41 = vpop.f32.mrf.mxu1 }
 0x125   : > { %25941 = vst [vmem:[#allocation10_spill] sm:$0xff] %v19962_v41  ;;  %v16850_v44 = vpop.f32.mrf.mxu0  ;;  %17212 = vmatmul.mubr.msk.f32.gmra.mxu0 %vm644_vm0, %v14534_v10 }
 0x126   : > { %v19966_v49 = vadd.f32 %v19850_v32, %v16850_v44  ;;  %17214 = vmatprep.mubr.msk.f32.mxu0 %vm644_vm0, %v14535_v7  ;;  %v19970_v46 = vpop.f32.mrf.mxu1  ;;  %v14538_v32 = vld [vmem:[%s18985_s28 + $0xe0] sm:$0xff] }
 0x127   : > { %v19972_v52 = vpop.f32.mrf.mxu0 }
 0x128   : > { %v19975_v12 = vpop.f32.mrf.mxu1 }
 0x129   : > { %25942 = vst [vmem:[#allocation11_spill] sm:$0xff] %v19975_v12  ;;  %v16853_v47 = vpop.f32.mrf.mxu0  ;;  %17215 = vmatmul.mubr.msk.f32.gmra.mxu0 %vm644_vm0, %v14536_v23 }
 0x12a   : > { %v19979_v61 = vadd.f32 %v19865_v39, %v16853_v47  ;;  %17217 = vmatprep.mubr.msk.f32.mxu0 %vm644_vm0, %v14537_v55  ;;  %v19983_v2 = vpop.f32.mrf.mxu1  ;;  %v14540_v39 = vld [vmem:[%s18985_s28 + $0xf8] sm:$0xff]  ;;  %v14543_v47 = vld [vmem:[%s18985_s28 + $0x120] sm:$0xff] }
 0x12b   : > { %v19985_v59 = vpop.f32.mrf.mxu0 }
 0x12c   : > { %v19988_v5 = vpop.f32.mrf.mxu1 }
 0x12d   : > { %25943 = vst [vmem:[#allocation12_spill] sm:$0xff] %v19988_v5  ;;  %v16856_v11 = vpop.f32.mrf.mxu0  ;;  %17218 = vmatmul.mubr.msk.f32.gmra.mxu0 %vm644_vm0, %v14538_v32 }
 0x12e   : > { %v19992_v42 = vadd.f32 %v19889_v54, %v16856_v11  ;;  %17220 = vmatprep.mubr.msk.f32.mxu0 %vm644_vm0, %v14539_v18  ;;  %v19996_v22 = vpop.f32.mrf.mxu1  ;;  %v14542_v54 = vld [vmem:[%s18985_s28 + $0x110] sm:$0xff] }
 0x12f   : > { %v19998_v26 = vpop.f32.mrf.mxu0 }
 0x130   : > { %25944 = vst [vmem:[#allocation13_spill] sm:$0xff] %v19998_v26  ;;  %v20001_v10 = vpop.f32.mrf.mxu1 }
 0x131   : > { %25945 = vst [vmem:[#allocation14_spill] sm:$0xff] %v20001_v10  ;;  %v16859_v7 = vpop.f32.mrf.mxu0  ;;  %17221 = vmatmul.mubr.msk.f32.gmra.mxu0 %vm644_vm0, %v14540_v39 }
 0x132   : > { %v20005_v44 = vadd.f32 %v19911_v15, %v16859_v7  ;;  %17223 = vmatprep.mubr.msk.f32.mxu0 %vm644_vm0, %v14541_v3  ;;  %v20009_v23 = vpop.f32.mrf.mxu1  ;;  %v14544_v15 = vld [vmem:[%s18985_s28 + $0x128] sm:$0xff]  ;;  %v14545_v3 = vld [vmem:[%s18985_s28 + $0x138] sm:$0xff] }
 0x133   : > { %v20011_v55 = vpop.f32.mrf.mxu0 }
 0x134   : > { %25946 = vst [vmem:[#allocation15_spill] sm:$0xff] %v20011_v55  ;;  %v20014_v32 = vpop.f32.mrf.mxu1 }
 0x135   : > { %25947 = vst [vmem:[#allocation16_spill] sm:$0xff] %v20014_v32  ;;  %v16878_v18 = vpop.f32.mrf.mxu0  ;;  %17224 = vmatmul.mubr.msk.f32.gmra.mxu0 %vm644_vm0, %v14542_v54  ;;  %v14546_v54 = vld [vmem:[%s18985_s28 + $0x140] sm:$0xff] }
 0x136   : > { %v20018_v11 = vadd.f32 %v16878_v18, %v19759_v57  ;;  %17226 = vmatprep.mubr.msk.f32.mxu0 %vm644_vm0, %v14543_v47  ;;  %v14547_v18 = vld [vmem:[%s18985_s28 + $0x150] sm:$0xff] }
 0x137   : > { %v1128_v39 = vpop.f32.mrf.mxu0  ;;  %v20023_v7 = vpop.f32.mrf.mxu1 }
 0x138   : > { %v20026_v10 = vadd.f32 %v1128_v39, %v19766_v60 }
 0x139   : > { %v16881_v5 = vpop.f32.mrf.mxu0  ;;  %17227 = vmatmul.mubr.msk.f32.gmra.mxu0 %vm644_vm0, %v14544_v15  ;;  %v20029_v32 = vpop.f32.mrf.mxu1 }
 0x13a   : > { %25948 = vst [vmem:[#allocation17_spill] sm:$0xff] %v20029_v32  ;;  %v20032_v57 = vadd.f32 %v16881_v5, %v19773_v56  ;;  %17229 = vmatprep.mubr.msk.f32.mxu0 %vm644_vm0, %v14545_v3  ;;  %v14548_v56 = vld [vmem:[%s18985_s28 + $0x158] sm:$0xff]  ;;  %v14549_v3 = vld [vmem:[%s18985_s28 + $0x168] sm:$0xff] }
 0x13b   : > { %v1138_v47 = vpop.f32.mrf.mxu0  ;;  %v20037_v12 = vpop.f32.mrf.mxu1 }
 0x13c   : > { %v20040_v60 = vadd.f32 %v1138_v47, %v19782_v14 }
 0x13d   : > { %v16884_v39 = vpop.f32.mrf.mxu0  ;;  %17230 = vmatmul.mubr.msk.f32.gmra.mxu0 %vm644_vm0, %v14546_v54  ;;  %v20043_v15 = vpop.f32.mrf.mxu1 }
 0x13e   : > { %25949 = vst [vmem:[#allocation18_spill] sm:$0xff] %v20043_v15  ;;  %v20046_v32 = vadd.f32 %v16884_v39, %v19789_v24  ;;  %17232 = vmatprep.mubr.msk.f32.mxu0 %vm644_vm0, %v14547_v18  ;;  %v14550_v24 = vld [vmem:[%s18985_s28 + $0x170] sm:$0xff] }
 0x13f   : > { %v1148_v5 = vpop.f32.mrf.mxu0  ;;  %v20051_v41 = vpop.f32.mrf.mxu1 }
 0x140   : > { %v20054_v16 = vadd.f32 %v1148_v5, %v19798_v19 }
 0x141   : > { %v16887_v14 = vpop.f32.mrf.mxu0  ;;  %17233 = vmatmul.mubr.msk.f32.gmra.mxu0 %vm644_vm0, %v14548_v56  ;;  %v20057_v54 = vpop.f32.mrf.mxu1 }
 0x142   : > { %25950 = vst [vmem:[#allocation19_spill] sm:$0xff] %v20057_v54  ;;  %v20060_v47 = vadd.f32 %v16887_v14, %v19805_v27  ;;  %17235 = vmatprep.mubr.msk.f32.mxu0 %vm644_vm0, %v14549_v3  ;;  %v14553_v3 = vld [vmem:[%s18985_s28 + $0x198] sm:$0xff] }
 0x143   : > { %v1158_v18 = vpop.f32.mrf.mxu0  ;;  %v20064_v39 = vpop.f32.mrf.mxu1 }
 0x144   : > { %v20067_v15 = vadd.f32 %v1158_v18, %v19814_v29 }
 0x145   : > { %v16890_v19 = vpop.f32.mrf.mxu0  ;;  %17236 = vmatmul.mubr.msk.f32.gmra.mxu0 %vm644_vm0, %v14550_v24  ;;  %v20070_v56 = vpop.f32.mrf.mxu1 }
 0x146   : > { %25951 = vst [vmem:[#allocation20_spill] sm:$0xff] %v20070_v56  ;;  %v20073_v5 = vadd.f32 %v16890_v19, %v19821_v31  ;;  %17238 = vmatprep.mubr.msk.f32.mxu0 %vm644_vm0, %v19520_v51  ;;  %v14554_v51 = vld [vmem:[%s18985_s28 + $0x1a0] sm:$0xff]  ;;  %v14667_v19 = vld [vmem:[%s18985_s28 + $0x32] sm:$0xff] }
 0x147   : > { %v1168_v27 = vpop.f32.mrf.mxu0  ;;  %v20078_v14 = vpop.f32.mrf.mxu1 }
 0x148   : > { %v20081_v54 = vadd.f32 %v1168_v27, %v19830_v17 }
 0x149   : > { %v16893_v29 = vpop.f32.mrf.mxu0  ;;  %17239 = vmatmul.mubr.msk.f32.gmra.mxu0 %vm644_vm0, %v19536_v62  ;;  %v20085_v24 = vpop.f32.mrf.mxu1 }
 0x14a   : > { %25952 = vst [vmem:[#allocation21_spill] sm:$0xff] %v20085_v24  ;;  %v20088_v31 = vadd.f32 %v16893_v29, %v19838_v28  ;;  %17241 = vmatprep.mubr.msk.f32.mxu0 %vm644_vm0, %v14553_v3  ;;  %v14668_v3 = vld [vmem:[%s18985_s28 + $0x3a] sm:$0xff]  ;;  %v14669_v24 = vld [vmem:[%s18985_s28 + $0x4a] sm:$0xff] }
 0x14b   : > { %v1178_v18 = vpop.f32.mrf.mxu0  ;;  %v20093_v56 = vpop.f32.mrf.mxu1 }
 0x14c   : > { %v20096_v17 = vadd.f32 %v1178_v18, %v19847_v45 }
 0x14d   : > { %v16896_v27 = vpop.f32.mrf.mxu0  ;;  %17242 = vmatmul.mubr.msk.f32.gmra.mxu0 %vm644_vm0, %v14554_v51  ;;  %v20099_v62 = vpop.f32.mrf.mxu1 }
 0x14e   : > { %25953 = vst [vmem:[#allocation22_spill] sm:$0xff] %v20099_v62  ;;  %v20102_v28 = vadd.f32 %v16896_v27, %v19854_v37  ;;  %17324 = vmatprep.mubr.msk.f32.mxu0 %vm644_vm0, %v14667_v19  ;;  %v14670_v19 = vld [vmem:[%s18985_s28 + $0x52] sm:$0xff]  ;;  %v14671_v62 = vld [vmem:[%s18985_s28 + $0x62] sm:$0xff] }
 0x14f   : > { %v1188_v29 = vpop.f32.mrf.mxu0  ;;  %v20107_v55 = vpop.f32.mrf.mxu1 }
 0x150   : > { %v20110_v45 = vadd.f32 %v1188_v29, %v19862_v1 }
 0x151   : > { %v16942_v18 = vpop.f32.mrf.mxu0  ;;  %17325 = vmatmul.mubr.msk.f32.vlgmr.msra.gmra.mxu0 %vm644_vm0, %v14668_v3  ;;  %v20113_v51 = vpop.f32.mrf.mxu1 }
 0x152   : > { %25954 = vst [vmem:[#allocation23_spill] sm:$0xff] %v20113_v51  ;;  %v1650_v37 = vadd.f32 %v16942_v18, %v20018_v11  ;;  %17327 = vmatprep.mubr.msk.f32.mxu0 %vm644_vm0, %v14669_v24  ;;  %v14672_v24 = vld [vmem:[%s18985_s28 + $0x6a] sm:$0xff]  ;;  %v14673_v51 = vld [vmem:[%s18985_s28 + $0x7a] sm:$0xff] }
 0x153   : > { %v1490_v27 = vpop.f32.mrf.mxu0  ;;  %v20119_v0 = vpop.f32.mrf.mxu1 }
 0x154   : > { %v20122_v26 = vadd.f32 %v1490_v27, %v20026_v10  ;;  %v20125_v1 = vadd.f32 %v19943_v33, %v1650_v37 }
 0x155   : > { %v16945_v29 = vpop.f32.mrf.mxu0  ;;  %17328 = vmatmul.mubr.msk.f32.gmra.mxu0 %vm644_vm0, %v14670_v19  ;;  %v20128_v3 = vpop.f32.mrf.mxu1 }
 0x156   : > { %25955 = vst [vmem:[#allocation24_spill] sm:$0xff] %v20128_v3  ;;  %v1652_v11 = vadd.f32 %v16945_v29, %v20032_v57  ;;  %17330 = vmatprep.mubr.msk.f32.mxu0 %vm644_vm0, %v14671_v62  ;;  %v14674_v62 = vld [vmem:[%s18985_s28 + $0x82] sm:$0xff]  ;;  %v14675_v29 = vld [vmem:[%s18985_s28 + $0x92] sm:$0xff] }
 0x157   : > { %v1500_v18 = vpop.f32.mrf.mxu0  ;;  %v20134_v50 = vpop.f32.mrf.mxu1 }
 0x158   : > { %v20137_v10 = vadd.f32 %v1500_v18, %v20040_v60  ;;  %v20140_v33 = vadd.f32 %v19957_v43, %v1652_v11 }
 0x159   : > { %v16948_v37 = vpop.f32.mrf.mxu0  ;;  %17331 = vmatmul.mubr.msk.f32.gmra.mxu0 %vm644_vm0, %v14672_v24  ;;  %v20143_v19 = vpop.f32.mrf.mxu1 }
 0x15a   : > { %25956 = vst [vmem:[#allocation25_spill] sm:$0xff] %v20143_v19  ;;  %v1654_v57 = vadd.f32 %v16948_v37, %v20046_v32  ;;  %17333 = vmatprep.mubr.msk.f32.mxu0 %vm644_vm0, %v14673_v51  ;;  %v14676_v51 = vld [vmem:[%s18985_s28 + $0x9a] sm:$0xff]  ;;  %v14677_v37 = vld [vmem:[%s18985_s28 + $0xaa] sm:$0xff] }
 0x15b   : > { %v1510_v27 = vpop.f32.mrf.mxu0  ;;  %v20149_v3 = vpop.f32.mrf.mxu1 }
 0x15c   : > { %v20152_v60 = vadd.f32 %v1510_v27, %v20054_v16  ;;  %v20155_v43 = vadd.f32 %v19970_v46, %v1654_v57  ;;  %v14678_v27 = vld [vmem:[%s18985_s28 + $0xb2] sm:$0xff] }
 0x15d   : > { %v16951_v11 = vpop.f32.mrf.mxu0  ;;  %17334 = vmatmul.mubr.msk.f32.gmra.mxu0 %vm644_vm0, %v14674_v62  ;;  %v20158_v24 = vpop.f32.mrf.mxu1 }
 0x15e   : > { %25957 = vst [vmem:[#allocation26_spill] sm:$0xff] %v20158_v24  ;;  %v1656_v32 = vadd.f32 %v16951_v11, %v20060_v47  ;;  %17336 = vmatprep.mubr.msk.f32.mxu0 %vm644_vm0, %v14675_v29  ;;  %v14679_v11 = vld [vmem:[%s18985_s28 + $0xc2] sm:$0xff] }
 0x15f   : > { %v1520_v18 = vpop.f32.mrf.mxu0  ;;  %v20164_v19 = vpop.f32.mrf.mxu1 }
 0x160   : > { %v20167_v16 = vadd.f32 %v1520_v18, %v20067_v15  ;;  %v20170_v46 = vadd.f32 %v19983_v2, %v1656_v32  ;;  %v14680_v18 = vld [vmem:[%s18985_s28 + $0xca] sm:$0xff] }
 0x161   : > { %v16954_v57 = vpop.f32.mrf.mxu0  ;;  %17337 = vmatmul.mubr.msk.f32.gmra.mxu0 %vm644_vm0, %v14676_v51  ;;  %v20173_v62 = vpop.f32.mrf.mxu1 }
 0x162   : > { %v1658_v47 = vadd.f32 %v16954_v57, %v20073_v5  ;;  %17339 = vmatprep.mubr.msk.f32.mxu0 %vm644_vm0, %v14677_v37  ;;  %v14681_v57 = vld [vmem:[%s18985_s28 + $0xda] sm:$0xff] }
 0x163   : > { %v1530_v29 = vpop.f32.mrf.mxu0  ;;  %v20179_v24 = vpop.f32.mrf.mxu1 }
 0x164   : > { %25958 = vst [vmem:[#allocation27_spill] sm:$0xff] %v20179_v24  ;;  %v20182_v15 = vadd.f32 %v1530_v29, %v20081_v54  ;;  %v20185_v2 = vadd.f32 %v19996_v22, %v1658_v47  ;;  %v14682_v29 = vld [vmem:[%s18985_s28 + $0xe2] sm:$0xff] }
 0x165   : > { %v16957_v32 = vpop.f32.mrf.mxu0  ;;  %17340 = vmatmul.mubr.msk.f32.gmra.mxu0 %vm644_vm0, %v14678_v27  ;;  %v20188_v51 = vpop.f32.mrf.mxu1 }
 0x166   : > { %v1660_v5 = vadd.f32 %v16957_v32, %v20088_v31  ;;  %17342 = vmatprep.mubr.msk.f32.mxu0 %vm644_vm0, %v14679_v11  ;;  %v14683_v32 = vld [vmem:[%s18985_s28 + $0xf2] sm:$0xff] }
 0x167   : > { %v1540_v37 = vpop.f32.mrf.mxu0  ;;  %v20194_v24 = vpop.f32.mrf.mxu1 }
 0x168   : > { %25959 = vst [vmem:[#allocation28_spill] sm:$0xff] %v20194_v24  ;;  %v20197_v54 = vadd.f32 %v1540_v37, %v20096_v17  ;;  %v20200_v22 = vadd.f32 %v20009_v23, %v1660_v5  ;;  %v14684_v37 = vld [vmem:[%s18985_s28 + $0xfa] sm:$0xff] }
 0x169   : > { %v16960_v47 = vpop.f32.mrf.mxu0  ;;  %17343 = vmatmul.mubr.msk.f32.gmra.mxu0 %vm644_vm0, %v14680_v18  ;;  %v20203_v27 = vpop.f32.mrf.mxu1 }
 0x16a   : > { %v1662_v31 = vadd.f32 %v16960_v47, %v20102_v28  ;;  %17345 = vmatprep.mubr.msk.f32.mxu0 %vm644_vm0, %v14681_v57  ;;  %v14685_v47 = vld [vmem:[%s18985_s28 + $0x10a] sm:$0xff] }
 0x16b   : > { %v1550_v11 = vpop.f32.mrf.mxu0  ;;  %v20209_v24 = vpop.f32.mrf.mxu1 }
 0x16c   : > { %25960 = vst [vmem:[#allocation29_spill] sm:$0xff] %v20209_v24  ;;  %v20212_v17 = vadd.f32 %v1550_v11, %v20110_v45  ;;  %v20215_v23 = vadd.f32 %v20023_v7, %v1662_v31 }
 0x16d   : > { %v16963_v5 = vpop.f32.mrf.mxu0  ;;  %17346 = vmatmul.mubr.msk.f32.gmra.mxu0 %vm644_vm0, %v14682_v29  ;;  %v20218_v18 = vpop.f32.mrf.mxu1  ;;  %v14686_v29 = vld [vmem:[%s18985_s28 + $0x112] sm:$0xff] }
 0x16e   : > { %v1664_v28 = vadd.f32 %v16963_v5, %v19875_v6  ;;  %17348 = vmatprep.mubr.msk.f32.mxu0 %vm644_vm0, %v14683_v32  ;;  %v14687_v32 = vld [vmem:[%s18985_s28 + $0x122] sm:$0xff] }
 0x16f   : > { %v1560_v57 = vpop.f32.mrf.mxu0  ;;  %v20224_v24 = vpop.f32.mrf.mxu1 }
 0x170   : > { %25961 = vst [vmem:[#allocation30_spill] sm:$0xff] %v20224_v24  ;;  %v20227_v7 = vadd.f32 %v1560_v57, %v19887_v9  ;;  %v20230_v45 = vadd.f32 %v20037_v12, %v1664_v28  ;;  %v14689_v57 = vld [vmem:[%s18985_s28 + $0x13a] sm:$0xff] }
 0x171   : > { %v16966_v31 = vpop.f32.mrf.mxu0  ;;  %17349 = vmatmul.mubr.msk.f32.gmra.mxu0 %vm644_vm0, %v14684_v37  ;;  %v20239_v5 = vpop.f32.mrf.mxu1 }
 0x172   : > { %v1666_v6 = vadd.f32 %v16966_v31, %v19899_v4  ;;  %17351 = vmatprep.mubr.msk.f32.mxu0 %vm644_vm0, %v14685_v47  ;;  %25962 = vst [vmem:[#allocation31_spill] sm:$0xff] %v20239_v5  ;;  %v14688_v4 = vld [vmem:[%s18985_s28 + $0x12a] sm:$0xff] }
 0x173   : > { %v20236_v11 = vpop.f32.mrf.mxu0  ;;  %v20251_v47 = vpop.f32.mrf.mxu1 }
 0x174   : > { %v20242_v9 = vadd.f32 %v20051_v41, %v1666_v6  ;;  %25963 = vst [vmem:[#allocation32_spill] sm:$0xff] %v20251_v47 }
 0x175   : > { %v16969_v12 = vpop.f32.mrf.mxu0  ;;  %17352 = vmatmul.mubr.msk.f32.gmra.mxu0 %vm644_vm0, %v14686_v29 }
 0x176   : > { %v1668_v28 = vadd.f32 %v16969_v12, %v19921_v25  ;;  %17354 = vmatprep.mubr.msk.f32.mxu0 %vm644_vm0, %v14687_v32  ;;  %v14690_v25 = vld [vmem:[%s18985_s28 + $0x142] sm:$0xff]  ;;  %v14691_v32 = vld [vmem:[%s18985_s28 + $0x152] sm:$0xff]  ;;  %v20263_v12 = vpop.f32.mrf.mxu1 }
 0x177   : > { %v20248_v37 = vpop.f32.mrf.mxu0  ;;  %25964 = vst [vmem:[#allocation33_spill] sm:$0xff] %v20263_v12 }
 0x178   : > { %v20254_v31 = vadd.f32 %v20064_v39, %v1668_v28 }
 0x179   : > { %v16972_v41 = vpop.f32.mrf.mxu0  ;;  %17355 = vmatmul.mubr.msk.f32.gmra.mxu0 %vm644_vm0, %v14688_v4 }
 0x17a   : > { %v1670_v6 = vadd.f32 %v16972_v41, %v19939_v58  ;;  %17357 = vmatprep.mubr.msk.f32.mxu0 %vm644_vm0, %v14689_v57  ;;  %v14692_v58 = vld [vmem:[%s18985_s28 + $0x15a] sm:$0xff]  ;;  %v14693_v57 = vld [vmem:[%s18985_s28 + $0x16a] sm:$0xff]  ;;  %v20275_v41 = vpop.f32.mrf.mxu1 }
 0x17b   : > { %v20260_v29 = vpop.f32.mrf.mxu0  ;;  %25965 = vst [vmem:[#allocation34_spill] sm:$0xff] %v20275_v41 }
 0x17c   : > { %v20266_v47 = vadd.f32 %v20078_v14, %v1670_v6 }
 0x17d   : > { %v16975_v39 = vpop.f32.mrf.mxu0  ;;  %17358 = vmatmul.mubr.msk.f32.gmra.mxu0 %vm644_vm0, %v14690_v25  ;;  %v20286_v25 = vpop.f32.mrf.mxu1 }
 0x17e   : > { %v1672_v28 = vadd.f32 %v16975_v39, %v19953_v34  ;;  %17360 = vmatprep.mubr.msk.f32.mxu0 %vm644_vm0, %v14691_v32  ;;  %v14694_v34 = vld [vmem:[%s18985_s28 + $0x172] sm:$0xff]  ;;  %25966 = vst [vmem:[#allocation35_spill] sm:$0xff] %v20286_v25 }
 0x17f   : > { %v20272_v4 = vpop.f32.mrf.mxu0 }
 0x180   : > { %v20278_v5 = vadd.f32 %v20093_v56, %v1672_v28  ;;  %v20298_v28 = vpop.f32.mrf.mxu1 }
 0x181   : > { %v16978_v12 = vpop.f32.mrf.mxu0  ;;  %17361 = vmatmul.mubr.msk.f32.gmra.mxu0 %vm644_vm0, %v14692_v58  ;;  %25967 = vst [vmem:[#allocation36_spill] sm:$0xff] %v20298_v28 }
 0x182   : > { %v1674_v14 = vadd.f32 %v16978_v12, %v19966_v49  ;;  %17363 = vmatprep.mubr.msk.f32.mxu0 %vm644_vm0, %v14693_v57  ;;  %v14697_v12 = vld [vmem:[%s18985_s28 + $0x19a] sm:$0xff] }
 0x183   : > { %v20284_v6 = vpop.f32.mrf.mxu0 }
 0x184   : > { %v20289_v32 = vadd.f32 %v20107_v55, %v1674_v14 }
 0x185   : > { %v16981_v39 = vpop.f32.mrf.mxu0  ;;  %17364 = vmatmul.mubr.msk.f32.gmra.mxu0 %vm644_vm0, %v14694_v34 }
 0x186   : > { %v1676_v56 = vadd.f32 %v16981_v39, %v19979_v61  ;;  %17366 = vmatprep.mubr.msk.f32.mxu0 %vm644_vm0, %v19674_v21  ;;  %v14698_v61 = vld [vmem:[%s18985_s28 + $0x1a2] sm:$0xff]  ;;  %v20310_v21 = vpop.f32.mrf.mxu1 }
 0x187   : > { %v20295_v49 = vpop.f32.mrf.mxu0  ;;  %25968 = vst [vmem:[#allocation37_spill] sm:$0xff] %v20310_v21 }
 0x188   : > { %v20301_v58 = vadd.f32 %v20119_v0, %v1676_v56 }
 0x189   : > { %v16984_v57 = vpop.f32.mrf.mxu0  ;;  %17367 = vmatmul.mubr.msk.f32.gmra.mxu0 %vm644_vm0, %v19688_v20  ;;  %v20319_v20 = vpop.f32.mrf.mxu1 }
 0x18a   : > { %v1678_v55 = vadd.f32 %v16984_v57, %v19992_v42  ;;  %17369 = vmatprep.mubr.msk.f32.mxu0 %vm644_vm0, %v14697_v12  ;;  %25969 = vst [vmem:[#allocation38_spill] sm:$0xff] %v20319_v20 }
 0x18b   : > { %v20308_v14 = vpop.f32.mrf.mxu0 }
 0x18c   : > { %v20313_v34 = vadd.f32 %v20134_v50, %v1678_v55  ;;  %v20329_v50 = vpop.f32.mrf.mxu1 }
 0x18d   : > { %v16987_v39 = vpop.f32.mrf.mxu0  ;;  %17370 = vmatmul.mubr.msk.f32.gmra.mxu0 %vm644_vm0, %v14698_v61  ;;  %25970 = vst [vmem:[#allocation39_spill] sm:$0xff] %v20329_v50 }
 0x18e   : > { %v1680_v0 = vadd.f32 %v16987_v39, %v20005_v44  ;;  %v20336_v39 = vpop.f32.mrf.mxu1 }
 0x18f   : > { %v20317_v56 = vpop.f32.mrf.mxu0  ;;  %25971 = vst [vmem:[#allocation40_spill] sm:$0xff] %v20336_v39 }
 0x190   : > { %v20322_v42 = vadd.f32 %v20149_v3, %v1680_v0  ;;  %v4158_v3 = vld [vmem:[%s25733_s4 + $0x8] sm:$0xff]  ;;  %v20355_v50 = vpop.f32.mrf.mxu1 }
 0x191   : > { %v17070_v12 = vpop.f32.mrf.mxu0  ;;  %17372 = vmatprep.subr.mxu1 %v4158_v3  ;;  %25972 = vst [vmem:[#allocation41_spill] sm:$0xff] %v20355_v50 }
 0x192   : > { %v20325_v57 = vadd.f32 %v17070_v12, %v20125_v1  ;;  %v4489_v1 = vld [vmem:[%s25735_s6 + $0x8] sm:$0xff]  ;;  %17373 = vmatpush3.msra.mxu1 %v4158_v3 }
 0x193   : > { %v20327_v21 = vpop.f32.mrf.mxu0  ;;  %17424 = vmatprep.subr.mxu0 %v4489_v1 }
 0x194   : > { %17425 = vmatpush3.msra.mxu0 %v4489_v1 }
 0x195   : > { %v17073_v55 = vpop.f32.mrf.mxu0 }
 0x196   : > { %v20332_v61 = vadd.f32 %v17073_v55, %v20140_v33  ;;  %v4157_v33 = vld [vmem:[%s25733_s4] sm:$0xff] }
 0x197   : > { %v20334_v44 = vpop.f32.mrf.mxu0  ;;  %v4488_v55 = vld [vmem:[%s25735_s6] sm:$0xff]  ;;  %17374 = vmatprep.subr.mxu1 %v4157_v33 }
 0x198   : > { %17426 = vmatprep.subr.mxu0 %v4488_v55  ;;  %17375 = vmatpush3.msra.mxu1 %v4157_v33 }
 0x199   : > { %v17076_v0 = vpop.f32.mrf.mxu0  ;;  %17427 = vmatpush3.msra.mxu0 %v4488_v55 }
 0x19a   : > { %v20345_v12 = vadd.f32 %v17076_v0, %v20155_v43  ;;  %v20362_v0 = vpop.f32.mrf.mxu1 }
 0x19b   : > { %v20353_v39 = vpop.f32.mrf.mxu0  ;;  %25973 = vst [vmem:[#allocation42_spill] sm:$0xff] %v20362_v0 }
 0x19c   : > { %v20369_v41 = vpop.f32.mrf.mxu1 }
 0x19d   : > { %v17079_v43 = vpop.f32.mrf.mxu0  ;;  %25975 = vst [vmem:[#allocation44_spill] sm:$0xff] %v20369_v41 }
 0x19e   : > { %v20358_v3 = vadd.f32 %v17079_v43, %v20170_v46  ;;  %v20376_v46 = vpop.f32.mrf.mxu1 }
 0x19f   : > { %v20360_v1 = vpop.f32.mrf.mxu0  ;;  %25978 = vst [vmem:[#allocation47_spill] sm:$0xff] %v20376_v46 }
 0x1a1   : > { %v17082_v20 = vpop.f32.mrf.mxu0 }
 0x1a2   : > { %v20365_v28 = vadd.f32 %v17082_v20, %v20185_v2  ;;  %v20383_v2 = vpop.f32.mrf.mxu1 }
 0x1a3   : > { %v20367_v25 = vpop.f32.mrf.mxu0  ;;  %25981 = vst [vmem:[#allocation50_spill] sm:$0xff] %v20383_v2 }
 0x1a4   : > { %25974 = vst [vmem:[#allocation43_spill] sm:$0xff] %v20365_v28 }
 0x1a5   : > { %v17085_v50 = vpop.f32.mrf.mxu0 }
 0x1a6   : > { %v20372_v33 = vadd.f32 %v17085_v50, %v20200_v22  ;;  %v20390_v22 = vpop.f32.mrf.mxu1 }
 0x1a7   : > { %v20374_v55 = vpop.f32.mrf.mxu0  ;;  %25984 = vst [vmem:[#allocation53_spill] sm:$0xff] %v20390_v22 }
 0x1a8   : > { %25976 = vst [vmem:[#allocation45_spill] sm:$0xff] %v20372_v33  ;;  %25977 = vst [vmem:[#allocation46_spill] sm:$0xff] %v20374_v55 }
 0x1a9   : > { %v17088_v43 = vpop.f32.mrf.mxu0 }
 0x1aa   : > { %v20379_v24 = vadd.f32 %v17088_v43, %v20215_v23  ;;  %v20397_v23 = vpop.f32.mrf.mxu1 }
 0x1ab   : > { %v20381_v0 = vpop.f32.mrf.mxu0  ;;  %25987 = vst [vmem:[#allocation56_spill] sm:$0xff] %v20397_v23 }
 0x1ac   : > { %25979 = vst [vmem:[#allocation48_spill] sm:$0xff] %v20379_v24  ;;  %25980 = vst [vmem:[#allocation49_spill] sm:$0xff] %v20381_v0 }
 0x1ad   : > { %v17091_v20 = vpop.f32.mrf.mxu0 }
 0x1ae   : > { %v20386_v28 = vadd.f32 %v17091_v20, %v20230_v45  ;;  %v20404_v45 = vpop.f32.mrf.mxu1 }
 0x1af   : > { %v20388_v41 = vpop.f32.mrf.mxu0  ;;  %25990 = vst [vmem:[#allocation59_spill] sm:$0xff] %v20404_v45 }
 0x1b0   : > { %25982 = vst [vmem:[#allocation51_spill] sm:$0xff] %v20386_v28  ;;  %25983 = vst [vmem:[#allocation52_spill] sm:$0xff] %v20388_v41 }
 0x1b1   : > { %v17094_v50 = vpop.f32.mrf.mxu0 }
 0x1b2   : > { %v20393_v33 = vadd.f32 %v17094_v50, %v20242_v9  ;;  %v20411_v9 = vpop.f32.mrf.mxu1 }
 0x1b3   : > { %v20395_v46 = vpop.f32.mrf.mxu0  ;;  %25993 = vst [vmem:[#allocation62_spill] sm:$0xff] %v20411_v9 }
 0x1b4   : > { %25985 = vst [vmem:[#allocation54_spill] sm:$0xff] %v20393_v33  ;;  %25986 = vst [vmem:[#allocation55_spill] sm:$0xff] %v20395_v46 }
 0x1b5   : > { %v17097_v43 = vpop.f32.mrf.mxu0 }
 0x1b6   : > { %v20400_v24 = vadd.f32 %v17097_v43, %v20254_v31  ;;  %v20418_v31 = vpop.f32.mrf.mxu1 }
 0x1b7   : > { %v20402_v2 = vpop.f32.mrf.mxu0  ;;  %25996 = vst [vmem:[#allocation65_spill] sm:$0xff] %v20418_v31 }
 0x1b8   : > { %25988 = vst [vmem:[#allocation57_spill] sm:$0xff] %v20400_v24  ;;  %25989 = vst [vmem:[#allocation58_spill] sm:$0xff] %v20402_v2 }
 0x1b9   : > { %v17100_v20 = vpop.f32.mrf.mxu0 }
 0x1ba   : > { %v20407_v28 = vadd.f32 %v17100_v20, %v20266_v47  ;;  %v20425_v47 = vpop.f32.mrf.mxu1 }
 0x1bb   : > { %v20409_v22 = vpop.f32.mrf.mxu0  ;;  %25999 = vst [vmem:[#allocation68_spill] sm:$0xff] %v20425_v47 }
 0x1bc   : > { %25991 = vst [vmem:[#allocation60_spill] sm:$0xff] %v20407_v28  ;;  %25992 = vst [vmem:[#allocation61_spill] sm:$0xff] %v20409_v22 }
 0x1bd   : > { %v17103_v50 = vpop.f32.mrf.mxu0 }
 0x1be   : > { %v20414_v33 = vadd.f32 %v17103_v50, %v20278_v5  ;;  %v20432_v5 = vpop.f32.mrf.mxu1 }
 0x1bf   : > { %v20416_v23 = vpop.f32.mrf.mxu0  ;;  %26002 = vst [vmem:[#allocation71_spill] sm:$0xff] %v20432_v5 }
 0x1c0   : > { %25994 = vst [vmem:[#allocation63_spill] sm:$0xff] %v20414_v33  ;;  %25995 = vst [vmem:[#allocation64_spill] sm:$0xff] %v20416_v23 }
 0x1c1   : > { %v17106_v43 = vpop.f32.mrf.mxu0 }
 0x1c2   : > { %v20421_v24 = vadd.f32 %v17106_v43, %v20289_v32  ;;  %v20439_v32 = vpop.f32.mrf.mxu1 }
 0x1c3   : > { %v20423_v45 = vpop.f32.mrf.mxu0  ;;  %26005 = vst [vmem:[#allocation74_spill] sm:$0xff] %v20439_v32 }
 0x1c4   : > { %25997 = vst [vmem:[#allocation66_spill] sm:$0xff] %v20421_v24  ;;  %25998 = vst [vmem:[#allocation67_spill] sm:$0xff] %v20423_v45 }
 0x1c5   : > { %v17109_v20 = vpop.f32.mrf.mxu0 }
 0x1c6   : > { %v20428_v28 = vadd.f32 %v17109_v20, %v20301_v58  ;;  %v20446_v58 = vpop.f32.mrf.mxu1 }
 0x1c7   : > { %v20430_v9 = vpop.f32.mrf.mxu0 }
 0x1c8   : > { %26000 = vst [vmem:[#allocation69_spill] sm:$0xff] %v20428_v28  ;;  %26001 = vst [vmem:[#allocation70_spill] sm:$0xff] %v20430_v9  ;;  %v20452_v5 = vpop.f32.mrf.mxu1 }
 0x1c9   : > { %v17112_v50 = vpop.f32.mrf.mxu0 }
 0x1ca   : > { %v20435_v33 = vadd.f32 %v17112_v50, %v20313_v34 }
 0x1cb   : > { %v20437_v31 = vpop.f32.mrf.mxu0 }
 0x1cc   : > { %26003 = vst [vmem:[#allocation72_spill] sm:$0xff] %v20435_v33  ;;  %26004 = vst [vmem:[#allocation73_spill] sm:$0xff] %v20437_v31  ;;  %v20458_v33 = vpop.f32.mrf.mxu1 }
 0x1cd   : > { %v17115_v43 = vpop.f32.mrf.mxu0 }
 0x1ce   : > { %v20442_v24 = vadd.f32 %v17115_v43, %v20322_v42  ;;  %v20465_v42 = vld [vmem:[%s25737_s8 + $0x8] sm:$0xff]  ;;  %v20468_v43 = vpop.f32.mrf.mxu1 }
 0x1cf   : > { %v20444_v47 = vpop.f32.mrf.mxu0  ;;  %26008 = vst [vmem:[#allocation77_spill] sm:$0xff] %v20465_v42  ;;  %17476 = vmatprep.subr.mxu1 %v20465_v42 }
 0x1d0   : > { %26006 = vst [vmem:[#allocation75_spill] sm:$0xff] %v20442_v24  ;;  %26007 = vst [vmem:[#allocation76_spill] sm:$0xff] %v20444_v47  ;;  %v20474_v31 = vpop.f32.mrf.mxu1 }
 0x1d1   : > { %v20448_v20 = vpop.f32.mrf.mxu0 }
 0x1d2   : > { %v20480_v23 = vpop.f32.mrf.mxu1 }
 0x1d3   : > { %v20450_v28 = vpop.f32.mrf.mxu0  ;;  %26012 = vst [vmem:[#allocation81_spill] sm:$0xff] %v20480_v23 }
 0x1d4   : > { %v20486_v46 = vpop.f32.mrf.mxu1 }
 0x1d5   : > { %v20454_v34 = vpop.f32.mrf.mxu0  ;;  %26015 = vst [vmem:[#allocation84_spill] sm:$0xff] %v20486_v46 }
 0x1d6   : > { %v20492_v0 = vpop.f32.mrf.mxu1 }
 0x1d7   : > { %v20456_v50 = vpop.f32.mrf.mxu0  ;;  %26018 = vst [vmem:[#allocation87_spill] sm:$0xff] %v20492_v0 }
 0x1d9   : > { %v20460_v32 = vpop.f32.mrf.mxu0 }
 0x1db   : > { %v20470_v24 = vpop.f32.mrf.mxu0 }
 0x1dd   : > { %v20472_v47 = vpop.f32.mrf.mxu0 }
 0x1de   : > { %26009 = vst [vmem:[#allocation78_spill] sm:$0xff] %v20472_v47 }
 0x1df   : > { %v20476_v9 = vpop.f32.mrf.mxu0 }
 0x1e0   : > { %26010 = vst [vmem:[#allocation79_spill] sm:$0xff] %v20476_v9  ;;  %v20498_v9 = vpop.f32.mrf.mxu1 }
 0x1e1   : > { %v20478_v45 = vpop.f32.mrf.mxu0  ;;  %26021 = vst [vmem:[#allocation90_spill] sm:$0xff] %v20498_v9 }
 0x1e2   : > { %26011 = vst [vmem:[#allocation80_spill] sm:$0xff] %v20478_v45 }
 0x1e3   : > { %v20482_v22 = vpop.f32.mrf.mxu0 }
 0x1e4   : > { %26013 = vst [vmem:[#allocation82_spill] sm:$0xff] %v20482_v22  ;;  %v20504_v22 = vpop.f32.mrf.mxu1 }
 0x1e5   : > { %v20484_v2 = vpop.f32.mrf.mxu0  ;;  %26024 = vst [vmem:[#allocation93_spill] sm:$0xff] %v20504_v22 }
 0x1e6   : > { %26014 = vst [vmem:[#allocation83_spill] sm:$0xff] %v20484_v2 }
 0x1e7   : > { %v20488_v41 = vpop.f32.mrf.mxu0 }
 0x1e8   : > { %26016 = vst [vmem:[#allocation85_spill] sm:$0xff] %v20488_v41  ;;  %v20510_v41 = vpop.f32.mrf.mxu1 }
 0x1e9   : > { %v20490_v42 = vpop.f32.mrf.mxu0  ;;  %26027 = vst [vmem:[#allocation96_spill] sm:$0xff] %v20510_v41 }
 0x1ea   : > { %26017 = vst [vmem:[#allocation86_spill] sm:$0xff] %v20490_v42 }
 0x1eb   : > { %v20494_v55 = vpop.f32.mrf.mxu0 }
 0x1ec   : > { %26019 = vst [vmem:[#allocation88_spill] sm:$0xff] %v20494_v55  ;;  %v20516_v55 = vpop.f32.mrf.mxu1 }
 0x1ed   : > { %v20496_v47 = vpop.f32.mrf.mxu0 }
 0x1ee   : > { %26020 = vst [vmem:[#allocation89_spill] sm:$0xff] %v20496_v47 }
 0x1ef   : > { %v20500_v45 = vpop.f32.mrf.mxu0 }
 0x1f0   : > { %26022 = vst [vmem:[#allocation91_spill] sm:$0xff] %v20500_v45  ;;  %v20522_v45 = vpop.f32.mrf.mxu1 }
 0x1f1   : > { %v20502_v23 = vpop.f32.mrf.mxu0  ;;  %26032 = vst [vmem:[#allocation101_spill] sm:$0xff] %v20522_v45 }
 0x1f2   : > { %26023 = vst [vmem:[#allocation92_spill] sm:$0xff] %v20502_v23 }
 0x1f3   : > { %v20506_v2 = vpop.f32.mrf.mxu0 }
 0x1f4   : > { %26025 = vst [vmem:[#allocation94_spill] sm:$0xff] %v20506_v2  ;;  %v20528_v2 = vpop.f32.mrf.mxu1 }
 0x1f5   : > { %v20508_v46 = vpop.f32.mrf.mxu0  ;;  %26035 = vst [vmem:[#allocation104_spill] sm:$0xff] %v20528_v2  ;;  %v26042_v2 = vld [vmem:[#allocation8_spill] sm:$0xff] }
 0x1f6   : > { %26026 = vst [vmem:[#allocation95_spill] sm:$0xff] %v20508_v46 }
 0x1f7   : > { %v20512_v42 = vpop.f32.mrf.mxu0 }
 0x1f8   : > { %26028 = vst [vmem:[#allocation97_spill] sm:$0xff] %v20512_v42  ;;  %v20536_v42 = vpop.f32.mrf.mxu1 }
 0x1f9   : > { %v20514_v0 = vpop.f32.mrf.mxu0  ;;  %26038 = vst [vmem:[#allocation107_spill] sm:$0xff] %v20536_v42  ;;  %v26041_v42 = vld [vmem:[#allocation13_spill] sm:$0xff] }
 0x1fa   : > { %26029 = vst [vmem:[#allocation98_spill] sm:$0xff] %v20514_v0  ;;  %v2044_v0 = vadd.f32 %v19948_v53, %v20122_v26  ;;  %v1249_v53 = vadd.f32 %v19860_v48, %v19972_v52  ;;  %v26040_v26 = vld [vmem:[#allocation7_spill] sm:$0xff]  ;;  %v2833_v48 = vadd.f32 %v20164_v19, %v20325_v57 }
 0x1fb   : > { %v20518_v47 = vpop.f32.mrf.mxu0 }
 0x1fc   : > { %26030 = vst [vmem:[#allocation99_spill] sm:$0xff] %v20518_v47 }
 0x1fd   : > { %v20520_v9 = vpop.f32.mrf.mxu0 }
 0x1fe   : > { %26031 = vst [vmem:[#allocation100_spill] sm:$0xff] %v20520_v9  ;;  %v1209_v9 = vadd.f32 %v19796_v8, %v19908_v63  ;;  %v1269_v8 = vadd.f32 %v26042_v2, %v26041_v42 }
 0x1ff   : > { %v20524_v23 = vpop.f32.mrf.mxu0 }
 0x200   : > { %26033 = vst [vmem:[#allocation102_spill] sm:$0xff] %v20524_v23  ;;  %v1219_v23 = vadd.f32 %v19812_v13, %v19928_v36  ;;  %v26043_v13 = vld [vmem:[#allocation15_spill] sm:$0xff]  ;;  %v26044_v36 = vld [vmem:[#allocation9_spill] sm:$0xff]  ;;  %v1665_v2 = vadd.f32 %v20236_v11, %v1209_v9 }
 0x201   : > { %v20526_v22 = vpop.f32.mrf.mxu0  ;;  %v1279_v45 = vadd.f32 %v26044_v36, %v26043_v13 }
 0x202   : > { %26034 = vst [vmem:[#allocation103_spill] sm:$0xff] %v20526_v22  ;;  %v1229_v22 = vadd.f32 %v19828_v38, %v19945_v40  ;;  %v26045_v38 = vld [vmem:[#allocation10_spill] sm:$0xff]  ;;  %v1667_v42 = vadd.f32 %v20248_v37, %v1219_v23  ;;  %v1673_v23 = vadd.f32 %v20284_v6, %v1249_v53  ;;  %v26055_v53 = vld [vmem:[#allocation21_spill] sm:$0xff] }
 0x203   : > { %v20530_v46 = vpop.f32.mrf.mxu0  ;;  %v2046_v40 = vadd.f32 %v26045_v38, %v20137_v10  ;;  %v26049_v10 = vld [vmem:[#allocation16_spill] sm:$0xff] }
 0x204   : > { %26036 = vst [vmem:[#allocation105_spill] sm:$0xff] %v20530_v46  ;;  %v2438_v46 = vadd.f32 %v20327_v21, %v2044_v0  ;;  %v26046_v21 = vld [vmem:[#allocation11_spill] sm:$0xff]  ;;  %v1669_v11 = vadd.f32 %v20260_v29, %v1229_v22  ;;  %v26054_v29 = vld [vmem:[#allocation20_spill] sm:$0xff] }
 0x205   : > { %v20532_v41 = vpop.f32.mrf.mxu0  ;;  %v2440_v57 = vadd.f32 %v20334_v44, %v2046_v40  ;;  %v26052_v44 = vld [vmem:[#allocation27_spill] sm:$0xff] }
 0x206   : > { %26037 = vst [vmem:[#allocation106_spill] sm:$0xff] %v20532_v41  ;;  %v1239_v41 = vadd.f32 %v19845_v30, %v19959_v35  ;;  %v2048_v30 = vadd.f32 %v26046_v21, %v20152_v60  ;;  %v26047_v35 = vld [vmem:[#allocation12_spill] sm:$0xff]  ;;  %v20577_v60 = vadd.f32 %v26049_v10, %v20197_v54  ;;  %v2832_v19 = vadd.f32 %v20173_v62, %v2438_v46  ;;  %v26051_v54 = vld [vmem:[#allocation18_spill] sm:$0xff] }
 0x207   : > { %v20538_v47 = vpop.f32.mrf.mxu0  ;;  %v2050_v52 = vadd.f32 %v26047_v35, %v20167_v16  ;;  %v3228_v16 = vadd.f32 %v20448_v20, %v2833_v48  ;;  %v20593_v38 = vadd.f32 %v26051_v54, %v20227_v7  ;;  %v2835_v46 = vadd.f32 %v26052_v44, %v20332_v61  ;;  %v26053_v20 = vld [vmem:[#allocation19_spill] sm:$0xff]  ;;  %v26056_v48 = vld [vmem:[#allocation22_spill] sm:$0xff] }
 0x208   : > { %26039 = vst [vmem:[#allocation108_spill] sm:$0xff] %v20538_v47  ;;  %v1259_v47 = vadd.f32 %v26040_v26, %v19985_v59  ;;  %v26048_v59 = vld [vmem:[#allocation14_spill] sm:$0xff]  ;;  %v20571_v26 = vpop.f32.mrf.mxu1  ;;  %v1671_v37 = vadd.f32 %v20272_v4, %v1239_v41  ;;  %v20600_v40 = vadd.f32 %v26053_v20, %v1665_v2  ;;  %v20603_v4 = vadd.f32 %v26054_v29, %v1667_v42  ;;  %v26060_v42 = vld [vmem:[#allocation25_spill] sm:$0xff]  ;;  %v26063_v29 = vld [vmem:[#allocation43_spill] sm:$0xff] }
 0x209   : > { %v20555_v63 = vpop.f32.mrf.mxu0  ;;  %v2052_v0 = vadd.f32 %v26048_v59, %v20182_v15  ;;  %v26050_v15 = vld [vmem:[#allocation17_spill] sm:$0xff]  ;;  %v1677_v41 = vadd.f32 %v20308_v14, %v1269_v8  ;;  %v2442_v6 = vadd.f32 %v20353_v39, %v2048_v30  ;;  %v2834_v61 = vadd.f32 %v20188_v51, %v2440_v57  ;;  %v26057_v14 = vld [vmem:[#allocation23_spill] sm:$0xff]  ;;  %v26058_v8 = vld [vmem:[#allocation28_spill] sm:$0xff] }
 0x20a   : > { %v20584_v36 = vadd.f32 %v26050_v15, %v20212_v17  ;;  %v1675_v62 = vadd.f32 %v20295_v49, %v1259_v47  ;;  %v3227_v17 = vadd.f32 %v20450_v28, %v2832_v19  ;;  %v20607_v22 = vpop.f32.mrf.mxu1  ;;  %v1679_v49 = vadd.f32 %v20317_v56, %v1279_v45  ;;  %v20629_v51 = vld [vmem:[%s25731_s2] ss:$0 sm:$0xff]  ;;  %v26059_v56 = vld [vmem:[#allocation24_spill] sm:$0xff] }
 0x20b   : > { %v20573_v13 = vpop.f32.mrf.mxu0  ;;  %v3622_v28 = vadd.f32 %v20446_v58, %v3228_v16  ;;  %v3230_v47 = vadd.f32 %v20454_v34, %v2835_v46  ;;  %v20616_v21 = vadd.f32 %v26055_v53, %v1669_v11  ;;  %v20619_v35 = vadd.f32 %v26056_v48, %v1671_v37  ;;  %v20647_v15 = vld [vmem:[%s25732_s3] ss:$0 sm:$0xff]  ;;  %v26061_v11 = vld [vmem:[#allocation26_spill] sm:$0xff] }
 0x20c   : > { %v20622_v39 = vadd.f32 %v26057_v14, %v1673_v23  ;;  %v2837_v30 = vadd.f32 %v26058_v8, %v20345_v12  ;;  %v20632_v45 = vadd.f32 %v26059_v56, %v1675_v62  ;;  %v3621_v58 = vadd.f32 %v20452_v5, %v3227_v17  ;;  %v20642_v16 = vpop.f32.mrf.mxu1  ;;  %v26067_v53 = vld [vmem:[#allocation31_spill] sm:$0xff]  ;;  %v26069_v8 = vld [vmem:[#allocation81_spill] sm:$0xff] }
 0x20d   : > { %v20589_v9 = vpop.f32.mrf.mxu0  ;;  %v3229_v34 = vadd.f32 %v20456_v50, %v2834_v61  ;;  %v20637_v10 = vadd.f32 %v26060_v42, %v1677_v41  ;;  %v2836_v19 = vadd.f32 %v20203_v27, %v2442_v6  ;;  %v2444_v12 = vadd.f32 %v20360_v1, %v2050_v52  ;;  %v26062_v1 = vld [vmem:[#allocation29_spill] sm:$0xff]  ;;  %v26064_v41 = vld [vmem:[#allocation30_spill] sm:$0xff] }
 0x20e   : > { %v3232_v57 = vadd.f32 %v20460_v32, %v2837_v30  ;;  %v20650_v50 = vadd.f32 %v26061_v11, %v1679_v49  ;;  %v3624_v37 = vadd.f32 %v20458_v33, %v3230_v47  ;;  %v2839_v52 = vadd.f32 %v26062_v1, %v20358_v3  ;;  %v26065_v49 = vld [vmem:[#allocation78_spill] sm:$0xff]  ;;  %v26075_v11 = vld [vmem:[#allocation84_spill] sm:$0xff] }
 0x20f   : > { %v20609_v7 = vpop.f32.mrf.mxu0  ;;  %v2446_v32 = vadd.f32 %v20367_v25, %v2052_v0  ;;  %v3231_v54 = vadd.f32 %v20470_v24, %v2836_v19  ;;  %v3623_v44 = vadd.f32 %v20468_v43, %v3229_v34  ;;  %v2838_v33 = vadd.f32 %v20218_v18, %v2444_v12  ;;  %v20666_v0 = vpop.f32.mrf.mxu1  ;;  %v26068_v18 = vld [vmem:[#allocation46_spill] sm:$0xff]  ;;  %v26072_v19 = vld [vmem:[#allocation45_spill] sm:$0xff]  ;;  %v26073_v12 = vld [vmem:[#allocation32_spill] sm:$0xff] }
 0x210   : > { %v2841_v6 = vadd.f32 %v26064_v41, %v26063_v29  ;;  %v3626_v3 = vadd.f32 %v20474_v31, %v3232_v57  ;;  %v3234_v25 = vadd.f32 %v26065_v49, %v2839_v52  ;;  %v2448_v14 = vadd.f32 %v26068_v18, %v20577_v60  ;;  %v26070_v31 = vld [vmem:[#allocation79_spill] sm:$0xff]  ;;  %v26074_v60 = vld [vmem:[#allocation49_spill] sm:$0xff]  ;;  %v26085_v18 = vld [vmem:[#allocation90_spill] sm:$0xff] }
 0x211   : > { %v17326_v59 = vpop.f32.mrf.mxu0  ;;  %v2840_v48 = vadd.f32 %v26067_v53, %v2446_v32  ;;  %v3625_v30 = vadd.f32 %v26069_v8, %v3231_v54  ;;  %v2843_v57 = vadd.f32 %v26073_v12, %v26072_v19  ;;  %v20689_v1 = vpop.f32.mrf.mxu1  ;;  %v26081_v29 = vld [vmem:[#allocation87_spill] sm:$0xff]  ;;  %v26088_v19 = vld [vmem:[#allocation52_spill] sm:$0xff] }
 0x212   : > { %v4016_v2 = vadd.f32 %v17326_v59, %v3622_v28  ;;  %v3233_v59 = vadd.f32 %v26070_v31, %v2838_v33  ;;  %v2452_v12 = vadd.f32 %v26088_v19, %v20593_v38  ;;  %v26094_v38 = vld [vmem:[#allocation96_spill] sm:$0xff] }
 0x213   : > { %v3856_v5 = vpop.f32.mrf.mxu0 }
 0x214   : > { %v4055_v23 = vmul.f32 %v20629_v51, %v4016_v2  ;;  %v4015_v27 = vadd.f32 %v3856_v5, %v3621_v58  ;;  %v2450_v5 = vadd.f32 %v26074_v60, %v20584_v36  ;;  %v26078_v36 = vld [vmem:[#allocation33_spill] sm:$0xff]  ;;  %v3627_v41 = vadd.f32 %v26081_v29, %v3233_v59  ;;  %v26090_v60 = vld [vmem:[#allocation36_spill] sm:$0xff] }
 0x215   : > { %v17329_v62 = vpop.f32.mrf.mxu0 }
 0x216   : > { %v4094_v46 = vadd.f32 %v20647_v15, %v4055_v23  ;;  %v4054_v17 = vmul.f32 %v20629_v51, %v4015_v27  ;;  %v4018_v20 = vadd.f32 %v17329_v62, %v3624_v37  ;;  %v3628_v37 = vadd.f32 %v26075_v11, %v3234_v25  ;;  %v26076_v23 = vld [vmem:[#allocation80_spill] sm:$0xff]  ;;  %v26091_v11 = vld [vmem:[#allocation85_spill] sm:$0xff] }
 0x217   : > { %v3866_v24 = vpop.f32.mrf.mxu0  ;;  %v3236_v27 = vadd.f32 %v26076_v23, %v2841_v6 }
 0x218   : > { %v20668_v61 = vmax.f32 %v4094_v46, 0.0  ;;  %v4093_v43 = vadd.f32 %v20647_v15, %v4054_v17  ;;  %v4057_v28 = vmul.f32 %v20629_v51, %v4018_v20  ;;  %v4017_v47 = vadd.f32 %v3866_v24, %v3623_v44  ;;  %v26079_v17 = vld [vmem:[#allocation48_spill] sm:$0xff]  ;;  %v26080_v20 = vld [vmem:[#allocation34_spill] sm:$0xff] }
 0x219   : > { %v17332_v56 = vpop.f32.mrf.mxu0  ;;  %v2842_v46 = vadd.f32 %v26078_v36, %v2448_v14  ;;  %v2845_v33 = vadd.f32 %v26080_v20, %v26079_v17  ;;  %v3630_v14 = vadd.f32 %v26085_v18, %v3236_v27  ;;  %v26092_v27 = vld [vmem:[#allocation93_spill] sm:$0xff] }
 0x21a   : > { %26066 = vst [vmem:[#allocation7_spill] sm:$0xff] %v20668_v61  ;;  %v20677_v58 = vmax.f32 %v4093_v43, 0.0  ;;  %v4096_v34 = vadd.f32 %v20647_v15, %v4057_v28  ;;  %v4056_v2 = vmul.f32 %v20629_v51, %v4017_v47  ;;  %v4020_v42 = vadd.f32 %v17332_v56, %v3626_v3  ;;  %6179 = vrot.lane.b32.xlu1 %v20668_v61, %s18824_s23  ;;  %v26082_v3 = vld [vmem:[#allocation82_spill] sm:$0xff]  ;;  %v4722_v28 = vld [vmem:[%s25737_s8] sm:$0xff]  ;;  %v26087_v56 = vld [vmem:[#allocation77_spill] sm:$0xff] }
 0x21b   : > { %v3876_v52 = vpop.f32.mrf.mxu0  ;;  %v3235_v49 = vadd.f32 %v26082_v3, %v2840_v48  ;;  %v26084_v47 = vld [vmem:[#allocation35_spill] sm:$0xff] }
 0x21c   : > { %26071 = vst [vmem:[#allocation13_spill] sm:$0xff] %v20677_v58  ;;  %v20691_v32 = vmax.f32 %v4096_v34, 0.0  ;;  %v4095_v54 = vadd.f32 %v20647_v15, %v4056_v2  ;;  %v4059_v62 = vmul.f32 %v20629_v51, %v4020_v42  ;;  %v4019_v44 = vadd.f32 %v3876_v52, %v3625_v30  ;;  %6177 = vrot.lane.b32.xlu0 %v20677_v58, %s18824_s23  ;;  %v26086_v48 = vld [vmem:[#allocation83_spill] sm:$0xff]  ;;  %v20721_v30 = vpop.f32.mrf.mxu1 }
 0x21d   : > { %17376 = vmatprep.mubr.msk.f32.mxu1 %vm4166_vm1, %v20677_v58  ;;  %17428 = vmatprep.mubr.msk.f32.mxu0 %vm4166_vm1, %v20677_v58  ;;  %v17335_v6 = vpop.f32.mrf.mxu0  ;;  %v2844_v53 = vadd.f32 %v26084_v47, %v2450_v5  ;;  %v3238_v8 = vadd.f32 %v26086_v48, %v2843_v57  ;;  %v26089_v57 = vld [vmem:[#allocation51_spill] sm:$0xff]  ;;  %v3629_v52 = vadd.f32 %v26092_v27, %v3235_v49  ;;  %v26100_v48 = vld [vmem:[#allocation38_spill] sm:$0xff] }
 0x21e   : > { %26077 = vst [vmem:[#allocation8_spill] sm:$0xff] %v20691_v32  ;;  %17377 = vmatmul.mubr.msk.f32.vlgmr.msra.gmra.mxu1 %vm4166_vm1, %v20668_v61  ;;  %v20708_v25 = vmax.f32 %v4095_v54, 0.0  ;;  %v4058_v24 = vmul.f32 %v20629_v51, %v4019_v44  ;;  %v4022_v43 = vadd.f32 %v17335_v6, %v3628_v37  ;;  %17429 = vmatmul.mubr.msk.f32.vlgmr.msra.gmra.mxu0 %vm4166_vm1, %v20668_v61  ;;  %v20748_v20 = vpop.f32.mrf.mxu1  ;;  %v26098_v47 = vld [vmem:[#allocation55_spill] sm:$0xff] }
 0x21f   : > { %6183 = vrot.lane.b32.xlu1 %v20691_v32, %s18824_s23  ;;  %v4098_v31 = vadd.f32 %v20647_v15, %v4059_v62  ;;  %v3886_v59 = vpop.f32.mrf.mxu0  ;;  %17477 = vmatpush3.msra.mxu1 %v26087_v56  ;;  %v2847_v5 = vadd.f32 %v26090_v60, %v26089_v57  ;;  %v3237_v37 = vadd.f32 %v26091_v11, %v2842_v46  ;;  %v26095_v46 = vld [vmem:[#allocation86_spill] sm:$0xff] }
 0x220   : > { %26083 = vst [vmem:[#allocation15_spill] sm:$0xff] %v20708_v25  ;;  %v4097_v34 = vadd.f32 %v20647_v15, %v4058_v24  ;;  %v4061_v2 = vmul.f32 %v20629_v51, %v4022_v43  ;;  %v4021_v42 = vadd.f32 %v3886_v59, %v3627_v41  ;;  %17379 = vmatprep.mubr.msk.f32.mxu1 %vm4166_vm1, %v20708_v25  ;;  %v26101_v59 = vld [vmem:[#allocation88_spill] sm:$0xff]  ;;  %v20777_v57 = vpop.f32.mrf.mxu1 }
 0x221   : > { %17431 = vmatprep.mubr.msk.f32.mxu0 %vm4166_vm1, %v20708_v25  ;;  %v17338_v23 = vpop.f32.mrf.mxu0  ;;  %17478 = vmatprep.subr.mxu1 %v4722_v28  ;;  %v3632_v36 = vadd.f32 %v26094_v38, %v3238_v8  ;;  %v3240_v17 = vadd.f32 %v26095_v46, %v2845_v33  ;;  %v20750_v29 = vmax.f32 %v4098_v31, 0.0  ;;  %v26097_v33 = vld [vmem:[#allocation37_spill] sm:$0xff]  ;;  %v2454_v18 = vadd.f32 %v26098_v47, %v20600_v40 }
 0x222   : > { %17380 = vmatmul.mubr.msk.f32.gmra.mxu1 %vm4166_vm1, %v20691_v32  ;;  %v20739_v54 = vmax.f32 %v4097_v34, 0.0  ;;  %v4060_v62 = vmul.f32 %v20629_v51, %v4021_v42  ;;  %v4024_v44 = vadd.f32 %v17338_v23, %v3630_v14  ;;  %17432 = vmatmul.mubr.msk.f32.gmra.mxu0 %vm4166_vm1, %v20691_v32  ;;  %v4100_v41 = vadd.f32 %v20647_v15, %v4061_v2  ;;  %v26099_v14 = vld [vmem:[#allocation54_spill] sm:$0xff]  ;;  %v26103_v40 = vld [vmem:[#allocation101_spill] sm:$0xff] }
 0x223   : > { %6181 = vrot.lane.b32.xlu1 %v20708_v25, %s18824_s23  ;;  %26096 = vst [vmem:[#allocation10_spill] sm:$0xff] %v20750_v29  ;;  %v3896_v6 = vpop.f32.mrf.mxu0  ;;  %17479 = vmatpush3.msra.mxu1 %v4722_v28  ;;  %v2846_v43 = vadd.f32 %v26097_v33, %v2452_v12  ;;  %v2849_v8 = vadd.f32 %v26100_v48, %v26099_v14  ;;  %v26108_v38 = vld [vmem:[#allocation57_spill] sm:$0xff]  ;;  %v20806_v48 = vpop.f32.mrf.mxu1 }
 0x224   : > { %26093 = vst [vmem:[#allocation9_spill] sm:$0xff] %v20739_v54  ;;  %v4099_v3 = vadd.f32 %v20647_v15, %v4060_v62  ;;  %v4063_v49 = vmul.f32 %v20629_v51, %v4024_v44  ;;  %v4023_v24 = vadd.f32 %v3896_v6, %v3629_v52  ;;  %17382 = vmatprep.mubr.msk.f32.mxu1 %vm4166_vm1, %v20739_v54  ;;  %v20779_v60 = vmax.f32 %v4100_v41, 0.0  ;;  %v26106_v52 = vld [vmem:[#allocation39_spill] sm:$0xff]  ;;  %v26107_v62 = vld [vmem:[#allocation58_spill] sm:$0xff] }
 0x225   : > { %17434 = vmatprep.mubr.msk.f32.mxu0 %vm4166_vm1, %v20739_v54  ;;  %v3631_v28 = vadd.f32 %v20516_v55, %v3237_v37  ;;  %v17341_v31 = vpop.f32.mrf.mxu0  ;;  %v3239_v56 = vadd.f32 %v26101_v59, %v2844_v53  ;;  %v3634_v19 = vadd.f32 %v26103_v40, %v3240_v17  ;;  %v26104_v55 = vld [vmem:[#allocation89_spill] sm:$0xff]  ;;  %v2456_v44 = vadd.f32 %v26107_v62, %v20603_v4  ;;  %v26110_v17 = vld [vmem:[#allocation91_spill] sm:$0xff] }
 0x226   : > { %17383 = vmatmul.mubr.msk.f32.gmra.mxu1 %vm4166_vm1, %v20750_v29  ;;  %v20768_v34 = vmax.f32 %v4099_v3, 0.0  ;;  %v4062_v2 = vmul.f32 %v20629_v51, %v4023_v24  ;;  %v4026_v42 = vadd.f32 %v17341_v31, %v3632_v36  ;;  %17435 = vmatmul.mubr.msk.f32.gmra.mxu0 %vm4166_vm1, %v20750_v29  ;;  %v3242_v12 = vadd.f32 %v26104_v55, %v2847_v5  ;;  %v26109_v36 = vld [vmem:[#allocation40_spill] sm:$0xff]  ;;  %v26113_v4 = vld [vmem:[#allocation107_spill] sm:$0xff]  ;;  %v26116_v40 = vld [vmem:[#allocation41_spill] sm:$0xff] }
 0x227   : > { %6187 = vrot.lane.b32.xlu1 %v20750_v29, %s18824_s23  ;;  %26105 = vst [vmem:[#allocation12_spill] sm:$0xff] %v20779_v60  ;;  %v4102_v53 = vadd.f32 %v20647_v15, %v4063_v49  ;;  %v3906_v11 = vpop.f32.mrf.mxu0  ;;  %v2848_v5 = vadd.f32 %v26106_v52, %v2454_v18  ;;  %v2851_v46 = vadd.f32 %v26109_v36, %v26108_v38  ;;  %v26111_v3 = vld [vmem:[#allocation104_spill] sm:$0xff] }
 0x228   : > { %26102 = vst [vmem:[#allocation11_spill] sm:$0xff] %v20768_v34  ;;  %v4101_v37 = vadd.f32 %v20647_v15, %v4062_v2  ;;  %v4065_v23 = vmul.f32 %v20629_v51, %v4026_v42  ;;  %v4025_v27 = vadd.f32 %v3906_v11, %v3631_v28  ;;  %17385 = vmatprep.mubr.msk.f32.mxu1 %vm4166_vm1, %v20768_v34 }
 0x229   : > { %17437 = vmatprep.mubr.msk.f32.mxu0 %vm4166_vm1, %v20768_v34  ;;  %v3241_v41 = vadd.f32 %v26110_v17, %v2846_v43  ;;  %v17344_v6 = vpop.f32.mrf.mxu0  ;;  %v3633_v49 = vadd.f32 %v26111_v3, %v3239_v56  ;;  %v3636_v18 = vadd.f32 %v26113_v4, %v3242_v12  ;;  %v26114_v43 = vld [vmem:[#allocation92_spill] sm:$0xff]  ;;  %v20808_v28 = vmax.f32 %v4102_v53, 0.0  ;;  %v26119_v53 = vld [vmem:[#allocation42_spill] sm:$0xff]  ;;  %v20835_v17 = vpop.f32.mrf.mxu1 }
 0x22a   : > { %17386 = vmatmul.mubr.msk.f32.gmra.mxu1 %vm4166_vm1, %v20779_v60  ;;  %v20797_v24 = vmax.f32 %v4101_v37, 0.0  ;;  %v4064_v33 = vmul.f32 %v20629_v51, %v4025_v27  ;;  %v4028_v47 = vadd.f32 %v17344_v6, %v3634_v19  ;;  %17438 = vmatmul.mubr.msk.f32.gmra.mxu0 %vm4166_vm1, %v20779_v60  ;;  %v3244_v14 = vadd.f32 %v26114_v43, %v2849_v8  ;;  %v26117_v19 = vld [vmem:[#allocation61_spill] sm:$0xff]  ;;  %v26118_v12 = vld [vmem:[#allocation60_spill] sm:$0xff]  ;;  %v26120_v27 = vld [vmem:[#allocation94_spill] sm:$0xff] }
 0x22b   : > { %6185 = vrot.lane.b32.xlu1 %v20739_v54, %s18824_s23  ;;  %26115 = vst [vmem:[#allocation16_spill] sm:$0xff] %v20808_v28  ;;  %v4104_v31 = vadd.f32 %v20647_v15, %v4065_v23  ;;  %v3916_v59 = vpop.f32.mrf.mxu0  ;;  %v2850_v8 = vadd.f32 %v26116_v40, %v2456_v44  ;;  %v2458_v55 = vadd.f32 %v26117_v19, %v20616_v21  ;;  %v26127_v43 = vld [vmem:[#allocation47_spill] sm:$0xff] }
 0x22c   : > { %26112 = vst [vmem:[#allocation14_spill] sm:$0xff] %v20797_v24  ;;  %v4103_v56 = vadd.f32 %v20647_v15, %v4064_v33  ;;  %v4067_v2 = vmul.f32 %v20629_v51, %v4028_v47  ;;  %v4027_v42 = vadd.f32 %v3916_v59, %v3633_v49  ;;  %17388 = vmatprep.mubr.msk.f32.mxu1 %vm4166_vm1, %v20797_v24  ;;  %v26125_v47 = vld [vmem:[#allocation64_spill] sm:$0xff] }
 0x22d   : > { %17440 = vmatprep.mubr.msk.f32.mxu0 %vm4166_vm1, %v20797_v24  ;;  %v2853_v11 = vadd.f32 %v26119_v53, %v26118_v12  ;;  %v3635_v37 = vadd.f32 %v20571_v26, %v3241_v41  ;;  %v17347_v23 = vpop.f32.mrf.mxu0  ;;  %v3243_v52 = vadd.f32 %v26120_v27, %v2848_v5  ;;  %v3638_v21 = vadd.f32 %v20607_v22, %v3244_v14  ;;  %v26122_v26 = vld [vmem:[#allocation95_spill] sm:$0xff]  ;;  %v26124_v22 = vld [vmem:[#allocation44_spill] sm:$0xff]  ;;  %v20864_v12 = vpop.f32.mrf.mxu1 }
 0x22e   : > { %17389 = vmatmul.mubr.msk.f32.gmra.mxu1 %vm4166_vm1, %v20808_v28  ;;  %v20826_v62 = vmax.f32 %v4103_v56, 0.0  ;;  %v4066_v38 = vmul.f32 %v20629_v51, %v4027_v42  ;;  %v4030_v36 = vadd.f32 %v17347_v23, %v3636_v18  ;;  %17441 = vmatmul.mubr.msk.f32.gmra.mxu0 %vm4166_vm1, %v20808_v28  ;;  %v3246_v44 = vadd.f32 %v26122_v26, %v2851_v46  ;;  %v26126_v18 = vld [vmem:[#allocation63_spill] sm:$0xff] }
 0x22f   : > { %6191 = vrot.lane.b32.xlu1 %v20779_v60, %s18824_s23  ;;  %v20837_v41 = vmax.f32 %v4104_v31, 0.0  ;;  %v4106_v5 = vadd.f32 %v20647_v15, %v4067_v2  ;;  %v3926_v6 = vpop.f32.mrf.mxu0  ;;  %v2852_v46 = vadd.f32 %v26124_v22, %v2458_v55  ;;  %v2460_v4 = vadd.f32 %v26125_v47, %v20619_v35  ;;  %v26128_v31 = vld [vmem:[#allocation97_spill] sm:$0xff]  ;;  %v26134_v26 = vld [vmem:[#allocation99_spill] sm:$0xff] }
 0x230   : > { %26121 = vst [vmem:[#allocation17_spill] sm:$0xff] %v20826_v62  ;;  %v4105_v3 = vadd.f32 %v20647_v15, %v4066_v38  ;;  %v4069_v49 = vmul.f32 %v20629_v51, %v4030_v36  ;;  %v4029_v33 = vadd.f32 %v3926_v6, %v3635_v37  ;;  %17391 = vmatprep.mubr.msk.f32.mxu1 %vm4166_vm1, %v20826_v62  ;;  %v26133_v38 = vld [vmem:[#allocation67_spill] sm:$0xff] }
 0x231   : > { %26123 = vst [vmem:[#allocation18_spill] sm:$0xff] %v20837_v41  ;;  %17443 = vmatprep.mubr.msk.f32.mxu0 %vm4166_vm1, %v20826_v62  ;;  %v2855_v14 = vadd.f32 %v26127_v43, %v26126_v18  ;;  %v3245_v59 = vadd.f32 %v26128_v31, %v2850_v8  ;;  %v17350_v56 = vpop.f32.mrf.mxu0  ;;  %v3637_v2 = vadd.f32 %v20642_v16, %v3243_v52  ;;  %v26130_v8 = vld [vmem:[#allocation98_spill] sm:$0xff]  ;;  %v20866_v53 = vmax.f32 %v4106_v5, 0.0 }
 0x232   : > { %17392 = vmatmul.mubr.msk.f32.gmra.mxu1 %vm4166_vm1, %v20837_v41  ;;  %v20855_v42 = vmax.f32 %v4105_v3, 0.0  ;;  %v4068_v40 = vmul.f32 %v20629_v51, %v4029_v33  ;;  %v4032_v19 = vadd.f32 %v17350_v56, %v3638_v21  ;;  %17444 = vmatmul.mubr.msk.f32.gmra.mxu0 %vm4166_vm1, %v20837_v41  ;;  %v3640_v35 = vadd.f32 %v20666_v0, %v3246_v44  ;;  %v26132_v0 = vld [vmem:[#allocation50_spill] sm:$0xff] }
 0x233   : > { %6189 = vrot.lane.b32.xlu1 %v20768_v34, %s18824_s23  ;;  %v3248_v55 = vadd.f32 %v26130_v8, %v2853_v11  ;;  %26131 = vst [vmem:[#allocation19_spill] sm:$0xff] %v20866_v53  ;;  %v4108_v16 = vadd.f32 %v20647_v15, %v4069_v49  ;;  %v3936_v37 = vpop.f32.mrf.mxu0  ;;  %v2854_v11 = vadd.f32 %v26132_v0, %v2460_v4  ;;  %v20892_v4 = vpop.f32.mrf.mxu1  ;;  %v26143_v8 = vld [vmem:[#allocation102_spill] sm:$0xff]  ;;  %v26146_v0 = vld [vmem:[#allocation59_spill] sm:$0xff] }
 0x234   : > { %26129 = vst [vmem:[#allocation27_spill] sm:$0xff] %v20855_v42  ;;  %v4107_v23 = vadd.f32 %v20647_v15, %v4068_v40  ;;  %v4071_v27 = vmul.f32 %v20629_v51, %v4032_v19  ;;  %v4031_v52 = vadd.f32 %v3936_v37, %v3637_v2  ;;  %17394 = vmatprep.mubr.msk.f32.mxu1 %vm4166_vm1, %v20855_v42  ;;  %v26142_v40 = vld [vmem:[#allocation56_spill] sm:$0xff] }
 0x235   : > { %17446 = vmatprep.mubr.msk.f32.mxu0 %vm4166_vm1, %v20855_v42  ;;  %v2462_v36 = vadd.f32 %v26133_v38, %v20622_v39  ;;  %v3639_v21 = vadd.f32 %v20689_v1, %v3245_v59  ;;  %v3247_v44 = vadd.f32 %v26134_v26, %v2852_v46  ;;  %v17353_v5 = vpop.f32.mrf.mxu0  ;;  %v26136_v39 = vld [vmem:[#allocation70_spill] sm:$0xff]  ;;  %v3642_v1 = vadd.f32 %v20721_v30, %v3248_v55  ;;  %v26137_v46 = vld [vmem:[#allocation100_spill] sm:$0xff]  ;;  %v26141_v30 = vld [vmem:[#allocation53_spill] sm:$0xff] }
 0x236   : > { %17395 = vmatmul.mubr.msk.f32.gmra.mxu1 %vm4166_vm1, %v20866_v53  ;;  %v20882_v6 = vmax.f32 %v4107_v23, 0.0  ;;  %v4110_v3 = vadd.f32 %v20647_v15, %v4071_v27  ;;  %v4070_v49 = vmul.f32 %v20629_v51, %v4031_v52  ;;  %v4034_v33 = vadd.f32 %v17353_v5, %v3640_v35  ;;  %17447 = vmatmul.mubr.msk.f32.gmra.mxu0 %vm4166_vm1, %v20866_v53  ;;  %v26147_v38 = vld [vmem:[#allocation62_spill] sm:$0xff]  ;;  %v26148_v26 = vld [vmem:[#allocation103_spill] sm:$0xff]  ;;  %v3592_v5 = vpop.f32.mrf.mxu1 }
 0x237   : > { %v2464_v22 = vadd.f32 %v26136_v39, %v20632_v45  ;;  %v3250_v47 = vadd.f32 %v26137_v46, %v2855_v14  ;;  %v20894_v18 = vmax.f32 %v4108_v16, 0.0  ;;  %v3946_v43 = vpop.f32.mrf.mxu0  ;;  %v26140_v45 = vld [vmem:[#allocation66_spill] sm:$0xff]  ;;  %v2856_v19 = vadd.f32 %v26142_v40, %v2462_v36  ;;  %v26150_v46 = vld [vmem:[#allocation105_spill] sm:$0xff] }
 0x238   : > { %26135 = vst [vmem:[#allocation20_spill] sm:$0xff] %v20882_v6  ;;  %v20896_v31 = vmax.f32 %v4110_v3, 0.0  ;;  %v4109_v59 = vadd.f32 %v20647_v15, %v4070_v49  ;;  %v4073_v56 = vmul.f32 %v20629_v51, %v4034_v33  ;;  %v4033_v2 = vadd.f32 %v3946_v43, %v3639_v21  ;;  %17397 = vmatprep.mubr.msk.f32.mxu1 %vm4166_vm1, %v20882_v6  ;;  %v26155_v40 = vld [vmem:[#allocation106_spill] sm:$0xff] }
 0x239   : > { %26138 = vst [vmem:[#allocation21_spill] sm:$0xff] %v20894_v18  ;;  %17449 = vmatprep.mubr.msk.f32.mxu0 %vm4166_vm1, %v20882_v6  ;;  %v2857_v14 = vadd.f32 %v26141_v30, %v26140_v45  ;;  %v3641_v35 = vadd.f32 %v20748_v20, %v3247_v44  ;;  %v3249_v55 = vadd.f32 %v26143_v8, %v2854_v11  ;;  %v17356_v16 = vpop.f32.mrf.mxu0  ;;  %v26145_v20 = vld [vmem:[#allocation69_spill] sm:$0xff] }
 0x23a   : > { %26139 = vst [vmem:[#allocation22_spill] sm:$0xff] %v20896_v31  ;;  %17398 = vmatmul.mubr.msk.f32.gmra.mxu1 %vm4166_vm1, %v20894_v18  ;;  %v20911_v37 = vmax.f32 %v4109_v59, 0.0  ;;  %v4112_v23 = vadd.f32 %v20647_v15, %v4073_v56  ;;  %v4072_v27 = vmul.f32 %v20629_v51, %v4033_v2  ;;  %v4036_v52 = vadd.f32 %v17356_v16, %v3642_v1  ;;  %v26149_v1 = vld [vmem:[#allocation73_spill] sm:$0xff] }
 0x23b   : > { %17450 = vmatmul.mubr.msk.f32.gmra.mxu0 %vm4166_vm1, %v20894_v18  ;;  %6211 = vrot.lane.b32.xlu1 %v20896_v31, %s18824_s23  ;;  %v2859_v11 = vadd.f32 %v26146_v0, %v26145_v20  ;;  %v2858_v36 = vadd.f32 %v26147_v38, %v2464_v22  ;;  %v3644_v21 = vadd.f32 %v20777_v57, %v3250_v47  ;;  %v3956_v3 = vpop.f32.mrf.mxu0 }
 0x23c   : > { %26144 = vst [vmem:[#allocation23_spill] sm:$0xff] %v20911_v37  ;;  %v3252_v44 = vadd.f32 %v26148_v26, %v2857_v14  ;;  %v4111_v49 = vadd.f32 %v20647_v15, %v4072_v27  ;;  %v4075_v33 = vmul.f32 %v20629_v51, %v4036_v52  ;;  %v4035_v39 = vadd.f32 %v3956_v3, %v3641_v35  ;;  %v17304_v35 = vpop.f32.mrf.mxu1  ;;  %v26156_v52 = vld [vmem:[#allocation68_spill] sm:$0xff] }
 0x23d   : > { %6209 = vrot.lane.b32.xlu0 %v20911_v37, %s18824_s23  ;;  %17400 = vmatprep.mubr.msk.f32.mxu1 %vm4166_vm1, %v20911_v37  ;;  %v2466_v22 = vadd.f32 %v26149_v1, %v20637_v10  ;;  %v3643_v57 = vadd.f32 %v20806_v48, %v3249_v55  ;;  %v3251_v47 = vadd.f32 %v26150_v46, %v2856_v19  ;;  %v17359_v43 = vpop.f32.mrf.mxu0  ;;  %v20938_v59 = vmax.f32 %v4112_v23, 0.0  ;;  %v26153_v10 = vld [vmem:[#allocation72_spill] sm:$0xff]  ;;  %v26154_v48 = vld [vmem:[#allocation65_spill] sm:$0xff] }
 0x23e   : > { %17452 = vmatprep.mubr.msk.f32.mxu0 %vm4166_vm1, %v20911_v37  ;;  %17401 = vmatmul.mubr.msk.f32.gmra.mxu1 %vm4166_vm1, %v20896_v31  ;;  %v20940_v56 = vmax.f32 %v4111_v49, 0.0  ;;  %v4074_v2 = vmul.f32 %v20629_v51, %v4035_v39  ;;  %v4038_v45 = vadd.f32 %v17359_v43, %v3644_v21  ;;  %v2861_v30 = vadd.f32 %v26154_v48, %v26153_v10  ;;  %v26158_v21 = vld [vmem:[#allocation108_spill] sm:$0xff]  ;;  %v26163_v43 = vld [vmem:[#allocation74_spill] sm:$0xff] }
 0x23f   : > { %26151 = vst [vmem:[#allocation28_spill] sm:$0xff] %v20938_v59  ;;  %17453 = vmatmul.mubr.msk.f32.gmra.mxu0 %vm4166_vm1, %v20896_v31  ;;  %6193 = vrot.lane.b32.xlu1 %v20797_v24, %s18824_s23  ;;  %v3646_v14 = vadd.f32 %v20835_v17, %v3252_v44  ;;  %v3254_v19 = vadd.f32 %v26155_v40, %v2859_v11  ;;  %v3966_v55 = vpop.f32.mrf.mxu0  ;;  %v26157_v17 = vld [vmem:[#allocation76_spill] sm:$0xff] }
 0x240   : > { %26152 = vst [vmem:[#allocation24_spill] sm:$0xff] %v20940_v56  ;;  %v4114_v8 = vadd.f32 %v20647_v15, %v4075_v33  ;;  %v4113_v16 = vadd.f32 %v20647_v15, %v4074_v2  ;;  %v4077_v23 = vmul.f32 %v20629_v51, %v4038_v45  ;;  %v4037_v27 = vadd.f32 %v3966_v55, %v3643_v57  ;;  %v3602_v33 = vpop.f32.mrf.mxu1 }
 0x241   : > { %6215 = vrot.lane.b32.xlu0 %v20938_v59, %s18824_s23  ;;  %17403 = vmatprep.mubr.msk.f32.mxu1 %vm4166_vm1, %v20940_v56  ;;  %v2860_v20 = vadd.f32 %v26156_v52, %v2466_v22  ;;  %v2468_v0 = vadd.f32 %v26157_v17, %v20650_v50  ;;  %v3645_v11 = vadd.f32 %v20864_v12, %v3251_v47  ;;  %v17362_v38 = vpop.f32.mrf.mxu0  ;;  %v26162_v47 = vld [vmem:[#allocation71_spill] sm:$0xff] }
 0x242   : > { %17455 = vmatprep.mubr.msk.f32.mxu0 %vm4166_vm1, %v20940_v56  ;;  %17404 = vmatmul.mubr.msk.f32.gmra.mxu1 %vm4166_vm1, %v20938_v59  ;;  %v3253_v26 = vadd.f32 %v26158_v21, %v2858_v36  ;;  %v20967_v44 = vmax.f32 %v4113_v16, 0.0  ;;  %v4076_v3 = vmul.f32 %v20629_v51, %v4037_v27  ;;  %v4040_v49 = vadd.f32 %v17362_v38, %v3646_v14 }
 0x243   : > { %17456 = vmatmul.mubr.msk.f32.gmra.mxu0 %vm4166_vm1, %v20938_v59  ;;  %6195 = vrot.lane.b32.xlu1 %v20808_v28, %s18824_s23  ;;  %v3648_v50 = vadd.f32 %v20892_v4, %v3254_v19  ;;  %v3256_v12 = vadd.f32 %v20555_v63, %v2861_v30  ;;  %v20976_v39 = vmax.f32 %v4114_v8, 0.0  ;;  %v4116_v36 = vadd.f32 %v20647_v15, %v4077_v23  ;;  %v3976_v1 = vpop.f32.mrf.mxu0  ;;  %v26161_v4 = vld [vmem:[#allocation75_spill] sm:$0xff]  ;;  %v17307_v8 = vpop.f32.mrf.mxu1 }
 0x244   : > { %26159 = vst [vmem:[#allocation25_spill] sm:$0xff] %v20967_v44  ;;  %v4115_v22 = vadd.f32 %v20647_v15, %v4076_v3  ;;  %v4079_v57 = vmul.f32 %v20629_v51, %v4040_v49  ;;  %v4039_v46 = vadd.f32 %v3976_v1, %v3645_v11  ;;  %17406 = vmatprep.mubr.msk.f32.mxu1 %vm4166_vm1, %v20967_v44 }
 0x245   : > { %26160 = vst [vmem:[#allocation26_spill] sm:$0xff] %v20976_v39  ;;  %6213 = vrot.lane.b32.xlu0 %v20940_v56, %s18824_s23  ;;  %v2863_v63 = vadd.f32 %v26162_v47, %v26161_v4  ;;  %v2862_v2 = vadd.f32 %v26163_v43, %v2468_v0  ;;  %v3255_v45 = vadd.f32 %v20573_v13, %v2860_v20  ;;  %v17365_v10 = vpop.f32.mrf.mxu0  ;;  %v21001_v55 = vmax.f32 %v4116_v36, 0.0  ;;  %v3612_v21 = vpop.f32.mrf.mxu1 }
 0x246   : > { %17458 = vmatprep.mubr.msk.f32.mxu0 %vm4166_vm1, %v20967_v44  ;;  %17407 = vmatmul.mubr.msk.f32.gmra.mxu1 %vm4166_vm1, %v20976_v39  ;;  %v3647_v48 = vadd.f32 %v3592_v5, %v3253_v26  ;;  %v20993_v30 = vmax.f32 %v4115_v22, 0.0  ;;  %v4078_v14 = vmul.f32 %v20629_v51, %v4039_v46  ;;  %v4042_v40 = vadd.f32 %v17365_v10, %v3648_v50 }
 0x247   : > { %17459 = vmatmul.mubr.msk.f32.gmra.mxu0 %vm4166_vm1, %v20976_v39  ;;  %6197 = vrot.lane.b32.xlu1 %v20826_v62, %s18824_s23  ;;  %v3650_v13 = vadd.f32 %v17304_v35, %v3256_v12  ;;  %v3258_v19 = vadd.f32 %v20589_v9, %v2863_v63  ;;  %26165 = vst [vmem:[#allocation43_spill] sm:$0xff] %v21001_v55  ;;  %v3986_v5 = vpop.f32.mrf.mxu0 }
 0x248   : > { %26164 = vst [vmem:[#allocation29_spill] sm:$0xff] %v20993_v30  ;;  %v4118_v16 = vadd.f32 %v20647_v15, %v4079_v57  ;;  %v4117_v23 = vadd.f32 %v20647_v15, %v4078_v14  ;;  %v4081_v27 = vmul.f32 %v20629_v51, %v4042_v40  ;;  %v4041_v52 = vadd.f32 %v3986_v5, %v3647_v48 }
 0x249   : > { %6219 = vrot.lane.b32.xlu0 %v20976_v39, %s18824_s23  ;;  %17409 = vmatprep.mubr.msk.f32.mxu1 %vm4166_vm1, %v20993_v30  ;;  %v3649_v35 = vadd.f32 %v3602_v33, %v3255_v45  ;;  %v17368_v9 = vpop.f32.mrf.mxu0  ;;  %v3257_v20 = vadd.f32 %v20609_v7, %v2862_v2  ;;  %v3652_v38 = vadd.f32 %v17307_v8, %v3258_v19 }
 0x24a   : > { %17461 = vmatprep.mubr.msk.f32.mxu0 %vm4166_vm1, %v20993_v30  ;;  %17410 = vmatmul.mubr.msk.f32.gmra.mxu1 %vm4166_vm1, %v21001_v55  ;;  %v21015_v17 = vmax.f32 %v4117_v23, 0.0  ;;  %v4080_v0 = vmul.f32 %v20629_v51, %v4041_v52  ;;  %v4044_v11 = vadd.f32 %v17368_v9, %v3650_v13  ;;  %v21022_v26 = vmax.f32 %v4118_v16, 0.0 }
 0x24b   : > { %17462 = vmatmul.mubr.msk.f32.gmra.mxu0 %vm4166_vm1, %v21001_v55  ;;  %6199 = vrot.lane.b32.xlu1 %v20837_v41, %s18824_s23  ;;  %v4120_v3 = vadd.f32 %v20647_v15, %v4081_v27  ;;  %v3996_v49 = vpop.f32.mrf.mxu0  ;;  %v3651_v36 = vadd.f32 %v3612_v21, %v3257_v20 }
 0x24c   : > { %26166 = vst [vmem:[#allocation30_spill] sm:$0xff] %v21015_v17  ;;  %26167 = vst [vmem:[#allocation78_spill] sm:$0xff] %v21022_v26  ;;  %v4119_v7 = vadd.f32 %v20647_v15, %v4080_v0  ;;  %v4083_v50 = vmul.f32 %v20629_v51, %v4044_v11  ;;  %v4043_v12 = vadd.f32 %v3996_v49, %v3649_v35  ;;  %17412 = vmatprep.mubr.msk.f32.mxu1 %vm4166_vm1, %v21015_v17 }
 0x24d   : > { %6217 = vrot.lane.b32.xlu0 %v20967_v44, %s18824_s23  ;;  %17464 = vmatprep.mubr.msk.f32.mxu0 %vm4166_vm1, %v21015_v17  ;;  %v17371_v33 = vpop.f32.mrf.mxu0  ;;  %v21042_v46 = vmax.f32 %v4120_v3, 0.0 }
 0x24e   : > { %17413 = vmatmul.mubr.msk.f32.gmra.mxu1 %vm4166_vm1, %v21022_v26  ;;  %v21035_v1 = vmax.f32 %v4119_v7, 0.0  ;;  %v4082_v22 = vmul.f32 %v20629_v51, %v4043_v12  ;;  %v4046_v57 = vadd.f32 %v17371_v33, %v3652_v38  ;;  %v4122_v4 = vadd.f32 %v20647_v15, %v4083_v50 }
 0x24f   : > { %17465 = vmatmul.mubr.msk.f32.gmra.mxu0 %vm4166_vm1, %v21022_v26  ;;  %6201 = vrot.lane.b32.xlu1 %v20855_v42, %s18824_s23  ;;  %26169 = vst [vmem:[#allocation46_spill] sm:$0xff] %v21042_v46  ;;  %v4006_v47 = vpop.f32.mrf.mxu0  ;;  %v25750_v7 = vmov 0.0  }
 0x250   : > { %26168 = vst [vmem:[#allocation31_spill] sm:$0xff] %v21035_v1  ;;  %v4121_v63 = vadd.f32 %v20647_v15, %v4082_v22  ;;  %v4085_v43 = vmul.f32 %v20629_v51, %v4046_v57  ;;  %v4045_v2 = vadd.f32 %v4006_v47, %v3651_v36  ;;  %17415 = vmatprep.mubr.msk.f32.mxu1 %vm4166_vm1, %v21035_v1  ;;  %v21062_v48 = vmax.f32 %v4122_v4, 0.0 }
 0x251   : > { %6223 = vrot.lane.b32.xlu0 %v21001_v55, %s18824_s23  ;;  %17467 = vmatprep.mubr.msk.f32.mxu0 %vm4166_vm1, %v21035_v1  ;;  %6803 = vst.msk [vmem:[#allocation2] sm:$0xff] %vm4166_vm1, %v25750_v7  ;;  %6804 = vst.msk [vmem:[#allocation2 + $0x8] sm:$0xff] %vm4166_vm1, %v25750_v7 }
 0x252   : > { %17416 = vmatmul.mubr.msk.f32.gmra.mxu1 %vm4166_vm1, %v21042_v46  ;;  %v21055_v45 = vmax.f32 %v4121_v63, 0.0  ;;  %v4084_v10 = vmul.f32 %v20629_v51, %v4045_v2  ;;  %26171 = vst [vmem:[#allocation79_spill] sm:$0xff] %v21062_v48  ;;  %v4124_v14 = vadd.f32 %v20647_v15, %v4085_v43  ;;  %5887 = vmatprep.subr.mxu1 %v25750_v7  ;;  %6807 = vst.msk [vmem:[#allocation2 + $0x18] sm:$0xff] %vm4166_vm1, %v25750_v7 }
 0x253   : > { %17468 = vmatmul.mubr.msk.f32.gmra.mxu0 %vm4166_vm1, %v21042_v46  ;;  %6203 = vrot.lane.b32.xlu1 %v20866_v53, %s18824_s23  ;;  %6808 = vst.msk [vmem:[#allocation2 + $0x20] sm:$0xff] %vm4166_vm1, %v25750_v7  ;;  %6810 = vst.msk [vmem:[#allocation2 + $0x30] sm:$0xff] %vm4166_vm1, %v25750_v7 }
 0x254   : > { %26170 = vst [vmem:[#allocation81_spill] sm:$0xff] %v21055_v45  ;;  %v4123_v40 = vadd.f32 %v20647_v15, %v4084_v10  ;;  %17418 = vmatprep.mubr.msk.f32.mxu1 %vm4166_vm1, %v21055_v45  ;;  %17470 = vmatprep.mubr.msk.f32.mxu0 %vm4166_vm1, %v21055_v45  ;;  %v21080_v15 = vmax.f32 %v4124_v14, 0.0  ;;  %6811 = vst.msk [vmem:[#allocation2 + $0x38] sm:$0xff] %vm4166_vm1, %v25750_v7 }
 0x255   : > { %6221 = vrot.lane.b32.xlu0 %v20993_v30, %s18824_s23  ;;  %6813 = vst.msk [vmem:[#allocation2 + $0x48] sm:$0xff] %vm4166_vm1, %v25750_v7  ;;  %6814 = vst.msk [vmem:[#allocation2 + $0x50] sm:$0xff] %vm4166_vm1, %v25750_v7 }
 0x256   : > { %17419 = vmatmul.mubr.msk.f32.gmra.mxu1 %vm4166_vm1, %v21062_v48  ;;  %v21074_v51 = vmax.f32 %v4123_v40, 0.0  ;;  %26173 = vst [vmem:[#allocation32_spill] sm:$0xff] %v21080_v15  ;;  %6816 = vst.msk [vmem:[#allocation2 + $0x60] sm:$0xff] %vm4166_vm1, %v25750_v7 }
 0x257   : > { %17471 = vmatmul.mubr.msk.f32.gmra.mxu0 %vm4166_vm1, %v21062_v48  ;;  %6205 = vrot.lane.b32.xlu1 %v20882_v6, %s18824_s23  ;;  %6817 = vst.msk [vmem:[#allocation2 + $0x68] sm:$0xff] %vm4166_vm1, %v25750_v7  ;;  %6819 = vst.msk [vmem:[#allocation2 + $0x78] sm:$0xff] %vm4166_vm1, %v25750_v7 }
 0x258   : > { %26172 = vst [vmem:[#allocation45_spill] sm:$0xff] %v21074_v51  ;;  %17421 = vmatprep.mubr.msk.f32.mxu1 %vm4166_vm1, %v21074_v51  ;;  %17473 = vmatprep.mubr.msk.f32.mxu0 %vm4166_vm1, %v21074_v51  ;;  %6820 = vst.msk [vmem:[#allocation2 + $0x80] sm:$0xff] %vm4166_vm1, %v25750_v7 }
 0x259   : > { %6227 = vrot.lane.b32.xlu0 %v21022_v26, %s18824_s23  ;;  %6822 = vst.msk [vmem:[#allocation2 + $0x90] sm:$0xff] %vm4166_vm1, %v25750_v7  ;;  %6823 = vst.msk [vmem:[#allocation2 + $0x98] sm:$0xff] %vm4166_vm1, %v25750_v7 }
 0x25a   : > { %17422 = vmatmul.mubr.msk.f32.gmra.mxu1 %vm4166_vm1, %v21080_v15  ;;  %6825 = vst.msk [vmem:[#allocation2 + $0xa8] sm:$0xff] %vm4166_vm1, %v25750_v7  ;;  %6826 = vst.msk [vmem:[#allocation2 + $0xb0] sm:$0xff] %vm4166_vm1, %v25750_v7 }
 0x25b   : > { %17474 = vmatmul.mubr.msk.f32.gmra.mxu0 %vm4166_vm1, %v21080_v15  ;;  %6207 = vrot.lane.b32.xlu1 %v20894_v18, %s18824_s23  ;;  %6828 = vst.msk [vmem:[#allocation2 + $0xc0] sm:$0xff] %vm4166_vm1, %v25750_v7  ;;  %6829 = vst.msk [vmem:[#allocation2 + $0xc8] sm:$0xff] %vm4166_vm1, %v25750_v7 }
 0x25c   : > { %17480 = vmatprep.mubr.msk.f32.mxu1 %vm4166_vm1, %v20677_v58  ;;  %6831 = vst.msk [vmem:[#allocation2 + $0xd8] sm:$0xff] %vm4166_vm1, %v25750_v7  ;;  %6832 = vst.msk [vmem:[#allocation2 + $0xe0] sm:$0xff] %vm4166_vm1, %v25750_v7 }
 0x25d   : > { %6225 = vrot.lane.b32.xlu0 %v21015_v17, %s18824_s23  ;;  %6834 = vst.msk [vmem:[#allocation2 + $0xf0] sm:$0xff] %vm4166_vm1, %v25750_v7  ;;  %6835 = vst.msk [vmem:[#allocation2 + $0xf8] sm:$0xff] %vm4166_vm1, %v25750_v7 }
 0x25e   : > { %17481 = vmatmul.mubr.msk.f32.vlgmr.msra.gmra.mxu1 %vm4166_vm1, %v20668_v61  ;;  %6837 = vst.msk [vmem:[#allocation2 + $0x108] sm:$0xff] %vm4166_vm1, %v25750_v7  ;;  %6838 = vst.msk [vmem:[#allocation2 + $0x110] sm:$0xff] %vm4166_vm1, %v25750_v7 }
 0x25f   : > { %17483 = vmatprep.mubr.msk.f32.mxu1 %vm4166_vm1, %v20708_v25  ;;  %6840 = vst.msk [vmem:[#allocation2 + $0x120] sm:$0xff] %vm4166_vm1, %v25750_v7  ;;  %6841 = vst.msk [vmem:[#allocation2 + $0x128] sm:$0xff] %vm4166_vm1, %v25750_v7 }
 0x260   : > { %6843 = vst.msk [vmem:[#allocation2 + $0x138] sm:$0xff] %vm4166_vm1, %v25750_v7  ;;  %6844 = vst.msk [vmem:[#allocation2 + $0x140] sm:$0xff] %vm4166_vm1, %v25750_v7 }
 0x261   : > { %6231 = vrot.lane.b32.xlu0 %v21042_v46, %s18824_s23  ;;  %6846 = vst.msk [vmem:[#allocation2 + $0x150] sm:$0xff] %vm4166_vm1, %v25750_v7  ;;  %6847 = vst.msk [vmem:[#allocation2 + $0x158] sm:$0xff] %vm4166_vm1, %v25750_v7 }
 0x262   : > { %17484 = vmatmul.mubr.msk.f32.gmra.mxu1 %vm4166_vm1, %v20691_v32  ;;  %6849 = vst.msk [vmem:[#allocation2 + $0x168] sm:$0xff] %vm4166_vm1, %v25750_v7  ;;  %6850 = vst.msk [vmem:[#allocation2 + $0x170] sm:$0xff] %vm4166_vm1, %v25750_v7 }
 0x263   : > { %17486 = vmatprep.mubr.msk.f32.mxu1 %vm4166_vm1, %v20739_v54  ;;  %6852 = vst.msk [vmem:[#allocation2 + $0x180] sm:$0xff] %vm4166_vm1, %v25750_v7  ;;  %6853 = vst.msk [vmem:[#allocation2 + $0x188] sm:$0xff] %vm4166_vm1, %v25750_v7 }
 0x264   : > { %6855 = vst.msk [vmem:[#allocation2 + $0x198] sm:$0xff] %vm4166_vm1, %v25750_v7  ;;  %6856 = vst.msk [vmem:[#allocation2 + $0x1a0] sm:$0xff] %vm4166_vm1, %v25750_v7 }
 0x265   : > { %6229 = vrot.lane.b32.xlu0 %v21035_v1, %s18824_s23  ;;  %10429 = vst.msk [vmem:[#allocation3] sm:$0xff] %vm4166_vm1, %v25750_v7  ;;  %10430 = vst.msk [vmem:[#allocation3 + $0x8] sm:$0xff] %vm4166_vm1, %v25750_v7 }
 0x266   : > { %17487 = vmatmul.mubr.msk.f32.gmra.mxu1 %vm4166_vm1, %v20750_v29  ;;  %10432 = vst.msk [vmem:[#allocation3 + $0x18] sm:$0xff] %vm4166_vm1, %v25750_v7  ;;  %10433 = vst.msk [vmem:[#allocation3 + $0x20] sm:$0xff] %vm4166_vm1, %v25750_v7 }
 0x267   : > { %17489 = vmatprep.mubr.msk.f32.mxu1 %vm4166_vm1, %v20768_v34  ;;  %10435 = vst.msk [vmem:[#allocation3 + $0x30] sm:$0xff] %vm4166_vm1, %v25750_v7  ;;  %10436 = vst.msk [vmem:[#allocation3 + $0x38] sm:$0xff] %vm4166_vm1, %v25750_v7 }
 0x268   : > { %10438 = vst.msk [vmem:[#allocation3 + $0x48] sm:$0xff] %vm4166_vm1, %v25750_v7  ;;  %10439 = vst.msk [vmem:[#allocation3 + $0x50] sm:$0xff] %vm4166_vm1, %v25750_v7 }
 0x269   : > { %6235 = vrot.lane.b32.xlu0 %v21062_v48, %s18824_s23  ;;  %10441 = vst.msk [vmem:[#allocation3 + $0x60] sm:$0xff] %vm4166_vm1, %v25750_v7  ;;  %10442 = vst.msk [vmem:[#allocation3 + $0x68] sm:$0xff] %vm4166_vm1, %v25750_v7 }
 0x26a   : > { %17490 = vmatmul.mubr.msk.f32.gmra.mxu1 %vm4166_vm1, %v20779_v60  ;;  %10444 = vst.msk [vmem:[#allocation3 + $0x78] sm:$0xff] %vm4166_vm1, %v25750_v7  ;;  %10445 = vst.msk [vmem:[#allocation3 + $0x80] sm:$0xff] %vm4166_vm1, %v25750_v7 }
 0x26b   : > { %17492 = vmatprep.mubr.msk.f32.mxu1 %vm4166_vm1, %v20797_v24  ;;  %10447 = vst.msk [vmem:[#allocation3 + $0x90] sm:$0xff] %vm4166_vm1, %v25750_v7  ;;  %10448 = vst.msk [vmem:[#allocation3 + $0x98] sm:$0xff] %vm4166_vm1, %v25750_v7 }
 0x26c   : > { %10450 = vst.msk [vmem:[#allocation3 + $0xa8] sm:$0xff] %vm4166_vm1, %v25750_v7  ;;  %10451 = vst.msk [vmem:[#allocation3 + $0xb0] sm:$0xff] %vm4166_vm1, %v25750_v7 }
 0x26d   : > { %6233 = vrot.lane.b32.xlu0 %v21055_v45, %s18824_s23  ;;  %10453 = vst.msk [vmem:[#allocation3 + $0xc0] sm:$0xff] %vm4166_vm1, %v25750_v7  ;;  %10454 = vst.msk [vmem:[#allocation3 + $0xc8] sm:$0xff] %vm4166_vm1, %v25750_v7 }
 0x26e   : > { %17493 = vmatmul.mubr.msk.f32.gmra.mxu1 %vm4166_vm1, %v20808_v28  ;;  %10456 = vst.msk [vmem:[#allocation3 + $0xd8] sm:$0xff] %vm4166_vm1, %v25750_v7  ;;  %10457 = vst.msk [vmem:[#allocation3 + $0xe0] sm:$0xff] %vm4166_vm1, %v25750_v7 }
 0x26f   : > { %17495 = vmatprep.mubr.msk.f32.mxu1 %vm4166_vm1, %v20826_v62  ;;  %10459 = vst.msk [vmem:[#allocation3 + $0xf0] sm:$0xff] %vm4166_vm1, %v25750_v7  ;;  %10460 = vst.msk [vmem:[#allocation3 + $0xf8] sm:$0xff] %vm4166_vm1, %v25750_v7 }
 0x270   : > { %10462 = vst.msk [vmem:[#allocation3 + $0x108] sm:$0xff] %vm4166_vm1, %v25750_v7  ;;  %10463 = vst.msk [vmem:[#allocation3 + $0x110] sm:$0xff] %vm4166_vm1, %v25750_v7 }
 0x271   : > { %6239 = vrot.lane.b32.xlu0 %v21080_v15, %s18824_s23  ;;  %10465 = vst.msk [vmem:[#allocation3 + $0x120] sm:$0xff] %vm4166_vm1, %v25750_v7  ;;  %10466 = vst.msk [vmem:[#allocation3 + $0x128] sm:$0xff] %vm4166_vm1, %v25750_v7 }
 0x272   : > { %17496 = vmatmul.mubr.msk.f32.gmra.mxu1 %vm4166_vm1, %v20837_v41  ;;  %10468 = vst.msk [vmem:[#allocation3 + $0x138] sm:$0xff] %vm4166_vm1, %v25750_v7  ;;  %10469 = vst.msk [vmem:[#allocation3 + $0x140] sm:$0xff] %vm4166_vm1, %v25750_v7 }
 0x273   : > { %17498 = vmatprep.mubr.msk.f32.mxu1 %vm4166_vm1, %v20855_v42  ;;  %10471 = vst.msk [vmem:[#allocation3 + $0x150] sm:$0xff] %vm4166_vm1, %v25750_v7  ;;  %10472 = vst.msk [vmem:[#allocation3 + $0x158] sm:$0xff] %vm4166_vm1, %v25750_v7 }
 0x274   : > { %10474 = vst.msk [vmem:[#allocation3 + $0x168] sm:$0xff] %vm4166_vm1, %v25750_v7  ;;  %10475 = vst.msk [vmem:[#allocation3 + $0x170] sm:$0xff] %vm4166_vm1, %v25750_v7 }
 0x275   : > { %6237 = vrot.lane.b32.xlu0 %v21074_v51, %s18824_s23  ;;  %10477 = vst.msk [vmem:[#allocation3 + $0x180] sm:$0xff] %vm4166_vm1, %v25750_v7  ;;  %10478 = vst.msk [vmem:[#allocation3 + $0x188] sm:$0xff] %vm4166_vm1, %v25750_v7 }
 0x276   : > { %17499 = vmatmul.mubr.msk.f32.gmra.mxu1 %vm4166_vm1, %v20866_v53  ;;  %10480 = vst.msk [vmem:[#allocation3 + $0x198] sm:$0xff] %vm4166_vm1, %v25750_v7  ;;  %10481 = vst.msk [vmem:[#allocation3 + $0x1a0] sm:$0xff] %vm4166_vm1, %v25750_v7 }
 0x277   : > { %17501 = vmatprep.mubr.msk.f32.mxu1 %vm4166_vm1, %v20882_v6 }
 0x27a   : > { %17502 = vmatmul.mubr.msk.f32.gmra.mxu1 %vm4166_vm1, %v20894_v18 }
 0x27b   : > { %17504 = vmatprep.mubr.msk.f32.mxu1 %vm4166_vm1, %v20911_v37 }
 0x27e   : > { %17505 = vmatmul.mubr.msk.f32.gmra.mxu1 %vm4166_vm1, %v20896_v31 }
 0x27f   : > { %17507 = vmatprep.mubr.msk.f32.mxu1 %vm4166_vm1, %v20940_v56 }
 0x282   : > { %17508 = vmatmul.mubr.msk.f32.gmra.mxu1 %vm4166_vm1, %v20938_v59 }
 0x283   : > { %17510 = vmatprep.mubr.msk.f32.mxu1 %vm4166_vm1, %v20967_v44 }
 0x286   : > { %17511 = vmatmul.mubr.msk.f32.gmra.mxu1 %vm4166_vm1, %v20976_v39 }
 0x287   : > { %17513 = vmatprep.mubr.msk.f32.mxu1 %vm4166_vm1, %v20993_v30 }
 0x28a   : > { %17514 = vmatmul.mubr.msk.f32.gmra.mxu1 %vm4166_vm1, %v21001_v55 }
 0x28b   : > { %17516 = vmatprep.mubr.msk.f32.mxu1 %vm4166_vm1, %v21015_v17 }
 0x28c   : > { %v21158_v13 = vpop.permute.xlu1 %6179 }
 0x28d   : > { %26174 = vst [vmem:[#allocation49_spill] sm:$0xff] %v21158_v13 }
 0x28e   : > { %17517 = vmatmul.mubr.msk.f32.gmra.mxu1 %vm4166_vm1, %v21022_v26  ;;  %v21184_v27 = vpop.permute.xlu0 %6177 }
 0x28f   : > { %17519 = vmatprep.mubr.msk.f32.mxu1 %vm4166_vm1, %v21035_v1  ;;  %26180 = vst [vmem:[#allocation87_spill] sm:$0xff] %v21184_v27 }
 0x291   : > { %v21164_v19 = vpop.permute.xlu1 %6183 }
 0x292   : > { %26175 = vst [vmem:[#allocation84_spill] sm:$0xff] %v21164_v19  ;;  %17520 = vmatmul.mubr.msk.f32.gmra.mxu1 %vm4166_vm1, %v21042_v46 }
 0x293   : > { %17522 = vmatprep.mubr.msk.f32.mxu1 %vm4166_vm1, %v21055_v45 }
 0x295   : > { %v21170_v8 = vpop.permute.xlu1 %6181 }
 0x296   : > { %26176 = vst [vmem:[#allocation80_spill] sm:$0xff] %v21170_v8  ;;  %17523 = vmatmul.mubr.msk.f32.gmra.mxu1 %vm4166_vm1, %v21062_v48 }
 0x297   : > { %17525 = vmatprep.mubr.msk.f32.mxu1 %vm4166_vm1, %v21074_v51 }
 0x299   : > { %v21178_v16 = vpop.permute.xlu1 %6187 }
 0x29a   : > { %17526 = vmatmul.mubr.msk.f32.gmra.mxu1 %vm4166_vm1, %v21080_v15  ;;  %26177 = vst [vmem:[#allocation33_spill] sm:$0xff] %v21178_v16 }
 0x29d   : > { %v21180_v5 = vpop.permute.xlu1 %6185 }
 0x29e   : > { %26178 = vst [vmem:[#allocation48_spill] sm:$0xff] %v21180_v5 }
 0x2a1   : > { %v21182_v23 = vpop.permute.xlu1 %6191 }
 0x2a2   : > { %26179 = vst [vmem:[#allocation34_spill] sm:$0xff] %v21182_v23 }
 0x2a5   : > { %v21186_v52 = vpop.permute.xlu1 %6189 }
 0x2a6   : > { %26181 = vst [vmem:[#allocation82_spill] sm:$0xff] %v21186_v52 }
 0x2ad   : > { %v21192_v20 = vpop.permute.xlu1 %6211 }
 0x2ae   : > { %26183 = vst [vmem:[#allocation90_spill] sm:$0xff] %v21192_v20  ;;  %v18556_v11 = vpack.i.bf16 %v21158_v13, %v21192_v20 }
 0x2af   : > { %v21188_v35 = vpop.permute.xlu0 %6209 }
 0x2b0   : > { %26182 = vst [vmem:[#allocation35_spill] sm:$0xff] %v21188_v35  ;;  %v18554_v9 = vpack.i.bf16 %v21184_v27, %v21188_v35 }
 0x2b1   : > { %v21356_v12 = vpop.permute.xlu1 %6193 }
 0x2b2   : > { %18555 = vxpose.xlu0.b32.start [1/16] (narrow) %v18554_v9, 16  ;;  %26188 = vst [vmem:[#allocation36_spill] sm:$0xff] %v21356_v12 }
 0x2b3   : > { %v21194_v0 = vpop.permute.xlu0 %6215 }
 0x2b4   : > { %26184 = vst [vmem:[#allocation83_spill] sm:$0xff] %v21194_v0  ;;  %v18560_v49 = vpack.i.bf16 %v21164_v19, %v21194_v0 }
 0x2b5   : > { %v21364_v57 = vpop.permute.xlu1 %6195 }
 0x2b6   : > { %18557 = vxpose.xlu0.b32.cont [2/16] (narrow) %v18556_v11, 16  ;;  %26190 = vst [vmem:[#allocation93_spill] sm:$0xff] %v21364_v57 }
 0x2b7   : > { %v21198_v38 = vpop.permute.xlu0 %6213 }
 0x2b8   : > { %26185 = vst [vmem:[#allocation77_spill] sm:$0xff] %v21198_v38  ;;  %v18558_v21 = vpack.i.bf16 %v21170_v8, %v21198_v38 }
 0x2b9   : > { %v21372_v43 = vpop.permute.xlu1 %6197 }
 0x2ba   : > { %18559 = vxpose.xlu0.b32.cont [3/16] (narrow) %v18558_v21, 16  ;;  %26193 = vst [vmem:[#allocation37_spill] sm:$0xff] %v21372_v43 }
 0x2bb   : > { %v21202_v3 = vpop.permute.xlu0 %6219 }
 0x2bc   : > { %26186 = vst [vmem:[#allocation52_spill] sm:$0xff] %v21202_v3  ;;  %v18564_v22 = vpack.i.bf16 %v21178_v16, %v21202_v3 }
 0x2bd   : > { %v21380_v40 = vpop.permute.xlu1 %6199 }
 0x2be   : > { %18561 = vxpose.xlu0.b32.cont [4/16] (narrow) %v18560_v49, 16  ;;  %26195 = vst [vmem:[#allocation54_spill] sm:$0xff] %v21380_v40 }
 0x2bf   : > { %v21354_v50 = vpop.permute.xlu0 %6217 }
 0x2c0   : > { %26187 = vst [vmem:[#allocation51_spill] sm:$0xff] %v21354_v50  ;;  %v18562_v33 = vpack.i.bf16 %v21180_v5, %v21354_v50 }
 0x2c1   : > { %v21388_v49 = vpop.permute.xlu1 %6201 }
 0x2c2   : > { %18563 = vxpose.xlu0.b32.cont [5/16] (narrow) %v18562_v33, 16  ;;  %26198 = vst [vmem:[#allocation101_spill] sm:$0xff] %v21388_v49 }
 0x2c3   : > { %v21360_v36 = vpop.permute.xlu0 %6223 }
 0x2c4   : > { %26189 = vst [vmem:[#allocation85_spill] sm:$0xff] %v21360_v36  ;;  %v18568_v2 = vpack.i.bf16 %v21182_v23, %v21360_v36 }
 0x2c6   : > { %18565 = vxpose.xlu0.b32.cont [6/16] (narrow) %v18564_v22, 16 }
 0x2c7   : > { %v21366_v4 = vpop.permute.xlu0 %6221 }
 0x2c8   : > { %26191 = vst [vmem:[#allocation96_spill] sm:$0xff] %v21366_v4  ;;  %v18566_v47 = vpack.i.bf16 %v21186_v52, %v21366_v4 }
 0x2ca   : > { %18567 = vxpose.xlu0.b32.cont [7/16] (narrow) %v18566_v47, 16 }
 0x2cb   : > { %v21370_v63 = vpop.permute.xlu0 %6227 }
 0x2cc   : > { %26192 = vst [vmem:[#allocation86_spill] sm:$0xff] %v21370_v63  ;;  %v18572_v11 = vpack.i.bf16 %v21364_v57, %v21370_v63 }
 0x2ce   : > { %18569 = vxpose.xlu0.b32.cont [8/16] (narrow) %v18568_v2, 16  ;;  %v21399_v2 = vld [vmem:[%s25734_s5] ss:$0 sm:$0xff] }
 0x2cf   : > { %v21376_v10 = vpop.permute.xlu0 %6225 }
 0x2d0   : > { %26194 = vst [vmem:[#allocation55_spill] sm:$0xff] %v21376_v10  ;;  %v18570_v14 = vpack.i.bf16 %v21356_v12, %v21376_v10 }
 0x2d2   : > { %18571 = vxpose.xlu0.b32.cont [9/16] (narrow) %v18570_v14, 16  ;;  %v21401_v14 = vpop.permute.xlu1 %6203 }
 0x2d3   : > { %v21382_v9 = vpop.permute.xlu0 %6231  ;;  %26200 = vst [vmem:[#allocation39_spill] sm:$0xff] %v21401_v14 }
 0x2d4   : > { %26196 = vst [vmem:[#allocation38_spill] sm:$0xff] %v21382_v9  ;;  %v18576_v47 = vpack.i.bf16 %v21380_v40, %v21382_v9 }
 0x2d6   : > { %18573 = vxpose.xlu0.b32.cont [10/16] (narrow) %v18572_v11, 16  ;;  %v21430_v55 = vpop.permute.xlu1 %6205 }
 0x2d7   : > { %v21386_v21 = vpop.permute.xlu0 %6229  ;;  %26203 = vst [vmem:[#allocation40_spill] sm:$0xff] %v21430_v55 }
 0x2d8   : > { %26197 = vst [vmem:[#allocation88_spill] sm:$0xff] %v21386_v21  ;;  %v18574_v33 = vpack.i.bf16 %v21372_v43, %v21386_v21 }
 0x2da   : > { %18575 = vxpose.xlu0.b32.cont [11/16] (narrow) %v18574_v33, 16  ;;  %v21447_v18 = vpop.permute.xlu1 %6207 }
 0x2db   : > { %v21392_v22 = vpop.permute.xlu0 %6235  ;;  %26206 = vst [vmem:[#allocation107_spill] sm:$0xff] %v21447_v18 }
 0x2dc   : > { %26199 = vst [vmem:[#allocation89_spill] sm:$0xff] %v21392_v22 }
 0x2de   : > { %18577 = vxpose.xlu0.b32.cont [12/16] (narrow) %v18576_v47, 16  ;;  %v17378_v11 = vpop.f32.mrf.mxu1  ;;  %v21406_v15 = vpop.f32.mrf.mxu0 }
 0x2df   : > { %v21404_v7 = vadd.f32 %v17378_v11, %v21399_v2  ;;  %v21408_v33 = vpop.permute.xlu0 %6233 }
 0x2e0   : > { %26201 = vst [vmem:[#allocation58_spill] sm:$0xff] %v21408_v33  ;;  %v4329_v51 = vpop.f32.mrf.mxu1  ;;  %v18578_v48 = vpack.i.bf16 %v21388_v49, %v21408_v33  ;;  %v21415_v46 = vpop.f32.mrf.mxu0 }
 0x2e1   : > { %v21413_v45 = vadd.f32 %v21399_v2, %v4329_v51  ;;  %v18580_v51 = vpack.i.bf16 %v21401_v14, %v21392_v22 }
 0x2e2   : > { %18579 = vxpose.xlu0.b32.cont [13/16] (narrow) %v18578_v48, 16  ;;  %v17381_v47 = vpop.f32.mrf.mxu1  ;;  %v21420_v11 = vpop.f32.mrf.mxu0 }
 0x2e3   : > { %v21418_v1 = vadd.f32 %v17381_v47, %v21399_v2  ;;  %v21422_v26 = vpop.permute.xlu0 %6239  ;;  %16048 = vmatprep.mubr.msk.f32.mxu0 %vm4956_vm2, %v21413_v45 }
 0x2e4   : > { %26202 = vst [vmem:[#allocation57_spill] sm:$0xff] %v21422_v26  ;;  %v21426_v17 = vpop.f32.mrf.mxu1  ;;  %v21432_v30 = vpop.f32.mrf.mxu0  ;;  %v18584_v53 = vpack.i.bf16 %v21447_v18, %v21422_v26 }
 0x2e6   : > { %18581 = vxpose.xlu0.b32.cont [14/16] (narrow) %v18580_v51, 16  ;;  %v17384_v48 = vpop.f32.mrf.mxu1  ;;  %v21437_v39 = vpop.f32.mrf.mxu0 }
 0x2e7   : > { %v21435_v47 = vadd.f32 %v17384_v48, %v21399_v2  ;;  %v21439_v44 = vpop.permute.xlu0 %6237 }
 0x2e8   : > { %26205 = vst [vmem:[#allocation104_spill] sm:$0xff] %v21439_v44  ;;  %v21441_v59 = vpop.f32.mrf.mxu1  ;;  %v18582_v56 = vpack.i.bf16 %v21430_v55, %v21439_v44  ;;  %v21445_v31 = vpop.f32.mrf.mxu0 }
 0x2e9   : > { %26204 = vst [vmem:[#allocation91_spill] sm:$0xff] %v21435_v47  ;;  %v26233_v47 = vmov 0.0  }
 0x2ea   : > { %18583 = vxpose.xlu0.b32.cont [15/16] (narrow) %v18582_v56, 16  ;;  %v17387_v37 = vpop.f32.mrf.mxu1  ;;  %v21452_v48 = vpop.f32.mrf.mxu0 }
 0x2eb   : > { %v21450_v51 = vadd.f32 %v17387_v37, %v21399_v2 }
 0x2ec   : > { %v21454_v6 = vpop.f32.mrf.mxu1  ;;  %v21458_v42 = vpop.f32.mrf.mxu0 }
 0x2ed   : > { %26207 = vst [vmem:[#allocation92_spill] sm:$0xff] %v21450_v51  ;;  %26208 = vst [vmem:[#allocation41_spill] sm:$0xff] %v21454_v6 }
 0x2ee   : > { %18585 = vxpose.xlu0.b32.end [16/16] (narrow) %v18584_v53, 16  ;;  %v17390_v41 = vpop.f32.mrf.mxu1  ;;  %v21463_v56 = vpop.f32.mrf.mxu0 }
 0x2ef   : > { %v21461_v62 = vadd.f32 %v17390_v41, %v21399_v2 }
 0x2f0   : > { %v21465_v28 = vpop.f32.mrf.mxu1  ;;  %v21467_v37 = vpop.f32.mrf.mxu0 }
 0x2f1   : > { %26209 = vst [vmem:[#allocation61_spill] sm:$0xff] %v21461_v62  ;;  %26210 = vst [vmem:[#allocation60_spill] sm:$0xff] %v21465_v28 }
 0x2f2   : > { %v17393_v24 = vpop.f32.mrf.mxu1  ;;  %v21472_v34 = vpop.f32.mrf.mxu0 }
 0x2f3   : > { %v21470_v60 = vadd.f32 %v17393_v24, %v21399_v2 }
 0x2f4   : > { %v21474_v29 = vpop.f32.mrf.mxu1  ;;  %v21476_v54 = vpop.f32.mrf.mxu0 }
 0x2f5   : > { %26211 = vst [vmem:[#allocation42_spill] sm:$0xff] %v21470_v60  ;;  %26212 = vst [vmem:[#allocation94_spill] sm:$0xff] %v21474_v29 }
 0x2f6   : > { %v17396_v53 = vpop.f32.mrf.mxu1  ;;  %v21481_v32 = vpop.f32.mrf.mxu0 }
 0x2f7   : > { %v21479_v41 = vadd.f32 %v17396_v53, %v21399_v2 }
 0x2f8   : > { %v21483_v25 = vpop.f32.mrf.mxu1  ;;  %v21485_v61 = vpop.f32.mrf.mxu0 }
 0x2f9   : > { %26213 = vst [vmem:[#allocation95_spill] sm:$0xff] %v21479_v41  ;;  %26214 = vst [vmem:[#allocation44_spill] sm:$0xff] %v21483_v25 }
 0x2fa   : > { %v17399_v58 = vpop.f32.mrf.mxu1 }
 0x2fb   : > { %v21488_v24 = vadd.f32 %v17399_v58, %v21399_v2  ;;  %v17451_v60 = vpop.f32.mrf.mxu0 }
 0x2fc   : > { %v21490_v62 = vpop.f32.mrf.mxu1 }
 0x2fd   : > { %26215 = vst [vmem:[#allocation64_spill] sm:$0xff] %v21488_v24  ;;  %26216 = vst [vmem:[#allocation63_spill] sm:$0xff] %v21490_v62  ;;  %v4633_v29 = vpop.f32.mrf.mxu0 }
 0x2fe   : > { %v17402_v27 = vpop.f32.mrf.mxu1 }
 0x2ff   : > { %v21493_v35 = vadd.f32 %v17402_v27, %v21399_v2  ;;  %v21495_v53 = vpop.f32.mrf.mxu0 }
 0x300   : > { %v21497_v41 = vpop.f32.mrf.mxu1 }
 0x301   : > { %26217 = vst [vmem:[#allocation47_spill] sm:$0xff] %v21493_v35  ;;  %26218 = vst [vmem:[#allocation97_spill] sm:$0xff] %v21497_v41  ;;  %v21499_v13 = vpop.f32.mrf.mxu0 }
 0x302   : > { %v17405_v25 = vpop.f32.mrf.mxu1 }
 0x303   : > { %v21502_v20 = vadd.f32 %v17405_v25, %v21399_v2  ;;  %v21504_v58 = vpop.f32.mrf.mxu0 }
 0x304   : > { %v21506_v24 = vpop.f32.mrf.mxu1 }
 0x305   : > { %26219 = vst [vmem:[#allocation98_spill] sm:$0xff] %v21502_v20  ;;  %26220 = vst [vmem:[#allocation50_spill] sm:$0xff] %v21506_v24  ;;  %v21508_v62 = vpop.f32.mrf.mxu0 }
 0x306   : > { %v17408_v8 = vpop.f32.mrf.mxu1 }
 0x307   : > { %v21511_v27 = vadd.f32 %v17408_v8, %v21399_v2  ;;  %v21513_v35 = vpop.f32.mrf.mxu0 }
 0x308   : > { %v21515_v28 = vpop.f32.mrf.mxu1 }
 0x309   : > { %26221 = vst [vmem:[#allocation67_spill] sm:$0xff] %v21511_v27  ;;  %26222 = vst [vmem:[#allocation99_spill] sm:$0xff] %v21515_v28  ;;  %v21517_v41 = vpop.f32.mrf.mxu0 }
 0x30a   : > { %v17411_v38 = vpop.f32.mrf.mxu1 }
 0x30b   : > { %v21520_v25 = vadd.f32 %v17411_v38, %v21399_v2  ;;  %v21522_v20 = vpop.f32.mrf.mxu0 }
 0x30c   : > { %v21524_v19 = vpop.f32.mrf.mxu1 }
 0x30d   : > { %26223 = vst [vmem:[#allocation70_spill] sm:$0xff] %v21520_v25  ;;  %26224 = vst [vmem:[#allocation100_spill] sm:$0xff] %v21524_v19  ;;  %v21526_v24 = vpop.f32.mrf.mxu0 }
 0x30e   : > { %v17414_v51 = vpop.f32.mrf.mxu1 }
 0x30f   : > { %v21529_v8 = vadd.f32 %v17414_v51, %v21399_v2  ;;  %v17466_v27 = vpop.f32.mrf.mxu0 }
 0x310   : > { %v21531_v0 = vpop.f32.mrf.mxu1 }
 0x311   : > { %26225 = vst [vmem:[#allocation66_spill] sm:$0xff] %v21529_v8  ;;  %26226 = vst [vmem:[#allocation53_spill] sm:$0xff] %v21531_v0  ;;  %v4683_v28 = vpop.f32.mrf.mxu0  ;;  %v21546_v0 = vld [vmem:[%s25736_s7] ss:$0 sm:$0xff] }
 0x312   : > { %v17417_v5 = vpop.f32.mrf.mxu1 }
 0x313   : > { %v21534_v50 = vadd.f32 %v17417_v5, %v21399_v2  ;;  %v17469_v38 = vpop.f32.mrf.mxu0 }
 0x314   : > { %v21536_v25 = vpop.f32.mrf.mxu1 }
 0x315   : > { %26227 = vst [vmem:[#allocation56_spill] sm:$0xff] %v21534_v50  ;;  %26228 = vst [vmem:[#allocation102_spill] sm:$0xff] %v21536_v25  ;;  %v4693_v16 = vpop.f32.mrf.mxu0 }
 0x316   : > { %v17420_v3 = vpop.f32.mrf.mxu1 }
 0x317   : > { %v21539_v19 = vadd.f32 %v17420_v3, %v21399_v2  ;;  %v17472_v52 = vpop.f32.mrf.mxu0  ;;  %v4639_v3 = vadd.f32 %v17451_v60, %v21546_v0 }
 0x318   : > { %v21541_v6 = vpop.f32.mrf.mxu1 }
 0x319   : > { %26229 = vst [vmem:[#allocation69_spill] sm:$0xff] %v21539_v19  ;;  %26230 = vst [vmem:[#allocation59_spill] sm:$0xff] %v21541_v6  ;;  %v4703_v51 = vpop.f32.mrf.mxu0 }
 0x31a   : > { %v17423_v8 = vpop.f32.mrf.mxu1 }
 0x31b   : > { %v21549_v5 = vadd.f32 %v17423_v8, %v21399_v2  ;;  %v17475_v50 = vpop.f32.mrf.mxu0 }
 0x31c   : > { %v4719_v25 = vadd.f32 %v17475_v50, %v21546_v0  ;;  %v21552_v4 = vpop.f32.mrf.mxu1  ;;  %v4709_v50 = vadd.f32 %v17472_v52, %v21546_v0  ;;  %v4624_v52 = vadd.f32 %v21546_v0, %v21485_v61 }
 0x31d   : > { %26231 = vst [vmem:[#allocation62_spill] sm:$0xff] %v21549_v5  ;;  %26232 = vst [vmem:[#allocation103_spill] sm:$0xff] %v21552_v4  ;;  %v4713_v19 = vpop.f32.mrf.mxu0  ;;  %v4634_v5 = vadd.f32 %v21546_v0, %v4633_v29 }
 0x31e   : > { %v4714_v6 = vadd.f32 %v21546_v0, %v4713_v19  ;;  %16016 = vmatprep.subr.msk.mxu0 %vm4956_vm2, %v4719_v25  ;;  %v21557_v23 = vpop.f32.mrf.mxu1  ;;  %v4629_v19 = vadd.f32 %v21481_v32, %v21546_v0  ;;  %v4704_v25 = vadd.f32 %v21546_v0, %v4703_v51  ;;  %v4619_v51 = vadd.f32 %v21472_v34, %v21546_v0 }
 0x31f   : > { %16017 = vmatpush3.xpose.msk.msra.mxu0 %vm4956_vm2, %v4639_v3  ;;  %v4609_v34 = vadd.f32 %v21463_v56, %v21546_v0 }
 0x320   : > { %16018 = vmatprep.subr.msk.mxu0 %vm4956_vm2, %v4714_v6  ;;  %v21561_v8 = vpop.f32.mrf.mxu1 }
 0x322   : > { %v21565_v4 = vpop.f32.mrf.mxu1 }
 0x323   : > { %16019 = vmatpush3.xpose.msk.msra.mxu0 %vm4956_vm2, %v4634_v5  ;;  %v4699_v5 = vadd.f32 %v17469_v38, %v21546_v0  ;;  %v4614_v38 = vadd.f32 %v21546_v0, %v21476_v54  ;;  %v4604_v54 = vadd.f32 %v21546_v0, %v21467_v37 }
 0x324   : > { %16020 = vmatprep.subr.msk.mxu0 %vm4956_vm2, %v4709_v50  ;;  %v21569_v60 = vpop.f32.mrf.mxu1  ;;  %v4694_v50 = vadd.f32 %v21546_v0, %v4693_v16  ;;  %v4684_v16 = vadd.f32 %v21546_v0, %v4683_v28 }
 0x326   : > { %v21574_v6 = vpop.f32.mrf.mxu1 }
 0x327   : > { %16021 = vmatpush3.xpose.msk.msra.mxu0 %vm4956_vm2, %v4629_v19 }
 0x328   : > { %16022 = vmatprep.subr.msk.mxu0 %vm4956_vm2, %v4704_v25  ;;  %v21578_v29 = vpop.f32.mrf.mxu1  ;;  %v4689_v25 = vadd.f32 %v17466_v27, %v21546_v0  ;;  %v4679_v27 = vadd.f32 %v21522_v20, %v21546_v0  ;;  %v4674_v20 = vadd.f32 %v21546_v0, %v21526_v24 }
 0x32a   : > { %v21583_v3 = vpop.f32.mrf.mxu1 }
 0x32b   : > { %16023 = vmatpush3.xpose.msk.msra.mxu0 %vm4956_vm2, %v4624_v52 }
 0x32c   : > { %16024 = vmatprep.subr.msk.mxu0 %vm4956_vm2, %v4699_v5  ;;  %v21587_v32 = vpop.f32.mrf.mxu1 }
 0x32e   : > { %v17494_v19 = vpop.f32.mrf.mxu1 }
 0x32f   : > { %16025 = vmatpush3.xpose.msk.msra.mxu0 %vm4956_vm2, %v4619_v51 }
 0x330   : > { %16026 = vmatprep.subr.msk.mxu0 %vm4956_vm2, %v4694_v50  ;;  %v4837_v61 = vpop.f32.mrf.mxu1 }
 0x332   : > { %v17497_v52 = vpop.f32.mrf.mxu1 }
 0x333   : > { %16027 = vmatpush3.xpose.msk.msra.mxu0 %vm4956_vm2, %v4614_v38  ;;  %v21611_v38 = vld [vmem:[%s25738_s9] ss:$0 sm:$0xff] }
 0x334   : > { %16028 = vmatprep.subr.msk.mxu0 %vm4956_vm2, %v4689_v25  ;;  %v4847_v5 = vpop.f32.mrf.mxu1 }
 0x336   : > { %v17500_v51 = vpop.f32.mrf.mxu1 }
 0x337   : > { %16029 = vmatpush3.xpose.msk.msra.mxu0 %vm4956_vm2, %v4609_v34  ;;  %v4599_v34 = vadd.f32 %v21452_v48, %v21546_v0  ;;  %v4594_v48 = vadd.f32 %v21546_v0, %v21458_v42  ;;  %v4589_v42 = vadd.f32 %v21437_v39, %v21546_v0  ;;  %v4584_v39 = vadd.f32 %v21546_v0, %v21445_v31 }
 0x338   : > { %16030 = vmatprep.subr.msk.mxu0 %vm4956_vm2, %v4684_v16  ;;  %v4857_v50 = vpop.f32.mrf.mxu1  ;;  %v4579_v31 = vadd.f32 %v21420_v11, %v21546_v0 }
 0x339   : > { %v4858_v24 = vadd.f32 %v21611_v38, %v4857_v50  ;;  %v4664_v50 = vadd.f32 %v21546_v0, %v21517_v41  ;;  %v4838_v41 = vadd.f32 %v21611_v38, %v4837_v61  ;;  %v4654_v61 = vadd.f32 %v21546_v0, %v21508_v62 }
 0x33a   : > { %v17503_v56 = vpop.f32.mrf.mxu1  ;;  %v4818_v62 = vadd.f32 %v21611_v38, %v21578_v29  ;;  %v4644_v29 = vadd.f32 %v21546_v0, %v21499_v13  ;;  %v4798_v13 = vadd.f32 %v21611_v38, %v21561_v8 }
 0x33b   : > { %v4873_v28 = vadd.f32 %v17503_v56, %v21611_v38  ;;  %16031 = vmatpush3.xpose.msk.msra.mxu0 %vm4956_vm2, %v4604_v54  ;;  %v4863_v56 = vadd.f32 %v17500_v51, %v21611_v38  ;;  %v4853_v51 = vadd.f32 %v17497_v52, %v21611_v38  ;;  %v4843_v52 = vadd.f32 %v17494_v19, %v21611_v38 }
 0x33c   : > { %16032 = vmatprep.subr.msk.mxu0 %vm4956_vm2, %v4679_v27  ;;  %v4867_v25 = vpop.f32.mrf.mxu1  ;;  %v4669_v27 = vadd.f32 %v21513_v35, %v21546_v0  ;;  %v4848_v35 = vadd.f32 %v21611_v38, %v4847_v5  ;;  %v4659_v5 = vadd.f32 %v21504_v58, %v21546_v0  ;;  %v4833_v19 = vadd.f32 %v21583_v3, %v21611_v38 }
 0x33d   : > { %v4868_v37 = vadd.f32 %v21611_v38, %v4867_v25  ;;  %5888 = vmatpush1.msra.mxu1 %v4873_v28  ;;  %v4828_v58 = vadd.f32 %v21611_v38, %v21587_v32  ;;  %v4574_v32 = vadd.f32 %v21546_v0, %v21432_v30  ;;  %v4569_v30 = vadd.f32 %v21406_v15, %v21546_v0 }
 0x33e   : > { %v21621_v16 = vpop.f32.mrf.mxu1  ;;  %5889 = vmatprep.subr.mxu1 %v26233_v47  ;;  %v4564_v15 = vadd.f32 %v21546_v0, %v21415_v46 }
 0x33f   : > { %16033 = vmatpush3.xpose.msk.msra.mxu0 %vm4956_vm2, %v4599_v34  ;;  %5890 = vmatpush1.msra.mxu1 %v4868_v37 }
 0x340   : > { %16034 = vmatprep.subr.msk.mxu0 %vm4956_vm2, %v4674_v20  ;;  %v21627_v54 = vpop.f32.mrf.mxu1  ;;  %5891 = vmatprep.subr.mxu1 %v26233_v47 }
 0x341   : > { %5892 = vmatpush1.msra.mxu1 %v4863_v56 }
 0x342   : > { %v21635_v28 = vpop.f32.mrf.mxu1  ;;  %5893 = vmatprep.subr.mxu1 %v26233_v47 }
 0x343   : > { %16035 = vmatpush3.xpose.msk.msra.mxu0 %vm4956_vm2, %v4594_v48  ;;  %5894 = vmatpush1.msra.mxu1 %v4858_v24  ;;  %v4823_v48 = vadd.f32 %v21574_v6, %v21611_v38  ;;  %v4649_v24 = vadd.f32 %v21495_v53, %v21546_v0  ;;  %v4808_v53 = vadd.f32 %v21611_v38, %v21569_v60 }
 0x344   : > { %16036 = vmatprep.subr.msk.mxu0 %vm4956_vm2, %v4669_v27  ;;  %v21641_v25 = vpop.f32.mrf.mxu1  ;;  %5895 = vmatprep.subr.mxu1 %v26233_v47  ;;  %v4813_v27 = vadd.f32 %v21565_v4, %v21611_v38  ;;  %v4803_v4 = vadd.f32 %v21557_v23, %v21611_v38  ;;  %v4340_v0 = vadd.f32 %v21399_v2, %v21426_v17 }
 0x345   : > { %5896 = vmatpush1.msra.mxu1 %v4853_v51 }
 0x346   : > { %v21649_v34 = vpop.f32.mrf.mxu1  ;;  %5897 = vmatprep.subr.mxu1 %v26233_v47 }
 0x347   : > { %16037 = vmatpush3.xpose.msk.msra.mxu0 %vm4956_vm2, %v4589_v42  ;;  %5898 = vmatpush1.msra.mxu1 %v4848_v35 }
 0x348   : > { %16038 = vmatprep.subr.msk.mxu0 %vm4956_vm2, %v4664_v50  ;;  %v21655_v37 = vpop.f32.mrf.mxu1  ;;  %5899 = vmatprep.subr.mxu1 %v26233_v47 }
 0x349   : > { %5900 = vmatpush1.msra.mxu1 %v4843_v52 }
 0x34a   : > { %v21663_v20 = vpop.f32.mrf.mxu1  ;;  %5901 = vmatprep.subr.mxu1 %v26233_v47 }
 0x34b   : > { %16039 = vmatpush3.xpose.msk.msra.mxu0 %vm4956_vm2, %v4584_v39  ;;  %5902 = vmatpush1.msra.mxu1 %v4838_v41 }
 0x34c   : > { %16040 = vmatprep.subr.msk.mxu0 %vm4956_vm2, %v4659_v5  ;;  %v21670_v56 = vpop.f32.mrf.mxu1  ;;  %5903 = vmatprep.subr.mxu1 %v26233_v47  ;;  %v4350_v5 = vadd.f32 %v21399_v2, %v21441_v59  ;;  %v4913_v59 = vadd.f32 %v21663_v20, %v21611_v38  ;;  %v26235_v20 = vld [vmem:[#allocation34_spill] sm:$0xff] }
 0x34d   : > { %5904 = vmatpush1.msra.mxu1 %v4833_v19 }
 0x34e   : > { %v21679_v3 = vpop.f32.mrf.mxu1  ;;  %5905 = vmatprep.subr.mxu1 %v26233_v47 }
 0x34f   : > { %16041 = vmatpush3.xpose.msk.msra.mxu0 %vm4956_vm2, %v4579_v31  ;;  %5906 = vmatpush1.msra.mxu1 %v4828_v58  ;;  %v4923_v41 = vadd.f32 %v21679_v3, %v21611_v38  ;;  %v26234_v31 = vld [vmem:[#allocation91_spill] sm:$0xff]  ;;  %v4903_v58 = vadd.f32 %v21649_v34, %v21611_v38  ;;  %v26237_v3 = vld [vmem:[#allocation41_spill] sm:$0xff] }
 0x350   : > { %16042 = vmatprep.subr.msk.mxu0 %vm4956_vm2, %v4654_v61  ;;  %v21686_v11 = vpop.f32.mrf.mxu1  ;;  %5907 = vmatprep.subr.mxu1 %v26233_v47  ;;  %v26236_v61 = vld [vmem:[#allocation96_spill] sm:$0xff]  ;;  %v26240_v34 = vld [vmem:[#allocation33_spill] sm:$0xff] }
 0x351   : > { %5908 = vmatpush1.msra.mxu1 %v4823_v48  ;;  %v4918_v19 = vadd.f32 %v21611_v38, %v21686_v11  ;;  %v4360_v48 = vadd.f32 %v21399_v2, %v26237_v3  ;;  %v4898_v11 = vadd.f32 %v21611_v38, %v21655_v37  ;;  %v4888_v37 = vadd.f32 %v21611_v38, %v21641_v25  ;;  %v26248_v25 = vld [vmem:[#allocation80_spill] sm:$0xff]  ;;  %v26265_v3 = vld [vmem:[#allocation67_spill] sm:$0xff] }
 0x352   : > { %v17521_v6 = vpop.f32.mrf.mxu1  ;;  %5909 = vmatprep.subr.mxu1 %v26233_v47 }
 0x353   : > { %16043 = vmatpush3.xpose.msk.msra.mxu0 %vm4956_vm2, %v4574_v32  ;;  %5910 = vmatpush1.msra.mxu1 %v4818_v62  ;;  %v4933_v17 = vadd.f32 %v17521_v6, %v21611_v38  ;;  %v26239_v32 = vld [vmem:[#allocation52_spill] sm:$0xff]  ;;  %v4893_v62 = vadd.f32 %v21635_v28, %v21611_v38 }
 0x354   : > { %16044 = vmatprep.subr.msk.mxu0 %vm4956_vm2, %v4649_v24  ;;  %v4927_v51 = vpop.f32.mrf.mxu1  ;;  %5911 = vmatprep.subr.mxu1 %v26233_v47  ;;  %v26241_v24 = vld [vmem:[#allocation51_spill] sm:$0xff]  ;;  %v26242_v6 = vld [vmem:[#allocation48_spill] sm:$0xff] }
 0x355   : > { %5912 = vmatpush1.msra.mxu1 %v4813_v27  ;;  %v26243_v27 = vld [vmem:[#allocation83_spill] sm:$0xff]  ;;  %v26245_v28 = vld [vmem:[#allocation84_spill] sm:$0xff] }
 0x356   : > { %v17524_v42 = vpop.f32.mrf.mxu1  ;;  %5913 = vmatprep.subr.mxu1 %v26233_v47 }
 0x357   : > { %16045 = vmatpush3.xpose.msk.msra.mxu0 %vm4956_vm2, %v4569_v30  ;;  %5914 = vmatpush1.msra.mxu1 %v4808_v53  ;;  %v4943_v46 = vadd.f32 %v17524_v42, %v21611_v38  ;;  %v4883_v30 = vadd.f32 %v21621_v16, %v21611_v38  ;;  %v26246_v53 = vld [vmem:[#allocation77_spill] sm:$0xff] }
 0x358   : > { %16046 = vmatprep.subr.msk.mxu0 %vm4956_vm2, %v4644_v29  ;;  %v4937_v35 = vpop.f32.mrf.mxu1  ;;  %5915 = vmatprep.subr.mxu1 %v26233_v47  ;;  %v26247_v29 = vld [vmem:[#allocation60_spill] sm:$0xff]  ;;  %v26250_v16 = vld [vmem:[#allocation49_spill] sm:$0xff] }
 0x359   : > { %5916 = vmatpush1.msra.mxu1 %v4803_v4  ;;  %v4938_v8 = vadd.f32 %v21611_v38, %v4937_v35  ;;  %v4370_v42 = vadd.f32 %v21399_v2, %v26247_v29  ;;  %v4878_v4 = vadd.f32 %v21611_v38, %v21627_v54  ;;  %v26249_v35 = vld [vmem:[#allocation90_spill] sm:$0xff] }
 0x35a   : > { %v17527_v60 = vpop.f32.mrf.mxu1  ;;  %5917 = vmatprep.subr.mxu1 %v26233_v47  ;;  %v26255_v54 = vld [vmem:[#allocation42_spill] sm:$0xff] }
 0x35b   : > { %v4953_v23 = vadd.f32 %v17527_v60, %v21611_v38  ;;  %16047 = vmatpush3.xpose.msk.msra.mxu0 %vm4956_vm2, %v4564_v15  ;;  %5918 = vmatpush1.msra.mxu1 %v4798_v13  ;;  %v26251_v15 = vld [vmem:[#allocation35_spill] sm:$0xff]  ;;  %v26253_v60 = vld [vmem:[#allocation61_spill] sm:$0xff]  ;;  %v26270_v29 = vld [vmem:[#allocation102_spill] sm:$0xff] }
 0x35c   : > { %16112 = vmatprep.subr.mxu0 %v21422_v26  ;;  %v4947_v50 = vpop.f32.mrf.mxu1  ;;  %5919 = vmatprep.subr.mxu1 %v26233_v47  ;;  %v26252_v13 = vld [vmem:[#allocation87_spill] sm:$0xff] }
 0x35d   : > { %v4948_v52 = vadd.f32 %v21611_v38, %v4947_v50  ;;  %5920 = vmatpush2.msra.mxu1 %v4953_v23  ;;  %v26254_v23 = vld [vmem:[#allocation94_spill] sm:$0xff]  ;;  %v26256_v50 = vld [vmem:[#allocation44_spill] sm:$0xff] }
 0x35e   : > { %16049 = vmatmul.mubr.msk.f32.vlgmr.msra.gmra.mxu0 %vm4956_vm2, %v21413_v45  ;;  %5921 = vmatprep.subr.mxu1 %v26233_v47  ;;  %v21735_v45 = vpop.trf.xlu0 }
 0x35f   : > { %16050 = vmatprep.mubr.msk.f32.mxu0 %vm4956_vm2, %v21404_v7  ;;  %16113 = vmatpush3.msra.mxu0 %v21447_v18 }
 0x360   : > { %5922 = vmatpush2.msra.mxu1 %v4948_v52  ;;  %16114 = vmatprep.subr.mxu0 %v21439_v44  ;;  %v4390_v52 = vadd.f32 %v21399_v2, %v26256_v50 }
 0x361   : > { %5923 = vmatprep.subr.mxu1 %v26233_v47  ;;  %16115 = vmatpush3.msra.mxu0 %v21430_v55 }
 0x362   : > { %16051 = vmatmul.mubr.msk.f32.gmra.mxu0 %vm4956_vm2, %v21404_v7  ;;  %5924 = vmatpush2.msra.mxu1 %v4943_v46  ;;  %v21746_v39 = vpop.trf.xlu0  ;;  %v4928_v7 = vadd.f32 %v21611_v38, %v4927_v51  ;;  %v26244_v51 = vld [vmem:[#allocation92_spill] sm:$0xff]  ;;  %v26257_v46 = vld [vmem:[#allocation95_spill] sm:$0xff] }
 0x363   : > { %16116 = vmatprep.subr.mxu0 %v21392_v22  ;;  %16052 = vmatprep.mubr.msk.f32.mxu0 %vm4956_vm2, %v4340_v0 }
 0x364   : > { %5925 = vmatprep.subr.mxu1 %v26233_v47  ;;  %16117 = vmatpush3.msra.mxu0 %v21401_v14 }
 0x365   : > { %5926 = vmatpush2.msra.mxu1 %v4938_v8  ;;  %16118 = vmatprep.subr.mxu0 %v21408_v33 }
 0x366   : > { %5927 = vmatprep.subr.mxu1 %v26233_v47  ;;  %16119 = vmatpush3.msra.mxu0 %v21388_v49 }
 0x367   : > { %16053 = vmatmul.mubr.msk.f32.gmra.mxu0 %vm4956_vm2, %v4340_v0  ;;  %5928 = vmatpush2.msra.mxu1 %v4933_v17  ;;  %v26258_v0 = vld [vmem:[#allocation63_spill] sm:$0xff]  ;;  %v26259_v17 = vld [vmem:[#allocation64_spill] sm:$0xff] }
 0x368   : > { %16120 = vmatprep.subr.mxu0 %v21382_v9  ;;  %16054 = vmatprep.mubr.msk.f32.mxu0 %vm4956_vm2, %v21418_v1  ;;  %v4400_v8 = vadd.f32 %v21399_v2, %v26258_v0  ;;  %v18590_v0 = vunpack.i.h.bf16 %v21735_v45 }
 0x369   : > { %5929 = vmatprep.subr.mxu1 %v26233_v47  ;;  %16121 = vmatpush3.msra.mxu0 %v21380_v40 }
 0x36a   : > { %5930 = vmatpush2.msra.mxu1 %v4928_v7  ;;  %16122 = vmatprep.subr.mxu0 %v21386_v21  ;;  %v26260_v7 = vld [vmem:[#allocation97_spill] sm:$0xff] }
 0x36b   : > { %5931 = vmatprep.subr.mxu1 %v26233_v47  ;;  %16123 = vmatpush3.msra.mxu0 %v21372_v43 }
 0x36c   : > { %16055 = vmatmul.mubr.msk.f32.gmra.mxu0 %vm4956_vm2, %v21418_v1  ;;  %5932 = vmatpush2.msra.mxu1 %v4923_v41  ;;  %v4908_v1 = vadd.f32 %v21611_v38, %v21670_v56  ;;  %v26238_v56 = vld [vmem:[#allocation82_spill] sm:$0xff]  ;;  %v4380_v38 = vadd.f32 %v21399_v2, %v26254_v23  ;;  %v4410_v41 = vadd.f32 %v21399_v2, %v26260_v7 }
 0x36d   : > { %16124 = vmatprep.subr.mxu0 %v21370_v63  ;;  %16056 = vmatprep.mubr.msk.f32.mxu0 %vm4956_vm2, %v4350_v5 }
 0x36e   : > { %5933 = vmatprep.subr.mxu1 %v26233_v47  ;;  %16125 = vmatpush3.msra.mxu0 %v21364_v57 }
 0x36f   : > { %5934 = vmatpush2.msra.mxu1 %v4918_v19  ;;  %16126 = vmatprep.subr.mxu0 %v21376_v10  ;;  %v26262_v19 = vld [vmem:[#allocation50_spill] sm:$0xff] }
 0x370   : > { %5935 = vmatprep.subr.mxu1 %v26233_v47  ;;  %16127 = vmatpush3.msra.mxu0 %v21356_v12 }
 0x371   : > { %16057 = vmatmul.mubr.msk.f32.gmra.mxu0 %vm4956_vm2, %v4350_v5  ;;  %5936 = vmatpush2.msra.mxu1 %v4913_v59  ;;  %v26261_v5 = vld [vmem:[#allocation47_spill] sm:$0xff]  ;;  %v4420_v59 = vadd.f32 %v21399_v2, %v26262_v19 }
 0x372   : > { %16128 = vmatprep.subr.mxu0 %v21360_v36  ;;  %16058 = vmatprep.mubr.msk.f32.mxu0 %vm4956_vm2, %v26234_v31 }
 0x373   : > { %5937 = vmatprep.subr.mxu1 %v26233_v47  ;;  %16129 = vmatpush3.msra.mxu0 %v26235_v20 }
 0x374   : > { %5938 = vmatpush2.msra.mxu1 %v4908_v1  ;;  %16130 = vmatprep.subr.mxu0 %v26236_v61  ;;  %v26263_v1 = vld [vmem:[#allocation98_spill] sm:$0xff] }
 0x375   : > { %5939 = vmatprep.subr.mxu1 %v26233_v47  ;;  %16131 = vmatpush3.msra.mxu0 %v26238_v56 }
 0x376   : > { %16059 = vmatmul.mubr.msk.f32.gmra.mxu0 %vm4956_vm2, %v26234_v31  ;;  %5940 = vmatpush2.msra.mxu1 %v4903_v58  ;;  %v26264_v31 = vld [vmem:[#allocation99_spill] sm:$0xff] }
 0x377   : > { %16132 = vmatprep.subr.mxu0 %v26239_v32  ;;  %16060 = vmatprep.mubr.msk.f32.mxu0 %vm4956_vm2, %v4360_v48  ;;  %v4430_v58 = vadd.f32 %v21399_v2, %v26264_v31 }
 0x378   : > { %5941 = vmatprep.subr.mxu1 %v26233_v47  ;;  %16133 = vmatpush3.msra.mxu0 %v26240_v34 }
 0x379   : > { %5942 = vmatpush2.msra.mxu1 %v4898_v11  ;;  %16134 = vmatprep.subr.mxu0 %v26241_v24 }
 0x37a   : > { %5943 = vmatprep.subr.mxu1 %v26233_v47  ;;  %16135 = vmatpush3.msra.mxu0 %v26242_v6 }
 0x37b   : > { %16061 = vmatmul.mubr.msk.f32.gmra.mxu0 %vm4956_vm2, %v4360_v48  ;;  %5944 = vmatpush2.msra.mxu1 %v4893_v62  ;;  %v26266_v48 = vld [vmem:[#allocation100_spill] sm:$0xff]  ;;  %v26267_v62 = vld [vmem:[#allocation70_spill] sm:$0xff] }
 0x37c   : > { %16136 = vmatprep.subr.mxu0 %v26243_v27  ;;  %16062 = vmatprep.mubr.msk.f32.mxu0 %vm4956_vm2, %v26244_v51  ;;  %v4440_v11 = vadd.f32 %v21399_v2, %v26266_v48 }
 0x37d   : > { %5945 = vmatprep.subr.mxu1 %v26233_v47  ;;  %16137 = vmatpush3.msra.mxu0 %v26245_v28 }
 0x37e   : > { %5946 = vmatpush2.msra.mxu1 %v4888_v37  ;;  %16138 = vmatprep.subr.mxu0 %v26246_v53  ;;  %v26268_v37 = vld [vmem:[#allocation53_spill] sm:$0xff] }
 0x37f   : > { %5947 = vmatprep.subr.mxu1 %v26233_v47  ;;  %16139 = vmatpush3.msra.mxu0 %v26248_v25 }
 0x380   : > { %16063 = vmatmul.mubr.msk.f32.gmra.mxu0 %vm4956_vm2, %v26244_v51  ;;  %5948 = vmatpush2.msra.mxu1 %v4883_v30  ;;  %v4450_v51 = vadd.f32 %v21399_v2, %v26268_v37  ;;  %v26269_v30 = vld [vmem:[#allocation66_spill] sm:$0xff] }
 0x381   : > { %16140 = vmatprep.subr.mxu0 %v26249_v35  ;;  %16064 = vmatprep.mubr.msk.f32.mxu0 %vm4956_vm2, %v4370_v42 }
 0x382   : > { %5949 = vmatprep.subr.mxu1 %v26233_v47  ;;  %16141 = vmatpush3.msra.mxu0 %v26250_v16 }
 0x383   : > { %5950 = vmatpush2.msra.mxu1 %v4878_v4  ;;  %16142 = vmatprep.subr.mxu0 %v26251_v15  ;;  %v26271_v4 = vld [vmem:[#allocation56_spill] sm:$0xff] }
 0x384   : > { %16143 = vmatpush3.msra.mxu0 %v26252_v13 }
 0x385   : > { %16065 = vmatmul.mubr.msk.f32.gmra.mxu0 %vm4956_vm2, %v4370_v42  ;;  %v4460_v42 = vadd.f32 %v21399_v2, %v26270_v29 }
 0x386   : > { %16066 = vmatprep.mubr.msk.f32.mxu0 %vm4956_vm2, %v26253_v60 }
 0x389   : > { %16067 = vmatmul.mubr.msk.f32.gmra.mxu0 %vm4956_vm2, %v26253_v60  ;;  %v26272_v60 = vld [vmem:[#allocation59_spill] sm:$0xff] }
 0x38a   : > { %16068 = vmatprep.mubr.msk.f32.mxu0 %vm4956_vm2, %v4380_v38  ;;  %v4470_v23 = vadd.f32 %v21399_v2, %v26272_v60 }
 0x38d   : > { %16069 = vmatmul.mubr.msk.f32.gmra.mxu0 %vm4956_vm2, %v4380_v38  ;;  %v26273_v38 = vld [vmem:[#allocation69_spill] sm:$0xff] }
 0x38e   : > { %16070 = vmatprep.mubr.msk.f32.mxu0 %vm4956_vm2, %v26255_v54 }
 0x391   : > { %16071 = vmatmul.mubr.msk.f32.gmra.mxu0 %vm4956_vm2, %v26255_v54  ;;  %v26274_v54 = vld [vmem:[#allocation103_spill] sm:$0xff] }
 0x392   : > { %16072 = vmatprep.mubr.msk.f32.mxu0 %vm4956_vm2, %v4390_v52  ;;  %v4480_v50 = vadd.f32 %v21399_v2, %v26274_v54  ;;  %v18592_v2 = vunpack.i.l.bf16 %v21746_v39 }
 0x395   : > { %16073 = vmatmul.mubr.msk.f32.gmra.mxu0 %vm4956_vm2, %v4390_v52  ;;  %v26275_v52 = vld [vmem:[#allocation62_spill] sm:$0xff] }
 0x396   : > { %16074 = vmatprep.mubr.msk.f32.mxu0 %vm4956_vm2, %v26257_v46 }
 0x399   : > { %16075 = vmatmul.mubr.msk.f32.gmra.mxu0 %vm4956_vm2, %v26257_v46  ;;  %v18587_v46 = vunpack.i.l.bf16 %v21735_v45 }
 0x39a   : > { %16076 = vmatprep.mubr.msk.f32.mxu0 %vm4956_vm2, %v4400_v8 }
 0x39d   : > { %16077 = vmatmul.mubr.msk.f32.gmra.mxu0 %vm4956_vm2, %v4400_v8  ;;  %v18595_v8 = vunpack.i.h.bf16 %v21746_v39 }
 0x39e   : > { %16078 = vmatprep.mubr.msk.f32.mxu0 %vm4956_vm2, %v26259_v17 }
 0x3a1   : > { %16079 = vmatmul.mubr.msk.f32.gmra.mxu0 %vm4956_vm2, %v26259_v17 }
 0x3a2   : > { %16080 = vmatprep.mubr.msk.f32.mxu0 %vm4956_vm2, %v4410_v41 }
 0x3a5   : > { %16081 = vmatmul.mubr.msk.f32.gmra.mxu0 %vm4956_vm2, %v4410_v41 }
 0x3a6   : > { %16082 = vmatprep.mubr.msk.f32.mxu0 %vm4956_vm2, %v26261_v5 }
 0x3a9   : > { %16083 = vmatmul.mubr.msk.f32.gmra.mxu0 %vm4956_vm2, %v26261_v5 }
 0x3aa   : > { %16084 = vmatprep.mubr.msk.f32.mxu0 %vm4956_vm2, %v4420_v59 }
 0x3ad   : > { %16085 = vmatmul.mubr.msk.f32.gmra.mxu0 %vm4956_vm2, %v4420_v59 }
 0x3ae   : > { %16086 = vmatprep.mubr.msk.f32.mxu0 %vm4956_vm2, %v26263_v1 }
 0x3b1   : > { %16087 = vmatmul.mubr.msk.f32.gmra.mxu0 %vm4956_vm2, %v26263_v1 }
 0x3b2   : > { %16088 = vmatprep.mubr.msk.f32.mxu0 %vm4956_vm2, %v4430_v58 }
 0x3b5   : > { %16089 = vmatmul.mubr.msk.f32.gmra.mxu0 %vm4956_vm2, %v4430_v58 }
 0x3b6   : > { %16090 = vmatprep.mubr.msk.f32.mxu0 %vm4956_vm2, %v26265_v3 }
 0x3b9   : > { %16091 = vmatmul.mubr.msk.f32.gmra.mxu0 %vm4956_vm2, %v26265_v3 }
 0x3ba   : > { %16092 = vmatprep.mubr.msk.f32.mxu0 %vm4956_vm2, %v4440_v11 }
 0x3bd   : > { %16093 = vmatmul.mubr.msk.f32.gmra.mxu0 %vm4956_vm2, %v4440_v11 }
 0x3be   : > { %16094 = vmatprep.mubr.msk.f32.mxu0 %vm4956_vm2, %v26267_v62 }
 0x3c1   : > { %16095 = vmatmul.mubr.msk.f32.gmra.mxu0 %vm4956_vm2, %v26267_v62 }
 0x3c2   : > { %16096 = vmatprep.mubr.msk.f32.mxu0 %vm4956_vm2, %v4450_v51 }
 0x3c5   : > { %16097 = vmatmul.mubr.msk.f32.gmra.mxu0 %vm4956_vm2, %v4450_v51 }
 0x3c6   : > { %16098 = vmatprep.mubr.msk.f32.mxu0 %vm4956_vm2, %v26269_v30 }
 0x3c9   : > { %16099 = vmatmul.mubr.msk.f32.gmra.mxu0 %vm4956_vm2, %v26269_v30 }
 0x3ca   : > { %16100 = vmatprep.mubr.msk.f32.mxu0 %vm4956_vm2, %v4460_v42 }
 0x3cd   : > { %16101 = vmatmul.mubr.msk.f32.gmra.mxu0 %vm4956_vm2, %v4460_v42 }
 0x3ce   : > { %16102 = vmatprep.mubr.msk.f32.mxu0 %vm4956_vm2, %v26271_v4 }
 0x3d1   : > { %16103 = vmatmul.mubr.msk.f32.gmra.mxu0 %vm4956_vm2, %v26271_v4 }
 0x3d2   : > { %16104 = vmatprep.mubr.msk.f32.mxu0 %vm4956_vm2, %v4470_v23 }
 0x3d5   : > { %16105 = vmatmul.mubr.msk.f32.gmra.mxu0 %vm4956_vm2, %v4470_v23 }
 0x3d6   : > { %16106 = vmatprep.mubr.msk.f32.mxu0 %vm4956_vm2, %v26273_v38 }
 0x3d9   : > { %16107 = vmatmul.mubr.msk.f32.gmra.mxu0 %vm4956_vm2, %v26273_v38 }
 0x3da   : > { %16108 = vmatprep.mubr.msk.f32.mxu0 %vm4956_vm2, %v4480_v50 }
 0x3dd   : > { %16109 = vmatmul.mubr.msk.f32.gmra.mxu0 %vm4956_vm2, %v4480_v50 }
 0x3de   : > { %16110 = vmatprep.mubr.msk.f32.mxu0 %vm4956_vm2, %v26275_v52 }
 0x3e1   : > { %16111 = vmatmul.mubr.msk.f32.gmra.mxu0 %vm4956_vm2, %v26275_v52 }
 0x3e2   : > { %6401 = vmatprep.mubr.f32.mxu0 %v18587_v46 }
 0x3e5   : > { %6402 = vmatmul.mubr.f32.vlgmr.msra.gmra.mxu0 %v18590_v0 }
 0x3e6   : > { %6406 = vmatprep.mubr.f32.mxu0 %v18592_v2 }
 0x3e9   : > { %6407 = vmatmul.mubr.f32.gmra.mxu0 %v18595_v8 }
 0x41e   : > { %v21927_v17 = vpop.f32.mrf.mxu0 }
 0x420   : > { %v21929_v7 = vpop.f32.mrf.mxu0 }
 0x421   : > { %v5406_v41 = vmax.f32 %v21927_v17, %v21929_v7 }
 0x422   : > { %v21933_v5 = vpop.f32.mrf.mxu0 }
 0x423   : > { %5407 = vmax.xlane.f32.xlu1 %v5406_v41 }
 0x424   : > { %v21935_v19 = vpop.f32.mrf.mxu0 }
 0x425   : > { %v5409_v45 = vmax.f32 %v21933_v5, %v21935_v19 }
 0x427   : > { %v21939_v59 = vpop.f32.mrf.mxu0  ;;  %5410 = vmax.xlane.f32.xlu1 %v5409_v45 }
 0x429   : > { %v21941_v39 = vpop.f32.mrf.mxu0 }
 0x42a   : > { %v5412_v1 = vmax.f32 %v21939_v59, %v21941_v39 }
 0x42c   : > { %v21945_v31 = vpop.f32.mrf.mxu0  ;;  %5413 = vmax.xlane.f32.xlu1 %v5412_v1 }
 0x42e   : > { %v21947_v58 = vpop.f32.mrf.mxu0 }
 0x42f   : > { %v5415_v3 = vmax.f32 %v21945_v31, %v21947_v58 }
 0x431   : > { %v21951_v48 = vpop.f32.mrf.mxu0  ;;  %5416 = vmax.xlane.f32.xlu1 %v5415_v3 }
 0x433   : > { %v21953_v11 = vpop.f32.mrf.mxu0 }
 0x434   : > { %v5418_v62 = vmax.f32 %v21951_v48, %v21953_v11 }
 0x436   : > { %v21957_v37 = vpop.f32.mrf.mxu0  ;;  %5419 = vmax.xlane.f32.xlu1 %v5418_v62 }
 0x438   : > { %v21959_v51 = vpop.f32.mrf.mxu0 }
 0x439   : > { %v5421_v30 = vmax.f32 %v21957_v37, %v21959_v51 }
 0x43b   : > { %v21963_v29 = vpop.f32.mrf.mxu0  ;;  %5422 = vmax.xlane.f32.xlu1 %v5421_v30 }
 0x43d   : > { %v21965_v42 = vpop.f32.mrf.mxu0 }
 0x43e   : > { %v5424_v4 = vmax.f32 %v21963_v29, %v21965_v42 }
 0x440   : > { %v21969_v60 = vpop.f32.mrf.mxu0  ;;  %5425 = vmax.xlane.f32.xlu1 %v5424_v4 }
 0x442   : > { %v21971_v23 = vpop.f32.mrf.mxu0 }
 0x443   : > { %v5427_v38 = vmax.f32 %v21969_v60, %v21971_v23 }
 0x445   : > { %v21975_v54 = vpop.f32.mrf.mxu0  ;;  %5428 = vmax.xlane.f32.xlu1 %v5427_v38 }
 0x447   : > { %v21977_v50 = vpop.f32.mrf.mxu0 }
 0x448   : > { %v5430_v52 = vmax.f32 %v21975_v54, %v21977_v50 }
 0x449   : > { %v21981_v46 = vpop.f32.mrf.mxu0 }
 0x44a   : > { %5431 = vmax.xlane.f32.xlu1 %v5430_v52 }
 0x44b   : > { %v21983_v0 = vpop.f32.mrf.mxu0 }
 0x44c   : > { %v5433_v2 = vmax.f32 %v21981_v46, %v21983_v0 }
 0x44d   : > { %v21987_v8 = vpop.f32.mrf.mxu0 }
 0x44e   : > { %5434 = vmax.xlane.f32.xlu1 %v5433_v2 }
 0x44f   : > { %v21989_v41 = vpop.f32.mrf.mxu0 }
 0x450   : > { %v5436_v45 = vmax.f32 %v21987_v8, %v21989_v41 }
 0x451   : > { %v21993_v1 = vpop.f32.mrf.mxu0 }
 0x452   : > { %5437 = vmax.xlane.f32.xlu1 %v5436_v45 }
 0x453   : > { %v21995_v3 = vpop.f32.mrf.mxu0 }
 0x454   : > { %v5439_v62 = vmax.f32 %v21993_v1, %v21995_v3 }
 0x455   : > { %v21999_v30 = vpop.f32.mrf.mxu0 }
 0x456   : > { %5440 = vmax.xlane.f32.xlu1 %v5439_v62 }
 0x457   : > { %v22001_v4 = vpop.f32.mrf.mxu0 }
 0x458   : > { %v5442_v38 = vmax.f32 %v21999_v30, %v22001_v4 }
 0x459   : > { %v22005_v52 = vpop.f32.mrf.mxu0 }
 0x45a   : > { %5443 = vmax.xlane.f32.xlu1 %v5442_v38 }
 0x45b   : > { %v22007_v2 = vpop.f32.mrf.mxu0 }
 0x45c   : > { %v5445_v45 = vmax.f32 %v22005_v52, %v22007_v2 }
 0x45d   : > { %v22011_v26 = vpop.f32.mrf.mxu0 }
 0x45e   : > { %5446 = vmax.xlane.f32.xlu1 %v5445_v45 }
 0x45f   : > { %v22013_v44 = vpop.f32.mrf.mxu0 }
 0x460   : > { %v5448_v62 = vmax.f32 %v22011_v26, %v22013_v44 }
 0x461   : > { %v22017_v22 = vpop.f32.mrf.mxu0 }
 0x462   : > { %5449 = vmax.xlane.f32.xlu1 %v5448_v62 }
 0x463   : > { %v22019_v33 = vpop.f32.mrf.mxu0 }
 0x464   : > { %v5451_v38 = vmax.f32 %v22017_v22, %v22019_v33 }
 0x465   : > { %v22023_v9 = vpop.f32.mrf.mxu0 }
 0x466   : > { %5452 = vmax.xlane.f32.xlu0 %v5451_v38 }
 0x467   : > { %v22025_v21 = vpop.f32.mrf.mxu0 }
 0x468   : > { %v5454_v45 = vmax.f32 %v22023_v9, %v22025_v21 }
 0x469   : > { %v22029_v63 = vpop.f32.mrf.mxu0 }
 0x46a   : > { %5455 = vmax.xlane.f32.xlu1 %v5454_v45 }
 0x46b   : > { %v22031_v10 = vpop.f32.mrf.mxu0 }
 0x46c   : > { %v5457_v62 = vmax.f32 %v22029_v63, %v22031_v10 }
 0x46d   : > { %v22035_v36 = vpop.f32.mrf.mxu0 }
 0x46e   : > { %5458 = vmax.xlane.f32.xlu1 %v5457_v62 }
 0x46f   : > { %v22037_v61 = vpop.f32.mrf.mxu0 }
 0x470   : > { %v5460_v38 = vmax.f32 %v22035_v36, %v22037_v61 }
 0x471   : > { %v22041_v32 = vpop.f32.mrf.mxu0 }
 0x472   : > { %5461 = vmax.xlane.f32.xlu1 %v5460_v38 }
 0x473   : > { %v22043_v24 = vpop.f32.mrf.mxu0 }
 0x474   : > { %v5463_v45 = vmax.f32 %v22041_v32, %v22043_v24 }
 0x475   : > { %v22047_v27 = vpop.f32.mrf.mxu0 }
 0x476   : > { %5464 = vmax.xlane.f32.xlu1 %v5463_v45 }
 0x477   : > { %v22049_v53 = vpop.f32.mrf.mxu0 }
 0x478   : > { %v5466_v62 = vmax.f32 %v22047_v27, %v22049_v53 }
 0x479   : > { %v22053_v35 = vpop.f32.mrf.mxu0 }
 0x47a   : > { %5467 = vmax.xlane.f32.xlu1 %v5466_v62 }
 0x47b   : > { %v22055_v15 = vpop.f32.mrf.mxu0 }
 0x47c   : > { %26276 = vst [vmem:[#allocation73_spill] sm:$0xff] %v22055_v15  ;;  %v5469_v38 = vmax.f32 %v22053_v35, %v22055_v15 }
 0x47d   : > { %v22059_v18 = vpop.f32.mrf.mxu0 }
 0x47e   : > { %26277 = vst [vmem:[#allocation105_spill] sm:$0xff] %v22059_v18  ;;  %5470 = vmax.xlane.f32.xlu1 %v5469_v38 }
 0x47f   : > { %v22061_v55 = vpop.f32.mrf.mxu0 }
 0x480   : > { %26278 = vst [vmem:[#allocation72_spill] sm:$0xff] %v22061_v55  ;;  %v5472_v45 = vmax.f32 %v22059_v18, %v22061_v55 }
 0x481   : > { %v22065_v14 = vpop.f32.mrf.mxu0 }
 0x482   : > { %26279 = vst [vmem:[#allocation65_spill] sm:$0xff] %v22065_v14  ;;  %5473 = vmax.xlane.f32.xlu1 %v5472_v45 }
 0x483   : > { %v22067_v49 = vpop.f32.mrf.mxu0 }
 0x484   : > { %26280 = vst [vmem:[#allocation106_spill] sm:$0xff] %v22067_v49  ;;  %v5475_v62 = vmax.f32 %v22065_v14, %v22067_v49 }
 0x485   : > { %v22071_v40 = vpop.f32.mrf.mxu0 }
 0x486   : > { %5476 = vmax.xlane.f32.xlu1 %v5475_v62 }
 0x487   : > { %v22073_v43 = vpop.f32.mrf.mxu0 }
 0x489   : > { %v22075_v57 = vpop.f32.mrf.mxu0 }
 0x48b   : > { %v22077_v38 = vpop.f32.mrf.mxu0 }
 0x48d   : > { %v22079_v12 = vpop.f32.mrf.mxu0 }
 0x48f   : > { %v22081_v20 = vpop.f32.mrf.mxu0 }
 0x491   : > { %v22083_v56 = vpop.f32.mrf.mxu0 }
 0x493   : > { %v22085_v45 = vpop.f32.mrf.mxu0 }
 0x495   : > { %v22089_v16 = vpop.f32.mrf.mxu0 }
 0x497   : > { %v22093_v18 = vpop.f32.mrf.mxu0 }
 0x4ac   : > { %v5408_v34 = vpop.xlane.xlu1 %5407 }
 0x4ad   : > { %v5502_v6 = vsub.f32 %v21927_v17, %v5408_v34  ;;  %v5503_v62 = vsub.f32 %v21929_v7, %v5408_v34  ;;  %v22097_v17 = vpop.f32.mrf.mxu0 }
 0x4af   : > { %v5566_v28 = vmul.f32 1.442695, %v5502_v6  ;;  %v5568_v25 = vmul.f32 1.442695, %v5503_v62 }
 0x4b0   : > { %v5411_v13 = vpop.xlane.xlu1 %5410 }
 0x4b1   : > { %18596 = vpow2.f32 %v5566_v28  ;;  %v5504_v47 = vsub.f32 %v21933_v5, %v5411_v13  ;;  %v5505_v49 = vsub.f32 %v21935_v19, %v5411_v13 }
 0x4b2   : > { %18598 = vpow2.f32 %v5568_v25 }
 0x4b3   : > { %v5570_v14 = vmul.f32 1.442695, %v5504_v47  ;;  %v5572_v55 = vmul.f32 1.442695, %v5505_v49  ;;  %v22101_v47 = vpop.f32.mrf.mxu0 }
 0x4b5   : > { %18600 = vpow2.f32 %v5570_v14  ;;  %v5414_v15 = vpop.xlane.xlu1 %5413 }
 0x4b6   : > { %18602 = vpow2.f32 %v5572_v55  ;;  %v5506_v34 = vsub.f32 %v21939_v59, %v5414_v15  ;;  %v5507_v6 = vsub.f32 %v21941_v39, %v5414_v15  ;;  %v22107_v59 = vpop.f32.mrf.mxu0 }
 0x4b8   : > { %v5574_v7 = vmul.f32 1.442695, %v5506_v34  ;;  %v5576_v28 = vmul.f32 1.442695, %v5507_v6 }
 0x4ba   : > { %18604 = vpow2.f32 %v5574_v7  ;;  %v5417_v5 = vpop.xlane.xlu1 %5416 }
 0x4bb   : > { %18606 = vpow2.f32 %v5576_v28  ;;  %v5508_v25 = vsub.f32 %v21945_v31, %v5417_v5  ;;  %v5509_v49 = vsub.f32 %v21947_v58, %v5417_v5  ;;  %v22117_v28 = vpop.f32.mrf.mxu0 }
 0x4bd   : > { %v5578_v14 = vmul.f32 1.442695, %v5508_v25  ;;  %v5580_v13 = vmul.f32 1.442695, %v5509_v49 }
 0x4be   : > { %v22103_v55 = vpop.eup %18596 }
 0x4bf   : > { %v22105_v19 = vpop.eup %18598  ;;  %18608 = vpow2.f32 %v5578_v14  ;;  %v5420_v15 = vpop.xlane.xlu1 %5419 }
 0x4c0   : > { %18610 = vpow2.f32 %v5580_v13  ;;  %v5510_v39 = vsub.f32 %v21951_v48, %v5420_v15  ;;  %v5511_v62 = vsub.f32 %v21953_v11, %v5420_v15  ;;  %v5694_v31 = vadd.f32 %v22105_v19, %v22103_v55 }
 0x4c2   : > { %v22113_v58 = vpop.eup %18600  ;;  %v5582_v34 = vmul.f32 1.442695, %v5510_v39  ;;  %v5584_v6 = vmul.f32 1.442695, %v5511_v62  ;;  %5695 = vadd.xlane.f32.xlu1 %v5694_v31  ;;  %v22127_v39 = vpop.f32.mrf.mxu0  ;;  %v5478_v62 = vmax.f32 %v22071_v40, %v22073_v43 }
 0x4c3   : > { %v22115_v7 = vpop.eup %18602 }
 0x4c4   : > { %18612 = vpow2.f32 %v5582_v34  ;;  %v5423_v5 = vpop.xlane.xlu1 %5422  ;;  %v5697_v25 = vadd.f32 %v22115_v7, %v22113_v58 }
 0x4c5   : > { %18614 = vpow2.f32 %v5584_v6  ;;  %v5512_v48 = vsub.f32 %v21957_v37, %v5423_v5  ;;  %v5513_v11 = vsub.f32 %v21959_v51, %v5423_v5  ;;  %v22137_v5 = vpop.f32.mrf.mxu0 }
 0x4c6   : > { %5698 = vadd.xlane.f32.xlu1 %v5697_v25 }
 0x4c7   : > { %v22123_v49 = vpop.eup %18604  ;;  %v5586_v14 = vmul.f32 1.442695, %v5512_v48  ;;  %v5588_v13 = vmul.f32 1.442695, %v5513_v11  ;;  %v5481_v11 = vmax.f32 %v22075_v57, %v22077_v38 }
 0x4c8   : > { %26281 = vst [vmem:[#allocation68_spill] sm:$0xff] %v22123_v49  ;;  %v22125_v15 = vpop.eup %18606 }
 0x4c9   : > { %26282 = vst [vmem:[#allocation76_spill] sm:$0xff] %v22125_v15  ;;  %18616 = vpow2.f32 %v5586_v14  ;;  %v5426_v31 = vpop.xlane.xlu1 %5425  ;;  %v5700_v34 = vadd.f32 %v22125_v15, %v22123_v49 }
 0x4ca   : > { %18618 = vpow2.f32 %v5588_v13  ;;  %v5514_v37 = vsub.f32 %v21963_v29, %v5426_v31  ;;  %v5515_v51 = vsub.f32 %v21965_v42, %v5426_v31  ;;  %5479 = vmax.xlane.f32.xlu1 %v5478_v62  ;;  %v16144_v42 = vpop.f32.mrf.mxu0  ;;  %v5484_v31 = vmax.f32 %v22079_v12, %v22081_v20 }
 0x4cb   : > { %5701 = vadd.xlane.f32.xlu0 %v5700_v34 }
 0x4cc   : > { %v22135_v6 = vpop.eup %18608  ;;  %v5590_v25 = vmul.f32 1.442695, %v5514_v37  ;;  %v5592_v48 = vmul.f32 1.442695, %v5515_v51  ;;  %v16145_v15 = vpop.f32.mrf.mxu0 }
 0x4cd   : > { %26283 = vst [vmem:[#allocation108_spill] sm:$0xff] %v22135_v6  ;;  %v22141_v14 = vpop.eup %18610 }
 0x4ce   : > { %18620 = vpow2.f32 %v5590_v25  ;;  %v5429_v49 = vpop.xlane.xlu1 %5428  ;;  %v5703_v29 = vadd.f32 %v22141_v14, %v22135_v6  ;;  %5482 = vmax.xlane.f32.xlu1 %v5481_v11 }
 0x4cf   : > { %18622 = vpow2.f32 %v5592_v48  ;;  %v5516_v13 = vsub.f32 %v21969_v60, %v5429_v49  ;;  %v5517_v62 = vsub.f32 %v21971_v23, %v5429_v49  ;;  %v5487_v49 = vmax.f32 %v22083_v56, %v22085_v45 }
 0x4d0   : > { %5704 = vadd.xlane.f32.xlu0 %v5703_v29 }
 0x4d1   : > { %v22149_v34 = vpop.eup %18612  ;;  %v5594_v37 = vmul.f32 1.442695, %v5516_v13  ;;  %v5596_v51 = vmul.f32 1.442695, %v5517_v62 }
 0x4d2   : > { %26284 = vst [vmem:[#allocation75_spill] sm:$0xff] %v22149_v34  ;;  %v22151_v25 = vpop.eup %18614  ;;  %5485 = vmax.xlane.f32.xlu1 %v5484_v31  ;;  %v16147_v31 = vpop.f32.mrf.mxu0 }
 0x4d3   : > { %26285 = vst [vmem:[#allocation71_spill] sm:$0xff] %v22151_v25  ;;  %18624 = vpow2.f32 %v5594_v37  ;;  %v5432_v11 = vpop.xlane.xlu1 %5431  ;;  %v5706_v48 = vadd.f32 %v22151_v25, %v22149_v34 }
 0x4d4   : > { %18626 = vpow2.f32 %v5596_v51  ;;  %v5518_v60 = vsub.f32 %v21975_v54, %v5432_v11  ;;  %v5519_v23 = vsub.f32 %v21977_v50, %v5432_v11  ;;  %v5490_v51 = vmax.f32 %v22089_v16, %v22093_v18 }
 0x4d5   : > { %5707 = vadd.xlane.f32.xlu0 %v5706_v48 }
 0x4d6   : > { %v22159_v29 = vpop.eup %18616  ;;  %v5598_v13 = vmul.f32 1.442695, %v5518_v60  ;;  %v5600_v62 = vmul.f32 1.442695, %v5519_v23  ;;  %5488 = vmax.xlane.f32.xlu1 %v5487_v49  ;;  %v16148_v23 = vpop.f32.mrf.mxu0 }
 0x4d7   : > { %v22161_v37 = vpop.eup %18618  ;;  %v5435_v6 = vpop.xlane.xlu1 %5434 }
 0x4d8   : > { %18628 = vpow2.f32 %v5598_v13  ;;  %v5520_v54 = vsub.f32 %v21981_v46, %v5435_v6  ;;  %v5521_v50 = vsub.f32 %v21983_v0, %v5435_v6  ;;  %v5709_v11 = vadd.f32 %v22161_v37, %v22159_v29 }
 0x4d9   : > { %18630 = vpow2.f32 %v5600_v62  ;;  %v5493_v0 = vmax.f32 %v22097_v17, %v22101_v47  ;;  %v22179_v62 = vadd.f32 %v16148_v23, %v16147_v31 }
 0x4da   : > { %v5602_v48 = vmul.f32 1.442695, %v5520_v54  ;;  %v5604_v60 = vmul.f32 1.442695, %v5521_v50  ;;  %5710 = vadd.xlane.f32.xlu0 %v5709_v11  ;;  %5491 = vmax.xlane.f32.xlu1 %v5490_v51 }
 0x4db   : > { %v22169_v49 = vpop.eup %18620  ;;  %v5438_v34 = vpop.xlane.xlu1 %5437  ;;  %v6415_v31 = vsel %vm4166_vm1, %v22179_v62, -inf }
 0x4dc   : > { %v22171_v25 = vpop.eup %18622  ;;  %18632 = vpow2.f32 %v5602_v48  ;;  %v5522_v13 = vsub.f32 %v21987_v8, %v5438_v34  ;;  %v5523_v46 = vsub.f32 %v21989_v41, %v5438_v34  ;;  %v22187_v48 = vadd.f32 %v16145_v15, %v16144_v42 }
 0x4dd   : > { %18634 = vpow2.f32 %v5604_v60  ;;  %v5712_v6 = vadd.f32 %v22171_v25, %v22169_v49 }
 0x4de   : > { %v5606_v51 = vmul.f32 1.442695, %v5522_v13  ;;  %v5608_v54 = vmul.f32 1.442695, %v5523_v46  ;;  %5494 = vmax.xlane.f32.xlu1 %v5493_v0  ;;  %v6412_v15 = vsel %vm4166_vm1, %v22187_v48, -inf }
 0x4df   : > { %v5441_v50 = vpop.xlane.xlu1 %5440  ;;  %5713 = vadd.xlane.f32.xlu0 %v5712_v6 }
 0x4e0   : > { %v22181_v11 = vpop.eup %18624  ;;  %18636 = vpow2.f32 %v5606_v51  ;;  %v5524_v8 = vsub.f32 %v21993_v1, %v5441_v50  ;;  %v5525_v41 = vsub.f32 %v21995_v3, %v5441_v50 }
 0x4e1   : > { %v22185_v34 = vpop.eup %18626  ;;  %18638 = vpow2.f32 %v5608_v54 }
 0x4e2   : > { %v5610_v60 = vmul.f32 1.442695, %v5524_v8  ;;  %v5612_v23 = vmul.f32 1.442695, %v5525_v41  ;;  %v5715_v13 = vadd.f32 %v22185_v34, %v22181_v11  ;;  %6416 = vmax.xlane.f32.xlu1 %v6415_v31 }
 0x4e3   : > { %v5444_v46 = vpop.xlane.xlu1 %5443 }
 0x4e4   : > { %18640 = vpow2.f32 %v5610_v60  ;;  %v5526_v1 = vsub.f32 %v21999_v30, %v5444_v46  ;;  %v5527_v3 = vsub.f32 %v22001_v4, %v5444_v46  ;;  %5716 = vadd.xlane.f32.xlu0 %v5715_v13 }
 0x4e5   : > { %v22195_v0 = vpop.eup %18628  ;;  %18642 = vpow2.f32 %v5612_v23 }
 0x4e6   : > { %v22199_v42 = vpop.eup %18630  ;;  %v5614_v6 = vmul.f32 1.442695, %v5526_v1  ;;  %v5616_v51 = vmul.f32 1.442695, %v5527_v3  ;;  %6413 = vmax.xlane.f32.xlu1 %v6412_v15 }
 0x4e7   : > { %v5447_v54 = vpop.xlane.xlu1 %5446  ;;  %v5718_v50 = vadd.f32 %v22199_v42, %v22195_v0 }
 0x4e8   : > { %18644 = vpow2.f32 %v5614_v6  ;;  %v5528_v30 = vsub.f32 %v22005_v52, %v5447_v54  ;;  %v5529_v4 = vsub.f32 %v22007_v2, %v5447_v54 }
 0x4e9   : > { %v22205_v8 = vpop.eup %18632  ;;  %18646 = vpow2.f32 %v5616_v51  ;;  %5719 = vadd.xlane.f32.xlu0 %v5718_v50 }
 0x4ea   : > { %v22207_v41 = vpop.eup %18634  ;;  %v5618_v31 = vmul.f32 1.442695, %v5528_v30  ;;  %v5620_v60 = vmul.f32 1.442695, %v5529_v4 }
 0x4eb   : > { %v5450_v23 = vpop.xlane.xlu1 %5449  ;;  %v5721_v13 = vadd.f32 %v22207_v41, %v22205_v8 }
 0x4ec   : > { %18648 = vpow2.f32 %v5618_v31  ;;  %v5530_v46 = vsub.f32 %v22011_v26, %v5450_v23  ;;  %v5531_v1 = vsub.f32 %v22013_v44, %v5450_v23 }
 0x4ed   : > { %v22213_v52 = vpop.eup %18636  ;;  %18650 = vpow2.f32 %v5620_v60  ;;  %5722 = vadd.xlane.f32.xlu0 %v5721_v13 }
 0x4ee   : > { %v22215_v2 = vpop.eup %18638  ;;  %v5622_v3 = vmul.f32 1.442695, %v5530_v46  ;;  %v5624_v15 = vmul.f32 1.442695, %v5531_v1 }
 0x4ef   : > { %v5453_v6 = vpop.xlane.xlu0 %5452  ;;  %v5724_v51 = vadd.f32 %v22215_v2, %v22213_v52 }
 0x4f0   : > { %18652 = vpow2.f32 %v5622_v3  ;;  %v5532_v54 = vsub.f32 %v22017_v22, %v5453_v6  ;;  %v5533_v50 = vsub.f32 %v22019_v33, %v5453_v6 }
 0x4f1   : > { %v22221_v26 = vpop.eup %18640  ;;  %18654 = vpow2.f32 %v5624_v15  ;;  %5725 = vadd.xlane.f32.xlu1 %v5724_v51 }
 0x4f2   : > { %v22223_v44 = vpop.eup %18642  ;;  %v5626_v30 = vmul.f32 1.442695, %v5532_v54  ;;  %v5628_v4 = vmul.f32 1.442695, %v5533_v50 }
 0x4f3   : > { %v5456_v31 = vpop.xlane.xlu1 %5455  ;;  %v5727_v60 = vadd.f32 %v22223_v44, %v22221_v26 }
 0x4f4   : > { %18656 = vpow2.f32 %v5626_v30  ;;  %v5534_v23 = vsub.f32 %v22023_v9, %v5456_v31  ;;  %v5535_v13 = vsub.f32 %v22025_v21, %v5456_v31 }
 0x4f5   : > { %v22229_v22 = vpop.eup %18644  ;;  %18658 = vpow2.f32 %v5628_v4  ;;  %5728 = vadd.xlane.f32.xlu0 %v5727_v60 }
 0x4f6   : > { %v22231_v33 = vpop.eup %18646  ;;  %v5630_v46 = vmul.f32 1.442695, %v5534_v23  ;;  %v5632_v1 = vmul.f32 1.442695, %v5535_v13 }
 0x4f7   : > { %v5459_v3 = vpop.xlane.xlu1 %5458  ;;  %v5730_v15 = vadd.f32 %v22231_v33, %v22229_v22 }
 0x4f8   : > { %18660 = vpow2.f32 %v5630_v46  ;;  %v5536_v6 = vsub.f32 %v22029_v63, %v5459_v3  ;;  %v5537_v51 = vsub.f32 %v22031_v10, %v5459_v3 }
 0x4f9   : > { %v22237_v9 = vpop.eup %18648  ;;  %18662 = vpow2.f32 %v5632_v1  ;;  %5731 = vadd.xlane.f32.xlu1 %v5730_v15 }
 0x4fa   : > { %v22239_v21 = vpop.eup %18650  ;;  %v5634_v54 = vmul.f32 1.442695, %v5536_v6  ;;  %v5636_v50 = vmul.f32 1.442695, %v5537_v51 }
 0x4fb   : > { %v5462_v30 = vpop.xlane.xlu1 %5461  ;;  %v5733_v4 = vadd.f32 %v22239_v21, %v22237_v9 }
 0x4fc   : > { %18664 = vpow2.f32 %v5634_v54  ;;  %v5538_v31 = vsub.f32 %v22035_v36, %v5462_v30  ;;  %v5539_v60 = vsub.f32 %v22037_v61, %v5462_v30 }
 0x4fd   : > { %v22245_v63 = vpop.eup %18652  ;;  %18666 = vpow2.f32 %v5636_v50  ;;  %5734 = vadd.xlane.f32.xlu0 %v5733_v4 }
 0x4fe   : > { %v22247_v10 = vpop.eup %18654  ;;  %v5638_v23 = vmul.f32 1.442695, %v5538_v31  ;;  %v5640_v13 = vmul.f32 1.442695, %v5539_v60 }
 0x4ff   : > { %v5465_v46 = vpop.xlane.xlu1 %5464  ;;  %v5736_v1 = vadd.f32 %v22247_v10, %v22245_v63 }
 0x500   : > { %18668 = vpow2.f32 %v5638_v23  ;;  %v5540_v3 = vsub.f32 %v22041_v32, %v5465_v46  ;;  %v5541_v15 = vsub.f32 %v22043_v24, %v5465_v46 }
 0x501   : > { %v22253_v36 = vpop.eup %18656  ;;  %18670 = vpow2.f32 %v5640_v13  ;;  %5737 = vadd.xlane.f32.xlu1 %v5736_v1  ;;  %v26286_v1 = vld [vmem:[#allocation73_spill] sm:$0xff] }
 0x502   : > { %v22255_v61 = vpop.eup %18658  ;;  %v5642_v6 = vmul.f32 1.442695, %v5540_v3  ;;  %v5644_v51 = vmul.f32 1.442695, %v5541_v15 }
 0x503   : > { %v5468_v54 = vpop.xlane.xlu1 %5467  ;;  %v5739_v50 = vadd.f32 %v22255_v61, %v22253_v36 }
 0x504   : > { %18672 = vpow2.f32 %v5642_v6  ;;  %v5542_v30 = vsub.f32 %v22047_v27, %v5468_v54  ;;  %v5543_v4 = vsub.f32 %v22049_v53, %v5468_v54 }
 0x505   : > { %v22261_v32 = vpop.eup %18660  ;;  %18674 = vpow2.f32 %v5644_v51  ;;  %5740 = vadd.xlane.f32.xlu0 %v5739_v50  ;;  %v26289_v50 = vld [vmem:[#allocation105_spill] sm:$0xff] }
 0x506   : > { %v22263_v24 = vpop.eup %18662  ;;  %v5646_v31 = vmul.f32 1.442695, %v5542_v30  ;;  %v5648_v60 = vmul.f32 1.442695, %v5543_v4  ;;  %v26290_v4 = vld [vmem:[#allocation72_spill] sm:$0xff] }
 0x507   : > { %v5471_v23 = vpop.xlane.xlu1 %5470  ;;  %v5742_v13 = vadd.f32 %v22263_v24, %v22261_v32 }
 0x508   : > { %18676 = vpow2.f32 %v5646_v31  ;;  %v5544_v46 = vsub.f32 %v22053_v35, %v5471_v23  ;;  %v5545_v3 = vsub.f32 %v26286_v1, %v5471_v23 }
 0x509   : > { %v22269_v27 = vpop.eup %18664  ;;  %18678 = vpow2.f32 %v5648_v60  ;;  %5743 = vadd.xlane.f32.xlu1 %v5742_v13 }
 0x50a   : > { %26287 = vst [vmem:[#allocation74_spill] sm:$0xff] %v22269_v27  ;;  %v22271_v53 = vpop.eup %18666  ;;  %v5650_v15 = vmul.f32 1.442695, %v5544_v46  ;;  %v5652_v6 = vmul.f32 1.442695, %v5545_v3  ;;  %v26291_v3 = vld [vmem:[#allocation65_spill] sm:$0xff] }
 0x50b   : > { %26288 = vst [vmem:[#allocation91_spill] sm:$0xff] %v22271_v53  ;;  %v5474_v51 = vpop.xlane.xlu1 %5473  ;;  %v5745_v54 = vadd.f32 %v22271_v53, %v22269_v27 }
 0x50c   : > { %18680 = vpow2.f32 %v5650_v15  ;;  %v5546_v30 = vsub.f32 %v26289_v50, %v5474_v51  ;;  %v5547_v31 = vsub.f32 %v26290_v4, %v5474_v51  ;;  %v26292_v15 = vld [vmem:[#allocation106_spill] sm:$0xff] }
 0x50d   : > { %v22277_v35 = vpop.eup %18668  ;;  %18682 = vpow2.f32 %v5652_v6  ;;  %5746 = vadd.xlane.f32.xlu0 %v5745_v54 }
 0x50e   : > { %v22279_v23 = vpop.eup %18670  ;;  %v5654_v60 = vmul.f32 1.442695, %v5546_v30  ;;  %v5656_v13 = vmul.f32 1.442695, %v5547_v31 }
 0x50f   : > { %v5477_v1 = vpop.xlane.xlu1 %5476  ;;  %v5748_v46 = vadd.f32 %v22279_v23, %v22277_v35 }
 0x510   : > { %18684 = vpow2.f32 %v5654_v60  ;;  %v5548_v27 = vsub.f32 %v26291_v3, %v5477_v1  ;;  %v5549_v53 = vsub.f32 %v26292_v15, %v5477_v1  ;;  %v5499_v15 = vmax.f32 %v22127_v39, %v22137_v5 }
 0x511   : > { %v22285_v50 = vpop.eup %18672  ;;  %18686 = vpow2.f32 %v5656_v13  ;;  %5749 = vadd.xlane.f32.xlu1 %v5748_v46 }
 0x512   : > { %26293 = vst [vmem:[#allocation41_spill] sm:$0xff] %v22285_v50  ;;  %v22287_v51 = vpop.eup %18674  ;;  %v5658_v6 = vmul.f32 1.442695, %v5548_v27  ;;  %v5660_v54 = vmul.f32 1.442695, %v5549_v53  ;;  %v5496_v27 = vmax.f32 %v22107_v59, %v22117_v28 }
 0x513   : > { %v5751_v30 = vadd.f32 %v22287_v51, %v22285_v50 }
 0x514   : > { %18688 = vpow2.f32 %v5658_v6 }
 0x515   : > { %v22291_v4 = vpop.eup %18676  ;;  %18690 = vpow2.f32 %v5660_v54  ;;  %5752 = vadd.xlane.f32.xlu0 %v5751_v30 }
 0x516   : > { %26294 = vst [vmem:[#allocation92_spill] sm:$0xff] %v22291_v4  ;;  %v22293_v31 = vpop.eup %18678 }
 0x517   : > { %26295 = vst [vmem:[#allocation60_spill] sm:$0xff] %v22293_v31  ;;  %v5754_v60 = vadd.f32 %v22293_v31, %v22291_v4 }
 0x519   : > { %v22297_v1 = vpop.eup %18680  ;;  %5755 = vadd.xlane.f32.xlu1 %v5754_v60 }
 0x51a   : > { %26296 = vst [vmem:[#allocation61_spill] sm:$0xff] %v22297_v1  ;;  %v22299_v13 = vpop.eup %18682 }
 0x51b   : > { %26297 = vst [vmem:[#allocation94_spill] sm:$0xff] %v22299_v13  ;;  %v5757_v53 = vadd.f32 %v22299_v13, %v22297_v1 }
 0x51d   : > { %v22305_v46 = vpop.eup %18684  ;;  %5758 = vadd.xlane.f32.xlu0 %v5757_v53  ;;  %5497 = vmax.xlane.f32.xlu1 %v5496_v27 }
 0x51e   : > { %26298 = vst [vmem:[#allocation42_spill] sm:$0xff] %v22305_v46  ;;  %v22307_v3 = vpop.eup %18686 }
 0x51f   : > { %26299 = vst [vmem:[#allocation44_spill] sm:$0xff] %v22307_v3  ;;  %v5760_v6 = vadd.f32 %v22307_v3, %v22305_v46 }
 0x521   : > { %v22313_v54 = vpop.eup %18688  ;;  %5761 = vadd.xlane.f32.xlu0 %v5760_v6  ;;  %5500 = vmax.xlane.f32.xlu1 %v5499_v15 }
 0x522   : > { %26300 = vst [vmem:[#allocation95_spill] sm:$0xff] %v22313_v54  ;;  %v22315_v30 = vpop.eup %18690 }
 0x523   : > { %26301 = vst [vmem:[#allocation63_spill] sm:$0xff] %v22315_v30  ;;  %v5763_v60 = vadd.f32 %v22315_v30, %v22313_v54 }
 0x525   : > { %5764 = vadd.xlane.f32.xlu0 %v5763_v60 }
 0x54b   : > { %v5696_v53 = vpop.xlane.xlu1 %5695 }
 0x54c   : > { %18692 = vrcp.f32 %v5696_v53 }
 0x54f   : > { %v5699_v27 = vpop.xlane.xlu1 %5698 }
 0x550   : > { %18694 = vrcp.f32 %v5699_v27 }
 0x553   : > { %v5480_v1 = vpop.xlane.xlu1 %5479 }
 0x554   : > { %v5702_v13 = vpop.xlane.xlu0 %5701  ;;  %v5550_v4 = vsub.f32 %v22071_v40, %v5480_v1  ;;  %v5551_v46 = vsub.f32 %v22073_v43, %v5480_v1 }
 0x555   : > { %18696 = vrcp.f32 %v5702_v13 }
 0x556   : > { %v5662_v3 = vmul.f32 1.442695, %v5550_v4  ;;  %v5664_v6 = vmul.f32 1.442695, %v5551_v46 }
 0x557   : > { %v5483_v15 = vpop.xlane.xlu1 %5482 }
 0x558   : > { %18698 = vpow2.f32 %v5662_v3  ;;  %v5552_v31 = vsub.f32 %v22075_v57, %v5483_v15  ;;  %v5553_v54 = vsub.f32 %v22077_v38, %v5483_v15  ;;  %v26302_v15 = vld [vmem:[#allocation76_spill] sm:$0xff] }
 0x559   : > { %v18693_v60 = vpop.eup %18692  ;;  %18700 = vpow2.f32 %v5664_v6  ;;  %v5705_v53 = vpop.xlane.xlu0 %5704 }
 0x55a   : > { %v5822_v27 = vmul.f32 %v18693_v60, %v22103_v55  ;;  %18702 = vrcp.f32 %v5705_v53  ;;  %v5666_v30 = vmul.f32 1.442695, %v5552_v31  ;;  %v5668_v50 = vmul.f32 1.442695, %v5553_v54 }
 0x55b   : > { %v5486_v40 = vpop.xlane.xlu1 %5485  ;;  %v5823_v43 = vmul.f32 %v18693_v60, %v22105_v19 }
 0x55c   : > { %18704 = vpow2.f32 %v5666_v30  ;;  %v5554_v4 = vsub.f32 %v22079_v12, %v5486_v40  ;;  %v5555_v1 = vsub.f32 %v22081_v20, %v5486_v40 }
 0x55d   : > { %v18695_v13 = vpop.eup %18694  ;;  %18706 = vpow2.f32 %v5668_v50  ;;  %5951 = vmatprep.mubr.f32.mxu1 %v5823_v43 }
 0x55e   : > { %v5708_v57 = vpop.xlane.xlu0 %5707  ;;  %v5670_v38 = vmul.f32 1.442695, %v5554_v4  ;;  %v5672_v46 = vmul.f32 1.442695, %v5555_v1  ;;  %5952 = vmatmul.mubr.f32.vlgmr.msra.gmra.mxu1 %v5822_v27  ;;  %v5825_v55 = vmul.f32 %v18695_v13, %v22115_v7  ;;  %v5824_v31 = vmul.f32 %v18695_v13, %v22113_v58  ;;  %v26303_v7 = vld [vmem:[#allocation68_spill] sm:$0xff] }
 0x55f   : > { %18708 = vrcp.f32 %v5708_v57  ;;  %v5489_v3 = vpop.xlane.xlu1 %5488 }
 0x560   : > { %18710 = vpow2.f32 %v5670_v38  ;;  %v5556_v19 = vsub.f32 %v22083_v56, %v5489_v3  ;;  %v5557_v12 = vsub.f32 %v22085_v45, %v5489_v3  ;;  %5956 = vmatprep.mubr.f32.mxu1 %v5825_v55  ;;  %v26304_v55 = vld [vmem:[#allocation108_spill] sm:$0xff] }
 0x561   : > { %18712 = vpow2.f32 %v5672_v46 }
 0x562   : > { %v18697_v20 = vpop.eup %18696  ;;  %v5674_v50 = vmul.f32 1.442695, %v5556_v19  ;;  %v5676_v54 = vmul.f32 1.442695, %v5557_v12  ;;  %5957 = vmatmul.mubr.f32.gmra.mxu1 %v5824_v31 }
 0x563   : > { %v5711_v30 = vpop.xlane.xlu0 %5710  ;;  %v5492_v6 = vpop.xlane.xlu1 %5491  ;;  %v5827_v60 = vmul.f32 %v18697_v20, %v26302_v15  ;;  %v5826_v53 = vmul.f32 %v18697_v20, %v26303_v7  ;;  %v26306_v15 = vld [vmem:[#allocation75_spill] sm:$0xff] }
 0x564   : > { %18714 = vrcp.f32 %v5711_v30  ;;  %v5558_v58 = vsub.f32 %v22089_v16, %v5492_v6  ;;  %v5559_v27 = vsub.f32 %v22093_v18, %v5492_v6  ;;  %v26305_v30 = vld [vmem:[#allocation71_spill] sm:$0xff] }
 0x565   : > { %v22335_v56 = vpop.eup %18698  ;;  %18716 = vpow2.f32 %v5674_v50  ;;  %5961 = vmatprep.mubr.f32.mxu1 %v5827_v60 }
 0x566   : > { %v22337_v45 = vpop.eup %18700  ;;  %18718 = vpow2.f32 %v5676_v54  ;;  %v5678_v40 = vmul.f32 1.442695, %v5558_v58  ;;  %v5680_v43 = vmul.f32 1.442695, %v5559_v27  ;;  %5962 = vmatmul.mubr.f32.gmra.mxu1 %v5826_v53 }
 0x567   : > { %v18703_v4 = vpop.eup %18702  ;;  %v5495_v1 = vpop.xlane.xlu1 %5494  ;;  %v5766_v13 = vadd.f32 %v22337_v45, %v22335_v56 }
 0x568   : > { %v5714_v57 = vpop.xlane.xlu0 %5713  ;;  %18720 = vpow2.f32 %v5678_v40  ;;  %v5560_v16 = vsub.f32 %v22097_v17, %v5495_v1  ;;  %v5561_v18 = vsub.f32 %v22101_v47, %v5495_v1  ;;  %v5829_v38 = vmul.f32 %v18703_v4, %v22141_v14 }
 0x569   : > { %v22344_v46 = vpop.eup %18704  ;;  %18722 = vrcp.f32 %v5714_v57  ;;  %5767 = vadd.xlane.f32.xlu1 %v5766_v13  ;;  %v5828_v31 = vmul.f32 %v18703_v4, %v26304_v55 }
 0x56a   : > { %v22347_v3 = vpop.eup %18706  ;;  %18724 = vpow2.f32 %v5680_v43  ;;  %v5682_v19 = vmul.f32 1.442695, %v5560_v16  ;;  %v5684_v12 = vmul.f32 1.442695, %v5561_v18  ;;  %5966 = vmatprep.mubr.f32.mxu1 %v5829_v38 }
 0x56b   : > { %5967 = vmatmul.mubr.f32.gmra.mxu1 %v5828_v31  ;;  %v6417_v20 = vpop.xlane.xlu1 %6416  ;;  %v5769_v17 = vadd.f32 %v22347_v3, %v22344_v46 }
 0x56c   : > { %v18709_v47 = vpop.eup %18708  ;;  %18726 = vpow2.f32 %v5682_v19  ;;  %v22352_v14 = vsub.f32 %v6417_v20, %v22179_v62 }
 0x56d   : > { %v22354_v50 = vpop.eup %18710  ;;  %v5717_v54 = vpop.xlane.xlu0 %5716  ;;  %18728 = vpow2.f32 %v5684_v12  ;;  %v5831_v6 = vmul.f32 %v18709_v47, %v26305_v30  ;;  %5770 = vadd.xlane.f32.xlu0 %v5769_v17  ;;  %v5830_v60 = vmul.f32 %v18709_v47, %v26306_v15 }
 0x56e   : > { %v22358_v7 = vpop.eup %18712  ;;  %18730 = vrcp.f32 %v5717_v54  ;;  %v6423_v53 = vsel %vm4166_vm1, %v22352_v14, -inf }
 0x56f   : > { %5971 = vmatprep.mubr.f32.mxu1 %v5831_v6  ;;  %v6414_v58 = vpop.xlane.xlu1 %6413  ;;  %6424 = vmax.xlane.f32.xlu1 %v6423_v53  ;;  %v5772_v62 = vadd.f32 %v22358_v7, %v22354_v50 }
 0x570   : > { %5972 = vmatmul.mubr.f32.gmra.mxu1 %v5830_v60  ;;  %v22365_v27 = vsub.f32 %v6414_v58, %v22187_v48 }
 0x571   : > { %v18715_v40 = vpop.eup %18714  ;;  %5773 = vadd.xlane.f32.xlu0 %v5772_v62 }
 0x572   : > { %v22367_v43 = vpop.eup %18716  ;;  %v5720_v4 = vpop.xlane.xlu0 %5719  ;;  %v5833_v1 = vmul.f32 %v18715_v40, %v22161_v37  ;;  %v5832_v13 = vmul.f32 %v18715_v40, %v22159_v29  ;;  %v6420_v57 = vsel %vm4166_vm1, %v22365_v27, -inf }
 0x573   : > { %v22373_v16 = vpop.eup %18718  ;;  %18732 = vrcp.f32 %v5720_v4  ;;  %6421 = vmax.xlane.f32.xlu1 %v6420_v57 }
 0x574   : > { %5976 = vmatprep.mubr.f32.mxu1 %v5833_v1  ;;  %v5775_v48 = vadd.f32 %v22373_v16, %v22367_v43 }
 0x575   : > { %v22377_v18 = vpop.eup %18720  ;;  %5977 = vmatmul.mubr.f32.gmra.mxu1 %v5832_v13 }
 0x576   : > { %v18723_v38 = vpop.eup %18722  ;;  %v5723_v55 = vpop.xlane.xlu0 %5722  ;;  %5776 = vadd.xlane.f32.xlu0 %v5775_v48 }
 0x577   : > { %v22379_v37 = vpop.eup %18724  ;;  %18734 = vrcp.f32 %v5723_v55  ;;  %v5835_v29 = vmul.f32 %v18723_v38, %v22171_v25  ;;  %v5834_v31 = vmul.f32 %v18723_v38, %v22169_v49 }
 0x578   : > { %v5778_v19 = vadd.f32 %v22379_v37, %v22377_v18 }
 0x579   : > { %v22385_v12 = vpop.eup %18726  ;;  %5981 = vmatprep.mubr.f32.mxu1 %v5835_v29 }
 0x57a   : > { %v22387_v20 = vpop.eup %18728  ;;  %v5726_v17 = vpop.xlane.xlu1 %5725  ;;  %5982 = vmatmul.mubr.f32.gmra.mxu1 %v5834_v31  ;;  %5779 = vadd.xlane.f32.xlu1 %v5778_v19 }
 0x57b   : > { %v18731_v47 = vpop.eup %18730  ;;  %18736 = vrcp.f32 %v5726_v17  ;;  %v5781_v54 = vadd.f32 %v22387_v20, %v22385_v12 }
 0x57c   : > { %v5837_v25 = vmul.f32 %v18731_v47, %v22185_v34  ;;  %v5836_v49 = vmul.f32 %v18731_v47, %v22181_v11 }
 0x57d   : > { %5782 = vadd.xlane.f32.xlu0 %v5781_v54 }
 0x57e   : > { %v5729_v30 = vpop.xlane.xlu0 %5728  ;;  %5986 = vmatprep.mubr.f32.mxu1 %v5837_v25 }
 0x57f   : > { %18738 = vrcp.f32 %v5729_v30  ;;  %5987 = vmatmul.mubr.f32.gmra.mxu1 %v5836_v49  ;;  %v26307_v49 = vld [vmem:[#allocation91_spill] sm:$0xff] }
 0x580   : > { %v18733_v6 = vpop.eup %18732 }
 0x581   : > { %v5839_v15 = vmul.f32 %v18733_v6, %v22199_v42  ;;  %v5838_v60 = vmul.f32 %v18733_v6, %v22195_v0  ;;  %v26308_v6 = vld [vmem:[#allocation74_spill] sm:$0xff] }
 0x582   : > { %v5732_v53 = vpop.xlane.xlu1 %5731 }
 0x583   : > { %18740 = vrcp.f32 %v5732_v53  ;;  %5991 = vmatprep.mubr.f32.mxu1 %v5839_v15 }
 0x584   : > { %v18735_v58 = vpop.eup %18734  ;;  %5992 = vmatmul.mubr.f32.gmra.mxu1 %v5838_v60  ;;  %v26309_v60 = vmov 0.0  }
 0x585   : > { %v5841_v62 = vmul.f32 %v18735_v58, %v22207_v41  ;;  %v5840_v34 = vmul.f32 %v18735_v58, %v22205_v8  ;;  %6809 = vst.msk [vmem:[#allocation2 + $0x28] sm:$0x3] %vm6805_vm3, %v26309_v60  ;;  %6806 = vst.msk [vmem:[#allocation2 + $0x10] sm:$0x3] %vm6805_vm3, %v26309_v60 }
 0x586   : > { %v5735_v11 = vpop.xlane.xlu0 %5734  ;;  %6812 = vst.msk [vmem:[#allocation2 + $0x40] sm:$0x3] %vm6805_vm3, %v26309_v60  ;;  %6815 = vst.msk [vmem:[#allocation2 + $0x58] sm:$0x3] %vm6805_vm3, %v26309_v60 }
 0x587   : > { %18742 = vrcp.f32 %v5735_v11  ;;  %5996 = vmatprep.mubr.f32.mxu1 %v5841_v62  ;;  %6818 = vst.msk [vmem:[#allocation2 + $0x70] sm:$0x3] %vm6805_vm3, %v26309_v60  ;;  %6821 = vst.msk [vmem:[#allocation2 + $0x88] sm:$0x3] %vm6805_vm3, %v26309_v60 }
 0x588   : > { %v18737_v40 = vpop.eup %18736  ;;  %5997 = vmatmul.mubr.f32.gmra.mxu1 %v5840_v34  ;;  %6824 = vst.msk [vmem:[#allocation2 + $0xa0] sm:$0x3] %vm6805_vm3, %v26309_v60  ;;  %6827 = vst.msk [vmem:[#allocation2 + $0xb8] sm:$0x3] %vm6805_vm3, %v26309_v60 }
 0x589   : > { %v5843_v4 = vmul.f32 %v18737_v40, %v22215_v2  ;;  %v5842_v42 = vmul.f32 %v18737_v40, %v22213_v52  ;;  %6830 = vst.msk [vmem:[#allocation2 + $0xd0] sm:$0x3] %vm6805_vm3, %v26309_v60  ;;  %6833 = vst.msk [vmem:[#allocation2 + $0xe8] sm:$0x3] %vm6805_vm3, %v26309_v60 }
 0x58a   : > { %v5738_v1 = vpop.xlane.xlu1 %5737  ;;  %6836 = vst.msk [vmem:[#allocation2 + $0x100] sm:$0x3] %vm6805_vm3, %v26309_v60  ;;  %6839 = vst.msk [vmem:[#allocation2 + $0x118] sm:$0x3] %vm6805_vm3, %v26309_v60 }
 0x58b   : > { %18744 = vrcp.f32 %v5738_v1  ;;  %6001 = vmatprep.mubr.f32.mxu1 %v5843_v4  ;;  %6842 = vst.msk [vmem:[#allocation2 + $0x130] sm:$0x3] %vm6805_vm3, %v26309_v60  ;;  %6845 = vst.msk [vmem:[#allocation2 + $0x148] sm:$0x3] %vm6805_vm3, %v26309_v60 }
 0x58c   : > { %v18739_v0 = vpop.eup %18738  ;;  %6002 = vmatmul.mubr.f32.gmra.mxu1 %v5842_v42  ;;  %6848 = vst.msk [vmem:[#allocation2 + $0x160] sm:$0x3] %vm6805_vm3, %v26309_v60  ;;  %6851 = vst.msk [vmem:[#allocation2 + $0x178] sm:$0x3] %vm6805_vm3, %v26309_v60 }
 0x58d   : > { %v5845_v13 = vmul.f32 %v18739_v0, %v22223_v44  ;;  %v5844_v41 = vmul.f32 %v18739_v0, %v22221_v26  ;;  %6854 = vst.msk [vmem:[#allocation2 + $0x190] sm:$0x3] %vm6805_vm3, %v26309_v60  ;;  %6857 = vst.msk [vmem:[#allocation2 + $0x1a8] sm:$0x3] %vm6805_vm3, %v26309_v60  ;;  %v6925_v0 = vld [vmem:[#allocation2 + $0x1] sm:$0xff] }
 0x58e   : > { %v5741_v57 = vpop.xlane.xlu0 %5740  ;;  %10431 = vst.msk [vmem:[#allocation3 + $0x10] sm:$0x3] %vm6805_vm3, %v26309_v60  ;;  %10434 = vst.msk [vmem:[#allocation3 + $0x28] sm:$0x3] %vm6805_vm3, %v26309_v60  ;;  %17584 = vmatprep.mubr.msk.f32.mxu0 %vm4166_vm1, %v6925_v0 }
 0x58f   : > { %18746 = vrcp.f32 %v5741_v57  ;;  %6006 = vmatprep.mubr.f32.mxu1 %v5845_v13  ;;  %10437 = vst.msk [vmem:[#allocation3 + $0x40] sm:$0x3] %vm6805_vm3, %v26309_v60  ;;  %10440 = vst.msk [vmem:[#allocation3 + $0x58] sm:$0x3] %vm6805_vm3, %v26309_v60 }
 0x590   : > { %v18741_v8 = vpop.eup %18740  ;;  %6007 = vmatmul.mubr.f32.gmra.mxu1 %v5844_v41  ;;  %10443 = vst.msk [vmem:[#allocation3 + $0x70] sm:$0x3] %vm6805_vm3, %v26309_v60  ;;  %10446 = vst.msk [vmem:[#allocation3 + $0x88] sm:$0x3] %vm6805_vm3, %v26309_v60  ;;  %v26310_v41 = vld [vmem:[#allocation41_spill] sm:$0xff] }
 0x591   : > { %v5847_v48 = vmul.f32 %v18741_v8, %v22231_v33  ;;  %v5846_v2 = vmul.f32 %v18741_v8, %v22229_v22  ;;  %10449 = vst.msk [vmem:[#allocation3 + $0xa0] sm:$0x3] %vm6805_vm3, %v26309_v60  ;;  %10452 = vst.msk [vmem:[#allocation3 + $0xb8] sm:$0x3] %vm6805_vm3, %v26309_v60 }
 0x592   : > { %v5744_v38 = vpop.xlane.xlu1 %5743  ;;  %10455 = vst.msk [vmem:[#allocation3 + $0xd0] sm:$0x3] %vm6805_vm3, %v26309_v60  ;;  %10458 = vst.msk [vmem:[#allocation3 + $0xe8] sm:$0x3] %vm6805_vm3, %v26309_v60 }
 0x593   : > { %18748 = vrcp.f32 %v5744_v38  ;;  %6011 = vmatprep.mubr.f32.mxu1 %v5847_v48  ;;  %10461 = vst.msk [vmem:[#allocation3 + $0x100] sm:$0x3] %vm6805_vm3, %v26309_v60  ;;  %10464 = vst.msk [vmem:[#allocation3 + $0x118] sm:$0x3] %vm6805_vm3, %v26309_v60  ;;  %v6926_v48 = vld [vmem:[#allocation2 + $0x9] sm:$0xff] }
 0x594   : > { %v18743_v52 = vpop.eup %18742  ;;  %6012 = vmatmul.mubr.f32.gmra.mxu1 %v5846_v2  ;;  %10467 = vst.msk [vmem:[#allocation3 + $0x130] sm:$0x3] %vm6805_vm3, %v26309_v60  ;;  %10470 = vst.msk [vmem:[#allocation3 + $0x148] sm:$0x3] %vm6805_vm3, %v26309_v60  ;;  %v26311_v2 = vld [vmem:[#allocation60_spill] sm:$0xff] }
 0x595   : > { %v5849_v55 = vmul.f32 %v18743_v52, %v22239_v21  ;;  %v5848_v44 = vmul.f32 %v18743_v52, %v22237_v9  ;;  %10473 = vst.msk [vmem:[#allocation3 + $0x160] sm:$0x3] %vm6805_vm3, %v26309_v60  ;;  %10476 = vst.msk [vmem:[#allocation3 + $0x178] sm:$0x3] %vm6805_vm3, %v26309_v60  ;;  %v26312_v52 = vld [vmem:[#allocation92_spill] sm:$0xff] }
 0x596   : > { %v5747_v29 = vpop.xlane.xlu0 %5746  ;;  %10479 = vst.msk [vmem:[#allocation3 + $0x190] sm:$0x3] %vm6805_vm3, %v26309_v60  ;;  %10482 = vst.msk [vmem:[#allocation3 + $0x1a8] sm:$0x3] %vm6805_vm3, %v26309_v60 }
 0x597   : > { %18750 = vrcp.f32 %v5747_v29  ;;  %6016 = vmatprep.mubr.f32.mxu1 %v5849_v55 }
 0x598   : > { %v18745_v26 = vpop.eup %18744  ;;  %6017 = vmatmul.mubr.f32.gmra.mxu1 %v5848_v44  ;;  %v26313_v44 = vld [vmem:[#allocation94_spill] sm:$0xff] }
 0x599   : > { %v5851_v31 = vmul.f32 %v18745_v26, %v22247_v10  ;;  %v5850_v33 = vmul.f32 %v18745_v26, %v22245_v63  ;;  %v26314_v26 = vld [vmem:[#allocation61_spill] sm:$0xff] }
 0x59a   : > { %v5750_v19 = vpop.xlane.xlu1 %5749 }
 0x59b   : > { %18752 = vrcp.f32 %v5750_v19  ;;  %6021 = vmatprep.mubr.f32.mxu1 %v5851_v31 }
 0x59c   : > { %v18747_v22 = vpop.eup %18746  ;;  %6022 = vmatmul.mubr.f32.gmra.mxu1 %v5850_v33 }
 0x59d   : > { %v5853_v17 = vmul.f32 %v18747_v22, %v22255_v61  ;;  %v5852_v21 = vmul.f32 %v18747_v22, %v22253_v36 }
 0x59e   : > { %v5753_v47 = vpop.xlane.xlu0 %5752 }
 0x59f   : > { %18754 = vrcp.f32 %v5753_v47  ;;  %6026 = vmatprep.mubr.f32.mxu1 %v5853_v17 }
 0x5a0   : > { %v18749_v9 = vpop.eup %18748  ;;  %6027 = vmatmul.mubr.f32.gmra.mxu1 %v5852_v21  ;;  %v26315_v21 = vld [vmem:[#allocation44_spill] sm:$0xff] }
 0x5a1   : > { %v5855_v54 = vmul.f32 %v18749_v9, %v22263_v24  ;;  %v5854_v10 = vmul.f32 %v18749_v9, %v22261_v32  ;;  %v26316_v9 = vld [vmem:[#allocation42_spill] sm:$0xff] }
 0x5a2   : > { %v5756_v25 = vpop.xlane.xlu1 %5755 }
 0x5a3   : > { %18756 = vrcp.f32 %v5756_v25  ;;  %6031 = vmatprep.mubr.f32.mxu1 %v5855_v54 }
 0x5a4   : > { %v18751_v63 = vpop.eup %18750  ;;  %6032 = vmatmul.mubr.f32.gmra.mxu1 %v5854_v10 }
 0x5a5   : > { %v5857_v30 = vmul.f32 %v18751_v63, %v26307_v49  ;;  %v5856_v61 = vmul.f32 %v18751_v63, %v26308_v6 }
 0x5a6   : > { %v5759_v36 = vpop.xlane.xlu0 %5758  ;;  %v5498_v15 = vpop.xlane.xlu1 %5497 }
 0x5a7   : > { %18758 = vrcp.f32 %v5759_v36  ;;  %v5562_v32 = vsub.f32 %v22107_v59, %v5498_v15  ;;  %v5563_v24 = vsub.f32 %v22117_v28, %v5498_v15  ;;  %6036 = vmatprep.mubr.f32.mxu1 %v5857_v30  ;;  %v14940_v59 = vld [vmem:[%s25739_s10 + $0x18] sm:$0xff]  ;;  %v14939_v28 = vld [vmem:[%s25739_s10 + $0x10] sm:$0xff]  ;;  %v26317_v30 = vld [vmem:[#allocation63_spill] sm:$0xff] }
 0x5a8   : > { %v18753_v53 = vpop.eup %18752  ;;  %6037 = vmatmul.mubr.f32.gmra.mxu1 %v5856_v61  ;;  %17580 = vmatprep.subr.mxu0 %v14940_v59  ;;  %v26318_v61 = vld [vmem:[#allocation95_spill] sm:$0xff] }
 0x5a9   : > { %v5686_v58 = vmul.f32 1.442695, %v5562_v32  ;;  %v5688_v62 = vmul.f32 1.442695, %v5563_v24  ;;  %v5859_v34 = vmul.f32 %v18753_v53, %v22279_v23  ;;  %v5858_v11 = vmul.f32 %v18753_v53, %v22277_v35  ;;  %17581 = vmatpush3.msra.mxu0 %v14940_v59 }
 0x5aa   : > { %v5762_v40 = vpop.xlane.xlu0 %5761  ;;  %v5501_v4 = vpop.xlane.xlu1 %5500  ;;  %17582 = vmatprep.subr.mxu0 %v14939_v28 }
 0x5ab   : > { %18760 = vpow2.f32 %v5686_v58  ;;  %v5564_v42 = vsub.f32 %v22127_v39, %v5501_v4  ;;  %v5565_v1 = vsub.f32 %v22137_v5, %v5501_v4  ;;  %6041 = vmatprep.mubr.f32.mxu1 %v5859_v34  ;;  %17583 = vmatpush3.msra.mxu0 %v14939_v28 }
 0x5ac   : > { %v18755_v23 = vpop.eup %18754  ;;  %18762 = vpow2.f32 %v5688_v62  ;;  %6042 = vmatmul.mubr.f32.gmra.mxu1 %v5858_v11  ;;  %17585 = vmatmul.mubr.msk.f32.vlgmr.msra.gmra.mxu0 %vm4166_vm1, %v6926_v48 }
 0x5ad   : > { %18764 = vrcp.f32 %v5762_v40  ;;  %v5690_v35 = vmul.f32 1.442695, %v5564_v42  ;;  %v5692_v13 = vmul.f32 1.442695, %v5565_v1  ;;  %v5861_v39 = vmul.f32 %v18755_v23, %v22287_v51 }
 0x5ae   : > { %v5765_v5 = vpop.xlane.xlu0 %5764  ;;  %v5860_v57 = vmul.f32 %v18755_v23, %v26310_v41 }
 0x5af   : > { %18766 = vpow2.f32 %v5690_v35  ;;  %6046 = vmatprep.mubr.f32.mxu1 %v5861_v39 }
 0x5b0   : > { %v18757_v8 = vpop.eup %18756  ;;  %18768 = vpow2.f32 %v5692_v13  ;;  %6047 = vmatmul.mubr.f32.gmra.mxu1 %v5860_v57 }
 0x5b1   : > { %18770 = vrcp.f32 %v5765_v5  ;;  %v5863_v38 = vmul.f32 %v18757_v8, %v26311_v2  ;;  %v5862_v55 = vmul.f32 %v18757_v8, %v26312_v52 }
 0x5b3   : > { %6051 = vmatprep.mubr.f32.mxu1 %v5863_v38 }
 0x5b4   : > { %v18759_v51 = vpop.eup %18758  ;;  %6052 = vmatmul.mubr.f32.gmra.mxu1 %v5862_v55  ;;  %v26319_v55 = vld [vmem:[#allocation13_spill] sm:$0xff] }
 0x5b5   : > { %v5865_v29 = vmul.f32 %v18759_v51, %v26313_v44  ;;  %v5864_v31 = vmul.f32 %v18759_v51, %v26314_v26 }
 0x5b7   : > { %6056 = vmatprep.mubr.f32.mxu1 %v5865_v29  ;;  %v26320_v29 = vld [vmem:[#allocation7_spill] sm:$0xff] }
 0x5b8   : > { %v22505_v33 = vpop.eup %18760  ;;  %6057 = vmatmul.mubr.f32.gmra.mxu1 %v5864_v31 }
 0x5b9   : > { %v22507_v19 = vpop.eup %18762 }
 0x5ba   : > { %v18765_v22 = vpop.eup %18764  ;;  %v5784_v17 = vadd.f32 %v22507_v19, %v22505_v33 }
 0x5bb   : > { %v5867_v47 = vmul.f32 %v18765_v22, %v26315_v21  ;;  %v5866_v54 = vmul.f32 %v18765_v22, %v26316_v9  ;;  %v26321_v22 = vld [vmem:[#allocation15_spill] sm:$0xff] }
 0x5bc   : > { %v22513_v10 = vpop.eup %18766  ;;  %5785 = vadd.xlane.f32.xlu1 %v5784_v17 }
 0x5bd   : > { %v22515_v25 = vpop.eup %18768  ;;  %6061 = vmatprep.mubr.f32.mxu1 %v5867_v47 }
 0x5be   : > { %v18771_v63 = vpop.eup %18770  ;;  %6062 = vmatmul.mubr.f32.gmra.mxu1 %v5866_v54  ;;  %v5787_v49 = vadd.f32 %v22515_v25, %v22513_v10 }
 0x5bf   : > { %v5869_v6 = vmul.f32 %v18771_v63, %v26317_v30  ;;  %v5868_v36 = vmul.f32 %v18771_v63, %v26318_v61  ;;  %v26322_v63 = vld [vmem:[#allocation8_spill] sm:$0xff] }
 0x5c0   : > { %5788 = vadd.xlane.f32.xlu0 %v5787_v49 }
 0x5c1   : > { %6066 = vmatprep.mubr.f32.mxu1 %v5869_v6 }
 0x5c2   : > { %6067 = vmatmul.mubr.f32.gmra.mxu1 %v5868_v36 }
 0x5f2   : > { %v5768_v15 = vpop.xlane.xlu1 %5767 }
 0x5f3   : > { %18772 = vrcp.f32 %v5768_v15 }
 0x5f6   : > { %v5771_v60 = vpop.xlane.xlu0 %5770 }
 0x5f7   : > { %18774 = vrcp.f32 %v5771_v60  ;;  %v26323_v60 = vld [vmem:[#allocation9_spill] sm:$0xff] }
 0x5f8   : > { %v6425_v32 = vpop.xlane.xlu1 %6424 }
 0x5f9   : > { %v6427_v24 = vsub.f32 %v22352_v14, %v6425_v32 }
 0x5fa   : > { %v5774_v53 = vpop.xlane.xlu0 %5773 }
 0x5fb   : > { %v6430_v58 = vmul.f32 1.442695, %v6427_v24  ;;  %18776 = vrcp.f32 %v5774_v53 }
 0x5fc   : > { %v6422_v62 = vpop.xlane.xlu1 %6421 }
 0x5fd   : > { %18778 = vpow2.f32 %v6430_v58  ;;  %v6426_v34 = vsub.f32 %v22365_v27, %v6422_v62 }
 0x5ff   : > { %v6428_v11 = vmul.f32 1.442695, %v6426_v34  ;;  %v5777_v40 = vpop.xlane.xlu0 %5776  ;;  %v26324_v34 = vld [vmem:[#allocation10_spill] sm:$0xff] }
 0x600   : > { %v18773_v4 = vpop.eup %18772  ;;  %18780 = vrcp.f32 %v5777_v40 }
 0x601   : > { %18782 = vpow2.f32 %v6428_v11  ;;  %v5871_v42 = vmul.f32 %v18773_v4, %v22337_v45  ;;  %v5870_v1 = vmul.f32 %v18773_v4, %v22335_v56 }
 0x603   : > { %v5780_v59 = vpop.xlane.xlu1 %5779  ;;  %6071 = vmatprep.mubr.f32.mxu1 %v5871_v42 }
 0x604   : > { %v18775_v28 = vpop.eup %18774  ;;  %18784 = vrcp.f32 %v5780_v59  ;;  %6072 = vmatmul.mubr.f32.gmra.mxu1 %v5870_v1  ;;  %v26325_v59 = vld [vmem:[#allocation11_spill] sm:$0xff] }
 0x605   : > { %v5873_v14 = vmul.f32 %v18775_v28, %v22347_v3  ;;  %v5872_v0 = vmul.f32 %v18775_v28, %v22344_v46 }
 0x606   : > { %v5783_v23 = vpop.xlane.xlu0 %5782 }
 0x607   : > { %18786 = vrcp.f32 %v5783_v23  ;;  %6076 = vmatprep.mubr.f32.mxu1 %v5873_v14 }
 0x608   : > { %v18777_v27 = vpop.eup %18776  ;;  %6077 = vmatmul.mubr.f32.gmra.mxu1 %v5872_v0 }
 0x609   : > { %v5875_v35 = vmul.f32 %v18777_v27, %v22358_v7  ;;  %v5874_v45 = vmul.f32 %v18777_v27, %v22354_v50 }
 0x60a   : > { %v22529_v13 = vpop.eup %18778 }
 0x60b   : > { %6081 = vmatprep.mubr.f32.mxu1 %v5875_v35  ;;  %v6435_v56 = vsel %vm4166_vm1, %v22529_v13, 0.0  ;;  %v26326_v35 = vld [vmem:[#allocation12_spill] sm:$0xff] }
 0x60c   : > { %6082 = vmatmul.mubr.f32.gmra.mxu1 %v5874_v45  ;;  %6436 = vadd.xlane.f32.xlu1 %v6435_v56 }
 0x60d   : > { %v18781_v3 = vpop.eup %18780 }
 0x60e   : > { %v22533_v39 = vpop.eup %18782  ;;  %v5877_v46 = vmul.f32 %v18781_v3, %v22373_v16  ;;  %v5876_v5 = vmul.f32 %v18781_v3, %v22367_v43  ;;  %v22543_v43 = vstv %s5886_s26 }
 0x60f   : > { %v6432_v7 = vsel %vm4166_vm1, %v22533_v39, 0.0 }
 0x610   : > { %6086 = vmatprep.mubr.f32.mxu1 %v5877_v46  ;;  %6433 = vadd.xlane.f32.xlu0 %v6432_v7 }
 0x611   : > { %v18785_v50 = vpop.eup %18784  ;;  %6087 = vmatmul.mubr.f32.gmra.mxu1 %v5876_v5 }
 0x612   : > { %v5879_v41 = vmul.f32 %v18785_v50, %v22379_v37  ;;  %v5878_v57 = vmul.f32 %v18785_v50, %v22377_v18  ;;  %v26327_v50 = vld [vmem:[#allocation14_spill] sm:$0xff] }
 0x614   : > { %v18787_v8 = vpop.eup %18786  ;;  %6091 = vmatprep.mubr.f32.mxu1 %v5879_v41 }
 0x615   : > { %6092 = vmatmul.mubr.f32.gmra.mxu1 %v5878_v57  ;;  %v5881_v48 = vmul.f32 %v18787_v8, %v22387_v20  ;;  %v5880_v16 = vmul.f32 %v18787_v8, %v22385_v12 }
 0x617   : > { %6096 = vmatprep.mubr.f32.mxu1 %v5881_v48 }
 0x619   : > { %6097 = vmatmul.mubr.f32.gmra.mxu1 %v5880_v16 }
 0x61e   : > { %v5953_v2 = vpop.f32.mrf.mxu1 }
 0x61f   : > { %v6113_v38 = vmul.f32 %v22543_v43, %v5953_v2  ;;  %v26328_v2 = vld [vmem:[#allocation16_spill] sm:$0xff] }
 0x620   : > { %v5955_v52 = vpop.f32.mrf.mxu1 }
 0x621   : > { %v6145_v37 = vadd.f32 %v6113_v38, %v26319_v55 }
 0x622   : > { %v5958_v51 = vpop.f32.mrf.mxu1 }
 0x623   : > { %6859 = vst.msk [vmem:[#allocation2 + $0x19] sm:$0xff] %vm4166_vm1, %v6145_v37  ;;  %v6114_v18 = vmul.f32 %v22543_v43, %v5958_v51 }
 0x624   : > { %v5960_v44 = vpop.f32.mrf.mxu1 }
 0x625   : > { %v6146_v20 = vadd.f32 %v6114_v18, %v26320_v29  ;;  %v26329_v18 = vld [vmem:[#allocation17_spill] sm:$0xff] }
 0x626   : > { %v5963_v26 = vpop.f32.mrf.mxu1 }
 0x627   : > { %6860 = vst.msk [vmem:[#allocation2 + $0x21] sm:$0xff] %vm4166_vm1, %v6146_v20  ;;  %v6115_v12 = vmul.f32 %v22543_v43, %v5963_v26 }
 0x628   : > { %v5965_v31 = vpop.f32.mrf.mxu1 }
 0x629   : > { %v6147_v17 = vadd.f32 %v6115_v12, %v26321_v22  ;;  %v26330_v22 = vld [vmem:[#allocation18_spill] sm:$0xff] }
 0x62a   : > { %v22553_v21 = vld [vmem:[#allocation2 + $0x19] sm:$0xff] }
 0x62b   : > { %6861 = vst.msk [vmem:[#allocation2 + $0x31] sm:$0xff] %vm4166_vm1, %v6147_v17  ;;  %v5968_v47 = vpop.f32.mrf.mxu1  ;;  %17587 = vmatprep.mubr.msk.f32.mxu0 %vm4166_vm1, %v22553_v21 }
 0x62c   : > { %v6116_v9 = vmul.f32 %v22543_v43, %v5968_v47 }
 0x62d   : > { %v5970_v54 = vpop.f32.mrf.mxu1 }
 0x62e   : > { %v6148_v49 = vadd.f32 %v6116_v9, %v26322_v63  ;;  %v22560_v30 = vld [vmem:[#allocation2 + $0x21] sm:$0xff] }
 0x62f   : > { %17588 = vmatmul.mubr.msk.f32.gmra.mxu0 %vm4166_vm1, %v22560_v30 }
 0x630   : > { %6862 = vst.msk [vmem:[#allocation2 + $0x39] sm:$0xff] %vm4166_vm1, %v6148_v49  ;;  %v5973_v6 = vpop.f32.mrf.mxu1 }
 0x631   : > { %v6117_v61 = vmul.f32 %v22543_v43, %v5973_v6 }
 0x632   : > { %v5975_v36 = vpop.f32.mrf.mxu1  ;;  %v22566_v15 = vld [vmem:[#allocation2 + $0x31] sm:$0xff] }
 0x633   : > { %v6149_v32 = vadd.f32 %v6117_v61, %v26323_v60  ;;  %17590 = vmatprep.mubr.msk.f32.mxu0 %vm4166_vm1, %v22566_v15  ;;  %v26331_v36 = vld [vmem:[#allocation27_spill] sm:$0xff] }
 0x635   : > { %6863 = vst.msk [vmem:[#allocation2 + $0x49] sm:$0xff] %vm4166_vm1, %v6149_v32  ;;  %v5978_v24 = vpop.f32.mrf.mxu1 }
 0x636   : > { %v6118_v53 = vmul.f32 %v22543_v43, %v5978_v24 }
 0x637   : > { %v5980_v58 = vpop.f32.mrf.mxu1  ;;  %v22573_v62 = vld [vmem:[#allocation2 + $0x39] sm:$0xff] }
 0x638   : > { %v6150_v11 = vadd.f32 %v6118_v53, %v26324_v34  ;;  %17591 = vmatmul.mubr.msk.f32.gmra.mxu0 %vm4166_vm1, %v22573_v62  ;;  %v26332_v34 = vld [vmem:[#allocation19_spill] sm:$0xff] }
 0x63a   : > { %6864 = vst.msk [vmem:[#allocation2 + $0x51] sm:$0xff] %vm4166_vm1, %v6150_v11  ;;  %v5983_v40 = vpop.f32.mrf.mxu1 }
 0x63b   : > { %v6119_v4 = vmul.f32 %v22543_v43, %v5983_v40  ;;  %v26333_v40 = vld [vmem:[#allocation87_spill] sm:$0xff] }
 0x63c   : > { %v5985_v42 = vpop.f32.mrf.mxu1  ;;  %v22580_v1 = vld [vmem:[#allocation2 + $0x49] sm:$0xff] }
 0x63d   : > { %v6151_v28 = vadd.f32 %v6119_v4, %v26325_v59  ;;  %17593 = vmatprep.mubr.msk.f32.mxu0 %vm4166_vm1, %v22580_v1  ;;  %v26334_v59 = vld [vmem:[#allocation20_spill] sm:$0xff] }
 0x63f   : > { %6865 = vst.msk [vmem:[#allocation2 + $0x61] sm:$0xff] %vm4166_vm1, %v6151_v28  ;;  %v5988_v14 = vpop.f32.mrf.mxu1 }
 0x640   : > { %v6120_v0 = vmul.f32 %v22543_v43, %v5988_v14 }
 0x641   : > { %v5990_v23 = vpop.f32.mrf.mxu1  ;;  %v22587_v27 = vld [vmem:[#allocation2 + $0x51] sm:$0xff] }
 0x642   : > { %v6152_v45 = vadd.f32 %v6120_v0, %v26326_v35  ;;  %17594 = vmatmul.mubr.msk.f32.gmra.mxu0 %vm4166_vm1, %v22587_v27 }
 0x644   : > { %6866 = vst.msk [vmem:[#allocation2 + $0x69] sm:$0xff] %vm4166_vm1, %v6152_v45  ;;  %v5993_v56 = vpop.f32.mrf.mxu1  ;;  %v26335_v45 = vld [vmem:[#allocation21_spill] sm:$0xff] }
 0x645   : > { %v6121_v3 = vmul.f32 %v22543_v43, %v5993_v56  ;;  %v5786_v46 = vpop.xlane.xlu1 %5785 }
 0x646   : > { %18788 = vrcp.f32 %v5786_v46  ;;  %v5995_v5 = vpop.f32.mrf.mxu1  ;;  %v22594_v7 = vld [vmem:[#allocation2 + $0x61] sm:$0xff] }
 0x647   : > { %v6153_v41 = vadd.f32 %v6121_v3, %v26327_v50  ;;  %17596 = vmatprep.mubr.msk.f32.mxu0 %vm4166_vm1, %v22594_v7 }
 0x648   : > { %v5998_v57 = vpop.f32.mrf.mxu1 }
 0x649   : > { %6867 = vst.msk [vmem:[#allocation2 + $0x79] sm:$0xff] %vm4166_vm1, %v6153_v41  ;;  %v6122_v8 = vmul.f32 %v22543_v43, %v5998_v57  ;;  %v5789_v48 = vpop.xlane.xlu0 %5788  ;;  %v15006_v41 = vld [vmem:[%s25739_s10 + $0x28] sm:$0xff]  ;;  %v15005_v57 = vld [vmem:[%s25739_s10 + $0x20] sm:$0xff] }
 0x64a   : > { %18790 = vrcp.f32 %v5789_v48  ;;  %v6000_v16 = vpop.f32.mrf.mxu1  ;;  %17684 = vmatprep.subr.mxu0 %v15006_v41 }
 0x64b   : > { %v6154_v38 = vadd.f32 %v6122_v8, %v26328_v2  ;;  %v22602_v52 = vld [vmem:[#allocation2 + $0x69] sm:$0xff]  ;;  %v26336_v8 = vld [vmem:[#allocation23_spill] sm:$0xff]  ;;  %17685 = vmatpush3.msra.mxu0 %v15006_v41 }
 0x64c   : > { %v6003_v55 = vpop.f32.mrf.mxu1  ;;  %17597 = vmatmul.mubr.msk.f32.gmra.mxu0 %vm4166_vm1, %v22602_v52  ;;  %17686 = vmatprep.subr.mxu0 %v15005_v57 }
 0x64d   : > { %6868 = vst.msk [vmem:[#allocation2 + $0x81] sm:$0xff] %vm4166_vm1, %v6154_v38  ;;  %v6123_v37 = vmul.f32 %v22543_v43, %v6003_v55  ;;  %17687 = vmatpush3.msra.mxu0 %v15005_v57 }
 0x64e   : > { %v6005_v51 = vpop.f32.mrf.mxu1 }
 0x64f   : > { %v6155_v44 = vadd.f32 %v6123_v37, %v26329_v18  ;;  %v26337_v37 = vld [vmem:[#allocation22_spill] sm:$0xff] }
 0x650   : > { %v6008_v29 = vpop.f32.mrf.mxu1  ;;  %v22609_v20 = vld [vmem:[#allocation2 + $0x79] sm:$0xff] }
 0x651   : > { %6869 = vst.msk [vmem:[#allocation2 + $0x91] sm:$0xff] %vm4166_vm1, %v6155_v44  ;;  %v6124_v26 = vmul.f32 %v22543_v43, %v6008_v29  ;;  %17599 = vmatprep.mubr.msk.f32.mxu0 %vm4166_vm1, %v22609_v20 }
 0x652   : > { %v6010_v12 = vpop.f32.mrf.mxu1 }
 0x653   : > { %v18789_v31 = vpop.eup %18788  ;;  %v6156_v17 = vadd.f32 %v6124_v26, %v26330_v22  ;;  %v26338_v12 = vld [vmem:[#allocation24_spill] sm:$0xff] }
 0x654   : > { %v6013_v47 = vpop.f32.mrf.mxu1  ;;  %v5883_v9 = vmul.f32 %v18789_v31, %v22507_v19  ;;  %v22617_v54 = vld [vmem:[#allocation2 + $0x81] sm:$0xff]  ;;  %v5882_v63 = vmul.f32 %v18789_v31, %v22505_v33 }
 0x655   : > { %6870 = vst.msk [vmem:[#allocation2 + $0x99] sm:$0xff] %vm4166_vm1, %v6156_v17  ;;  %v6125_v49 = vmul.f32 %v22543_v43, %v6013_v47  ;;  %17600 = vmatmul.mubr.msk.f32.gmra.mxu0 %vm4166_vm1, %v22617_v54 }
 0x656   : > { %6101 = vmatprep.mubr.f32.mxu1 %v5883_v9  ;;  %v6015_v6 = vpop.f32.mrf.mxu1 }
 0x657   : > { %v18791_v61 = vpop.eup %18790  ;;  %v6157_v60 = vadd.f32 %v6125_v49, %v26331_v36  ;;  %6102 = vmatmul.mubr.f32.gmra.mxu1 %v5882_v63  ;;  %v26339_v63 = vld [vmem:[#allocation28_spill] sm:$0xff] }
 0x658   : > { %v6018_v32 = vpop.f32.mrf.mxu1  ;;  %v5885_v19 = vmul.f32 %v18791_v61, %v22515_v25  ;;  %v22626_v24 = vld [vmem:[#allocation2 + $0x91] sm:$0xff]  ;;  %v5884_v33 = vmul.f32 %v18791_v61, %v22513_v10 }
 0x659   : > { %6871 = vst.msk [vmem:[#allocation2 + $0xa9] sm:$0xff] %vm4166_vm1, %v6157_v60  ;;  %v6126_v53 = vmul.f32 %v22543_v43, %v6018_v32  ;;  %17602 = vmatprep.mubr.msk.f32.mxu0 %vm4166_vm1, %v22626_v24  ;;  %v26340_v32 = vld [vmem:[#allocation25_spill] sm:$0xff] }
 0x65a   : > { %6106 = vmatprep.mubr.f32.mxu1 %v5885_v19  ;;  %v6020_v58 = vpop.f32.mrf.mxu1 }
 0x65b   : > { %v6158_v11 = vadd.f32 %v6126_v53, %v26332_v34  ;;  %6107 = vmatmul.mubr.f32.gmra.mxu1 %v5884_v33 }
 0x65c   : > { %17532 = vmatprep.mubr.msk.f32.mxu1 %vm4166_vm1, %v26333_v40  ;;  %v6023_v25 = vpop.f32.mrf.mxu1  ;;  %v22636_v4 = vld [vmem:[#allocation2 + $0x99] sm:$0xff] }
 0x65d   : > { %6872 = vst.msk [vmem:[#allocation2 + $0xb1] sm:$0xff] %vm4166_vm1, %v6158_v11  ;;  %v6127_v10 = vmul.f32 %v22543_v43, %v6023_v25  ;;  %17603 = vmatmul.mubr.msk.f32.gmra.mxu0 %vm4166_vm1, %v22636_v4  ;;  %v26341_v11 = vld [vmem:[#allocation26_spill] sm:$0xff] }
 0x65e   : > { %v6025_v42 = vpop.f32.mrf.mxu1 }
 0x65f   : > { %v6159_v28 = vadd.f32 %v6127_v10, %v26334_v59 }
 0x660   : > { %v6028_v14 = vpop.f32.mrf.mxu1  ;;  %v22643_v0 = vld [vmem:[#allocation2 + $0xa9] sm:$0xff] }
 0x661   : > { %6873 = vst.msk [vmem:[#allocation2 + $0xc1] sm:$0xff] %vm4166_vm1, %v6159_v28  ;;  %v6128_v23 = vmul.f32 %v22543_v43, %v6028_v14  ;;  %17605 = vmatprep.mubr.msk.f32.mxu0 %vm4166_vm1, %v22643_v0 }
 0x662   : > { %v6030_v35 = vpop.f32.mrf.mxu1 }
 0x663   : > { %v6160_v56 = vadd.f32 %v6128_v23, %v26335_v45  ;;  %v26342_v23 = vld [vmem:[#allocation29_spill] sm:$0xff] }
 0x664   : > { %v6033_v3 = vpop.f32.mrf.mxu1  ;;  %v22650_v46 = vld [vmem:[#allocation2 + $0xb1] sm:$0xff] }
 0x665   : > { %6874 = vst.msk [vmem:[#allocation2 + $0xc9] sm:$0xff] %vm4166_vm1, %v6160_v56  ;;  %v6129_v5 = vmul.f32 %v22543_v43, %v6033_v3  ;;  %17606 = vmatmul.mubr.msk.f32.gmra.mxu0 %vm4166_vm1, %v22650_v46 }
 0x666   : > { %v6035_v50 = vpop.f32.mrf.mxu1 }
 0x667   : > { %v6161_v48 = vadd.f32 %v6129_v5, %v26336_v8  ;;  %v26343_v50 = vld [vmem:[#allocation43_spill] sm:$0xff] }
 0x668   : > { %v6038_v16 = vpop.f32.mrf.mxu1  ;;  %v22663_v2 = vld [vmem:[#allocation2 + $0xc1] sm:$0xff] }
 0x669   : > { %6875 = vst.msk [vmem:[#allocation2 + $0xd9] sm:$0xff] %vm4166_vm1, %v6161_v48  ;;  %v6130_v38 = vmul.f32 %v22543_v43, %v6038_v16  ;;  %17608 = vmatprep.mubr.msk.f32.mxu0 %vm4166_vm1, %v22663_v2 }
 0x66a   : > { %v6040_v55 = vpop.f32.mrf.mxu1 }
 0x66b   : > { %v6162_v51 = vadd.f32 %v6130_v38, %v26337_v37 }
 0x66c   : > { %v6043_v18 = vpop.f32.mrf.mxu1  ;;  %v22670_v44 = vld [vmem:[#allocation2 + $0xc9] sm:$0xff] }
 0x66d   : > { %6876 = vst.msk [vmem:[#allocation2 + $0xe1] sm:$0xff] %vm4166_vm1, %v6162_v51  ;;  %v6131_v29 = vmul.f32 %v22543_v43, %v6043_v18  ;;  %17609 = vmatmul.mubr.msk.f32.gmra.mxu0 %vm4166_vm1, %v22670_v44  ;;  %v22731_v51 = vld [vmem:[%s25739_s10 + $0x48] sm:$0xff] }
 0x66e   : > { %v6045_v26 = vpop.f32.mrf.mxu1  ;;  %17788 = vmatprep.subr.mxu0 %v22731_v51 }
 0x66f   : > { %v6163_v31 = vadd.f32 %v6131_v29, %v26338_v12  ;;  %v6924_v29 = vld [vmem:[%s25739_s10 + $0x8] sm:$0xff]  ;;  %v26344_v26 = vld [vmem:[#allocation49_spill] sm:$0xff] }
 0x670   : > { %v6048_v22 = vpop.f32.mrf.mxu1  ;;  %v22677_v17 = vld [vmem:[#allocation2 + $0xd9] sm:$0xff]  ;;  %v26345_v12 = vld [vmem:[#allocation80_spill] sm:$0xff] }
 0x671   : > { %6877 = vst.msk [vmem:[#allocation2 + $0xf1] sm:$0xff] %vm4166_vm1, %v6163_v31  ;;  %v6132_v47 = vmul.f32 %v22543_v43, %v6048_v22  ;;  %17611 = vmatprep.mubr.msk.f32.mxu0 %vm4166_vm1, %v22677_v17  ;;  %v26346_v31 = vld [vmem:[#allocation84_spill] sm:$0xff] }
 0x672   : > { %v6050_v9 = vpop.f32.mrf.mxu1  ;;  %v26347_v22 = vld [vmem:[#allocation48_spill] sm:$0xff] }
 0x673   : > { %v6164_v49 = vadd.f32 %v6132_v47, %v26339_v63  ;;  %v26348_v47 = vld [vmem:[#allocation33_spill] sm:$0xff]  ;;  %v26349_v9 = vld [vmem:[#allocation82_spill] sm:$0xff] }
 0x674   : > { %v6053_v6 = vpop.f32.mrf.mxu1  ;;  %v22684_v61 = vld [vmem:[#allocation2 + $0xe1] sm:$0xff]  ;;  %v26350_v63 = vld [vmem:[#allocation34_spill] sm:$0xff] }
 0x675   : > { %6878 = vst.msk [vmem:[#allocation2 + $0xf9] sm:$0xff] %vm4166_vm1, %v6164_v49  ;;  %v6133_v36 = vmul.f32 %v22543_v43, %v6053_v6  ;;  %17612 = vmatmul.mubr.msk.f32.gmra.mxu0 %vm4166_vm1, %v22684_v61  ;;  %v26351_v49 = vld [vmem:[#allocation36_spill] sm:$0xff]  ;;  %v26352_v6 = vld [vmem:[#allocation93_spill] sm:$0xff] }
 0x676   : > { %v6055_v60 = vpop.f32.mrf.mxu1 }
 0x677   : > { %v6165_v19 = vadd.f32 %v6133_v36, %v26340_v32  ;;  %v26353_v36 = vld [vmem:[#allocation37_spill] sm:$0xff]  ;;  %v26354_v60 = vld [vmem:[#allocation54_spill] sm:$0xff] }
 0x678   : > { %v6058_v33 = vpop.f32.mrf.mxu1  ;;  %v22691_v53 = vld [vmem:[#allocation2 + $0xf1] sm:$0xff] }
 0x679   : > { %6879 = vst.msk [vmem:[#allocation2 + $0x109] sm:$0xff] %vm4166_vm1, %v6165_v19  ;;  %v6134_v58 = vmul.f32 %v22543_v43, %v6058_v33  ;;  %17614 = vmatprep.mubr.msk.f32.mxu0 %vm4166_vm1, %v22691_v53  ;;  %v26355_v32 = vld [vmem:[#allocation101_spill] sm:$0xff] }
 0x67a   : > { %v6060_v34 = vpop.f32.mrf.mxu1 }
 0x67b   : > { %v6166_v25 = vadd.f32 %v6134_v58, %v26341_v11  ;;  %v26356_v34 = vld [vmem:[#allocation39_spill] sm:$0xff]  ;;  %v26357_v11 = vld [vmem:[#allocation30_spill] sm:$0xff] }
 0x67c   : > { %v22698_v10 = vld [vmem:[#allocation2 + $0xf9] sm:$0xff] }
 0x67d   : > { %6880 = vst.msk [vmem:[#allocation2 + $0x111] sm:$0xff] %vm4166_vm1, %v6166_v25  ;;  %17615 = vmatmul.mubr.msk.f32.gmra.mxu0 %vm4166_vm1, %v22698_v10 }
 0x67e   : > { %v6063_v42 = vpop.f32.mrf.mxu1 }
 0x67f   : > { %v6135_v59 = vmul.f32 %v22543_v43, %v6063_v42  ;;  %v26358_v42 = vld [vmem:[#allocation40_spill] sm:$0xff] }
 0x680   : > { %v6065_v28 = vpop.f32.mrf.mxu1  ;;  %v22704_v14 = vld [vmem:[#allocation2 + $0x109] sm:$0xff] }
 0x681   : > { %v6167_v35 = vadd.f32 %v6135_v59, %v26342_v23  ;;  %17617 = vmatprep.mubr.msk.f32.mxu0 %vm4166_vm1, %v22704_v14 }
 0x682   : > { %v6068_v45 = vpop.f32.mrf.mxu1 }
 0x683   : > { %6881 = vst.msk [vmem:[#allocation2 + $0x121] sm:$0xff] %vm4166_vm1, %v6167_v35  ;;  %v6136_v56 = vmul.f32 %v22543_v43, %v6068_v45  ;;  %v26359_v35 = vld [vmem:[#allocation107_spill] sm:$0xff]  ;;  %v26360_v45 = vld [vmem:[#allocation78_spill] sm:$0xff] }
 0x684   : > { %v6070_v3 = vpop.f32.mrf.mxu1  ;;  %v22711_v5 = vld [vmem:[#allocation2 + $0x111] sm:$0xff] }
 0x685   : > { %v6168_v41 = vadd.f32 %v6136_v56, %v26343_v50  ;;  %17618 = vmatmul.mubr.msk.f32.gmra.mxu0 %vm4166_vm1, %v22711_v5  ;;  %v26361_v3 = vld [vmem:[#allocation35_spill] sm:$0xff] }
 0x687   : > { %6882 = vst.msk [vmem:[#allocation2 + $0x129] sm:$0xff] %vm4166_vm1, %v6168_v41 }
 0x68a   : > { %v22717_v57 = vld [vmem:[#allocation2 + $0x121] sm:$0xff] }
 0x68b   : > { %17620 = vmatprep.mubr.msk.f32.mxu0 %vm4166_vm1, %v22717_v57 }
 0x68e   : > { %v22721_v8 = vld [vmem:[#allocation2 + $0x129] sm:$0xff] }
 0x68f   : > { %17621 = vmatmul.mubr.msk.f32.gmra.mxu0 %vm4166_vm1, %v22721_v8 }
 0x695   : > { %v6437_v48 = vpop.xlane.xlu1 %6436 }
 0x696   : > { %18792 = vrcp.f32 %v6437_v48 }
 0x699   : > { %v6434_v16 = vpop.xlane.xlu0 %6433 }
 0x69a   : > { %18794 = vrcp.f32 %v6434_v16  ;;  %v26362_v16 = vld [vmem:[#allocation90_spill] sm:$0xff] }
 0x6a3   : > { %v18793_v38 = vpop.eup %18792 }
 0x6a4   : > { %v6441_v55 = vmul.f32 %v18793_v38, %v22529_v13  ;;  %v6923_v13 = vld [vmem:[%s25739_s10] sm:$0xff] }
 0x6a5   : > { %v26363_v38 = vld [vmem:[#allocation31_spill] sm:$0xff] }
 0x6a6   : > { %17528 = vmatprep.subr.msk.mxu1 %vm4166_vm1, %v6441_v55 }
 0x6a7   : > { %v18795_v37 = vpop.eup %18794  ;;  %17529 = vmatpush3.xpose.msk.msra.mxu1 %vm4166_vm1, %v6441_v55 }
 0x6a8   : > { %v6440_v18 = vmul.f32 %v18795_v37, %v22533_v39  ;;  %v22750_v39 = vld [vmem:[%s25739_s10 + $0x38] sm:$0xff]  ;;  %v26364_v37 = vld [vmem:[#allocation77_spill] sm:$0xff] }
 0x6aa   : > { %17530 = vmatprep.subr.msk.mxu1 %vm4166_vm1, %v6440_v18 }
 0x6ab   : > { %17531 = vmatpush3.xpose.msk.msra.mxu1 %vm4166_vm1, %v6440_v18 }
 0x6ac   : > { %17632 = vmatprep.subr.mxu1 %v6924_v29 }
 0x6ae   : > { %17533 = vmatmul.mubr.msk.f32.vlgmr.msra.gmra.mxu1 %vm4166_vm1, %v26344_v26  ;;  %v26407_v26 = vld [vmem:[#allocation45_spill] sm:$0xff] }
 0x6af   : > { %17535 = vmatprep.mubr.msk.f32.mxu1 %vm4166_vm1, %v26345_v12  ;;  %17633 = vmatpush3.msra.mxu1 %v6924_v29  ;;  %v23031_v12 = vld [vmem:[#allocation2 + $0xf0] sm:$0xff] }
 0x6b0   : > { %17634 = vmatprep.subr.mxu1 %v6923_v13 }
 0x6b1   : > { %17635 = vmatpush3.msra.mxu1 %v6923_v13 }
 0x6b2   : > { %17536 = vmatmul.mubr.msk.f32.gmra.mxu1 %vm4166_vm1, %v26346_v31  ;;  %17736 = vmatprep.subr.mxu1 %v22750_v39  ;;  %v23047_v31 = vld [vmem:[#allocation2 + $0x108] sm:$0xff] }
 0x6b3   : > { %17538 = vmatprep.mubr.msk.f32.mxu1 %vm4166_vm1, %v26347_v22  ;;  %v22999_v22 = vld [vmem:[#allocation2 + $0xc0] sm:$0xff] }
 0x6b6   : > { %17539 = vmatmul.mubr.msk.f32.gmra.mxu1 %vm4166_vm1, %v26348_v47  ;;  %v23015_v47 = vld [vmem:[#allocation2 + $0xd8] sm:$0xff] }
 0x6b7   : > { %17541 = vmatprep.mubr.msk.f32.mxu1 %vm4166_vm1, %v26349_v9  ;;  %v22967_v9 = vld [vmem:[#allocation2 + $0x90] sm:$0xff] }
 0x6ba   : > { %17542 = vmatmul.mubr.msk.f32.gmra.mxu1 %vm4166_vm1, %v26350_v63  ;;  %v22983_v63 = vld [vmem:[#allocation2 + $0xa8] sm:$0xff] }
 0x6bb   : > { %17544 = vmatprep.mubr.msk.f32.mxu1 %vm4166_vm1, %v26351_v49  ;;  %v22959_v49 = vld [vmem:[#allocation2 + $0x80] sm:$0xff] }
 0x6be   : > { %17545 = vmatmul.mubr.msk.f32.gmra.mxu1 %vm4166_vm1, %v26352_v6  ;;  %v22963_v6 = vld [vmem:[#allocation2 + $0xaa] sm:$0xff] }
 0x6bf   : > { %17547 = vmatprep.mubr.msk.f32.mxu1 %vm4166_vm1, %v26353_v36  ;;  %v22951_v36 = vld [vmem:[#allocation2 + $0x78] sm:$0xff]  ;;  %26395 = vst [vmem:[#allocation69_spill] sm:$0xff] %v22963_v6 }
 0x6c2   : > { %17548 = vmatmul.mubr.msk.f32.gmra.mxu1 %vm4166_vm1, %v26354_v60  ;;  %v22957_v60 = vld [vmem:[#allocation2 + $0x9a] sm:$0xff] }
 0x6c3   : > { %17550 = vmatprep.mubr.msk.f32.mxu1 %vm4166_vm1, %v26355_v32  ;;  %v22943_v32 = vld [vmem:[#allocation2 + $0x68] sm:$0xff]  ;;  %26394 = vst [vmem:[#allocation59_spill] sm:$0xff] %v22957_v60 }
 0x6c4   : > { %v6073_v19 = vpop.f32.mrf.mxu1 }
 0x6c5   : > { %v6137_v33 = vmul.f32 %v22543_v43, %v6073_v19  ;;  %v26365_v19 = vld [vmem:[#allocation83_spill] sm:$0xff] }
 0x6c6   : > { %v6075_v58 = vpop.f32.mrf.mxu1  ;;  %17551 = vmatmul.mubr.msk.f32.gmra.mxu1 %vm4166_vm1, %v26356_v34  ;;  %v22947_v34 = vld [vmem:[#allocation2 + $0x92] sm:$0xff] }
 0x6c7   : > { %v6169_v25 = vadd.f32 %v6137_v33, %v26357_v11  ;;  %17553 = vmatprep.mubr.msk.f32.mxu1 %vm4166_vm1, %v26358_v42  ;;  %v26366_v58 = vld [vmem:[#allocation51_spill] sm:$0xff]  ;;  %v26367_v11 = vld [vmem:[#allocation46_spill] sm:$0xff]  ;;  %26393 = vst [vmem:[#allocation56_spill] sm:$0xff] %v22947_v34 }
 0x6c8   : > { %v6078_v59 = vpop.f32.mrf.mxu1  ;;  %v22935_v42 = vld [vmem:[#allocation2 + $0x60] sm:$0xff] }
 0x6c9   : > { %6883 = vst.msk [vmem:[#allocation2 + $0x139] sm:$0xff] %vm4166_vm1, %v6169_v25  ;;  %v6138_v28 = vmul.f32 %v22543_v43, %v6078_v59 }
 0x6ca   : > { %v6080_v23 = vpop.f32.mrf.mxu1  ;;  %17554 = vmatmul.mubr.msk.f32.gmra.mxu1 %vm4166_vm1, %v26359_v35  ;;  %v22941_v35 = vld [vmem:[#allocation2 + $0x82] sm:$0xff] }
 0x6cb   : > { %v6170_v56 = vadd.f32 %v6138_v28, %v26360_v45  ;;  %17556 = vmatprep.mubr.msk.f32.mxu1 %vm4166_vm1, %v26361_v3  ;;  %v26368_v45 = vld [vmem:[#allocation52_spill] sm:$0xff]  ;;  %v22927_v3 = vld [vmem:[#allocation2 + $0x50] sm:$0xff]  ;;  %26392 = vst [vmem:[#allocation102_spill] sm:$0xff] %v22941_v35 }
 0x6cc   : > { %v6083_v50 = vpop.f32.mrf.mxu1 }
 0x6cd   : > { %6884 = vst.msk [vmem:[#allocation2 + $0x141] sm:$0xff] %vm4166_vm1, %v6170_v56  ;;  %v6139_v41 = vmul.f32 %v22543_v43, %v6083_v50  ;;  %v26369_v50 = vld [vmem:[#allocation96_spill] sm:$0xff] }
 0x6ce   : > { %v6085_v48 = vpop.f32.mrf.mxu1  ;;  %17557 = vmatmul.mubr.msk.f32.gmra.mxu1 %vm4166_vm1, %v26362_v16  ;;  %v22931_v16 = vld [vmem:[#allocation2 + $0x7a] sm:$0xff] }
 0x6cf   : > { %v6171_v55 = vadd.f32 %v6139_v41, %v26363_v38  ;;  %17559 = vmatprep.mubr.msk.f32.mxu1 %vm4166_vm1, %v26364_v37  ;;  %v26370_v41 = vld [vmem:[#allocation81_spill] sm:$0xff]  ;;  %v22915_v37 = vld [vmem:[#allocation2 + $0x62] sm:$0xff]  ;;  %26391 = vst [vmem:[#allocation66_spill] sm:$0xff] %v22931_v16 }
 0x6d0   : > { %v22793_v18 = vld [vmem:[#allocation2 + $0x139] sm:$0xff]  ;;  %26389 = vst [vmem:[#allocation70_spill] sm:$0xff] %v22915_v37 }
 0x6d1   : > { %6885 = vst.msk [vmem:[#allocation2 + $0x151] sm:$0xff] %vm4166_vm1, %v6171_v55  ;;  %v6088_v29 = vpop.f32.mrf.mxu1  ;;  %17623 = vmatprep.mubr.msk.f32.mxu0 %vm4166_vm1, %v22793_v18 }
 0x6d2   : > { %v6140_v13 = vmul.f32 %v22543_v43, %v6088_v29  ;;  %17560 = vmatmul.mubr.msk.f32.gmra.mxu1 %vm4166_vm1, %v26365_v19  ;;  %v22919_v19 = vld [vmem:[#allocation2 + $0x48] sm:$0xff] }
 0x6d3   : > { %v6090_v33 = vpop.f32.mrf.mxu1  ;;  %17562 = vmatprep.mubr.msk.f32.mxu1 %vm4166_vm1, %v26366_v58  ;;  %v22897_v58 = vld [vmem:[#allocation2 + $0x30] sm:$0xff] }
 0x6d4   : > { %v6172_v25 = vadd.f32 %v6140_v13, %v26367_v11  ;;  %v22804_v59 = vld [vmem:[#allocation2 + $0x141] sm:$0xff]  ;;  %v26371_v13 = vld [vmem:[#allocation85_spill] sm:$0xff] }
 0x6d5   : > { %v6093_v28 = vpop.f32.mrf.mxu1  ;;  %17624 = vmatmul.mubr.msk.f32.gmra.mxu0 %vm4166_vm1, %v22804_v59  ;;  %v26372_v11 = vld [vmem:[#allocation55_spill] sm:$0xff] }
 0x6d6   : > { %6886 = vst.msk [vmem:[#allocation2 + $0x159] sm:$0xff] %vm4166_vm1, %v6172_v25  ;;  %v6141_v23 = vmul.f32 %v22543_v43, %v6093_v28  ;;  %17563 = vmatmul.mubr.msk.f32.gmra.mxu1 %vm4166_vm1, %v26368_v45  ;;  %v26373_v25 = vld [vmem:[#allocation79_spill] sm:$0xff]  ;;  %v22910_v45 = vld [vmem:[#allocation2 + $0x38] sm:$0xff] }
 0x6d7   : > { %v6095_v56 = vpop.f32.mrf.mxu1  ;;  %17565 = vmatprep.mubr.msk.f32.mxu1 %vm4166_vm1, %v26369_v50  ;;  %v15073_v50 = vld [vmem:[%s25739_s10 + $0x40] sm:$0xff] }
 0x6d8   : > { %v6173_v48 = vadd.f32 %v6141_v23, %v26370_v41  ;;  %v22815_v38 = vld [vmem:[#allocation2 + $0x151] sm:$0xff]  ;;  %v26375_v41 = vld [vmem:[#allocation88_spill] sm:$0xff] }
 0x6d9   : > { %v6098_v55 = vpop.f32.mrf.mxu1  ;;  %17626 = vmatprep.mubr.msk.f32.mxu0 %vm4166_vm1, %v22815_v38  ;;  %v26374_v56 = vld [vmem:[#allocation86_spill] sm:$0xff] }
 0x6da   : > { %6887 = vst.msk [vmem:[#allocation2 + $0x169] sm:$0xff] %vm4166_vm1, %v6173_v48  ;;  %v6142_v29 = vmul.f32 %v22543_v43, %v6098_v55  ;;  %17566 = vmatmul.mubr.msk.f32.gmra.mxu1 %vm4166_vm1, %v26371_v13  ;;  %v26377_v55 = vld [vmem:[#allocation38_spill] sm:$0xff]  ;;  %v22893_v13 = vld [vmem:[#allocation2 + $0x4a] sm:$0xff] }
 0x6db   : > { %v6100_v33 = vpop.f32.mrf.mxu1  ;;  %17568 = vmatprep.mubr.msk.f32.mxu1 %vm4166_vm1, %v26372_v11  ;;  %v7603_v11 = vld [vmem:[#allocation2 + $0xa] sm:$0xff]  ;;  %26387 = vst [vmem:[#allocation67_spill] sm:$0xff] %v22893_v13 }
 0x6dc   : > { %v6174_v28 = vadd.f32 %v6142_v29, %v26373_v25  ;;  %v26378_v29 = vld [vmem:[#allocation58_spill] sm:$0xff]  ;;  %v7602_v33 = vld [vmem:[#allocation2 + $0x2] sm:$0xff] }
 0x6dd   : > { %v22826_v23 = vld [vmem:[#allocation2 + $0x159] sm:$0xff] }
 0x6de   : > { %6888 = vst.msk [vmem:[#allocation2 + $0x171] sm:$0xff] %vm4166_vm1, %v6174_v28  ;;  %17627 = vmatmul.mubr.msk.f32.gmra.mxu0 %vm4166_vm1, %v22826_v23  ;;  %17569 = vmatmul.mubr.msk.f32.gmra.mxu1 %vm4166_vm1, %v26374_v56  ;;  %v26380_v28 = vld [vmem:[#allocation89_spill] sm:$0xff]  ;;  %v6891_v56 = vld [vmem:[#allocation2] sm:$0xff] }
 0x6df   : > { %17571 = vmatprep.mubr.msk.f32.mxu1 %vm4166_vm1, %v26375_v41  ;;  %v26381_v41 = vld [vmem:[#allocation104_spill] sm:$0xff] }
 0x6e1   : > { %v22835_v48 = vld [vmem:[#allocation2 + $0x169] sm:$0xff] }
 0x6e2   : > { %26376 = vst [vmem:[#allocation64_spill] sm:$0xff] %v22835_v48  ;;  %17629 = vmatprep.mubr.msk.f32.mxu0 %vm4166_vm1, %v22835_v48  ;;  %17572 = vmatmul.mubr.msk.f32.gmra.mxu1 %vm4166_vm1, %v26377_v55  ;;  %v22853_v55 = vld [vmem:[#allocation2 + $0x1a] sm:$0xff]  ;;  %v23080_v48 = vld [vmem:[#allocation2 + $0x152] sm:$0xff] }
 0x6e3   : > { %17574 = vmatprep.mubr.msk.f32.mxu1 %vm4166_vm1, %v26378_v29  ;;  %26382 = vst [vmem:[#allocation47_spill] sm:$0xff] %v22853_v55  ;;  %v26383_v29 = vld [vmem:[#allocation57_spill] sm:$0xff] }
 0x6e5   : > { %v22843_v25 = vld [vmem:[#allocation2 + $0x171] sm:$0xff] }
 0x6e6   : > { %26379 = vst [vmem:[#allocation97_spill] sm:$0xff] %v22843_v25  ;;  %17630 = vmatmul.mubr.msk.f32.gmra.mxu0 %vm4166_vm1, %v22843_v25  ;;  %17575 = vmatmul.mubr.msk.f32.gmra.mxu1 %vm4166_vm1, %v26380_v28  ;;  %v15039_v28 = vld [vmem:[%s25739_s10 + $0x30] sm:$0xff] }
 0x6e7   : > { %17577 = vmatprep.mubr.msk.f32.mxu1 %vm4166_vm1, %v26381_v41  ;;  %17688 = vmatprep.mubr.msk.f32.mxu0 %vm4166_vm1, %v7602_v33  ;;  %v6892_v41 = vld [vmem:[#allocation2 + $0x8] sm:$0xff] }
 0x6e8   : > { %v22864_v33 = vld [vmem:[#allocation2 + $0x22] sm:$0xff] }
 0x6e9   : > { %26384 = vst [vmem:[#allocation50_spill] sm:$0xff] %v22864_v33 }
 0x6ea   : > { %17689 = vmatmul.mubr.msk.f32.vlgmr.msra.gmra.mxu0 %vm4166_vm1, %v7603_v11  ;;  %17578 = vmatmul.mubr.msk.f32.gmra.mxu1 %vm4166_vm1, %v26383_v29  ;;  %v22866_v11 = vld [vmem:[#allocation2 + $0x18] sm:$0xff] }
 0x6eb   : > { %17691 = vmatprep.mubr.msk.f32.mxu0 %vm4166_vm1, %v22853_v55  ;;  %17636 = vmatprep.mubr.msk.f32.mxu1 %vm4166_vm1, %v6891_v56  ;;  %v22870_v29 = vld [vmem:[#allocation2 + $0x32] sm:$0xff]  ;;  %v22886_v56 = vld [vmem:[#allocation2 + $0x3a] sm:$0xff] }
 0x6ec   : > { %17789 = vmatpush3.msra.mxu0 %v22731_v51  ;;  %26385 = vst [vmem:[#allocation98_spill] sm:$0xff] %v22870_v29  ;;  %v22879_v51 = vld [vmem:[%s25739_s10 + $0x68] sm:$0xff]  ;;  %26386 = vst [vmem:[#allocation99_spill] sm:$0xff] %v22886_v56 }
 0x6ed   : > { %17790 = vmatprep.subr.mxu0 %v15073_v50 }
 0x6ee   : > { %17692 = vmatmul.mubr.msk.f32.gmra.mxu0 %vm4166_vm1, %v22864_v33  ;;  %17637 = vmatmul.mubr.msk.f32.vlgmr.msra.gmra.mxu1 %vm4166_vm1, %v6892_v41  ;;  %v22888_v41 = vld [vmem:[#allocation2 + $0x20] sm:$0xff] }
 0x6ef   : > { %17694 = vmatprep.mubr.msk.f32.mxu0 %vm4166_vm1, %v22870_v29  ;;  %17639 = vmatprep.mubr.msk.f32.mxu1 %vm4166_vm1, %v22866_v11  ;;  %v23061_v33 = vld [vmem:[#allocation2 + $0x13a] sm:$0xff] }
 0x6f0   : > { %17791 = vmatpush3.msra.mxu0 %v15073_v50  ;;  %17737 = vmatpush3.msra.mxu1 %v22750_v39  ;;  %v22902_v39 = vld [vmem:[%s25739_s10 + $0x58] sm:$0xff]  ;;  %26408 = vst [vmem:[#allocation75_spill] sm:$0xff] %v23061_v33 }
 0x6f1   : > { %17738 = vmatprep.subr.mxu1 %v15039_v28  ;;  %17892 = vmatprep.subr.mxu0 %v22879_v51  ;;  %v22908_v50 = vld [vmem:[#allocation2 + $0x52] sm:$0xff] }
 0x6f2   : > { %17695 = vmatmul.mubr.msk.f32.gmra.mxu0 %vm4166_vm1, %v22886_v56  ;;  %17640 = vmatmul.mubr.msk.f32.gmra.mxu1 %vm4166_vm1, %v22888_v41  ;;  %26388 = vst [vmem:[#allocation100_spill] sm:$0xff] %v22908_v50  ;;  %v23054_v56 = vld [vmem:[#allocation2 + $0x12a] sm:$0xff] }
 0x6f3   : > { %17697 = vmatprep.mubr.msk.f32.mxu0 %vm4166_vm1, %v22893_v13  ;;  %17642 = vmatprep.mubr.msk.f32.mxu1 %vm4166_vm1, %v22897_v58  ;;  %26406 = vst [vmem:[#allocation71_spill] sm:$0xff] %v23054_v56 }
 0x6f4   : > { %17739 = vmatpush3.msra.mxu1 %v15039_v28  ;;  %v22925_v28 = vld [vmem:[#allocation2 + $0x6a] sm:$0xff] }
 0x6f5   : > { %17840 = vmatprep.subr.mxu1 %v22902_v39  ;;  %26390 = vst [vmem:[#allocation53_spill] sm:$0xff] %v22925_v28 }
 0x6f6   : > { %17698 = vmatmul.mubr.msk.f32.gmra.mxu0 %vm4166_vm1, %v22908_v50  ;;  %17643 = vmatmul.mubr.msk.f32.gmra.mxu1 %vm4166_vm1, %v22910_v45  ;;  %v23039_v50 = vld [vmem:[#allocation2 + $0xf8] sm:$0xff] }
 0x6f7   : > { %17700 = vmatprep.mubr.msk.f32.mxu0 %vm4166_vm1, %v22915_v37  ;;  %17645 = vmatprep.mubr.msk.f32.mxu1 %vm4166_vm1, %v22919_v19  ;;  %v23023_v37 = vld [vmem:[#allocation2 + $0xe0] sm:$0xff] }
 0x6fa   : > { %17701 = vmatmul.mubr.msk.f32.gmra.mxu0 %vm4166_vm1, %v22925_v28  ;;  %17646 = vmatmul.mubr.msk.f32.gmra.mxu1 %vm4166_vm1, %v22927_v3  ;;  %v23007_v28 = vld [vmem:[#allocation2 + $0xc8] sm:$0xff] }
 0x6fb   : > { %17703 = vmatprep.mubr.msk.f32.mxu0 %vm4166_vm1, %v22931_v16  ;;  %17648 = vmatprep.mubr.msk.f32.mxu1 %vm4166_vm1, %v22935_v42  ;;  %v22991_v16 = vld [vmem:[#allocation2 + $0xb0] sm:$0xff] }
 0x6fe   : > { %17704 = vmatmul.mubr.msk.f32.gmra.mxu0 %vm4166_vm1, %v22941_v35  ;;  %17649 = vmatmul.mubr.msk.f32.gmra.mxu1 %vm4166_vm1, %v22943_v32  ;;  %v22975_v35 = vld [vmem:[#allocation2 + $0x98] sm:$0xff] }
 0x6ff   : > { %17706 = vmatprep.mubr.msk.f32.mxu0 %vm4166_vm1, %v22947_v34  ;;  %17651 = vmatprep.mubr.msk.f32.mxu1 %vm4166_vm1, %v22951_v36  ;;  %v22973_v34 = vld [vmem:[#allocation2 + $0xb2] sm:$0xff] }
 0x700   : > { %26396 = vst [vmem:[#allocation103_spill] sm:$0xff] %v22973_v34 }
 0x702   : > { %17707 = vmatmul.mubr.msk.f32.gmra.mxu0 %vm4166_vm1, %v22957_v60  ;;  %17652 = vmatmul.mubr.msk.f32.gmra.mxu1 %vm4166_vm1, %v22959_v49  ;;  %v22979_v60 = vld [vmem:[#allocation2 + $0xc2] sm:$0xff] }
 0x703   : > { %17709 = vmatprep.mubr.msk.f32.mxu0 %vm4166_vm1, %v22963_v6  ;;  %17654 = vmatprep.mubr.msk.f32.mxu1 %vm4166_vm1, %v22967_v9  ;;  %26397 = vst [vmem:[#allocation62_spill] sm:$0xff] %v22979_v60  ;;  %v22989_v6 = vld [vmem:[#allocation2 + $0xca] sm:$0xff] }
 0x704   : > { %26398 = vst [vmem:[#allocation73_spill] sm:$0xff] %v22989_v6 }
 0x706   : > { %17710 = vmatmul.mubr.msk.f32.gmra.mxu0 %vm4166_vm1, %v22973_v34  ;;  %17655 = vmatmul.mubr.msk.f32.gmra.mxu1 %vm4166_vm1, %v22975_v35  ;;  %v22995_v34 = vld [vmem:[#allocation2 + $0xda] sm:$0xff] }
 0x707   : > { %17712 = vmatprep.mubr.msk.f32.mxu0 %vm4166_vm1, %v22979_v60  ;;  %17657 = vmatprep.mubr.msk.f32.mxu1 %vm4166_vm1, %v22983_v63  ;;  %26399 = vst [vmem:[#allocation105_spill] sm:$0xff] %v22995_v34  ;;  %v23005_v60 = vld [vmem:[#allocation2 + $0xe2] sm:$0xff] }
 0x708   : > { %26400 = vst [vmem:[#allocation72_spill] sm:$0xff] %v23005_v60 }
 0x70a   : > { %17713 = vmatmul.mubr.msk.f32.gmra.mxu0 %vm4166_vm1, %v22989_v6  ;;  %17658 = vmatmul.mubr.msk.f32.gmra.mxu1 %vm4166_vm1, %v22991_v16  ;;  %v23011_v6 = vld [vmem:[#allocation2 + $0xf2] sm:$0xff] }
 0x70b   : > { %17715 = vmatprep.mubr.msk.f32.mxu0 %vm4166_vm1, %v22995_v34  ;;  %17660 = vmatprep.mubr.msk.f32.mxu1 %vm4166_vm1, %v22999_v22  ;;  %26401 = vst [vmem:[#allocation65_spill] sm:$0xff] %v23011_v6  ;;  %v23021_v34 = vld [vmem:[#allocation2 + $0xfa] sm:$0xff] }
 0x70c   : > { %26402 = vst [vmem:[#allocation106_spill] sm:$0xff] %v23021_v34 }
 0x70e   : > { %17716 = vmatmul.mubr.msk.f32.gmra.mxu0 %vm4166_vm1, %v23005_v60  ;;  %17661 = vmatmul.mubr.msk.f32.gmra.mxu1 %vm4166_vm1, %v23007_v28  ;;  %v23027_v60 = vld [vmem:[#allocation2 + $0x10a] sm:$0xff] }
 0x70f   : > { %17718 = vmatprep.mubr.msk.f32.mxu0 %vm4166_vm1, %v23011_v6  ;;  %17663 = vmatprep.mubr.msk.f32.mxu1 %vm4166_vm1, %v23015_v47  ;;  %26403 = vst [vmem:[#allocation76_spill] sm:$0xff] %v23027_v60  ;;  %v23037_v6 = vld [vmem:[#allocation2 + $0x112] sm:$0xff] }
 0x710   : > { %26404 = vst [vmem:[#allocation68_spill] sm:$0xff] %v23037_v6 }
 0x712   : > { %17719 = vmatmul.mubr.msk.f32.gmra.mxu0 %vm4166_vm1, %v23021_v34  ;;  %17664 = vmatmul.mubr.msk.f32.gmra.mxu1 %vm4166_vm1, %v23023_v37  ;;  %v23043_v34 = vld [vmem:[#allocation2 + $0x122] sm:$0xff] }
 0x713   : > { %17721 = vmatprep.mubr.msk.f32.mxu0 %vm4166_vm1, %v23027_v60  ;;  %17666 = vmatprep.mubr.msk.f32.mxu1 %vm4166_vm1, %v23031_v12  ;;  %26405 = vst [vmem:[#allocation108_spill] sm:$0xff] %v23043_v34 }
 0x716   : > { %17722 = vmatmul.mubr.msk.f32.gmra.mxu0 %vm4166_vm1, %v23037_v6  ;;  %17667 = vmatmul.mubr.msk.f32.gmra.mxu1 %vm4166_vm1, %v23039_v50  ;;  %v23056_v6 = vld [vmem:[#allocation2 + $0x110] sm:$0xff] }
 0x717   : > { %v6103_v13 = vpop.f32.mrf.mxu1  ;;  %17724 = vmatprep.mubr.msk.f32.mxu0 %vm4166_vm1, %v23043_v34  ;;  %17669 = vmatprep.mubr.msk.f32.mxu1 %vm4166_vm1, %v23047_v31  ;;  %v23065_v34 = vld [vmem:[#allocation2 + $0x120] sm:$0xff] }
 0x718   : > { %v6143_v60 = vmul.f32 %v22543_v43, %v6103_v13  ;;  %v23075_v13 = vld [vmem:[#allocation2 + $0x128] sm:$0xff] }
 0x719   : > { %v6105_v40 = vpop.f32.mrf.mxu1 }
 0x71a   : > { %v6175_v29 = vadd.f32 %v6143_v60, %v26407_v26  ;;  %17725 = vmatmul.mubr.msk.f32.gmra.mxu0 %vm4166_vm1, %v23054_v56  ;;  %17670 = vmatmul.mubr.msk.f32.gmra.mxu1 %vm4166_vm1, %v23056_v6  ;;  %v23073_v60 = vld [vmem:[#allocation2 + $0x142] sm:$0xff] }
 0x71b   : > { %v6108_v55 = vpop.f32.mrf.mxu1  ;;  %17727 = vmatprep.mubr.msk.f32.mxu0 %vm4166_vm1, %v23061_v33  ;;  %17672 = vmatprep.mubr.msk.f32.mxu1 %vm4166_vm1, %v23065_v34  ;;  %v26409_v56 = vld [vmem:[#allocation32_spill] sm:$0xff]  ;;  %v23084_v33 = vld [vmem:[#allocation2 + $0x138] sm:$0xff] }
 0x71c   : > { %6889 = vst.msk [vmem:[#allocation2 + $0x181] sm:$0xff] %vm4166_vm1, %v6175_v29  ;;  %v6144_v40 = vmul.f32 %v22543_v43, %v6108_v55  ;;  %v23091_v43 = vld [vmem:[#allocation2 + $0x15a] sm:$0xff]  ;;  %v23097_v29 = vld [vmem:[#allocation2 + $0x16a] sm:$0xff] }
 0x71d   : > { %v6110_v26 = vpop.f32.mrf.mxu1  ;;  %v23093_v55 = vld [vmem:[#allocation2 + $0x140] sm:$0xff]  ;;  %26410 = vst [vmem:[#allocation91_spill] sm:$0xff] %v23097_v29 }
 0x71e   : > { %v6176_v25 = vadd.f32 %v6144_v40, %v26409_v56  ;;  %17728 = vmatmul.mubr.msk.f32.gmra.mxu0 %vm4166_vm1, %v23073_v60  ;;  %17673 = vmatmul.mubr.msk.f32.gmra.mxu1 %vm4166_vm1, %v23075_v13  ;;  %v23101_v56 = vld [vmem:[#allocation2 + $0x150] sm:$0xff]  ;;  %v23109_v40 = vld [vmem:[#allocation2 + $0x158] sm:$0xff]  ;;  %v23115_v26 = vld [vmem:[#allocation2 + $0x168] sm:$0xff] }
 0x71f   : > { %17730 = vmatprep.mubr.msk.f32.mxu0 %vm4166_vm1, %v23080_v48  ;;  %17675 = vmatprep.mubr.msk.f32.mxu1 %vm4166_vm1, %v23084_v33 }
 0x720   : > { %6890 = vst.msk [vmem:[#allocation2 + $0x189] sm:$0xff] %vm4166_vm1, %v6176_v25  ;;  %v23107_v25 = vld [vmem:[#allocation2 + $0x172] sm:$0xff] }
 0x721   : > { %26411 = vst [vmem:[#allocation74_spill] sm:$0xff] %v23107_v25 }
 0x722   : > { %17731 = vmatmul.mubr.msk.f32.gmra.mxu0 %vm4166_vm1, %v23091_v43  ;;  %17676 = vmatmul.mubr.msk.f32.gmra.mxu1 %vm4166_vm1, %v23093_v55 }
 0x723   : > { %17733 = vmatprep.mubr.msk.f32.mxu0 %vm4166_vm1, %v23097_v29  ;;  %17678 = vmatprep.mubr.msk.f32.mxu1 %vm4166_vm1, %v23101_v56  ;;  %v23121_v29 = vld [vmem:[#allocation2 + $0x170] sm:$0xff] }
 0x726   : > { %17734 = vmatmul.mubr.msk.f32.gmra.mxu0 %vm4166_vm1, %v23107_v25  ;;  %17679 = vmatmul.mubr.msk.f32.gmra.mxu1 %vm4166_vm1, %v23109_v40  ;;  %v15141_v25 = vld [vmem:[%s25739_s10 + $0x60] sm:$0xff] }
 0x727   : > { %17792 = vmatprep.mubr.msk.f32.mxu0 %vm4166_vm1, %v22553_v21  ;;  %17681 = vmatprep.mubr.msk.f32.mxu1 %vm4166_vm1, %v23115_v26  ;;  %v15107_v21 = vld [vmem:[%s25739_s10 + $0x50] sm:$0xff] }
 0x72a   : > { %17793 = vmatmul.mubr.msk.f32.vlgmr.msra.gmra.mxu0 %vm4166_vm1, %v22560_v30  ;;  %17682 = vmatmul.mubr.msk.f32.gmra.mxu1 %vm4166_vm1, %v23121_v29  ;;  %v23145_v30 = vld [vmem:[%s25739_s10 + $0x88] sm:$0xff] }
 0x72b   : > { %17795 = vmatprep.mubr.msk.f32.mxu0 %vm4166_vm1, %v22566_v15  ;;  %17740 = vmatprep.mubr.msk.f32.mxu1 %vm4166_vm1, %v22866_v11  ;;  %v23160_v15 = vld [vmem:[%s25739_s10 + $0x78] sm:$0xff]  ;;  %v26417_v11 = vld [vmem:[#allocation49_spill] sm:$0xff] }
 0x72c   : > { %17893 = vmatpush3.msra.mxu0 %v22879_v51 }
 0x72d   : > { %17894 = vmatprep.subr.mxu0 %v15141_v25 }
 0x72e   : > { %17796 = vmatmul.mubr.msk.f32.gmra.mxu0 %vm4166_vm1, %v22573_v62  ;;  %17741 = vmatmul.mubr.msk.f32.vlgmr.msra.gmra.mxu1 %vm4166_vm1, %v22888_v41  ;;  %v23207_v62 = vpop.f32.mrf.mxu0 }
 0x72f   : > { %17798 = vmatprep.mubr.msk.f32.mxu0 %vm4166_vm1, %v22580_v1  ;;  %17743 = vmatprep.mubr.msk.f32.mxu1 %vm4166_vm1, %v22897_v58 }
 0x730   : > { %17895 = vmatpush3.msra.mxu0 %v15141_v25  ;;  %17841 = vmatpush3.msra.mxu1 %v22902_v39  ;;  %v23217_v1 = vpop.f32.mrf.mxu0  ;;  %v26418_v39 = vld [vmem:[#allocation99_spill] sm:$0xff]  ;;  %v23347_v25 = vld [vmem:[%s25742_s13 + $0x18] sm:$0xff] }
 0x731   : > { %17842 = vmatprep.subr.mxu1 %v15107_v21  ;;  %17996 = vmatprep.subr.mxu0 %v23145_v30 }
 0x732   : > { %17799 = vmatmul.mubr.msk.f32.gmra.mxu0 %vm4166_vm1, %v22587_v27  ;;  %17744 = vmatmul.mubr.msk.f32.gmra.mxu1 %vm4166_vm1, %v22910_v45  ;;  %v23227_v27 = vpop.f32.mrf.mxu0 }
 0x733   : > { %17801 = vmatprep.mubr.msk.f32.mxu0 %vm4166_vm1, %v22594_v7  ;;  %17746 = vmatprep.mubr.msk.f32.mxu1 %vm4166_vm1, %v22919_v19 }
 0x734   : > { %17843 = vmatpush3.msra.mxu1 %v15107_v21  ;;  %v23237_v7 = vpop.f32.mrf.mxu0  ;;  %v26419_v21 = vld [vmem:[#allocation87_spill] sm:$0xff] }
 0x735   : > { %17944 = vmatprep.subr.mxu1 %v23160_v15 }
 0x736   : > { %17802 = vmatmul.mubr.msk.f32.gmra.mxu0 %vm4166_vm1, %v22602_v52  ;;  %17747 = vmatmul.mubr.msk.f32.gmra.mxu1 %vm4166_vm1, %v22927_v3  ;;  %v23247_v52 = vpop.f32.mrf.mxu0 }
 0x737   : > { %17804 = vmatprep.mubr.msk.f32.mxu0 %vm4166_vm1, %v22609_v20  ;;  %17749 = vmatprep.mubr.msk.f32.mxu1 %vm4166_vm1, %v22935_v42 }
 0x738   : > { %v23257_v20 = vpop.f32.mrf.mxu0 }
 0x73a   : > { %17805 = vmatmul.mubr.msk.f32.gmra.mxu0 %vm4166_vm1, %v22617_v54  ;;  %17750 = vmatmul.mubr.msk.f32.gmra.mxu1 %vm4166_vm1, %v22943_v32  ;;  %v23259_v54 = vpop.f32.mrf.mxu0 }
 0x73b   : > { %17807 = vmatprep.mubr.msk.f32.mxu0 %vm4166_vm1, %v22626_v24  ;;  %17752 = vmatprep.mubr.msk.f32.mxu1 %vm4166_vm1, %v22951_v36  ;;  %v26412_v24 = vld [vmem:[#allocation64_spill] sm:$0xff] }
 0x73e   : > { %17808 = vmatmul.mubr.msk.f32.gmra.mxu0 %vm4166_vm1, %v22636_v4  ;;  %17753 = vmatmul.mubr.msk.f32.gmra.mxu1 %vm4166_vm1, %v22959_v49  ;;  %v23269_v4 = vpop.f32.mrf.mxu0 }
 0x73f   : > { %17810 = vmatprep.mubr.msk.f32.mxu0 %vm4166_vm1, %v22643_v0  ;;  %17755 = vmatprep.mubr.msk.f32.mxu1 %vm4166_vm1, %v22967_v9  ;;  %v26413_v0 = vld [vmem:[#allocation97_spill] sm:$0xff] }
 0x742   : > { %17811 = vmatmul.mubr.msk.f32.gmra.mxu0 %vm4166_vm1, %v22650_v46  ;;  %17756 = vmatmul.mubr.msk.f32.gmra.mxu1 %vm4166_vm1, %v22975_v35  ;;  %v23273_v46 = vld [vmem:[#allocation2 + $0x181] sm:$0xff] }
 0x743   : > { %17813 = vmatprep.mubr.msk.f32.mxu0 %vm4166_vm1, %v22663_v2  ;;  %17758 = vmatprep.mubr.msk.f32.mxu1 %vm4166_vm1, %v22983_v63  ;;  %v23281_v2 = vpop.f32.mrf.mxu0 }
 0x746   : > { %17814 = vmatmul.mubr.msk.f32.gmra.mxu0 %vm4166_vm1, %v22670_v44  ;;  %17759 = vmatmul.mubr.msk.f32.gmra.mxu1 %vm4166_vm1, %v22991_v16  ;;  %v23283_v44 = vld [vmem:[#allocation2 + $0x189] sm:$0xff] }
 0x747   : > { %17816 = vmatprep.mubr.msk.f32.mxu0 %vm4166_vm1, %v22677_v17  ;;  %17761 = vmatprep.mubr.msk.f32.mxu1 %vm4166_vm1, %v22999_v22  ;;  %v23289_v17 = vld [vmem:[#allocation2 + $0x180] sm:$0xff] }
 0x74a   : > { %17817 = vmatmul.mubr.msk.f32.gmra.mxu0 %vm4166_vm1, %v22684_v61  ;;  %17762 = vmatmul.mubr.msk.f32.gmra.mxu1 %vm4166_vm1, %v23007_v28  ;;  %v23295_v61 = vpop.f32.mrf.mxu0 }
 0x74b   : > { %17819 = vmatprep.mubr.msk.f32.mxu0 %vm4166_vm1, %v22691_v53  ;;  %17764 = vmatprep.mubr.msk.f32.mxu1 %vm4166_vm1, %v23015_v47  ;;  %v23297_v53 = vld [vmem:[#allocation2 + $0x188] sm:$0xff] }
 0x74e   : > { %17820 = vmatmul.mubr.msk.f32.gmra.mxu0 %vm4166_vm1, %v22698_v10  ;;  %17765 = vmatmul.mubr.msk.f32.gmra.mxu1 %vm4166_vm1, %v23023_v37  ;;  %v23299_v10 = vpop.f32.mrf.mxu0 }
 0x74f   : > { %17822 = vmatprep.mubr.msk.f32.mxu0 %vm4166_vm1, %v22704_v14  ;;  %17767 = vmatprep.mubr.msk.f32.mxu1 %vm4166_vm1, %v23031_v12  ;;  %v15209_v14 = vld [vmem:[%s25739_s10 + $0x80] sm:$0xff] }
 0x752   : > { %17823 = vmatmul.mubr.msk.f32.gmra.mxu0 %vm4166_vm1, %v22711_v5  ;;  %17768 = vmatmul.mubr.msk.f32.gmra.mxu1 %vm4166_vm1, %v23039_v50  ;;  %v26414_v5 = vld [vmem:[#allocation47_spill] sm:$0xff] }
 0x753   : > { %17825 = vmatprep.mubr.msk.f32.mxu0 %vm4166_vm1, %v22717_v57  ;;  %17770 = vmatprep.mubr.msk.f32.mxu1 %vm4166_vm1, %v23047_v31  ;;  %v23312_v57 = vstv %s14938_s19 }
 0x756   : > { %17826 = vmatmul.mubr.msk.f32.gmra.mxu0 %vm4166_vm1, %v22721_v8  ;;  %17771 = vmatmul.mubr.msk.f32.gmra.mxu1 %vm4166_vm1, %v23056_v6  ;;  %v23315_v8 = vpop.f32.mrf.mxu0 }
 0x757   : > { %17828 = vmatprep.mubr.msk.f32.mxu0 %vm4166_vm1, %v22793_v18  ;;  %17773 = vmatprep.mubr.msk.f32.mxu1 %vm4166_vm1, %v23065_v34 }
 0x75a   : > { %17829 = vmatmul.mubr.msk.f32.gmra.mxu0 %vm4166_vm1, %v22804_v59  ;;  %17774 = vmatmul.mubr.msk.f32.gmra.mxu1 %vm4166_vm1, %v23075_v13  ;;  %v23327_v59 = vld [vmem:[%s25742_s13 + $0x8] sm:$0xff] }
 0x75b   : > { %17831 = vmatprep.mubr.msk.f32.mxu0 %vm4166_vm1, %v22815_v38  ;;  %17776 = vmatprep.mubr.msk.f32.mxu1 %vm4166_vm1, %v23084_v33  ;;  %v26416_v38 = vld [vmem:[#allocation98_spill] sm:$0xff] }
 0x75e   : > { %17832 = vmatmul.mubr.msk.f32.gmra.mxu0 %vm4166_vm1, %v22826_v23  ;;  %17777 = vmatmul.mubr.msk.f32.gmra.mxu1 %vm4166_vm1, %v23093_v55 }
 0x75f   : > { %17834 = vmatprep.mubr.msk.f32.mxu0 %vm4166_vm1, %v26412_v24  ;;  %17779 = vmatprep.mubr.msk.f32.mxu1 %vm4166_vm1, %v23101_v56  ;;  %v26420_v24 = vld [vmem:[#allocation67_spill] sm:$0xff] }
 0x762   : > { %17835 = vmatmul.mubr.msk.f32.gmra.mxu0 %vm4166_vm1, %v26413_v0  ;;  %17780 = vmatmul.mubr.msk.f32.gmra.mxu1 %vm4166_vm1, %v23109_v40 }
 0x763   : > { %17837 = vmatprep.mubr.msk.f32.mxu0 %vm4166_vm1, %v23273_v46  ;;  %17782 = vmatprep.mubr.msk.f32.mxu1 %vm4166_vm1, %v23115_v26 }
 0x766   : > { %17838 = vmatmul.mubr.msk.f32.gmra.mxu0 %vm4166_vm1, %v23283_v44  ;;  %17783 = vmatmul.mubr.msk.f32.gmra.mxu1 %vm4166_vm1, %v23121_v29 }
 0x767   : > { %17896 = vmatprep.mubr.msk.f32.mxu0 %vm4166_vm1, %v22897_v58  ;;  %17785 = vmatprep.mubr.msk.f32.mxu1 %vm4166_vm1, %v23289_v17  ;;  %v26415_v58 = vld [vmem:[#allocation50_spill] sm:$0xff] }
 0x76a   : > { %17897 = vmatmul.mubr.msk.f32.vlgmr.msra.gmra.mxu0 %vm4166_vm1, %v22910_v45  ;;  %17786 = vmatmul.mubr.msk.f32.gmra.mxu1 %vm4166_vm1, %v23297_v53 }
 0x76b   : > { %17899 = vmatprep.mubr.msk.f32.mxu0 %vm4166_vm1, %v22919_v19  ;;  %17844 = vmatprep.mubr.msk.f32.mxu1 %vm4166_vm1, %v26414_v5  ;;  %v15175_v19 = vld [vmem:[%s25739_s10 + $0x70] sm:$0xff] }
 0x76c   : > { %17997 = vmatpush3.msra.mxu0 %v23145_v30 }
 0x76d   : > { %17998 = vmatprep.subr.mxu0 %v15209_v14 }
 0x76e   : > { %17900 = vmatmul.mubr.msk.f32.gmra.mxu0 %vm4166_vm1, %v22927_v3  ;;  %v17534_v18 = vpop.f32.mrf.mxu1  ;;  %17845 = vmatmul.mubr.msk.f32.vlgmr.msra.gmra.mxu1 %vm4166_vm1, %v26415_v58  ;;  %v23334_v3 = vpop.f32.mrf.mxu0 }
 0x76f   : > { %17902 = vmatprep.mubr.msk.f32.mxu0 %vm4166_vm1, %v22935_v42  ;;  %v6740_v45 = vmul.f32 %v17534_v18, %v23312_v57  ;;  %17847 = vmatprep.mubr.msk.f32.mxu1 %vm4166_vm1, %v26416_v38 }
 0x770   : > { %v6578_v23 = vpop.f32.mrf.mxu1  ;;  %17999 = vmatpush3.msra.mxu0 %v15209_v14  ;;  %17945 = vmatpush3.msra.mxu1 %v23160_v15  ;;  %v26421_v14 = vld [vmem:[#allocation84_spill] sm:$0xff] }
 0x771   : > { %v6772_v51 = vadd.f32 %v6740_v45, %v26417_v11  ;;  %v6739_v41 = vmul.f32 %v23312_v57, %v6578_v23  ;;  %17946 = vmatprep.subr.mxu1 %v15175_v19  ;;  %18100 = vmatprep.subr.mxu0 %v23327_v59  ;;  %v26422_v45 = vld [vmem:[#allocation100_spill] sm:$0xff]  ;;  %v26424_v11 = vld [vmem:[#allocation70_spill] sm:$0xff] }
 0x772   : > { %17903 = vmatmul.mubr.msk.f32.gmra.mxu0 %vm4166_vm1, %v22943_v32  ;;  %v17537_v42 = vpop.f32.mrf.mxu1  ;;  %17848 = vmatmul.mubr.msk.f32.gmra.mxu1 %vm4166_vm1, %v26418_v39  ;;  %v23356_v32 = vpop.f32.mrf.mxu0 }
 0x773   : > { %10485 = vst.msk [vmem:[#allocation3 + $0x21] sm:$0xff] %vm4166_vm1, %v6772_v51  ;;  %v6771_v30 = vadd.f32 %v6739_v41, %v26419_v21  ;;  %17905 = vmatprep.mubr.msk.f32.mxu0 %vm4166_vm1, %v22951_v36  ;;  %v6742_v15 = vmul.f32 %v17537_v42, %v23312_v57  ;;  %17850 = vmatprep.mubr.msk.f32.mxu1 %vm4166_vm1, %v26420_v24 }
 0x774   : > { %v6588_v0 = vpop.f32.mrf.mxu1  ;;  %17947 = vmatpush3.msra.mxu1 %v15175_v19  ;;  %v23362_v58 = vpop.f32.mrf.mxu0  ;;  %v26423_v19 = vld [vmem:[#allocation80_spill] sm:$0xff] }
 0x775   : > { %10484 = vst.msk [vmem:[#allocation3 + $0x19] sm:$0xff] %vm4166_vm1, %v6771_v30  ;;  %v6774_v5 = vadd.f32 %v6742_v15, %v26421_v14  ;;  %v6741_v18 = vmul.f32 %v23312_v57, %v6588_v0  ;;  %18048 = vmatprep.subr.mxu1 %v23347_v25  ;;  %v26426_v30 = vld [vmem:[#allocation53_spill] sm:$0xff]  ;;  %v26428_v0 = vld [vmem:[#allocation66_spill] sm:$0xff] }
 0x776   : > { %17906 = vmatmul.mubr.msk.f32.gmra.mxu0 %vm4166_vm1, %v22959_v49  ;;  %v17540_v36 = vpop.f32.mrf.mxu1  ;;  %17851 = vmatmul.mubr.msk.f32.gmra.mxu1 %vm4166_vm1, %v26422_v45  ;;  %v26425_v49 = vld [vmem:[#allocation33_spill] sm:$0xff]  ;;  %v23378_v39 = vpop.f32.mrf.mxu0 }
 0x777   : > { %10487 = vst.msk [vmem:[#allocation3 + $0x39] sm:$0xff] %vm4166_vm1, %v6774_v5  ;;  %v6773_v38 = vadd.f32 %v6741_v18, %v26423_v19  ;;  %17908 = vmatprep.mubr.msk.f32.mxu0 %vm4166_vm1, %v22967_v9  ;;  %v6744_v23 = vmul.f32 %v17540_v36, %v23312_v57  ;;  %17853 = vmatprep.mubr.msk.f32.mxu1 %vm4166_vm1, %v26424_v11  ;;  %v26427_v9 = vld [vmem:[#allocation48_spill] sm:$0xff]  ;;  %v26430_v19 = vld [vmem:[#allocation102_spill] sm:$0xff] }
 0x778   : > { %v6598_v51 = vpop.f32.mrf.mxu1  ;;  %v23391_v14 = vpop.f32.mrf.mxu0  ;;  %v26432_v11 = vld [vmem:[#allocation56_spill] sm:$0xff] }
 0x779   : > { %10486 = vst.msk [vmem:[#allocation3 + $0x31] sm:$0xff] %vm4166_vm1, %v6773_v38  ;;  %v6776_v41 = vadd.f32 %v6744_v23, %v26425_v49  ;;  %v6743_v42 = vmul.f32 %v23312_v57, %v6598_v51 }
 0x77a   : > { %17909 = vmatmul.mubr.msk.f32.gmra.mxu0 %vm4166_vm1, %v22975_v35  ;;  %v17543_v21 = vpop.f32.mrf.mxu1  ;;  %17854 = vmatmul.mubr.msk.f32.gmra.mxu1 %vm4166_vm1, %v26426_v30  ;;  %v26429_v35 = vld [vmem:[#allocation34_spill] sm:$0xff]  ;;  %v23407_v51 = vpop.f32.mrf.mxu0  ;;  %v26434_v30 = vld [vmem:[#allocation59_spill] sm:$0xff] }
 0x77b   : > { %10489 = vst.msk [vmem:[#allocation3 + $0x51] sm:$0xff] %vm4166_vm1, %v6776_v41  ;;  %v6775_v15 = vadd.f32 %v6743_v42, %v26427_v9  ;;  %17911 = vmatprep.mubr.msk.f32.mxu0 %vm4166_vm1, %v22983_v63  ;;  %v6746_v24 = vmul.f32 %v17543_v21, %v23312_v57  ;;  %17856 = vmatprep.mubr.msk.f32.mxu1 %vm4166_vm1, %v26428_v0  ;;  %v26431_v63 = vld [vmem:[#allocation82_spill] sm:$0xff]  ;;  %v26435_v9 = vld [vmem:[#allocation36_spill] sm:$0xff]  ;;  %v26436_v0 = vld [vmem:[#allocation69_spill] sm:$0xff] }
 0x77c   : > { %v6608_v5 = vpop.f32.mrf.mxu1  ;;  %v23412_v21 = vpop.f32.mrf.mxu0 }
 0x77d   : > { %10488 = vst.msk [vmem:[#allocation3 + $0x49] sm:$0xff] %vm4166_vm1, %v6775_v15  ;;  %v6778_v18 = vadd.f32 %v6746_v24, %v26429_v35  ;;  %v6745_v36 = vmul.f32 %v23312_v57, %v6608_v5 }
 0x77e   : > { %17912 = vmatmul.mubr.msk.f32.gmra.mxu0 %vm4166_vm1, %v22991_v16  ;;  %v17546_v45 = vpop.f32.mrf.mxu1  ;;  %17857 = vmatmul.mubr.msk.f32.gmra.mxu1 %vm4166_vm1, %v26430_v19  ;;  %v26433_v16 = vld [vmem:[#allocation93_spill] sm:$0xff]  ;;  %v26438_v19 = vld [vmem:[#allocation103_spill] sm:$0xff] }
 0x77f   : > { %10491 = vst.msk [vmem:[#allocation3 + $0x69] sm:$0xff] %vm4166_vm1, %v6778_v18  ;;  %v6777_v38 = vadd.f32 %v6745_v36, %v26431_v63  ;;  %17914 = vmatprep.mubr.msk.f32.mxu0 %vm4166_vm1, %v22999_v22  ;;  %v6748_v23 = vmul.f32 %v17546_v45, %v23312_v57  ;;  %17859 = vmatprep.mubr.msk.f32.mxu1 %vm4166_vm1, %v26432_v11  ;;  %v23428_v36 = vpop.f32.mrf.mxu0 }
 0x780   : > { %v6618_v49 = vpop.f32.mrf.mxu1 }
 0x781   : > { %10490 = vst.msk [vmem:[#allocation3 + $0x61] sm:$0xff] %vm4166_vm1, %v6777_v38  ;;  %v6780_v41 = vadd.f32 %v6748_v23, %v26433_v16  ;;  %v6747_v42 = vmul.f32 %v23312_v57, %v6618_v49  ;;  %v26440_v23 = vld [vmem:[#allocation62_spill] sm:$0xff]  ;;  %v23441_v11 = vpop.f32.mrf.mxu0 }
 0x782   : > { %17915 = vmatmul.mubr.msk.f32.gmra.mxu0 %vm4166_vm1, %v23007_v28  ;;  %v17549_v22 = vpop.f32.mrf.mxu1  ;;  %17860 = vmatmul.mubr.msk.f32.gmra.mxu1 %vm4166_vm1, %v26434_v30  ;;  %v26437_v28 = vld [vmem:[#allocation54_spill] sm:$0xff] }
 0x783   : > { %10493 = vst.msk [vmem:[#allocation3 + $0x81] sm:$0xff] %vm4166_vm1, %v6780_v41  ;;  %v6779_v15 = vadd.f32 %v6747_v42, %v26435_v9  ;;  %17917 = vmatprep.mubr.msk.f32.mxu0 %vm4166_vm1, %v23015_v47  ;;  %v6750_v24 = vmul.f32 %v17549_v22, %v23312_v57  ;;  %17862 = vmatprep.mubr.msk.f32.mxu1 %vm4166_vm1, %v26436_v0  ;;  %v26439_v47 = vld [vmem:[#allocation37_spill] sm:$0xff] }
 0x784   : > { %v6628_v5 = vpop.f32.mrf.mxu1  ;;  %v26442_v22 = vld [vmem:[#allocation73_spill] sm:$0xff] }
 0x785   : > { %10492 = vst.msk [vmem:[#allocation3 + $0x79] sm:$0xff] %vm4166_vm1, %v6779_v15  ;;  %v6782_v35 = vadd.f32 %v6750_v24, %v26437_v28  ;;  %v6749_v18 = vmul.f32 %v23312_v57, %v6628_v5  ;;  %v26444_v15 = vld [vmem:[#allocation105_spill] sm:$0xff]  ;;  %v23457_v24 = vpop.f32.mrf.mxu0 }
 0x786   : > { %17918 = vmatmul.mubr.msk.f32.gmra.mxu0 %vm4166_vm1, %v23023_v37  ;;  %v17552_v45 = vpop.f32.mrf.mxu1  ;;  %17863 = vmatmul.mubr.msk.f32.gmra.mxu1 %vm4166_vm1, %v26438_v19  ;;  %v26441_v37 = vld [vmem:[#allocation39_spill] sm:$0xff] }
 0x787   : > { %10495 = vst.msk [vmem:[#allocation3 + $0x99] sm:$0xff] %vm4166_vm1, %v6782_v35  ;;  %v6781_v63 = vadd.f32 %v6749_v18, %v26439_v47  ;;  %17920 = vmatprep.mubr.msk.f32.mxu0 %vm4166_vm1, %v23031_v12  ;;  %v6752_v38 = vmul.f32 %v17552_v45, %v23312_v57  ;;  %17865 = vmatprep.mubr.msk.f32.mxu1 %vm4166_vm1, %v26440_v23  ;;  %v26443_v12 = vld [vmem:[#allocation101_spill] sm:$0xff]  ;;  %v23462_v35 = vpop.f32.mrf.mxu0  ;;  %v26446_v18 = vld [vmem:[#allocation72_spill] sm:$0xff] }
 0x788   : > { %v6638_v49 = vpop.f32.mrf.mxu1  ;;  %v26447_v45 = vld [vmem:[#allocation40_spill] sm:$0xff] }
 0x789   : > { %10494 = vst.msk [vmem:[#allocation3 + $0x91] sm:$0xff] %vm4166_vm1, %v6781_v63  ;;  %v6784_v16 = vadd.f32 %v6752_v38, %v26441_v37  ;;  %v6751_v41 = vmul.f32 %v23312_v57, %v6638_v49  ;;  %v26448_v63 = vld [vmem:[#allocation65_spill] sm:$0xff]  ;;  %v23478_v37 = vpop.f32.mrf.mxu0 }
 0x78a   : > { %17921 = vmatmul.mubr.msk.f32.gmra.mxu0 %vm4166_vm1, %v23039_v50  ;;  %v17555_v42 = vpop.f32.mrf.mxu1  ;;  %17866 = vmatmul.mubr.msk.f32.gmra.mxu1 %vm4166_vm1, %v26442_v22  ;;  %v26445_v50 = vld [vmem:[#allocation107_spill] sm:$0xff] }
 0x78b   : > { %10497 = vst.msk [vmem:[#allocation3 + $0xb1] sm:$0xff] %vm4166_vm1, %v6784_v16  ;;  %v6783_v30 = vadd.f32 %v6751_v41, %v26443_v12  ;;  %17923 = vmatprep.mubr.msk.f32.mxu0 %vm4166_vm1, %v23047_v31  ;;  %v6754_v9 = vmul.f32 %v17555_v42, %v23312_v57  ;;  %17868 = vmatprep.mubr.msk.f32.mxu1 %vm4166_vm1, %v26444_v15  ;;  %v26450_v41 = vld [vmem:[#allocation106_spill] sm:$0xff]  ;;  %v26452_v12 = vld [vmem:[#allocation76_spill] sm:$0xff] }
 0x78c   : > { %v6648_v0 = vpop.f32.mrf.mxu1 }
 0x78d   : > { %10496 = vst.msk [vmem:[#allocation3 + $0xa9] sm:$0xff] %vm4166_vm1, %v6783_v30  ;;  %v6786_v5 = vadd.f32 %v6754_v9, %v26445_v50  ;;  %v6753_v28 = vmul.f32 %v23312_v57, %v6648_v0  ;;  %v23491_v30 = vpop.f32.mrf.mxu0 }
 0x78e   : > { %17924 = vmatmul.mubr.msk.f32.gmra.mxu0 %vm4166_vm1, %v23056_v6  ;;  %v17558_v31 = vpop.f32.mrf.mxu1  ;;  %17869 = vmatmul.mubr.msk.f32.gmra.mxu1 %vm4166_vm1, %v26446_v18  ;;  %v26449_v6 = vld [vmem:[#allocation90_spill] sm:$0xff]  ;;  %v26456_v18 = vld [vmem:[#allocation108_spill] sm:$0xff] }
 0x78f   : > { %10499 = vst.msk [vmem:[#allocation3 + $0xc9] sm:$0xff] %vm4166_vm1, %v6786_v5  ;;  %v6785_v19 = vadd.f32 %v6753_v28, %v26447_v45  ;;  %17926 = vmatprep.mubr.msk.f32.mxu0 %vm4166_vm1, %v23065_v34  ;;  %v6756_v47 = vmul.f32 %v17558_v31, %v23312_v57  ;;  %17871 = vmatprep.mubr.msk.f32.mxu1 %vm4166_vm1, %v26448_v63  ;;  %v26451_v34 = vld [vmem:[#allocation35_spill] sm:$0xff]  ;;  %v26454_v5 = vld [vmem:[#allocation68_spill] sm:$0xff]  ;;  %v23507_v45 = vpop.f32.mrf.mxu0 }
 0x790   : > { %v6658_v38 = vpop.f32.mrf.mxu1 }
 0x791   : > { %10498 = vst.msk [vmem:[#allocation3 + $0xc1] sm:$0xff] %vm4166_vm1, %v6785_v19  ;;  %v6788_v23 = vadd.f32 %v6756_v47, %v26449_v6  ;;  %v6755_v49 = vmul.f32 %v23312_v57, %v6658_v38  ;;  %v26458_v6 = vld [vmem:[#allocation71_spill] sm:$0xff] }
 0x792   : > { %17927 = vmatmul.mubr.msk.f32.gmra.mxu0 %vm4166_vm1, %v23075_v13  ;;  %v17561_v16 = vpop.f32.mrf.mxu1  ;;  %17872 = vmatmul.mubr.msk.f32.gmra.mxu1 %vm4166_vm1, %v26450_v41  ;;  %v26453_v13 = vld [vmem:[#allocation83_spill] sm:$0xff] }
 0x793   : > { %10501 = vst.msk [vmem:[#allocation3 + $0xe1] sm:$0xff] %vm4166_vm1, %v6788_v23  ;;  %v6787_v42 = vadd.f32 %v6755_v49, %v26451_v34  ;;  %17929 = vmatprep.mubr.msk.f32.mxu0 %vm4166_vm1, %v23084_v33  ;;  %v6758_v22 = vmul.f32 %v17561_v16, %v23312_v57  ;;  %17874 = vmatprep.mubr.msk.f32.mxu1 %vm4166_vm1, %v26452_v12  ;;  %v26455_v33 = vld [vmem:[#allocation77_spill] sm:$0xff]  ;;  %v26459_v23 = vld [vmem:[#allocation51_spill] sm:$0xff] }
 0x794   : > { %v6668_v9 = vpop.f32.mrf.mxu1  ;;  %v26460_v41 = vld [vmem:[#allocation75_spill] sm:$0xff] }
 0x795   : > { %10500 = vst.msk [vmem:[#allocation3 + $0xd9] sm:$0xff] %vm4166_vm1, %v6787_v42  ;;  %v6790_v15 = vadd.f32 %v6758_v22, %v26453_v13  ;;  %v6757_v0 = vmul.f32 %v23312_v57, %v6668_v9  ;;  %v23512_v38 = vpop.f32.mrf.mxu0 }
 0x796   : > { %17930 = vmatmul.mubr.msk.f32.gmra.mxu0 %vm4166_vm1, %v23093_v55  ;;  %v17564_v50 = vpop.f32.mrf.mxu1  ;;  %17875 = vmatmul.mubr.msk.f32.gmra.mxu1 %vm4166_vm1, %v26454_v5  ;;  %v26457_v55 = vld [vmem:[#allocation52_spill] sm:$0xff]  ;;  %v26463_v5 = vld [vmem:[#allocation86_spill] sm:$0xff] }
 0x797   : > { %10503 = vst.msk [vmem:[#allocation3 + $0xf9] sm:$0xff] %vm4166_vm1, %v6790_v15  ;;  %v6789_v28 = vadd.f32 %v6757_v0, %v26455_v33  ;;  %17932 = vmatprep.mubr.msk.f32.mxu0 %vm4166_vm1, %v23101_v56  ;;  %v6760_v31 = vmul.f32 %v17564_v50, %v23312_v57  ;;  %17877 = vmatprep.mubr.msk.f32.mxu1 %vm4166_vm1, %v26456_v18  ;;  %v23528_v12 = vpop.f32.mrf.mxu0  ;;  %v26465_v18 = vld [vmem:[#allocation91_spill] sm:$0xff] }
 0x798   : > { %v6678_v19 = vpop.f32.mrf.mxu1 }
 0x799   : > { %10502 = vst.msk [vmem:[#allocation3 + $0xf1] sm:$0xff] %vm4166_vm1, %v6789_v28  ;;  %v6792_v47 = vadd.f32 %v6760_v31, %v26457_v55  ;;  %v6759_v63 = vmul.f32 %v23312_v57, %v6678_v19  ;;  %v9186_v19 = vld [vmem:[#allocation2 + $0x1a0] sm:$0xff] }
 0x79a   : > { %17933 = vmatmul.mubr.msk.f32.gmra.mxu0 %vm4166_vm1, %v23109_v40  ;;  %v17567_v56 = vpop.f32.mrf.mxu1  ;;  %17878 = vmatmul.mubr.msk.f32.gmra.mxu1 %vm4166_vm1, %v26458_v6  ;;  %v26461_v40 = vld [vmem:[#allocation85_spill] sm:$0xff] }
 0x79b   : > { %10505 = vst.msk [vmem:[#allocation3 + $0x111] sm:$0xff] %vm4166_vm1, %v6792_v47  ;;  %v6791_v49 = vadd.f32 %v6759_v63, %v26459_v23  ;;  %17935 = vmatprep.mubr.msk.f32.mxu0 %vm4166_vm1, %v23115_v26  ;;  %v6762_v16 = vmul.f32 %v17567_v56, %v23312_v57  ;;  %17880 = vmatprep.mubr.msk.f32.mxu1 %vm4166_vm1, %v26460_v41  ;;  %v26462_v26 = vld [vmem:[#allocation96_spill] sm:$0xff]  ;;  %v9931_v6 = vld [vmem:[#allocation2 + $0x32] sm:$0xff] }
 0x79c   : > { %v6688_v34 = vpop.f32.mrf.mxu1  ;;  %v26468_v41 = vld [vmem:[#allocation88_spill] sm:$0xff] }
 0x79d   : > { %10504 = vst.msk [vmem:[#allocation3 + $0x109] sm:$0xff] %vm4166_vm1, %v6791_v49  ;;  %v6794_v42 = vadd.f32 %v6762_v16, %v26461_v40  ;;  %v6761_v22 = vmul.f32 %v23312_v57, %v6688_v34  ;;  %v26467_v49 = vld [vmem:[#allocation74_spill] sm:$0xff]  ;;  %v23566_v16 = vld [vmem:[#allocation2 + $0x182] sm:$0xff] }
 0x79e   : > { %17936 = vmatmul.mubr.msk.f32.gmra.mxu0 %vm4166_vm1, %v23121_v29  ;;  %v17570_v9 = vpop.f32.mrf.mxu1  ;;  %17881 = vmatmul.mubr.msk.f32.gmra.mxu1 %vm4166_vm1, %v23073_v60  ;;  %v23541_v0 = vpop.f32.mrf.mxu0  ;;  %v9185_v29 = vld [vmem:[#allocation2 + $0x198] sm:$0xff] }
 0x79f   : > { %10507 = vst.msk [vmem:[#allocation3 + $0x129] sm:$0xff] %vm4166_vm1, %v6794_v42  ;;  %v6793_v13 = vadd.f32 %v6761_v22, %v26462_v26  ;;  %17938 = vmatprep.mubr.msk.f32.mxu0 %vm4166_vm1, %v23289_v17  ;;  %v6764_v15 = vmul.f32 %v17570_v9, %v23312_v57  ;;  %17883 = vmatprep.mubr.msk.f32.mxu1 %vm4166_vm1, %v23080_v48  ;;  %v26464_v48 = vld [vmem:[#allocation55_spill] sm:$0xff]  ;;  %v26469_v9 = vld [vmem:[#allocation89_spill] sm:$0xff] }
 0x7a0   : > { %v6698_v50 = vpop.f32.mrf.mxu1  ;;  %v23556_v55 = vpop.f32.mrf.mxu0 }
 0x7a1   : > { %10506 = vst.msk [vmem:[#allocation3 + $0x121] sm:$0xff] %vm4166_vm1, %v6793_v13  ;;  %v6796_v60 = vadd.f32 %v6764_v15, %v26463_v5  ;;  %v6763_v33 = vmul.f32 %v23312_v57, %v6698_v50  ;;  %v9932_v15 = vld [vmem:[#allocation2 + $0x3a] sm:$0xff]  ;;  %v23579_v50 = vld [vmem:[#allocation2 + $0x18a] sm:$0xff] }
 0x7a2   : > { %17939 = vmatmul.mubr.msk.f32.gmra.mxu0 %vm4166_vm1, %v23297_v53  ;;  %v17573_v28 = vpop.f32.mrf.mxu1  ;;  %17884 = vmatmul.mubr.msk.f32.gmra.mxu1 %vm4166_vm1, %v23091_v43  ;;  %v26466_v53 = vld [vmem:[#allocation38_spill] sm:$0xff]  ;;  %v9933_v5 = vld [vmem:[#allocation2 + $0x4a] sm:$0xff] }
 0x7a3   : > { %10509 = vst.msk [vmem:[#allocation3 + $0x141] sm:$0xff] %vm4166_vm1, %v6796_v60  ;;  %v6795_v17 = vadd.f32 %v6763_v33, %v26464_v48  ;;  %v6766_v31 = vmul.f32 %v17573_v28, %v23312_v57  ;;  %17886 = vmatprep.mubr.msk.f32.mxu1 %vm4166_vm1, %v26465_v18  ;;  %17941 = vmatprep.mubr.msk.f32.mxu0 %vm4166_vm1, %v9185_v29  ;;  %v9543_v33 = vld [vmem:[#allocation2 + $0x31] sm:$0xff]  ;;  %v10548_v28 = vld [vmem:[%s25742_s13] sm:$0xff] }
 0x7a4   : > { %v6708_v47 = vpop.f32.mrf.mxu1  ;;  %v26470_v48 = vld [vmem:[#allocation58_spill] sm:$0xff] }
 0x7a5   : > { %10508 = vst.msk [vmem:[#allocation3 + $0x139] sm:$0xff] %vm4166_vm1, %v6795_v17  ;;  %v6798_v63 = vadd.f32 %v6766_v31, %v26466_v53  ;;  %v6765_v43 = vmul.f32 %v23312_v57, %v6708_v47  ;;  %v26471_v47 = vld [vmem:[#allocation57_spill] sm:$0xff] }
 0x7a6   : > { %v23561_v56 = vpop.f32.mrf.mxu0  ;;  %17942 = vmatmul.mubr.msk.f32.gmra.mxu0 %vm4166_vm1, %v9186_v19  ;;  %v17576_v23 = vpop.f32.mrf.mxu1  ;;  %17887 = vmatmul.mubr.msk.f32.gmra.mxu1 %vm4166_vm1, %v26467_v49 }
 0x7a7   : > { %10511 = vst.msk [vmem:[#allocation3 + $0x159] sm:$0xff] %vm4166_vm1, %v6798_v63  ;;  %v6797_v34 = vadd.f32 %v6765_v43, %v26468_v41  ;;  %18000 = vmatprep.mubr.msk.f32.mxu0 %vm4166_vm1, %v9931_v6  ;;  %v6768_v40 = vmul.f32 %v17576_v23, %v23312_v57  ;;  %17889 = vmatprep.mubr.msk.f32.mxu1 %vm4166_vm1, %v23566_v16  ;;  %v9934_v43 = vld [vmem:[#allocation2 + $0x52] sm:$0xff]  ;;  %v9545_v23 = vld [vmem:[#allocation2 + $0x49] sm:$0xff] }
 0x7a8   : > { %v23574_v42 = vpop.f32.mrf.mxu0  ;;  %v6718_v22 = vpop.f32.mrf.mxu1  ;;  %v9544_v6 = vld [vmem:[#allocation2 + $0x39] sm:$0xff]  ;;  %v9935_v41 = vld [vmem:[#allocation2 + $0x62] sm:$0xff] }
 0x7a9   : > { %10510 = vst.msk [vmem:[#allocation3 + $0x151] sm:$0xff] %vm4166_vm1, %v6797_v34  ;;  %v6800_v26 = vadd.f32 %v6768_v40, %v26469_v9  ;;  %v6767_v13 = vmul.f32 %v23312_v57, %v6718_v22  ;;  %v23604_v40 = vld [vmem:[%s25742_s13 + $0x38] sm:$0xff] }
 0x7aa   : > { %v17690_v29 = vpop.f32.mrf.mxu0  ;;  %18001 = vmatmul.mubr.msk.f32.vlgmr.msra.gmra.mxu0 %vm4166_vm1, %v9932_v15  ;;  %v17579_v60 = vpop.f32.mrf.mxu1  ;;  %17890 = vmatmul.mubr.msk.f32.gmra.mxu1 %vm4166_vm1, %v23579_v50 }
 0x7ab   : > { %10513 = vst.msk [vmem:[#allocation3 + $0x171] sm:$0xff] %vm4166_vm1, %v6800_v26  ;;  %v6799_v17 = vadd.f32 %v6767_v13, %v26470_v48  ;;  %18003 = vmatprep.mubr.msk.f32.mxu0 %vm4166_vm1, %v9933_v5  ;;  %v6770_v31 = vmul.f32 %v17579_v60, %v23312_v57  ;;  %17948 = vmatprep.mubr.msk.f32.mxu1 %vm4166_vm1, %v9543_v33  ;;  %v9936_v5 = vld [vmem:[#allocation2 + $0x6a] sm:$0xff] }
 0x7ac   : > { %v7799_v18 = vpop.f32.mrf.mxu0  ;;  %v6728_v19 = vpop.f32.mrf.mxu1  ;;  %18101 = vmatpush3.msra.mxu0 %v23327_v59  ;;  %v15245_v59 = vld [vmem:[%s25742_s13 + $0x10] sm:$0xff] }
 0x7ad   : > { %10512 = vst.msk [vmem:[#allocation3 + $0x169] sm:$0xff] %vm4166_vm1, %v6799_v17  ;;  %v6802_v53 = vadd.f32 %v6770_v31, %v26471_v47  ;;  %v6769_v63 = vmul.f32 %v23312_v57, %v6728_v19  ;;  %18102 = vmatprep.subr.mxu0 %v10548_v28  ;;  %v26472_v57 = vld [vmem:[#allocation104_spill] sm:$0xff]  ;;  %v9546_v60 = vld [vmem:[#allocation2 + $0x51] sm:$0xff] }
 0x7ae   : > { %v17693_v49 = vpop.f32.mrf.mxu0  ;;  %18004 = vmatmul.mubr.msk.f32.gmra.mxu0 %vm4166_vm1, %v9934_v43  ;;  %v17638_v34 = vpop.f32.mrf.mxu1  ;;  %17949 = vmatmul.mubr.msk.f32.vlgmr.msra.gmra.mxu1 %vm4166_vm1, %v9544_v6 }
 0x7af   : > { %10515 = vst.msk [vmem:[#allocation3 + $0x189] sm:$0xff] %vm4166_vm1, %v6802_v53  ;;  %v6801_v22 = vadd.f32 %v6769_v63, %v26472_v57  ;;  %18006 = vmatprep.mubr.msk.f32.mxu0 %vm4166_vm1, %v9935_v41  ;;  %v7449_v9 = vadd.f32 %v17638_v34, %v23207_v62  ;;  %17951 = vmatprep.mubr.msk.f32.mxu1 %vm4166_vm1, %v9545_v23  ;;  %v9937_v62 = vld [vmem:[#allocation2 + $0x7a] sm:$0xff]  ;;  %v9938_v53 = vld [vmem:[#allocation2 + $0x82] sm:$0xff]  ;;  %v9939_v23 = vld [vmem:[#allocation2 + $0x92] sm:$0xff] }
 0x7b0   : > { %v7809_v26 = vpop.f32.mrf.mxu0  ;;  %v7443_v13 = vpop.f32.mrf.mxu1  ;;  %18103 = vmatpush3.msra.mxu0 %v10548_v28  ;;  %18049 = vmatpush3.msra.mxu1 %v23347_v25  ;;  %v9547_v28 = vld [vmem:[#allocation2 + $0x61] sm:$0xff]  ;;  %v9548_v63 = vld [vmem:[#allocation2 + $0x69] sm:$0xff] }
 0x7b1   : > { %10514 = vst.msk [vmem:[#allocation3 + $0x181] sm:$0xff] %vm4166_vm1, %v6801_v22  ;;  %v7444_v15 = vadd.f32 %v7443_v13, %v23217_v1  ;;  %18050 = vmatprep.subr.mxu1 %v15245_v59  ;;  %v23614_v33 = vadd.f32 %v17690_v29, %v7449_v9  ;;  %18204 = vmatprep.subr.mxu0 %v23604_v40  ;;  %v23622_v25 = vld [vmem:[%s25742_s13 + $0x28] sm:$0xff]  ;;  %v9940_v57 = vld [vmem:[#allocation2 + $0x9a] sm:$0xff] }
 0x7b2   : > { %v17696_v48 = vpop.f32.mrf.mxu0  ;;  %18007 = vmatmul.mubr.msk.f32.gmra.mxu0 %vm4166_vm1, %v9936_v5  ;;  %v17641_v17 = vpop.f32.mrf.mxu1  ;;  %17952 = vmatmul.mubr.msk.f32.gmra.mxu1 %vm4166_vm1, %v9546_v60  ;;  %v9550_v22 = vld [vmem:[#allocation2 + $0x81] sm:$0xff] }
 0x7b3   : > { %18009 = vmatprep.mubr.msk.f32.mxu0 %vm4166_vm1, %v9937_v62  ;;  %v7459_v1 = vadd.f32 %v17641_v17, %v23227_v27  ;;  %17954 = vmatprep.mubr.msk.f32.mxu1 %vm4166_vm1, %v9547_v28  ;;  %v23627_v29 = vadd.f32 %v7799_v18, %v7444_v15  ;;  %v9549_v18 = vld [vmem:[#allocation2 + $0x79] sm:$0xff]  ;;  %v9941_v15 = vld [vmem:[#allocation2 + $0xaa] sm:$0xff] }
 0x7b4   : > { %v7819_v31 = vpop.f32.mrf.mxu0  ;;  %v7453_v19 = vpop.f32.mrf.mxu1  ;;  %18051 = vmatpush3.msra.mxu1 %v15245_v59  ;;  %v9942_v17 = vld [vmem:[#allocation2 + $0xb2] sm:$0xff] }
 0x7b5   : > { %v7454_v47 = vadd.f32 %v7453_v19, %v23237_v7  ;;  %v23630_v43 = vadd.f32 %v17693_v49, %v7459_v1  ;;  %18152 = vmatprep.subr.mxu1 %v23622_v25  ;;  %v9552_v28 = vld [vmem:[#allocation2 + $0x99] sm:$0xff] }
 0x7b6   : > { %v17699_v6 = vpop.f32.mrf.mxu0  ;;  %18010 = vmatmul.mubr.msk.f32.gmra.mxu0 %vm4166_vm1, %v9938_v53  ;;  %v17644_v27 = vpop.f32.mrf.mxu1  ;;  %17955 = vmatmul.mubr.msk.f32.gmra.mxu1 %vm4166_vm1, %v9548_v63 }
 0x7b7   : > { %18012 = vmatprep.mubr.msk.f32.mxu0 %vm4166_vm1, %v9939_v23  ;;  %v7469_v41 = vadd.f32 %v17644_v27, %v23247_v52  ;;  %17957 = vmatprep.mubr.msk.f32.mxu1 %vm4166_vm1, %v9549_v18  ;;  %v23638_v7 = vadd.f32 %v7809_v26, %v7454_v47  ;;  %v9551_v52 = vld [vmem:[#allocation2 + $0x91] sm:$0xff]  ;;  %v9943_v47 = vld [vmem:[#allocation2 + $0xc2] sm:$0xff] }
 0x7b8   : > { %v7829_v49 = vpop.f32.mrf.mxu0  ;;  %v7463_v34 = vpop.f32.mrf.mxu1  ;;  %v9944_v27 = vld [vmem:[#allocation2 + $0xca] sm:$0xff] }
 0x7b9   : > { %v7464_v59 = vadd.f32 %v7463_v34, %v23257_v20  ;;  %v23641_v9 = vadd.f32 %v17696_v48, %v7469_v41  ;;  %v9554_v18 = vld [vmem:[#allocation2 + $0xb1] sm:$0xff] }
 0x7ba   : > { %v17702_v13 = vpop.f32.mrf.mxu0  ;;  %18013 = vmatmul.mubr.msk.f32.gmra.mxu0 %vm4166_vm1, %v9940_v57  ;;  %v17647_v5 = vpop.f32.mrf.mxu1  ;;  %17958 = vmatmul.mubr.msk.f32.gmra.mxu1 %vm4166_vm1, %v9550_v22 }
 0x7bb   : > { %18015 = vmatprep.mubr.msk.f32.mxu0 %vm4166_vm1, %v9941_v15  ;;  %v7479_v26 = vadd.f32 %v17647_v5, %v23259_v54  ;;  %17960 = vmatprep.mubr.msk.f32.mxu1 %vm4166_vm1, %v9551_v52  ;;  %v23648_v60 = vadd.f32 %v7819_v31, %v7464_v59  ;;  %v9553_v54 = vld [vmem:[#allocation2 + $0xa9] sm:$0xff]  ;;  %v9945_v59 = vld [vmem:[#allocation2 + $0xda] sm:$0xff] }
 0x7bc   : > { %v7839_v20 = vpop.f32.mrf.mxu0  ;;  %v7473_v62 = vpop.f32.mrf.mxu1  ;;  %v9946_v5 = vld [vmem:[#allocation2 + $0xe2] sm:$0xff] }
 0x7bd   : > { %v7474_v48 = vadd.f32 %v7473_v62, %v23269_v4  ;;  %v23651_v1 = vadd.f32 %v17699_v6, %v7479_v26  ;;  %v9556_v52 = vld [vmem:[#allocation2 + $0xc9] sm:$0xff] }
 0x7be   : > { %v17705_v19 = vpop.f32.mrf.mxu0  ;;  %18016 = vmatmul.mubr.msk.f32.gmra.mxu0 %vm4166_vm1, %v9942_v17  ;;  %v17650_v53 = vpop.f32.mrf.mxu1  ;;  %17961 = vmatmul.mubr.msk.f32.gmra.mxu1 %vm4166_vm1, %v9552_v28 }
 0x7bf   : > { %18018 = vmatprep.mubr.msk.f32.mxu0 %vm4166_vm1, %v9943_v47  ;;  %v7489_v31 = vadd.f32 %v17650_v53, %v23281_v2  ;;  %17963 = vmatprep.mubr.msk.f32.mxu1 %vm4166_vm1, %v9553_v54  ;;  %v23658_v63 = vadd.f32 %v7829_v49, %v7474_v48  ;;  %v9555_v2 = vld [vmem:[#allocation2 + $0xc1] sm:$0xff]  ;;  %v9947_v48 = vld [vmem:[#allocation2 + $0xf2] sm:$0xff] }
 0x7c0   : > { %v7849_v4 = vpop.f32.mrf.mxu0  ;;  %v7483_v23 = vpop.f32.mrf.mxu1  ;;  %v9948_v53 = vld [vmem:[#allocation2 + $0xfa] sm:$0xff] }
 0x7c1   : > { %v7484_v6 = vadd.f32 %v7483_v23, %v23295_v61  ;;  %v23661_v41 = vadd.f32 %v17702_v13, %v7489_v31  ;;  %v9558_v54 = vld [vmem:[#allocation2 + $0xe1] sm:$0xff] }
 0x7c2   : > { %v17708_v34 = vpop.f32.mrf.mxu0  ;;  %18019 = vmatmul.mubr.msk.f32.gmra.mxu0 %vm4166_vm1, %v9944_v27  ;;  %v17653_v57 = vpop.f32.mrf.mxu1  ;;  %17964 = vmatmul.mubr.msk.f32.gmra.mxu1 %vm4166_vm1, %v9554_v18 }
 0x7c3   : > { %18021 = vmatprep.mubr.msk.f32.mxu0 %vm4166_vm1, %v9945_v59  ;;  %v7499_v49 = vadd.f32 %v17653_v57, %v23299_v10  ;;  %17966 = vmatprep.mubr.msk.f32.mxu1 %vm4166_vm1, %v9555_v2  ;;  %v23668_v22 = vadd.f32 %v7839_v20, %v7484_v6  ;;  %v9557_v10 = vld [vmem:[#allocation2 + $0xd9] sm:$0xff]  ;;  %v9949_v6 = vld [vmem:[#allocation2 + $0x10a] sm:$0xff] }
 0x7c4   : > { %v7859_v61 = vpop.f32.mrf.mxu0  ;;  %v7493_v15 = vpop.f32.mrf.mxu1  ;;  %v9950_v57 = vld [vmem:[#allocation2 + $0x112] sm:$0xff] }
 0x7c5   : > { %v7494_v13 = vadd.f32 %v7493_v15, %v23315_v8  ;;  %v23671_v26 = vadd.f32 %v17705_v19, %v7499_v49  ;;  %v9560_v2 = vld [vmem:[#allocation2 + $0xf9] sm:$0xff] }
 0x7c6   : > { %v17711_v62 = vpop.f32.mrf.mxu0  ;;  %18022 = vmatmul.mubr.msk.f32.gmra.mxu0 %vm4166_vm1, %v9946_v5  ;;  %v17656_v17 = vpop.f32.mrf.mxu1  ;;  %17967 = vmatmul.mubr.msk.f32.gmra.mxu1 %vm4166_vm1, %v9556_v52 }
 0x7c7   : > { %18024 = vmatprep.mubr.msk.f32.mxu0 %vm4166_vm1, %v9947_v48  ;;  %v7509_v20 = vadd.f32 %v17656_v17, %v23334_v3  ;;  %17969 = vmatprep.mubr.msk.f32.mxu1 %vm4166_vm1, %v9557_v10  ;;  %v23678_v28 = vadd.f32 %v7849_v4, %v7494_v13  ;;  %v9559_v3 = vld [vmem:[#allocation2 + $0xf1] sm:$0xff]  ;;  %v9951_v13 = vld [vmem:[#allocation2 + $0x122] sm:$0xff] }
 0x7c8   : > { %v7869_v8 = vpop.f32.mrf.mxu0  ;;  %v7503_v47 = vpop.f32.mrf.mxu1  ;;  %v9952_v17 = vld [vmem:[#allocation2 + $0x12a] sm:$0xff] }
 0x7c9   : > { %v7504_v19 = vadd.f32 %v7503_v47, %v23356_v32  ;;  %v23681_v31 = vadd.f32 %v17708_v34, %v7509_v20  ;;  %v9562_v10 = vld [vmem:[#allocation2 + $0x111] sm:$0xff] }
 0x7ca   : > { %v17714_v23 = vpop.f32.mrf.mxu0  ;;  %18025 = vmatmul.mubr.msk.f32.gmra.mxu0 %vm4166_vm1, %v9948_v53  ;;  %v17659_v27 = vpop.f32.mrf.mxu1  ;;  %17970 = vmatmul.mubr.msk.f32.gmra.mxu1 %vm4166_vm1, %v9558_v54 }
 0x7cb   : > { %18027 = vmatprep.mubr.msk.f32.mxu0 %vm4166_vm1, %v9949_v6  ;;  %v7519_v4 = vadd.f32 %v17659_v27, %v23362_v58  ;;  %17972 = vmatprep.mubr.msk.f32.mxu1 %vm4166_vm1, %v9559_v3  ;;  %v23688_v18 = vadd.f32 %v7859_v61, %v7504_v19  ;;  %v9561_v58 = vld [vmem:[#allocation2 + $0x109] sm:$0xff]  ;;  %v9953_v19 = vld [vmem:[#allocation2 + $0x13a] sm:$0xff] }
 0x7cc   : > { %v7879_v32 = vpop.f32.mrf.mxu0  ;;  %v7513_v59 = vpop.f32.mrf.mxu1  ;;  %v9954_v27 = vld [vmem:[#allocation2 + $0x142] sm:$0xff] }
 0x7cd   : > { %v7514_v34 = vadd.f32 %v7513_v59, %v23378_v39  ;;  %v23691_v49 = vadd.f32 %v17711_v62, %v7519_v4  ;;  %v9564_v3 = vld [vmem:[#allocation2 + $0x129] sm:$0xff] }
 0x7ce   : > { %v17717_v15 = vpop.f32.mrf.mxu0  ;;  %18028 = vmatmul.mubr.msk.f32.gmra.mxu0 %vm4166_vm1, %v9950_v57  ;;  %v17662_v5 = vpop.f32.mrf.mxu1  ;;  %17973 = vmatmul.mubr.msk.f32.gmra.mxu1 %vm4166_vm1, %v9560_v2 }
 0x7cf   : > { %18030 = vmatprep.mubr.msk.f32.mxu0 %vm4166_vm1, %v9951_v13  ;;  %v7529_v61 = vadd.f32 %v17662_v5, %v23391_v14  ;;  %17975 = vmatprep.mubr.msk.f32.mxu1 %vm4166_vm1, %v9561_v58  ;;  %v23698_v52 = vadd.f32 %v7869_v8, %v7514_v34  ;;  %v9563_v14 = vld [vmem:[#allocation2 + $0x121] sm:$0xff]  ;;  %v9955_v34 = vld [vmem:[#allocation2 + $0x152] sm:$0xff] }
 0x7d0   : > { %v7889_v39 = vpop.f32.mrf.mxu0  ;;  %v7523_v48 = vpop.f32.mrf.mxu1  ;;  %v9956_v5 = vld [vmem:[#allocation2 + $0x15a] sm:$0xff] }
 0x7d1   : > { %v7524_v62 = vadd.f32 %v7523_v48, %v23407_v51  ;;  %v23701_v20 = vadd.f32 %v17714_v23, %v7529_v61  ;;  %v9566_v58 = vld [vmem:[#allocation2 + $0x141] sm:$0xff] }
 0x7d2   : > { %v17720_v47 = vpop.f32.mrf.mxu0  ;;  %18031 = vmatmul.mubr.msk.f32.gmra.mxu0 %vm4166_vm1, %v9952_v17  ;;  %v17665_v53 = vpop.f32.mrf.mxu1  ;;  %17976 = vmatmul.mubr.msk.f32.gmra.mxu1 %vm4166_vm1, %v9562_v10 }
 0x7d3   : > { %18033 = vmatprep.mubr.msk.f32.mxu0 %vm4166_vm1, %v9953_v19  ;;  %v7539_v8 = vadd.f32 %v17665_v53, %v23412_v21  ;;  %17978 = vmatprep.mubr.msk.f32.mxu1 %vm4166_vm1, %v9563_v14  ;;  %v23708_v54 = vadd.f32 %v7879_v32, %v7524_v62  ;;  %v9565_v21 = vld [vmem:[#allocation2 + $0x139] sm:$0xff]  ;;  %v9957_v62 = vld [vmem:[#allocation2 + $0x16a] sm:$0xff] }
 0x7d4   : > { %v7899_v51 = vpop.f32.mrf.mxu0  ;;  %v7533_v6 = vpop.f32.mrf.mxu1  ;;  %v9958_v53 = vld [vmem:[#allocation2 + $0x172] sm:$0xff] }
 0x7d5   : > { %v7534_v23 = vadd.f32 %v7533_v6, %v23428_v36  ;;  %v23711_v4 = vadd.f32 %v17717_v15, %v7539_v8  ;;  %v9568_v14 = vld [vmem:[#allocation2 + $0x159] sm:$0xff] }
 0x7d6   : > { %v17723_v59 = vpop.f32.mrf.mxu0  ;;  %18034 = vmatmul.mubr.msk.f32.gmra.mxu0 %vm4166_vm1, %v9954_v27  ;;  %v17668_v57 = vpop.f32.mrf.mxu1  ;;  %17979 = vmatmul.mubr.msk.f32.gmra.mxu1 %vm4166_vm1, %v9564_v3  ;;  %v9569_v27 = vld [vmem:[#allocation2 + $0x169] sm:$0xff] }
 0x7d7   : > { %18036 = vmatprep.mubr.msk.f32.mxu0 %vm4166_vm1, %v9955_v34  ;;  %v7549_v32 = vadd.f32 %v17668_v57, %v23441_v11  ;;  %17981 = vmatprep.mubr.msk.f32.mxu1 %vm4166_vm1, %v9565_v21  ;;  %v23718_v2 = vadd.f32 %v7889_v39, %v7534_v23  ;;  %v9567_v11 = vld [vmem:[#allocation2 + $0x151] sm:$0xff] }
 0x7d8   : > { %v7909_v36 = vpop.f32.mrf.mxu0  ;;  %v7543_v13 = vpop.f32.mrf.mxu1  ;;  %v9570_v57 = vld [vmem:[#allocation2 + $0x171] sm:$0xff] }
 0x7d9   : > { %v7544_v15 = vadd.f32 %v7543_v13, %v23457_v24  ;;  %v23721_v61 = vadd.f32 %v17720_v47, %v7549_v32 }
 0x7da   : > { %v17726_v48 = vpop.f32.mrf.mxu0  ;;  %18037 = vmatmul.mubr.msk.f32.gmra.mxu0 %vm4166_vm1, %v9956_v5  ;;  %v17671_v17 = vpop.f32.mrf.mxu1  ;;  %17982 = vmatmul.mubr.msk.f32.gmra.mxu1 %vm4166_vm1, %v9566_v58  ;;  %v10516_v5 = vld [vmem:[#allocation3] sm:$0xff]  ;;  %v9573_v58 = vld [vmem:[#allocation2 + $0x199] sm:$0xff] }
 0x7db   : > { %18039 = vmatprep.mubr.msk.f32.mxu0 %vm4166_vm1, %v9957_v62  ;;  %v7559_v39 = vadd.f32 %v17671_v17, %v23462_v35  ;;  %17984 = vmatprep.mubr.msk.f32.mxu1 %vm4166_vm1, %v9567_v11  ;;  %v23728_v10 = vadd.f32 %v7899_v51, %v7544_v15  ;;  %v10517_v17 = vld [vmem:[#allocation3 + $0x8] sm:$0xff]  ;;  %v9574_v11 = vld [vmem:[#allocation2 + $0x1a1] sm:$0xff] }
 0x7dc   : > { %v7919_v24 = vpop.f32.mrf.mxu0  ;;  %v7553_v19 = vpop.f32.mrf.mxu1 }
 0x7dd   : > { %v7554_v47 = vadd.f32 %v7553_v19, %v23478_v37  ;;  %v23731_v8 = vadd.f32 %v17723_v59, %v7559_v39  ;;  %v9961_v59 = vld [vmem:[#allocation2 + $0x19a] sm:$0xff]  ;;  %v10550_v19 = vld [vmem:[#allocation3 + $0x1] sm:$0xff] }
 0x7de   : > { %v17729_v6 = vpop.f32.mrf.mxu0  ;;  %18040 = vmatmul.mubr.msk.f32.gmra.mxu0 %vm4166_vm1, %v9958_v53  ;;  %v17674_v23 = vpop.f32.mrf.mxu1  ;;  %17985 = vmatmul.mubr.msk.f32.gmra.mxu1 %vm4166_vm1, %v9568_v14 }
 0x7df   : > { %18042 = vmatprep.mubr.msk.f32.mxu0 %vm4166_vm1, %v23566_v16  ;;  %v7569_v35 = vadd.f32 %v17674_v23, %v23491_v30  ;;  %17987 = vmatprep.mubr.msk.f32.mxu1 %vm4166_vm1, %v9569_v27  ;;  %v23739_v51 = vadd.f32 %v7909_v36, %v7554_v47  ;;  %v9962_v16 = vld [vmem:[#allocation2 + $0x1a2] sm:$0xff] }
 0x7e0   : > { %v7929_v37 = vpop.f32.mrf.mxu0  ;;  %v7563_v3 = vpop.f32.mrf.mxu1 }
 0x7e1   : > { %v7564_v34 = vadd.f32 %v7563_v3, %v23507_v45  ;;  %v23742_v21 = vadd.f32 %v17726_v48, %v7569_v35 }
 0x7e2   : > { %v17732_v32 = vpop.f32.mrf.mxu0  ;;  %18043 = vmatmul.mubr.msk.f32.gmra.mxu0 %vm4166_vm1, %v23579_v50  ;;  %v17677_v13 = vpop.f32.mrf.mxu1  ;;  %17988 = vmatmul.mubr.msk.f32.gmra.mxu1 %vm4166_vm1, %v9570_v57 }
 0x7e3   : > { %v7579_v30 = vadd.f32 %v17677_v13, %v23512_v38  ;;  %17990 = vmatprep.mubr.msk.f32.mxu1 %vm4166_vm1, %v23273_v46  ;;  %18045 = vmatprep.mubr.msk.f32.mxu0 %vm4166_vm1, %v9961_v59  ;;  %v23751_v36 = vadd.f32 %v7919_v24, %v7564_v34  ;;  %v23782_v59 = vld [vmem:[#allocation3 + $0x20] sm:$0xff] }
 0x7e4   : > { %v7939_v45 = vpop.f32.mrf.mxu0  ;;  %v7573_v15 = vpop.f32.mrf.mxu1  ;;  %v10552_v34 = vld [vmem:[#allocation3 + $0x19] sm:$0xff] }
 0x7e5   : > { %v7574_v48 = vadd.f32 %v7573_v15, %v23528_v12  ;;  %v23754_v50 = vadd.f32 %v17729_v6, %v7579_v30  ;;  %v15345_v6 = vld [vmem:[%s25742_s13 + $0x30] sm:$0xff] }
 0x7e6   : > { %v17735_v62 = vpop.f32.mrf.mxu0  ;;  %18046 = vmatmul.mubr.msk.f32.gmra.mxu0 %vm4166_vm1, %v9962_v16  ;;  %v17680_v38 = vpop.f32.mrf.mxu1  ;;  %17991 = vmatmul.mubr.msk.f32.gmra.mxu1 %vm4166_vm1, %v23283_v44  ;;  %v23768_v44 = vld [vmem:[#allocation3 + $0x18] sm:$0xff] }
 0x7e7   : > { %v7589_v46 = vadd.f32 %v17680_v38, %v23541_v0  ;;  %18104 = vmatprep.mubr.msk.f32.mxu0 %vm4166_vm1, %v10516_v5  ;;  %17993 = vmatprep.mubr.msk.f32.mxu1 %vm4166_vm1, %v9573_v58  ;;  %v23762_v39 = vadd.f32 %v7929_v37, %v7574_v48  ;;  %v23807_v58 = vld [vmem:[#allocation3 + $0x38] sm:$0xff]  ;;  %v10553_v48 = vld [vmem:[#allocation3 + $0x21] sm:$0xff] }
 0x7e8   : > { %v7949_v12 = vpop.f32.mrf.mxu0  ;;  %v7583_v24 = vpop.f32.mrf.mxu1  ;;  %v23814_v38 = vld [vmem:[#allocation3 + $0x48] sm:$0xff] }
 0x7e9   : > { %v7584_v47 = vadd.f32 %v7583_v24, %v23556_v55  ;;  %v23765_v53 = vadd.f32 %v17732_v32, %v7589_v46  ;;  %v10551_v55 = vld [vmem:[#allocation3 + $0x9] sm:$0xff] }
 0x7ea   : > { %v17794_v14 = vpop.f32.mrf.mxu0  ;;  %18105 = vmatmul.mubr.msk.f32.vlgmr.msra.gmra.mxu0 %vm4166_vm1, %v10517_v17  ;;  %v17683_v0 = vpop.f32.mrf.mxu1  ;;  %17994 = vmatmul.mubr.msk.f32.gmra.mxu1 %vm4166_vm1, %v9574_v11 }
 0x7eb   : > { %18107 = vmatprep.mubr.msk.f32.mxu0 %vm4166_vm1, %v23768_v44  ;;  %v7599_v23 = vadd.f32 %v17683_v0, %v23561_v56  ;;  %18052 = vmatprep.mubr.msk.f32.mxu1 %vm4166_vm1, %v10550_v19  ;;  %v23778_v27 = vadd.f32 %v7939_v45, %v7584_v47  ;;  %v23788_v56 = vld [vmem:[#allocation3 + $0x30] sm:$0xff] }
 0x7ec   : > { %v8575_v35 = vpop.f32.mrf.mxu0  ;;  %v7593_v37 = vpop.f32.mrf.mxu1  ;;  %18205 = vmatpush3.msra.mxu0 %v23604_v40  ;;  %v15311_v40 = vld [vmem:[%s25742_s13 + $0x20] sm:$0xff] }
 0x7ed   : > { %v7594_v3 = vadd.f32 %v7593_v37, %v23574_v42  ;;  %18206 = vmatprep.subr.mxu0 %v15345_v6  ;;  %v23784_v57 = vadd.f32 %v17735_v62, %v7599_v23  ;;  %v23797_v42 = vld [vmem:[%s25742_s13 + $0x58] sm:$0xff]  ;;  %v23829_v47 = vld [vmem:[#allocation3 + $0x50] sm:$0xff] }
 0x7ee   : > { %v17797_v32 = vpop.f32.mrf.mxu0  ;;  %18108 = vmatmul.mubr.msk.f32.gmra.mxu0 %vm4166_vm1, %v23782_v59  ;;  %v17742_v13 = vpop.f32.mrf.mxu1  ;;  %18053 = vmatmul.mubr.msk.f32.vlgmr.msra.gmra.mxu1 %vm4166_vm1, %v10551_v55  ;;  %v10556_v55 = vld [vmem:[#allocation3 + $0x49] sm:$0xff] }
 0x7ef   : > { %18110 = vmatprep.mubr.msk.f32.mxu0 %vm4166_vm1, %v23788_v56  ;;  %v8347_v30 = vadd.f32 %v17742_v13, %v23614_v33  ;;  %18055 = vmatprep.mubr.msk.f32.mxu1 %vm4166_vm1, %v10552_v34  ;;  %v23803_v16 = vadd.f32 %v7949_v12, %v7594_v3  ;;  %v10557_v13 = vld [vmem:[#allocation3 + $0x51] sm:$0xff] }
 0x7f0   : > { %v8585_v45 = vpop.f32.mrf.mxu0  ;;  %v8187_v15 = vpop.f32.mrf.mxu1  ;;  %18207 = vmatpush3.msra.mxu0 %v15345_v6  ;;  %18153 = vmatpush3.msra.mxu1 %v23622_v25  ;;  %v10554_v25 = vld [vmem:[#allocation3 + $0x31] sm:$0xff] }
 0x7f1   : > { %v8346_v5 = vadd.f32 %v8187_v15, %v23627_v29  ;;  %18154 = vmatprep.subr.mxu1 %v15311_v40  ;;  %v23809_v62 = vadd.f32 %v17794_v14, %v8347_v30  ;;  %18308 = vmatprep.subr.mxu0 %v23797_v42  ;;  %v23820_v29 = vld [vmem:[%s25742_s13 + $0x48] sm:$0xff] }
 0x7f2   : > { %v17800_v33 = vpop.f32.mrf.mxu0  ;;  %18111 = vmatmul.mubr.msk.f32.gmra.mxu0 %vm4166_vm1, %v23807_v58  ;;  %v17745_v46 = vpop.f32.mrf.mxu1  ;;  %18056 = vmatmul.mubr.msk.f32.gmra.mxu1 %vm4166_vm1, %v10553_v48  ;;  %v10555_v14 = vld [vmem:[#allocation3 + $0x39] sm:$0xff] }
 0x7f3   : > { %18113 = vmatprep.mubr.msk.f32.mxu0 %vm4166_vm1, %v23814_v38  ;;  %v8349_v17 = vadd.f32 %v17745_v46, %v23630_v43  ;;  %18058 = vmatprep.mubr.msk.f32.mxu1 %vm4166_vm1, %v10554_v25  ;;  %v23826_v11 = vadd.f32 %v8575_v35, %v8346_v5  ;;  %v23836_v43 = vld [vmem:[#allocation3 + $0x60] sm:$0xff]  ;;  %v23852_v15 = vld [vmem:[#allocation3 + $0x78] sm:$0xff] }
 0x7f4   : > { %v8595_v12 = vpop.f32.mrf.mxu0  ;;  %v8197_v24 = vpop.f32.mrf.mxu1  ;;  %18155 = vmatpush3.msra.mxu1 %v15311_v40  ;;  %v23862_v25 = vld [vmem:[#allocation3 + $0x80] sm:$0xff] }
 0x7f5   : > { %v8348_v19 = vadd.f32 %v8197_v24, %v23638_v7  ;;  %v23831_v0 = vadd.f32 %v17797_v32, %v8349_v17  ;;  %18256 = vmatprep.subr.mxu1 %v23820_v29  ;;  %v23846_v32 = vld [vmem:[#allocation3 + $0x68] sm:$0xff] }
 0x7f6   : > { %v17803_v6 = vpop.f32.mrf.mxu0  ;;  %18114 = vmatmul.mubr.msk.f32.gmra.mxu0 %vm4166_vm1, %v23829_v47  ;;  %v17748_v23 = vpop.f32.mrf.mxu1  ;;  %18059 = vmatmul.mubr.msk.f32.gmra.mxu1 %vm4166_vm1, %v10555_v14  ;;  %v10559_v17 = vld [vmem:[#allocation3 + $0x69] sm:$0xff] }
 0x7f7   : > { %18116 = vmatprep.mubr.msk.f32.mxu0 %vm4166_vm1, %v23836_v43  ;;  %v8351_v7 = vadd.f32 %v17748_v23, %v23641_v9  ;;  %18061 = vmatprep.mubr.msk.f32.mxu1 %vm4166_vm1, %v10556_v55  ;;  %v23843_v35 = vadd.f32 %v8585_v45, %v8348_v19  ;;  %v10558_v45 = vld [vmem:[#allocation3 + $0x61] sm:$0xff]  ;;  %v23868_v14 = vld [vmem:[#allocation3 + $0x90] sm:$0xff] }
 0x7f8   : > { %v8605_v37 = vpop.f32.mrf.mxu0  ;;  %v8207_v3 = vpop.f32.mrf.mxu1 }
 0x7f9   : > { %v8350_v34 = vadd.f32 %v8207_v3, %v23648_v60  ;;  %v23848_v40 = vadd.f32 %v17800_v33, %v8351_v7  ;;  %v23878_v3 = vld [vmem:[#allocation3 + $0x98] sm:$0xff] }
 0x7fa   : > { %v17806_v30 = vpop.f32.mrf.mxu0  ;;  %18117 = vmatmul.mubr.msk.f32.gmra.mxu0 %vm4166_vm1, %v23846_v32  ;;  %v17751_v9 = vpop.f32.mrf.mxu1  ;;  %18062 = vmatmul.mubr.msk.f32.gmra.mxu1 %vm4166_vm1, %v10557_v13 }
 0x7fb   : > { %18119 = vmatprep.mubr.msk.f32.mxu0 %vm4166_vm1, %v23852_v15  ;;  %v8353_v60 = vadd.f32 %v17751_v9, %v23651_v1  ;;  %18064 = vmatprep.mubr.msk.f32.mxu1 %vm4166_vm1, %v10558_v45  ;;  %v23859_v5 = vadd.f32 %v8595_v12, %v8350_v34  ;;  %v10560_v12 = vld [vmem:[#allocation3 + $0x79] sm:$0xff]  ;;  %v10561_v34 = vld [vmem:[#allocation3 + $0x81] sm:$0xff] }
 0x7fc   : > { %v8615_v48 = vpop.f32.mrf.mxu0  ;;  %v8217_v33 = vpop.f32.mrf.mxu1  ;;  %v23884_v45 = vld [vmem:[#allocation3 + $0xa8] sm:$0xff] }
 0x7fd   : > { %v8352_v46 = vadd.f32 %v8217_v33, %v23658_v63  ;;  %v23864_v24 = vadd.f32 %v17803_v6, %v8353_v60 }
 0x7fe   : > { %v17809_v19 = vpop.f32.mrf.mxu0  ;;  %18120 = vmatmul.mubr.msk.f32.gmra.mxu0 %vm4166_vm1, %v23862_v25  ;;  %v17754_v1 = vpop.f32.mrf.mxu1  ;;  %18065 = vmatmul.mubr.msk.f32.gmra.mxu1 %vm4166_vm1, %v10559_v17  ;;  %v23894_v17 = vld [vmem:[#allocation3 + $0xb0] sm:$0xff] }
 0x7ff   : > { %18122 = vmatprep.mubr.msk.f32.mxu0 %vm4166_vm1, %v23868_v14  ;;  %v8355_v63 = vadd.f32 %v17754_v1, %v23661_v41  ;;  %18067 = vmatprep.mubr.msk.f32.mxu1 %vm4166_vm1, %v10560_v12  ;;  %v23875_v23 = vadd.f32 %v8605_v37, %v8352_v46  ;;  %v10562_v37 = vld [vmem:[#allocation3 + $0x91] sm:$0xff]  ;;  %v10563_v1 = vld [vmem:[#allocation3 + $0x99] sm:$0xff] }
 0x800   : > { %v8625_v6 = vpop.f32.mrf.mxu0  ;;  %v8227_v55 = vpop.f32.mrf.mxu1 }
 0x801   : > { %v8354_v7 = vadd.f32 %v8227_v55, %v23668_v22  ;;  %v23880_v13 = vadd.f32 %v17806_v30, %v8355_v63  ;;  %v23900_v55 = vld [vmem:[#allocation3 + $0xc0] sm:$0xff] }
 0x802   : > { %v17812_v9 = vpop.f32.mrf.mxu0  ;;  %18123 = vmatmul.mubr.msk.f32.gmra.mxu0 %vm4166_vm1, %v23878_v3  ;;  %v17757_v41 = vpop.f32.mrf.mxu1  ;;  %18068 = vmatmul.mubr.msk.f32.gmra.mxu1 %vm4166_vm1, %v10561_v34 }
 0x803   : > { %18125 = vmatprep.mubr.msk.f32.mxu0 %vm4166_vm1, %v23884_v45  ;;  %v8357_v22 = vadd.f32 %v17757_v41, %v23671_v26  ;;  %18070 = vmatprep.mubr.msk.f32.mxu1 %vm4166_vm1, %v10562_v37  ;;  %v23891_v60 = vadd.f32 %v8615_v48, %v8354_v7  ;;  %v10564_v48 = vld [vmem:[#allocation3 + $0xa9] sm:$0xff] }
 0x804   : > { %v8635_v30 = vpop.f32.mrf.mxu0  ;;  %v8237_v33 = vpop.f32.mrf.mxu1  ;;  %v23910_v37 = vld [vmem:[#allocation3 + $0xc8] sm:$0xff] }
 0x805   : > { %v8356_v46 = vadd.f32 %v8237_v33, %v23678_v28  ;;  %v23896_v12 = vadd.f32 %v17809_v19, %v8357_v22  ;;  %v10565_v22 = vld [vmem:[#allocation3 + $0xb1] sm:$0xff] }
 0x806   : > { %v17815_v63 = vpop.f32.mrf.mxu0  ;;  %18126 = vmatmul.mubr.msk.f32.gmra.mxu0 %vm4166_vm1, %v23894_v17  ;;  %v17760_v26 = vpop.f32.mrf.mxu1  ;;  %18071 = vmatmul.mubr.msk.f32.gmra.mxu1 %vm4166_vm1, %v10563_v1 }
 0x807   : > { %26473 = vst [vmem:[#allocation41_spill] sm:$0xff] %v23896_v12  ;;  %18128 = vmatprep.mubr.msk.f32.mxu0 %vm4166_vm1, %v23900_v55  ;;  %v8359_v28 = vadd.f32 %v17760_v26, %v23681_v31  ;;  %18073 = vmatprep.mubr.msk.f32.mxu1 %vm4166_vm1, %v10564_v48  ;;  %v23907_v7 = vadd.f32 %v8625_v6, %v8356_v46  ;;  %v23916_v12 = vld [vmem:[#allocation3 + $0xd8] sm:$0xff]  ;;  %v10566_v6 = vld [vmem:[#allocation3 + $0xc1] sm:$0xff] }
 0x808   : > { %v8645_v19 = vpop.f32.mrf.mxu0  ;;  %v8247_v34 = vpop.f32.mrf.mxu1  ;;  %26475 = vst [vmem:[#allocation92_spill] sm:$0xff] %v23916_v12 }
 0x809   : > { %v8358_v41 = vadd.f32 %v8247_v34, %v23688_v18  ;;  %v23912_v33 = vadd.f32 %v17812_v9, %v8359_v28  ;;  %v23926_v28 = vld [vmem:[#allocation3 + $0xe0] sm:$0xff]  ;;  %v10567_v34 = vld [vmem:[#allocation3 + $0xc9] sm:$0xff] }
 0x80a   : > { %v17818_v1 = vpop.f32.mrf.mxu0  ;;  %18129 = vmatmul.mubr.msk.f32.gmra.mxu0 %vm4166_vm1, %v23910_v37  ;;  %v17763_v31 = vpop.f32.mrf.mxu1  ;;  %18074 = vmatmul.mubr.msk.f32.gmra.mxu1 %vm4166_vm1, %v10565_v22 }
 0x80b   : > { %26474 = vst [vmem:[#allocation60_spill] sm:$0xff] %v23912_v33  ;;  %18131 = vmatprep.mubr.msk.f32.mxu0 %vm4166_vm1, %v23916_v12  ;;  %v8361_v18 = vadd.f32 %v17763_v31, %v23691_v49  ;;  %18076 = vmatprep.mubr.msk.f32.mxu1 %vm4166_vm1, %v10566_v6  ;;  %v23923_v46 = vadd.f32 %v8635_v30, %v8358_v41  ;;  %v23932_v12 = vld [vmem:[#allocation3 + $0xf0] sm:$0xff]  ;;  %v10568_v30 = vld [vmem:[#allocation3 + $0xd9] sm:$0xff] }
 0x80c   : > { %v8655_v9 = vpop.f32.mrf.mxu0  ;;  %v8257_v26 = vpop.f32.mrf.mxu1  ;;  %26477 = vst [vmem:[#allocation61_spill] sm:$0xff] %v23932_v12 }
 0x80d   : > { %v8360_v48 = vadd.f32 %v8257_v26, %v23698_v52  ;;  %v23928_v33 = vadd.f32 %v17815_v63, %v8361_v18  ;;  %v23942_v18 = vld [vmem:[#allocation3 + $0xf8] sm:$0xff]  ;;  %v10569_v26 = vld [vmem:[#allocation3 + $0xe1] sm:$0xff] }
 0x80e   : > { %v17821_v22 = vpop.f32.mrf.mxu0  ;;  %18132 = vmatmul.mubr.msk.f32.gmra.mxu0 %vm4166_vm1, %v23926_v28  ;;  %v17766_v49 = vpop.f32.mrf.mxu1  ;;  %18077 = vmatmul.mubr.msk.f32.gmra.mxu1 %vm4166_vm1, %v10567_v34 }
 0x80f   : > { %26476 = vst [vmem:[#allocation94_spill] sm:$0xff] %v23928_v33  ;;  %18134 = vmatprep.mubr.msk.f32.mxu0 %vm4166_vm1, %v23932_v12  ;;  %v8363_v52 = vadd.f32 %v17766_v49, %v23701_v20  ;;  %18079 = vmatprep.mubr.msk.f32.mxu1 %vm4166_vm1, %v10568_v30  ;;  %v23939_v41 = vadd.f32 %v8645_v19, %v8360_v48  ;;  %v23948_v12 = vld [vmem:[#allocation3 + $0x108] sm:$0xff]  ;;  %v10570_v19 = vld [vmem:[#allocation3 + $0xf1] sm:$0xff] }
 0x810   : > { %v8665_v63 = vpop.f32.mrf.mxu0  ;;  %v8267_v31 = vpop.f32.mrf.mxu1  ;;  %26479 = vst [vmem:[#allocation42_spill] sm:$0xff] %v23948_v12 }
 0x811   : > { %v8362_v6 = vadd.f32 %v8267_v31, %v23708_v54  ;;  %v23944_v33 = vadd.f32 %v17818_v1, %v8363_v52  ;;  %v23958_v52 = vld [vmem:[#allocation3 + $0x110] sm:$0xff]  ;;  %v10571_v31 = vld [vmem:[#allocation3 + $0xf9] sm:$0xff] }
 0x812   : > { %v17824_v34 = vpop.f32.mrf.mxu0  ;;  %18135 = vmatmul.mubr.msk.f32.gmra.mxu0 %vm4166_vm1, %v23942_v18  ;;  %v17769_v20 = vpop.f32.mrf.mxu1  ;;  %18080 = vmatmul.mubr.msk.f32.gmra.mxu1 %vm4166_vm1, %v10569_v26 }
 0x813   : > { %26478 = vst [vmem:[#allocation44_spill] sm:$0xff] %v23944_v33  ;;  %18137 = vmatprep.mubr.msk.f32.mxu0 %vm4166_vm1, %v23948_v12  ;;  %v8365_v54 = vadd.f32 %v17769_v20, %v23711_v4  ;;  %18082 = vmatprep.mubr.msk.f32.mxu1 %vm4166_vm1, %v10570_v19  ;;  %v23955_v48 = vadd.f32 %v8655_v9, %v8362_v6  ;;  %v23964_v12 = vld [vmem:[#allocation3 + $0x120] sm:$0xff]  ;;  %v10572_v9 = vld [vmem:[#allocation3 + $0x109] sm:$0xff] }
 0x814   : > { %v8675_v1 = vpop.f32.mrf.mxu0  ;;  %v8277_v49 = vpop.f32.mrf.mxu1  ;;  %26481 = vst [vmem:[#allocation95_spill] sm:$0xff] %v23964_v12 }
 0x815   : > { %v8364_v30 = vadd.f32 %v8277_v49, %v23718_v2  ;;  %v23960_v33 = vadd.f32 %v17821_v22, %v8365_v54  ;;  %v23974_v54 = vld [vmem:[#allocation3 + $0x128] sm:$0xff]  ;;  %v10573_v49 = vld [vmem:[#allocation3 + $0x111] sm:$0xff] }
 0x816   : > { %v17827_v26 = vpop.f32.mrf.mxu0  ;;  %18138 = vmatmul.mubr.msk.f32.gmra.mxu0 %vm4166_vm1, %v23958_v52  ;;  %v17772_v4 = vpop.f32.mrf.mxu1  ;;  %18083 = vmatmul.mubr.msk.f32.gmra.mxu1 %vm4166_vm1, %v10571_v31 }
 0x817   : > { %26480 = vst [vmem:[#allocation63_spill] sm:$0xff] %v23960_v33  ;;  %18140 = vmatprep.mubr.msk.f32.mxu0 %vm4166_vm1, %v23964_v12  ;;  %v8367_v2 = vadd.f32 %v17772_v4, %v23721_v61  ;;  %18085 = vmatprep.mubr.msk.f32.mxu1 %vm4166_vm1, %v10572_v9  ;;  %v23971_v6 = vadd.f32 %v8665_v63, %v8364_v30  ;;  %v23980_v12 = vld [vmem:[#allocation3 + $0x138] sm:$0xff]  ;;  %v10574_v63 = vld [vmem:[#allocation3 + $0x121] sm:$0xff] }
 0x818   : > { %v8685_v22 = vpop.f32.mrf.mxu0  ;;  %v8287_v20 = vpop.f32.mrf.mxu1  ;;  %26483 = vst [vmem:[#allocation7_spill] sm:$0xff] %v23980_v12 }
 0x819   : > { %v8366_v19 = vadd.f32 %v8287_v20, %v23728_v10  ;;  %v23976_v33 = vadd.f32 %v17824_v34, %v8367_v2  ;;  %v23990_v2 = vld [vmem:[#allocation3 + $0x140] sm:$0xff]  ;;  %v10575_v20 = vld [vmem:[#allocation3 + $0x129] sm:$0xff] }
 0x81a   : > { %v17830_v31 = vpop.f32.mrf.mxu0  ;;  %18141 = vmatmul.mubr.msk.f32.gmra.mxu0 %vm4166_vm1, %v23974_v54  ;;  %v17775_v61 = vpop.f32.mrf.mxu1  ;;  %18086 = vmatmul.mubr.msk.f32.gmra.mxu1 %vm4166_vm1, %v10573_v49 }
 0x81b   : > { %26482 = vst [vmem:[#allocation13_spill] sm:$0xff] %v23976_v33  ;;  %18143 = vmatprep.mubr.msk.f32.mxu0 %vm4166_vm1, %v23980_v12  ;;  %v8369_v10 = vadd.f32 %v17775_v61, %v23731_v8  ;;  %18088 = vmatprep.mubr.msk.f32.mxu1 %vm4166_vm1, %v10574_v63  ;;  %v23987_v30 = vadd.f32 %v8675_v1, %v8366_v19  ;;  %v23996_v12 = vld [vmem:[#allocation3 + $0x150] sm:$0xff]  ;;  %v10576_v1 = vld [vmem:[#allocation3 + $0x139] sm:$0xff] }
 0x81c   : > { %v8695_v34 = vpop.f32.mrf.mxu0  ;;  %v8297_v4 = vpop.f32.mrf.mxu1  ;;  %26485 = vst [vmem:[#allocation8_spill] sm:$0xff] %v23996_v12 }
 0x81d   : > { %v8368_v9 = vadd.f32 %v8297_v4, %v23739_v51  ;;  %v23992_v33 = vadd.f32 %v17827_v26, %v8369_v10  ;;  %v24006_v10 = vld [vmem:[#allocation3 + $0x158] sm:$0xff]  ;;  %v10577_v4 = vld [vmem:[#allocation3 + $0x141] sm:$0xff] }
 0x81e   : > { %v17833_v49 = vpop.f32.mrf.mxu0  ;;  %18144 = vmatmul.mubr.msk.f32.gmra.mxu0 %vm4166_vm1, %v23990_v2  ;;  %v17778_v8 = vpop.f32.mrf.mxu1  ;;  %18089 = vmatmul.mubr.msk.f32.gmra.mxu1 %vm4166_vm1, %v10575_v20 }
 0x81f   : > { %26484 = vst [vmem:[#allocation15_spill] sm:$0xff] %v23992_v33  ;;  %18146 = vmatprep.mubr.msk.f32.mxu0 %vm4166_vm1, %v23996_v12  ;;  %v8371_v51 = vadd.f32 %v17778_v8, %v23742_v21  ;;  %18091 = vmatprep.mubr.msk.f32.mxu1 %vm4166_vm1, %v10576_v1  ;;  %v24003_v19 = vadd.f32 %v8685_v22, %v8368_v9  ;;  %v24012_v12 = vld [vmem:[#allocation3 + $0x168] sm:$0xff]  ;;  %v10578_v22 = vld [vmem:[#allocation3 + $0x151] sm:$0xff] }
 0x820   : > { %v8705_v26 = vpop.f32.mrf.mxu0  ;;  %v8307_v61 = vpop.f32.mrf.mxu1  ;;  %26487 = vst [vmem:[#allocation10_spill] sm:$0xff] %v24012_v12 }
 0x821   : > { %v8370_v63 = vadd.f32 %v8307_v61, %v23751_v36  ;;  %v24008_v33 = vadd.f32 %v17830_v31, %v8371_v51  ;;  %v24022_v51 = vld [vmem:[#allocation3 + $0x170] sm:$0xff]  ;;  %v10579_v61 = vld [vmem:[#allocation3 + $0x159] sm:$0xff] }
 0x822   : > { %v17836_v20 = vpop.f32.mrf.mxu0  ;;  %18147 = vmatmul.mubr.msk.f32.gmra.mxu0 %vm4166_vm1, %v24006_v10  ;;  %v17781_v21 = vpop.f32.mrf.mxu1  ;;  %18092 = vmatmul.mubr.msk.f32.gmra.mxu1 %vm4166_vm1, %v10577_v4 }
 0x823   : > { %26486 = vst [vmem:[#allocation9_spill] sm:$0xff] %v24008_v33  ;;  %18149 = vmatprep.mubr.msk.f32.mxu0 %vm4166_vm1, %v24012_v12  ;;  %v8373_v36 = vadd.f32 %v17781_v21, %v23754_v50  ;;  %18094 = vmatprep.mubr.msk.f32.mxu1 %vm4166_vm1, %v10578_v22  ;;  %v24019_v9 = vadd.f32 %v8695_v34, %v8370_v63  ;;  %v10580_v50 = vld [vmem:[#allocation3 + $0x169] sm:$0xff] }
 0x824   : > { %v8715_v31 = vpop.f32.mrf.mxu0  ;;  %v8317_v8 = vpop.f32.mrf.mxu1  ;;  %v11227_v21 = vld [vmem:[#allocation3 + $0x2] sm:$0xff] }
 0x825   : > { %v8372_v1 = vadd.f32 %v8317_v8, %v23762_v39  ;;  %v24024_v33 = vadd.f32 %v17833_v49, %v8373_v36  ;;  %v10581_v36 = vld [vmem:[#allocation3 + $0x171] sm:$0xff] }
 0x826   : > { %v17839_v4 = vpop.f32.mrf.mxu0  ;;  %18150 = vmatmul.mubr.msk.f32.gmra.mxu0 %vm4166_vm1, %v24022_v51  ;;  %v17784_v12 = vpop.f32.mrf.mxu1  ;;  %18095 = vmatmul.mubr.msk.f32.gmra.mxu1 %vm4166_vm1, %v10579_v61 }
 0x827   : > { %26488 = vst [vmem:[#allocation11_spill] sm:$0xff] %v24024_v33  ;;  %18208 = vmatprep.mubr.msk.f32.mxu0 %vm4166_vm1, %v23768_v44  ;;  %v8375_v34 = vadd.f32 %v17784_v12, %v23765_v53  ;;  %18097 = vmatprep.mubr.msk.f32.mxu1 %vm4166_vm1, %v10580_v50  ;;  %v24033_v39 = vadd.f32 %v8705_v26, %v8372_v1  ;;  %v15413_v53 = vld [vmem:[%s25742_s13 + $0x50] sm:$0xff] }
 0x828   : > { %v8725_v63 = vpop.f32.mrf.mxu0  ;;  %v8327_v49 = vpop.f32.mrf.mxu1 }
 0x829   : > { %v8374_v22 = vadd.f32 %v8327_v49, %v23778_v27  ;;  %v24036_v8 = vadd.f32 %v17836_v20, %v8375_v34  ;;  %v11228_v27 = vld [vmem:[#allocation3 + $0xa] sm:$0xff] }
 0x82a   : > { %v17898_v33 = vpop.f32.mrf.mxu0  ;;  %18209 = vmatmul.mubr.msk.f32.vlgmr.msra.gmra.mxu0 %vm4166_vm1, %v23782_v59  ;;  %v17787_v61 = vpop.f32.mrf.mxu1  ;;  %18098 = vmatmul.mubr.msk.f32.gmra.mxu1 %vm4166_vm1, %v10581_v36 }
 0x82b   : > { %18211 = vmatprep.mubr.msk.f32.mxu0 %vm4166_vm1, %v23788_v56  ;;  %v8377_v44 = vadd.f32 %v17787_v61, %v23784_v57  ;;  %18156 = vmatprep.mubr.msk.f32.mxu1 %vm4166_vm1, %v11227_v21  ;;  %v24048_v12 = vadd.f32 %v8715_v31, %v8374_v22  ;;  %v24057_v57 = vld [vmem:[#allocation3 + $0x1a] sm:$0xff]  ;;  %v15379_v31 = vld [vmem:[%s25742_s13 + $0x40] sm:$0xff]  ;;  %v24076_v21 = vld [vmem:[#allocation3 + $0x22] sm:$0xff] }
 0x82c   : > { %v9352_v26 = vpop.f32.mrf.mxu0  ;;  %v8337_v20 = vpop.f32.mrf.mxu1  ;;  %18309 = vmatpush3.msra.mxu0 %v23797_v42  ;;  %v24065_v42 = vld [vmem:[%s25742_s13 + $0x78] sm:$0xff] }
 0x82d   : > { %v8376_v59 = vadd.f32 %v8337_v20, %v23803_v16  ;;  %18310 = vmatprep.subr.mxu0 %v15413_v53  ;;  %v24052_v1 = vadd.f32 %v17839_v4, %v8377_v44 }
 0x82e   : > { %v17901_v50 = vpop.f32.mrf.mxu0  ;;  %18212 = vmatmul.mubr.msk.f32.gmra.mxu0 %vm4166_vm1, %v23807_v58  ;;  %v17846_v56 = vpop.f32.mrf.mxu1  ;;  %18157 = vmatmul.mubr.msk.f32.vlgmr.msra.gmra.mxu1 %vm4166_vm1, %v11228_v27  ;;  %v24109_v27 = vld [vmem:[#allocation3 + $0x4a] sm:$0xff] }
 0x82f   : > { %18214 = vmatprep.mubr.msk.f32.mxu0 %vm4166_vm1, %v23814_v38  ;;  %v9123_v16 = vadd.f32 %v17846_v56, %v23809_v62  ;;  %18159 = vmatprep.mubr.msk.f32.mxu1 %vm4166_vm1, %v24057_v57  ;;  %v24072_v58 = vadd.f32 %v8725_v63, %v8376_v59  ;;  %v24085_v63 = vld [vmem:[#allocation3 + $0x32] sm:$0xff] }
 0x830   : > { %v9362_v4 = vpop.f32.mrf.mxu0  ;;  %v8963_v34 = vpop.f32.mrf.mxu1  ;;  %18311 = vmatpush3.msra.mxu0 %v15413_v53  ;;  %18257 = vmatpush3.msra.mxu1 %v23820_v29  ;;  %v24100_v53 = vld [vmem:[#allocation3 + $0x3a] sm:$0xff] }
 0x831   : > { %v9122_v49 = vadd.f32 %v8963_v34, %v23826_v11  ;;  %18258 = vmatprep.subr.mxu1 %v15379_v31  ;;  %v24078_v22 = vadd.f32 %v17898_v33, %v9123_v16  ;;  %18412 = vmatprep.subr.mxu0 %v24065_v42 }
 0x832   : > { %v17904_v62 = vpop.f32.mrf.mxu0  ;;  %18215 = vmatmul.mubr.msk.f32.gmra.mxu0 %vm4166_vm1, %v23829_v47  ;;  %v17849_v38 = vpop.f32.mrf.mxu1  ;;  %18160 = vmatmul.mubr.msk.f32.gmra.mxu1 %vm4166_vm1, %v24076_v21  ;;  %v24097_v47 = vld [vmem:[%s25742_s13 + $0x68] sm:$0xff] }
 0x833   : > { %18217 = vmatprep.mubr.msk.f32.mxu0 %vm4166_vm1, %v23836_v43  ;;  %v9125_v29 = vadd.f32 %v17849_v38, %v23831_v0  ;;  %18162 = vmatprep.mubr.msk.f32.mxu1 %vm4166_vm1, %v24085_v63  ;;  %v24092_v11 = vadd.f32 %v9352_v26, %v9122_v49  ;;  %v24137_v49 = vld [vmem:[#allocation3 + $0x6a] sm:$0xff] }
 0x834   : > { %v9372_v33 = vpop.f32.mrf.mxu0  ;;  %v8973_v36 = vpop.f32.mrf.mxu1  ;;  %18259 = vmatpush3.msra.mxu1 %v15379_v31 }
 0x835   : > { %v9124_v61 = vadd.f32 %v8973_v36, %v23843_v35  ;;  %v24102_v43 = vadd.f32 %v17901_v50, %v9125_v29  ;;  %18360 = vmatprep.subr.mxu1 %v24097_v47  ;;  %v24119_v50 = vld [vmem:[#allocation3 + $0x52] sm:$0xff] }
 0x836   : > { %v17907_v0 = vpop.f32.mrf.mxu0  ;;  %18218 = vmatmul.mubr.msk.f32.gmra.mxu0 %vm4166_vm1, %v23846_v32  ;;  %v17852_v44 = vpop.f32.mrf.mxu1  ;;  %18163 = vmatmul.mubr.msk.f32.gmra.mxu1 %vm4166_vm1, %v24100_v53 }
 0x837   : > { %18220 = vmatprep.mubr.msk.f32.mxu0 %vm4166_vm1, %v23852_v15  ;;  %v9127_v35 = vadd.f32 %v17852_v44, %v23848_v40  ;;  %18165 = vmatprep.mubr.msk.f32.mxu1 %vm4166_vm1, %v24109_v27  ;;  %v24116_v26 = vadd.f32 %v9362_v4, %v9124_v61  ;;  %v24127_v40 = vld [vmem:[#allocation3 + $0x62] sm:$0xff] }
 0x838   : > { %v9382_v20 = vpop.f32.mrf.mxu0  ;;  %v8983_v59 = vpop.f32.mrf.mxu1  ;;  %v24155_v61 = vld [vmem:[#allocation3 + $0x82] sm:$0xff] }
 0x839   : > { %v9126_v32 = vadd.f32 %v8983_v59, %v23859_v5  ;;  %v24121_v56 = vadd.f32 %v17904_v62, %v9127_v35  ;;  %v26489_v35 = vld [vmem:[#allocation41_spill] sm:$0xff] }
 0x83a   : > { %v17910_v31 = vpop.f32.mrf.mxu0  ;;  %18221 = vmatmul.mubr.msk.f32.gmra.mxu0 %vm4166_vm1, %v23862_v25  ;;  %v17855_v15 = vpop.f32.mrf.mxu1  ;;  %18166 = vmatmul.mubr.msk.f32.gmra.mxu1 %vm4166_vm1, %v24119_v50 }
 0x83b   : > { %18223 = vmatprep.mubr.msk.f32.mxu0 %vm4166_vm1, %v23868_v14  ;;  %v9129_v16 = vadd.f32 %v17855_v15, %v23864_v24  ;;  %18168 = vmatprep.mubr.msk.f32.mxu1 %vm4166_vm1, %v24127_v40  ;;  %v24134_v5 = vadd.f32 %v9372_v33, %v9126_v32  ;;  %v24145_v24 = vld [vmem:[#allocation3 + $0x7a] sm:$0xff] }
 0x83c   : > { %v9392_v4 = vpop.f32.mrf.mxu0  ;;  %v8993_v34 = vpop.f32.mrf.mxu1 }
 0x83d   : > { %v9128_v25 = vadd.f32 %v8993_v34, %v23875_v23  ;;  %v24139_v62 = vadd.f32 %v17907_v0, %v9129_v16  ;;  %v24181_v34 = vld [vmem:[#allocation3 + $0xaa] sm:$0xff] }
 0x83e   : > { %v17913_v38 = vpop.f32.mrf.mxu0  ;;  %18224 = vmatmul.mubr.msk.f32.gmra.mxu0 %vm4166_vm1, %v23878_v3  ;;  %v17858_v14 = vpop.f32.mrf.mxu1  ;;  %18169 = vmatmul.mubr.msk.f32.gmra.mxu1 %vm4166_vm1, %v24137_v49 }
 0x83f   : > { %18226 = vmatprep.mubr.msk.f32.mxu0 %vm4166_vm1, %v23884_v45  ;;  %v9131_v29 = vadd.f32 %v17858_v14, %v23880_v13  ;;  %18171 = vmatprep.mubr.msk.f32.mxu1 %vm4166_vm1, %v24145_v24  ;;  %v24152_v23 = vadd.f32 %v9382_v20, %v9128_v25  ;;  %v24163_v13 = vld [vmem:[#allocation3 + $0x92] sm:$0xff] }
 0x840   : > { %v9402_v33 = vpop.f32.mrf.mxu0  ;;  %v9003_v36 = vpop.f32.mrf.mxu1  ;;  %v26491_v25 = vld [vmem:[#allocation60_spill] sm:$0xff] }
 0x841   : > { %v9130_v3 = vadd.f32 %v9003_v36, %v23891_v60  ;;  %v24157_v0 = vadd.f32 %v17910_v31, %v9131_v29  ;;  %v24173_v31 = vld [vmem:[#allocation3 + $0x9a] sm:$0xff]  ;;  %v24191_v36 = vld [vmem:[#allocation3 + $0xb2] sm:$0xff] }
 0x842   : > { %v17916_v44 = vpop.f32.mrf.mxu0  ;;  %18227 = vmatmul.mubr.msk.f32.gmra.mxu0 %vm4166_vm1, %v23894_v17  ;;  %v17861_v45 = vpop.f32.mrf.mxu1  ;;  %18172 = vmatmul.mubr.msk.f32.gmra.mxu1 %vm4166_vm1, %v24155_v61 }
 0x843   : > { %18229 = vmatprep.mubr.msk.f32.mxu0 %vm4166_vm1, %v23900_v55  ;;  %v9133_v20 = vadd.f32 %v17861_v45, %v26489_v35  ;;  %18174 = vmatprep.mubr.msk.f32.mxu1 %vm4166_vm1, %v24163_v13  ;;  %v24170_v60 = vadd.f32 %v9392_v4, %v9130_v3  ;;  %v26490_v4 = vld [vmem:[#allocation92_spill] sm:$0xff] }
 0x844   : > { %v9412_v59 = vpop.f32.mrf.mxu0  ;;  %v9013_v32 = vpop.f32.mrf.mxu1 }
 0x845   : > { %v9132_v17 = vadd.f32 %v9013_v32, %v23907_v7  ;;  %v24175_v15 = vadd.f32 %v17913_v38, %v9133_v20  ;;  %v24199_v20 = vld [vmem:[#allocation3 + $0xc2] sm:$0xff] }
 0x846   : > { %v17919_v16 = vpop.f32.mrf.mxu0  ;;  %18230 = vmatmul.mubr.msk.f32.gmra.mxu0 %vm4166_vm1, %v23910_v37  ;;  %v17864_v55 = vpop.f32.mrf.mxu1  ;;  %18175 = vmatmul.mubr.msk.f32.gmra.mxu1 %vm4166_vm1, %v24173_v31  ;;  %v26493_v32 = vld [vmem:[#allocation94_spill] sm:$0xff] }
 0x847   : > { %18232 = vmatprep.mubr.msk.f32.mxu0 %vm4166_vm1, %v26490_v4  ;;  %v9135_v14 = vadd.f32 %v17864_v55, %v26491_v25  ;;  %18177 = vmatprep.mubr.msk.f32.mxu1 %vm4166_vm1, %v24181_v34  ;;  %v24188_v7 = vadd.f32 %v9402_v33, %v9132_v17  ;;  %v26492_v33 = vld [vmem:[#allocation61_spill] sm:$0xff]  ;;  %v24209_v4 = vld [vmem:[#allocation3 + $0xca] sm:$0xff] }
 0x848   : > { %v9422_v38 = vpop.f32.mrf.mxu0  ;;  %v9023_v29 = vpop.f32.mrf.mxu1 }
 0x849   : > { %v9134_v37 = vadd.f32 %v9023_v29, %v23923_v46  ;;  %v24193_v3 = vadd.f32 %v17916_v44, %v9135_v14 }
 0x84a   : > { %v17922_v45 = vpop.f32.mrf.mxu0  ;;  %18233 = vmatmul.mubr.msk.f32.gmra.mxu0 %vm4166_vm1, %v23926_v28  ;;  %v17867_v35 = vpop.f32.mrf.mxu1  ;;  %18178 = vmatmul.mubr.msk.f32.gmra.mxu1 %vm4166_vm1, %v24191_v36 }
 0x84b   : > { %18235 = vmatprep.mubr.msk.f32.mxu0 %vm4166_vm1, %v26492_v33  ;;  %v9137_v17 = vadd.f32 %v17867_v35, %v26493_v32  ;;  %18180 = vmatprep.mubr.msk.f32.mxu1 %vm4166_vm1, %v24199_v20  ;;  %v24206_v46 = vadd.f32 %v9412_v59, %v9134_v37  ;;  %v24217_v35 = vld [vmem:[#allocation3 + $0xda] sm:$0xff]  ;;  %v26495_v59 = vld [vmem:[#allocation42_spill] sm:$0xff] }
 0x84c   : > { %v9432_v44 = vpop.f32.mrf.mxu0  ;;  %v9033_v55 = vpop.f32.mrf.mxu1  ;;  %v26496_v37 = vld [vmem:[#allocation44_spill] sm:$0xff] }
 0x84d   : > { %v9136_v28 = vadd.f32 %v9033_v55, %v23939_v41  ;;  %v24211_v25 = vadd.f32 %v17919_v16, %v9137_v17  ;;  %v24227_v17 = vld [vmem:[#allocation3 + $0xe2] sm:$0xff] }
 0x84e   : > { %v17925_v14 = vpop.f32.mrf.mxu0  ;;  %18236 = vmatmul.mubr.msk.f32.gmra.mxu0 %vm4166_vm1, %v23942_v18  ;;  %v17870_v29 = vpop.f32.mrf.mxu1  ;;  %18181 = vmatmul.mubr.msk.f32.gmra.mxu1 %vm4166_vm1, %v24209_v4 }
 0x84f   : > { %26494 = vst [vmem:[#allocation12_spill] sm:$0xff] %v24211_v25  ;;  %18238 = vmatprep.mubr.msk.f32.mxu0 %vm4166_vm1, %v26495_v59  ;;  %v9139_v33 = vadd.f32 %v17870_v29, %v26496_v37  ;;  %18183 = vmatprep.mubr.msk.f32.mxu1 %vm4166_vm1, %v24217_v35  ;;  %v24224_v41 = vadd.f32 %v9422_v38, %v9136_v28  ;;  %v24235_v29 = vld [vmem:[#allocation3 + $0xf2] sm:$0xff] }
 0x850   : > { %v9442_v16 = vpop.f32.mrf.mxu0  ;;  %v9043_v32 = vpop.f32.mrf.mxu1  ;;  %v26499_v38 = vld [vmem:[#allocation95_spill] sm:$0xff] }
 0x851   : > { %26497 = vst [vmem:[#allocation14_spill] sm:$0xff] %v24224_v41  ;;  %v9138_v18 = vadd.f32 %v9043_v32, %v23955_v48  ;;  %v24229_v55 = vadd.f32 %v17922_v45, %v9139_v33  ;;  %v26500_v28 = vld [vmem:[#allocation63_spill] sm:$0xff]  ;;  %v24245_v32 = vld [vmem:[#allocation3 + $0xfa] sm:$0xff] }
 0x852   : > { %v17928_v25 = vpop.f32.mrf.mxu0  ;;  %18239 = vmatmul.mubr.msk.f32.gmra.mxu0 %vm4166_vm1, %v23958_v52  ;;  %v17873_v59 = vpop.f32.mrf.mxu1  ;;  %18184 = vmatmul.mubr.msk.f32.gmra.mxu1 %vm4166_vm1, %v24227_v17 }
 0x853   : > { %26498 = vst [vmem:[#allocation16_spill] sm:$0xff] %v24229_v55  ;;  %18241 = vmatprep.mubr.msk.f32.mxu0 %vm4166_vm1, %v26499_v38  ;;  %v9141_v37 = vadd.f32 %v17873_v59, %v26500_v28  ;;  %18186 = vmatprep.mubr.msk.f32.mxu1 %vm4166_vm1, %v24235_v29  ;;  %v24242_v48 = vadd.f32 %v9432_v44, %v9138_v18  ;;  %v24253_v59 = vld [vmem:[#allocation3 + $0x10a] sm:$0xff]  ;;  %v26504_v18 = vld [vmem:[#allocation13_spill] sm:$0xff] }
 0x854   : > { %v9452_v45 = vpop.f32.mrf.mxu0  ;;  %v9053_v33 = vpop.f32.mrf.mxu1  ;;  %v26503_v44 = vld [vmem:[#allocation7_spill] sm:$0xff] }
 0x855   : > { %26501 = vst [vmem:[#allocation17_spill] sm:$0xff] %v24242_v48  ;;  %v9140_v52 = vadd.f32 %v9053_v33, %v23971_v6  ;;  %v24247_v55 = vadd.f32 %v17925_v14, %v9141_v37  ;;  %v24263_v33 = vld [vmem:[#allocation3 + $0x112] sm:$0xff] }
 0x856   : > { %v17931_v41 = vpop.f32.mrf.mxu0  ;;  %18242 = vmatmul.mubr.msk.f32.gmra.mxu0 %vm4166_vm1, %v23974_v54  ;;  %v17876_v38 = vpop.f32.mrf.mxu1  ;;  %18187 = vmatmul.mubr.msk.f32.gmra.mxu1 %vm4166_vm1, %v24245_v32 }
 0x857   : > { %26502 = vst [vmem:[#allocation18_spill] sm:$0xff] %v24247_v55  ;;  %18244 = vmatprep.mubr.msk.f32.mxu0 %vm4166_vm1, %v26503_v44  ;;  %v9143_v28 = vadd.f32 %v17876_v38, %v26504_v18  ;;  %18189 = vmatprep.mubr.msk.f32.mxu1 %vm4166_vm1, %v24253_v59  ;;  %v24260_v6 = vadd.f32 %v9442_v16, %v9140_v52  ;;  %v24271_v38 = vld [vmem:[#allocation3 + $0x122] sm:$0xff]  ;;  %v26507_v16 = vld [vmem:[#allocation8_spill] sm:$0xff]  ;;  %v26508_v52 = vld [vmem:[#allocation15_spill] sm:$0xff] }
 0x858   : > { %v9462_v14 = vpop.f32.mrf.mxu0  ;;  %v9063_v37 = vpop.f32.mrf.mxu1 }
 0x859   : > { %26505 = vst [vmem:[#allocation27_spill] sm:$0xff] %v24260_v6  ;;  %v9142_v54 = vadd.f32 %v9063_v37, %v23987_v30  ;;  %v24265_v55 = vadd.f32 %v17928_v25, %v9143_v28  ;;  %v24281_v37 = vld [vmem:[#allocation3 + $0x12a] sm:$0xff] }
 0x85a   : > { %v17934_v48 = vpop.f32.mrf.mxu0  ;;  %18245 = vmatmul.mubr.msk.f32.gmra.mxu0 %vm4166_vm1, %v23990_v2  ;;  %v17879_v44 = vpop.f32.mrf.mxu1  ;;  %18190 = vmatmul.mubr.msk.f32.gmra.mxu1 %vm4166_vm1, %v24263_v33  ;;  %26510 = vst [vmem:[#allocation21_spill] sm:$0xff] %v24281_v37 }
 0x85b   : > { %26506 = vst [vmem:[#allocation19_spill] sm:$0xff] %v24265_v55  ;;  %18247 = vmatprep.mubr.msk.f32.mxu0 %vm4166_vm1, %v26507_v16  ;;  %v9145_v18 = vadd.f32 %v17879_v44, %v26508_v52  ;;  %18192 = vmatprep.mubr.msk.f32.mxu1 %vm4166_vm1, %v24271_v38  ;;  %v24278_v30 = vadd.f32 %v9452_v45, %v9142_v54  ;;  %v24289_v44 = vld [vmem:[#allocation3 + $0x13a] sm:$0xff]  ;;  %v26512_v45 = vld [vmem:[#allocation10_spill] sm:$0xff] }
 0x85c   : > { %v9472_v25 = vpop.f32.mrf.mxu0  ;;  %v9073_v28 = vpop.f32.mrf.mxu1  ;;  %v26513_v54 = vld [vmem:[#allocation9_spill] sm:$0xff] }
 0x85d   : > { %26509 = vst [vmem:[#allocation20_spill] sm:$0xff] %v24278_v30  ;;  %v9144_v2 = vadd.f32 %v9073_v28, %v24003_v19  ;;  %v24283_v55 = vadd.f32 %v17931_v41, %v9145_v18  ;;  %v24299_v28 = vld [vmem:[#allocation3 + $0x142] sm:$0xff] }
 0x85e   : > { %v17937_v6 = vpop.f32.mrf.mxu0  ;;  %18248 = vmatmul.mubr.msk.f32.gmra.mxu0 %vm4166_vm1, %v24006_v10  ;;  %v17882_v16 = vpop.f32.mrf.mxu1  ;;  %18193 = vmatmul.mubr.msk.f32.gmra.mxu1 %vm4166_vm1, %v24281_v37 }
 0x85f   : > { %26511 = vst [vmem:[#allocation23_spill] sm:$0xff] %v24283_v55  ;;  %18250 = vmatprep.mubr.msk.f32.mxu0 %vm4166_vm1, %v26512_v45  ;;  %v9147_v52 = vadd.f32 %v17882_v16, %v26513_v54  ;;  %18195 = vmatprep.mubr.msk.f32.mxu1 %vm4166_vm1, %v24289_v44  ;;  %v24296_v19 = vadd.f32 %v9462_v14, %v9144_v2  ;;  %v11645_v45 = vld [vmem:[#allocation3 + $0x180] sm:$0xff]  ;;  %v24307_v16 = vld [vmem:[#allocation3 + $0x152] sm:$0xff] }
 0x860   : > { %v9482_v41 = vpop.f32.mrf.mxu0  ;;  %v9083_v18 = vpop.f32.mrf.mxu1  ;;  %v26516_v14 = vld [vmem:[#allocation11_spill] sm:$0xff] }
 0x861   : > { %26514 = vst [vmem:[#allocation22_spill] sm:$0xff] %v24296_v19  ;;  %v9146_v10 = vadd.f32 %v9083_v18, %v24019_v9  ;;  %v24301_v55 = vadd.f32 %v17934_v48, %v9147_v52  ;;  %v11646_v52 = vld [vmem:[#allocation3 + $0x188] sm:$0xff]  ;;  %v24316_v18 = vld [vmem:[#allocation3 + $0x15a] sm:$0xff] }
 0x862   : > { %v17940_v30 = vpop.f32.mrf.mxu0  ;;  %18251 = vmatmul.mubr.msk.f32.gmra.mxu0 %vm4166_vm1, %v24022_v51  ;;  %v17885_v37 = vpop.f32.mrf.mxu1  ;;  %18196 = vmatmul.mubr.msk.f32.gmra.mxu1 %vm4166_vm1, %v24299_v28 }
 0x863   : > { %26515 = vst [vmem:[#allocation24_spill] sm:$0xff] %v24301_v55  ;;  %18253 = vmatprep.mubr.msk.f32.mxu0 %vm4166_vm1, %v11645_v45  ;;  %v9149_v2 = vadd.f32 %v17885_v37, %v26516_v14  ;;  %18198 = vmatprep.mubr.msk.f32.mxu1 %vm4166_vm1, %v24307_v16  ;;  %v24313_v9 = vadd.f32 %v9472_v25, %v9146_v10  ;;  %v24323_v37 = vld [vmem:[#allocation3 + $0x16a] sm:$0xff] }
 0x864   : > { %v9492_v48 = vpop.f32.mrf.mxu0  ;;  %v9093_v54 = vpop.f32.mrf.mxu1 }
 0x865   : > { %v9148_v51 = vadd.f32 %v9093_v54, %v24033_v39  ;;  %v24318_v55 = vadd.f32 %v17937_v6, %v9149_v2  ;;  %v24333_v2 = vld [vmem:[#allocation3 + $0x172] sm:$0xff] }
 0x866   : > { %v17943_v19 = vpop.f32.mrf.mxu0  ;;  %18254 = vmatmul.mubr.msk.f32.gmra.mxu0 %vm4166_vm1, %v11646_v52  ;;  %v17888_v45 = vpop.f32.mrf.mxu1  ;;  %18199 = vmatmul.mubr.msk.f32.gmra.mxu1 %vm4166_vm1, %v24316_v18 }
 0x867   : > { %18312 = vmatprep.mubr.msk.f32.mxu0 %vm4166_vm1, %v24057_v57  ;;  %v9151_v25 = vadd.f32 %v17888_v45, %v24036_v8  ;;  %18201 = vmatprep.mubr.msk.f32.mxu1 %vm4166_vm1, %v24323_v37  ;;  %v24330_v39 = vadd.f32 %v9482_v41, %v9148_v51  ;;  %v12003_v8 = vld [vmem:[#allocation3 + $0x19] sm:$0xff] }
 0x868   : > { %v9502_v6 = vpop.f32.mrf.mxu0  ;;  %v9103_v10 = vpop.f32.mrf.mxu1  ;;  %v15481_v41 = vld [vmem:[%s25742_s13 + $0x70] sm:$0xff] }
 0x869   : > { %v9150_v14 = vadd.f32 %v9103_v10, %v24048_v12  ;;  %v24335_v54 = vadd.f32 %v17940_v30, %v9151_v25  ;;  %v12004_v25 = vld [vmem:[#allocation3 + $0x21] sm:$0xff] }
 0x86a   : > { %v18002_v52 = vpop.f32.mrf.mxu0  ;;  %18313 = vmatmul.mubr.msk.f32.vlgmr.msra.gmra.mxu0 %vm4166_vm1, %v24076_v21  ;;  %v17891_v57 = vpop.f32.mrf.mxu1  ;;  %18202 = vmatmul.mubr.msk.f32.gmra.mxu1 %vm4166_vm1, %v24333_v2 }
 0x86b   : > { %26517 = vst [vmem:[#allocation28_spill] sm:$0xff] %v24335_v54  ;;  %18315 = vmatprep.mubr.msk.f32.mxu0 %vm4166_vm1, %v24085_v63  ;;  %v9153_v12 = vadd.f32 %v17891_v57, %v24052_v1  ;;  %18260 = vmatprep.mubr.msk.f32.mxu1 %vm4166_vm1, %v12003_v8  ;;  %v24348_v30 = vadd.f32 %v9492_v48, %v9150_v14  ;;  %v24357_v1 = vld [vmem:[#allocation3 + $0x31] sm:$0xff]  ;;  %v24373_v8 = vld [vmem:[#allocation3 + $0x39] sm:$0xff] }
 0x86c   : > { %v10128_v51 = vpop.f32.mrf.mxu0  ;;  %v9113_v21 = vpop.f32.mrf.mxu1  ;;  %18413 = vmatpush3.msra.mxu0 %v24065_v42  ;;  %v15447_v48 = vld [vmem:[%s25742_s13 + $0x60] sm:$0xff] }
 0x86d   : > { %v9152_v45 = vadd.f32 %v9113_v21, %v24072_v58  ;;  %18414 = vmatprep.subr.mxu0 %v15481_v41  ;;  %v24352_v10 = vadd.f32 %v17943_v19, %v9153_v12 }
 0x86e   : > { %v18005_v54 = vpop.f32.mrf.mxu0  ;;  %18316 = vmatmul.mubr.msk.f32.gmra.mxu0 %vm4166_vm1, %v24100_v53  ;;  %v17950_v63 = vpop.f32.mrf.mxu1  ;;  %18261 = vmatmul.mubr.msk.f32.vlgmr.msra.gmra.mxu1 %vm4166_vm1, %v12004_v25 }
 0x86f   : > { %18318 = vmatprep.mubr.msk.f32.mxu0 %vm4166_vm1, %v24109_v27  ;;  %v9900_v42 = vadd.f32 %v17950_v63, %v24078_v22  ;;  %18263 = vmatprep.mubr.msk.f32.mxu1 %vm4166_vm1, %v24357_v1  ;;  %v24367_v58 = vadd.f32 %v9502_v6, %v9152_v45  ;;  %v24379_v6 = vld [vmem:[#allocation3 + $0x49] sm:$0xff]  ;;  %v24396_v45 = vld [vmem:[#allocation3 + $0x51] sm:$0xff] }
 0x870   : > { %v10138_v53 = vpop.f32.mrf.mxu0  ;;  %v9740_v19 = vpop.f32.mrf.mxu1  ;;  %18415 = vmatpush3.msra.mxu0 %v15481_v41  ;;  %18361 = vmatpush3.msra.mxu1 %v24097_v47  ;;  %v24384_v47 = vld [vmem:[%s25742_s13 + $0x88] sm:$0xff] }
 0x871   : > { %v24370_v14 = vadd.f32 %v18002_v52, %v9900_v42  ;;  %v9899_v57 = vadd.f32 %v9740_v19, %v24092_v11  ;;  %18362 = vmatprep.subr.mxu1 %v15447_v48 }
 0x872   : > { %v18008_v27 = vpop.f32.mrf.mxu0  ;;  %18319 = vmatmul.mubr.msk.f32.gmra.mxu0 %vm4166_vm1, %v24119_v50  ;;  %v17953_v22 = vpop.f32.mrf.mxu1  ;;  %18264 = vmatmul.mubr.msk.f32.gmra.mxu1 %vm4166_vm1, %v24373_v8 }
 0x873   : > { %v24386_v52 = vadd.f32 %v10128_v51, %v9899_v57  ;;  %18321 = vmatprep.mubr.msk.f32.mxu0 %vm4166_vm1, %v24127_v40  ;;  %v9902_v11 = vadd.f32 %v17953_v22, %v24102_v43  ;;  %18266 = vmatprep.mubr.msk.f32.mxu1 %vm4166_vm1, %v24379_v6  ;;  %v24403_v43 = vld [vmem:[#allocation3 + $0x61] sm:$0xff] }
 0x874   : > { %v10148_v50 = vpop.f32.mrf.mxu0  ;;  %v9750_v41 = vpop.f32.mrf.mxu1  ;;  %18363 = vmatpush3.msra.mxu1 %v15447_v48  ;;  %v24413_v48 = vld [vmem:[#allocation3 + $0x69] sm:$0xff] }
 0x875   : > { %v24393_v12 = vadd.f32 %v18005_v54, %v9902_v11  ;;  %v9901_v21 = vadd.f32 %v9750_v41, %v24116_v26  ;;  %18464 = vmatprep.subr.mxu1 %v24384_v47  ;;  %v24433_v11 = vld [vmem:[#allocation3 + $0x81] sm:$0xff] }
 0x876   : > { %v18011_v51 = vpop.f32.mrf.mxu0  ;;  %18322 = vmatmul.mubr.msk.f32.gmra.mxu0 %vm4166_vm1, %v24137_v49  ;;  %v17956_v40 = vpop.f32.mrf.mxu1  ;;  %18267 = vmatmul.mubr.msk.f32.gmra.mxu1 %vm4166_vm1, %v24396_v45 }
 0x877   : > { %v24405_v25 = vadd.f32 %v10138_v53, %v9901_v21  ;;  %18324 = vmatprep.mubr.msk.f32.mxu0 %vm4166_vm1, %v24145_v24  ;;  %18269 = vmatprep.mubr.msk.f32.mxu1 %vm4166_vm1, %v24403_v43  ;;  %v9904_v26 = vadd.f32 %v17956_v40, %v24121_v56  ;;  %v24421_v24 = vld [vmem:[#allocation3 + $0x79] sm:$0xff]  ;;  %v24444_v21 = vld [vmem:[#allocation3 + $0x91] sm:$0xff] }
 0x878   : > { %v10158_v54 = vpop.f32.mrf.mxu0  ;;  %v9760_v63 = vpop.f32.mrf.mxu1 }
 0x879   : > { %v9903_v49 = vadd.f32 %v9760_v63, %v24134_v5  ;;  %v24415_v42 = vadd.f32 %v18008_v27, %v9904_v26 }
 0x87a   : > { %v18014_v19 = vpop.f32.mrf.mxu0  ;;  %18325 = vmatmul.mubr.msk.f32.gmra.mxu0 %vm4166_vm1, %v24155_v61  ;;  %v17959_v53 = vpop.f32.mrf.mxu1  ;;  %18270 = vmatmul.mubr.msk.f32.gmra.mxu1 %vm4166_vm1, %v24413_v48 }
 0x87b   : > { %v24423_v57 = vadd.f32 %v10148_v50, %v9903_v49  ;;  %18327 = vmatprep.mubr.msk.f32.mxu0 %vm4166_vm1, %v24163_v13  ;;  %v9906_v56 = vadd.f32 %v17959_v53, %v24139_v62  ;;  %18272 = vmatprep.mubr.msk.f32.mxu1 %vm4166_vm1, %v24421_v24 }
 0x87c   : > { %v10168_v5 = vpop.f32.mrf.mxu0  ;;  %v9770_v27 = vpop.f32.mrf.mxu1 }
 0x87d   : > { %v24430_v22 = vadd.f32 %v18011_v51, %v9906_v56  ;;  %v9905_v61 = vadd.f32 %v9770_v27, %v24152_v23  ;;  %v24469_v56 = vld [vmem:[#allocation3 + $0xb1] sm:$0xff] }
 0x87e   : > { %v18017_v41 = vpop.f32.mrf.mxu0  ;;  %18328 = vmatmul.mubr.msk.f32.gmra.mxu0 %vm4166_vm1, %v24173_v31  ;;  %v17962_v50 = vpop.f32.mrf.mxu1  ;;  %18273 = vmatmul.mubr.msk.f32.gmra.mxu1 %vm4166_vm1, %v24433_v11  ;;  %v24450_v31 = vld [vmem:[#allocation3 + $0x99] sm:$0xff] }
 0x87f   : > { %v24439_v62 = vadd.f32 %v10158_v54, %v9905_v61  ;;  %18330 = vmatprep.mubr.msk.f32.mxu0 %vm4166_vm1, %v24181_v34  ;;  %v9908_v13 = vadd.f32 %v17962_v50, %v24157_v0  ;;  %18275 = vmatprep.mubr.msk.f32.mxu1 %vm4166_vm1, %v24444_v21  ;;  %v24457_v0 = vld [vmem:[#allocation3 + $0xa9] sm:$0xff] }
 0x880   : > { %v10178_v23 = vpop.f32.mrf.mxu0  ;;  %v9780_v51 = vpop.f32.mrf.mxu1 }
 0x881   : > { %v24448_v40 = vadd.f32 %v18014_v19, %v9908_v13  ;;  %v9907_v26 = vadd.f32 %v9780_v51, %v24170_v60  ;;  %v24487_v13 = vld [vmem:[#allocation3 + $0xc9] sm:$0xff] }
 0x882   : > { %v18020_v54 = vpop.f32.mrf.mxu0  ;;  %18331 = vmatmul.mubr.msk.f32.gmra.mxu0 %vm4166_vm1, %v24191_v36  ;;  %v17965_v34 = vpop.f32.mrf.mxu1  ;;  %18276 = vmatmul.mubr.msk.f32.gmra.mxu1 %vm4166_vm1, %v24450_v31 }
 0x883   : > { %18333 = vmatprep.mubr.msk.f32.mxu0 %vm4166_vm1, %v24199_v20  ;;  %v9910_v63 = vadd.f32 %v17965_v34, %v24175_v15  ;;  %18278 = vmatprep.mubr.msk.f32.mxu1 %vm4166_vm1, %v24457_v0  ;;  %v24464_v49 = vadd.f32 %v10168_v5, %v9907_v26  ;;  %v24475_v15 = vld [vmem:[#allocation3 + $0xc1] sm:$0xff] }
 0x884   : > { %v10188_v60 = vpop.f32.mrf.mxu0  ;;  %v9790_v19 = vpop.f32.mrf.mxu1 }
 0x885   : > { %v24466_v53 = vadd.f32 %v18017_v41, %v9910_v63  ;;  %v9909_v36 = vadd.f32 %v9790_v19, %v24188_v7  ;;  %v26520_v63 = vld [vmem:[#allocation14_spill] sm:$0xff] }
 0x886   : > { %v18023_v27 = vpop.f32.mrf.mxu0  ;;  %18334 = vmatmul.mubr.msk.f32.gmra.mxu0 %vm4166_vm1, %v24209_v4  ;;  %v17968_v20 = vpop.f32.mrf.mxu1  ;;  %18279 = vmatmul.mubr.msk.f32.gmra.mxu1 %vm4166_vm1, %v24469_v56  ;;  %v24503_v19 = vld [vmem:[#allocation3 + $0xe1] sm:$0xff] }
 0x887   : > { %v24477_v5 = vadd.f32 %v10178_v23, %v9909_v36  ;;  %18336 = vmatprep.mubr.msk.f32.mxu0 %vm4166_vm1, %v24217_v35  ;;  %v9912_v61 = vadd.f32 %v17968_v20, %v24193_v3  ;;  %18281 = vmatprep.mubr.msk.f32.mxu1 %vm4166_vm1, %v24475_v15  ;;  %v24493_v3 = vld [vmem:[#allocation3 + $0xd9] sm:$0xff] }
 0x888   : > { %v10198_v7 = vpop.f32.mrf.mxu0  ;;  %v9800_v41 = vpop.f32.mrf.mxu1 }
 0x889   : > { %v24484_v50 = vadd.f32 %v18020_v54, %v9912_v61  ;;  %v9911_v4 = vadd.f32 %v9800_v41, %v24206_v46  ;;  %v26519_v46 = vld [vmem:[#allocation12_spill] sm:$0xff] }
 0x88a   : > { %v18026_v51 = vpop.f32.mrf.mxu0  ;;  %18337 = vmatmul.mubr.msk.f32.gmra.mxu0 %vm4166_vm1, %v24227_v17  ;;  %v17971_v23 = vpop.f32.mrf.mxu1  ;;  %18282 = vmatmul.mubr.msk.f32.gmra.mxu1 %vm4166_vm1, %v24487_v13  ;;  %v26523_v41 = vld [vmem:[#allocation16_spill] sm:$0xff] }
 0x88b   : > { %v24495_v35 = vadd.f32 %v10188_v60, %v9911_v4  ;;  %18339 = vmatprep.mubr.msk.f32.mxu0 %vm4166_vm1, %v24235_v29  ;;  %18284 = vmatprep.mubr.msk.f32.mxu1 %vm4166_vm1, %v24493_v3  ;;  %v9914_v26 = vadd.f32 %v17971_v23, %v26519_v46  ;;  %v24511_v29 = vld [vmem:[#allocation3 + $0xf1] sm:$0xff] }
 0x88c   : > { %v10208_v54 = vpop.f32.mrf.mxu0  ;;  %v9810_v34 = vpop.f32.mrf.mxu1 }
 0x88d   : > { %26518 = vst [vmem:[#allocation25_spill] sm:$0xff] %v24495_v35  ;;  %v9913_v17 = vadd.f32 %v9810_v34, %v26520_v63  ;;  %v24505_v36 = vadd.f32 %v18023_v27, %v9914_v26  ;;  %v24523_v34 = vld [vmem:[#allocation3 + $0xf9] sm:$0xff]  ;;  %v13561_v35 = vld [vmem:[#allocation3 + $0x6a] sm:$0xff] }
 0x88e   : > { %v18029_v20 = vpop.f32.mrf.mxu0  ;;  %18340 = vmatmul.mubr.msk.f32.gmra.mxu0 %vm4166_vm1, %v24245_v32  ;;  %v17974_v60 = vpop.f32.mrf.mxu1  ;;  %18285 = vmatmul.mubr.msk.f32.gmra.mxu1 %vm4166_vm1, %v24503_v19  ;;  %v26525_v32 = vld [vmem:[#allocation17_spill] sm:$0xff] }
 0x88f   : > { %26521 = vst [vmem:[#allocation26_spill] sm:$0xff] %v24505_v36  ;;  %v24513_v61 = vadd.f32 %v10198_v7, %v9913_v17  ;;  %18342 = vmatprep.mubr.msk.f32.mxu0 %vm4166_vm1, %v24253_v59  ;;  %v9916_v4 = vadd.f32 %v17974_v60, %v26523_v41  ;;  %18287 = vmatprep.mubr.msk.f32.mxu1 %vm4166_vm1, %v24511_v29  ;;  %v26527_v17 = vld [vmem:[#allocation18_spill] sm:$0xff] }
 0x890   : > { %v10218_v27 = vpop.f32.mrf.mxu0  ;;  %v9820_v23 = vpop.f32.mrf.mxu1  ;;  %v24534_v60 = vld [vmem:[#allocation3 + $0x109] sm:$0xff] }
 0x891   : > { %26522 = vst [vmem:[#allocation29_spill] sm:$0xff] %v24513_v61  ;;  %v24520_v46 = vadd.f32 %v18026_v51, %v9916_v4  ;;  %v9915_v26 = vadd.f32 %v9820_v23, %v26525_v32  ;;  %v26529_v32 = vld [vmem:[#allocation27_spill] sm:$0xff] }
 0x892   : > { %v18032_v63 = vpop.f32.mrf.mxu0  ;;  %18343 = vmatmul.mubr.msk.f32.gmra.mxu0 %vm4166_vm1, %v24263_v33  ;;  %v17977_v7 = vpop.f32.mrf.mxu1  ;;  %18288 = vmatmul.mubr.msk.f32.gmra.mxu1 %vm4166_vm1, %v24523_v34  ;;  %v24540_v33 = vld [vmem:[#allocation3 + $0x111] sm:$0xff]  ;;  %v24559_v61 = vld [vmem:[#allocation3 + $0x129] sm:$0xff] }
 0x893   : > { %26524 = vst [vmem:[#allocation43_spill] sm:$0xff] %v24520_v46  ;;  %v24529_v59 = vadd.f32 %v10208_v54, %v9915_v26  ;;  %18345 = vmatprep.mubr.msk.f32.mxu0 %vm4166_vm1, %v24271_v38  ;;  %v9918_v51 = vadd.f32 %v17977_v7, %v26527_v17  ;;  %18290 = vmatprep.mubr.msk.f32.mxu1 %vm4166_vm1, %v24534_v60  ;;  %v26530_v26 = vld [vmem:[#allocation21_spill] sm:$0xff]  ;;  %v26531_v17 = vld [vmem:[#allocation19_spill] sm:$0xff] }
 0x894   : > { %v10228_v41 = vpop.f32.mrf.mxu0  ;;  %v9830_v4 = vpop.f32.mrf.mxu1  ;;  %v24547_v7 = vld [vmem:[#allocation3 + $0x121] sm:$0xff] }
 0x895   : > { %26526 = vst [vmem:[#allocation30_spill] sm:$0xff] %v24529_v59  ;;  %v24538_v23 = vadd.f32 %v18029_v20, %v9918_v51  ;;  %v9917_v46 = vadd.f32 %v9830_v4, %v26529_v32 }
 0x896   : > { %v18035_v54 = vpop.f32.mrf.mxu0  ;;  %18346 = vmatmul.mubr.msk.f32.gmra.mxu0 %vm4166_vm1, %v26530_v26  ;;  %v17980_v38 = vpop.f32.mrf.mxu1  ;;  %18291 = vmatmul.mubr.msk.f32.gmra.mxu1 %vm4166_vm1, %v24540_v33  ;;  %v26534_v26 = vld [vmem:[#allocation20_spill] sm:$0xff] }
 0x897   : > { %26528 = vst [vmem:[#allocation78_spill] sm:$0xff] %v24538_v23  ;;  %18348 = vmatprep.mubr.msk.f32.mxu0 %vm4166_vm1, %v24289_v44  ;;  %v9920_v20 = vadd.f32 %v17980_v38, %v26531_v17  ;;  %18293 = vmatprep.mubr.msk.f32.mxu1 %vm4166_vm1, %v24547_v7  ;;  %v24554_v51 = vadd.f32 %v10218_v27, %v9917_v46  ;;  %v24565_v38 = vld [vmem:[#allocation3 + $0x139] sm:$0xff]  ;;  %v26536_v46 = vld [vmem:[#allocation23_spill] sm:$0xff] }
 0x898   : > { %v10238_v4 = vpop.f32.mrf.mxu0  ;;  %v9840_v32 = vpop.f32.mrf.mxu1 }
 0x899   : > { %26532 = vst [vmem:[#allocation31_spill] sm:$0xff] %v24554_v51  ;;  %v24556_v23 = vadd.f32 %v18032_v63, %v9920_v20  ;;  %v9919_v59 = vadd.f32 %v9840_v32, %v26534_v26 }
 0x89a   : > { %v18038_v36 = vpop.f32.mrf.mxu0  ;;  %18349 = vmatmul.mubr.msk.f32.gmra.mxu0 %vm4166_vm1, %v24299_v28  ;;  %v17983_v44 = vpop.f32.mrf.mxu1  ;;  %18294 = vmatmul.mubr.msk.f32.gmra.mxu1 %vm4166_vm1, %v24559_v61  ;;  %v26538_v28 = vld [vmem:[#allocation22_spill] sm:$0xff] }
 0x89b   : > { %26533 = vst [vmem:[#allocation46_spill] sm:$0xff] %v24556_v23  ;;  %v24567_v27 = vadd.f32 %v10228_v41, %v9919_v59  ;;  %18351 = vmatprep.mubr.msk.f32.mxu0 %vm4166_vm1, %v24307_v16  ;;  %v9922_v63 = vadd.f32 %v17983_v44, %v26536_v46  ;;  %18296 = vmatprep.mubr.msk.f32.mxu1 %vm4166_vm1, %v24565_v38  ;;  %v24577_v23 = vld [vmem:[#allocation3 + $0x141] sm:$0xff]  ;;  %v24583_v16 = vld [vmem:[#allocation3 + $0x151] sm:$0xff] }
 0x89c   : > { %v10248_v17 = vpop.f32.mrf.mxu0  ;;  %v9850_v20 = vpop.f32.mrf.mxu1 }
 0x89d   : > { %26535 = vst [vmem:[#allocation81_spill] sm:$0xff] %v24567_v27  ;;  %v24574_v32 = vadd.f32 %v18035_v54, %v9922_v63  ;;  %v9921_v26 = vadd.f32 %v9850_v20, %v26538_v28  ;;  %v26540_v54 = vld [vmem:[#allocation24_spill] sm:$0xff] }
 0x89e   : > { %v18041_v51 = vpop.f32.mrf.mxu0  ;;  %18352 = vmatmul.mubr.msk.f32.gmra.mxu0 %vm4166_vm1, %v24316_v18  ;;  %v17986_v59 = vpop.f32.mrf.mxu1  ;;  %18297 = vmatmul.mubr.msk.f32.gmra.mxu1 %vm4166_vm1, %v24577_v23  ;;  %v24593_v20 = vld [vmem:[#allocation3 + $0x159] sm:$0xff] }
 0x89f   : > { %26537 = vst [vmem:[#allocation79_spill] sm:$0xff] %v24574_v32  ;;  %v24585_v41 = vadd.f32 %v10238_v4, %v9921_v26  ;;  %18354 = vmatprep.mubr.msk.f32.mxu0 %vm4166_vm1, %v24323_v37  ;;  %18299 = vmatprep.mubr.msk.f32.mxu1 %vm4166_vm1, %v24583_v16  ;;  %v9924_v44 = vadd.f32 %v17986_v59, %v26540_v54  ;;  %v24599_v4 = vld [vmem:[#allocation3 + $0x182] sm:$0xff] }
 0x8a0   : > { %v10258_v46 = vpop.f32.mrf.mxu0  ;;  %v9860_v63 = vpop.f32.mrf.mxu1  ;;  %v24603_v26 = vld [vmem:[#allocation3 + $0x169] sm:$0xff] }
 0x8a1   : > { %26539 = vst [vmem:[#allocation45_spill] sm:$0xff] %v24585_v41  ;;  %v9923_v18 = vadd.f32 %v9860_v63, %v24313_v9  ;;  %v24595_v28 = vadd.f32 %v18038_v36, %v9924_v44  ;;  %v24615_v63 = vld [vmem:[#allocation3 + $0x18a] sm:$0xff] }
 0x8a2   : > { %v18044_v32 = vpop.f32.mrf.mxu0  ;;  %18355 = vmatmul.mubr.msk.f32.gmra.mxu0 %vm4166_vm1, %v24333_v2  ;;  %v17989_v37 = vpop.f32.mrf.mxu1  ;;  %18300 = vmatmul.mubr.msk.f32.gmra.mxu1 %vm4166_vm1, %v24593_v20 }
 0x8a3   : > { %26541 = vst [vmem:[#allocation32_spill] sm:$0xff] %v24595_v28  ;;  %v24605_v59 = vadd.f32 %v10248_v17, %v9923_v18  ;;  %18357 = vmatprep.mubr.msk.f32.mxu0 %vm4166_vm1, %v24599_v4  ;;  %v9926_v9 = vadd.f32 %v17989_v37, %v24318_v55  ;;  %18302 = vmatprep.mubr.msk.f32.mxu1 %vm4166_vm1, %v24603_v26  ;;  %v24617_v28 = vld [vmem:[#allocation3 + $0x171] sm:$0xff] }
 0x8a4   : > { %v10268_v36 = vpop.f32.mrf.mxu0  ;;  %v9870_v2 = vpop.f32.mrf.mxu1 }
 0x8a5   : > { %26542 = vst [vmem:[#allocation64_spill] sm:$0xff] %v24605_v59  ;;  %v24612_v54 = vadd.f32 %v18041_v51, %v9926_v9  ;;  %v9925_v44 = vadd.f32 %v9870_v2, %v24330_v39  ;;  %v26545_v51 = vld [vmem:[#allocation28_spill] sm:$0xff]  ;;  %v24628_v39 = vld [vmem:[#allocation3 + $0x181] sm:$0xff]  ;;  %v24634_v59 = vld [vmem:[#allocation3 + $0x189] sm:$0xff] }
 0x8a6   : > { %v18047_v17 = vpop.f32.mrf.mxu0  ;;  %18358 = vmatmul.mubr.msk.f32.gmra.mxu0 %vm4166_vm1, %v24615_v63  ;;  %v17992_v18 = vpop.f32.mrf.mxu1  ;;  %18303 = vmatmul.mubr.msk.f32.gmra.mxu1 %vm4166_vm1, %v24617_v28 }
 0x8a7   : > { %26543 = vst [vmem:[#allocation97_spill] sm:$0xff] %v24612_v54  ;;  %v24623_v55 = vadd.f32 %v10258_v46, %v9925_v44  ;;  %18416 = vmatprep.mubr.msk.f32.mxu0 %vm4166_vm1, %v24357_v1  ;;  %v9928_v37 = vadd.f32 %v17992_v18, %v26545_v51  ;;  %18305 = vmatprep.mubr.msk.f32.mxu1 %vm4166_vm1, %v24628_v39  ;;  %v12780_v44 = vld [vmem:[#allocation3 + $0x30] sm:$0xff] }
 0x8a8   : > { %v10278_v9 = vpop.f32.mrf.mxu0  ;;  %v9880_v2 = vpop.f32.mrf.mxu1 }
 0x8a9   : > { %26544 = vst [vmem:[#allocation47_spill] sm:$0xff] %v24623_v55  ;;  %v24632_v54 = vadd.f32 %v18044_v32, %v9928_v37  ;;  %v9927_v41 = vadd.f32 %v9880_v2, %v24348_v30  ;;  %v12781_v2 = vld [vmem:[#allocation3 + $0x38] sm:$0xff] }
 0x8aa   : > { %v18106_v46 = vpop.f32.mrf.mxu0  ;;  %18417 = vmatmul.mubr.msk.f32.vlgmr.msra.gmra.mxu0 %vm4166_vm1, %v24373_v8  ;;  %v17995_v1 = vpop.f32.mrf.mxu1  ;;  %18306 = vmatmul.mubr.msk.f32.gmra.mxu1 %vm4166_vm1, %v24634_v59 }
 0x8ab   : > { %26546 = vst [vmem:[#allocation50_spill] sm:$0xff] %v24632_v54  ;;  %18419 = vmatprep.mubr.msk.f32.mxu0 %vm4166_vm1, %v24379_v6  ;;  %v9930_v18 = vadd.f32 %v17995_v1, %v24352_v10  ;;  %18364 = vmatprep.mubr.msk.f32.mxu1 %vm4166_vm1, %v12780_v44  ;;  %v24645_v32 = vadd.f32 %v10268_v36, %v9927_v41  ;;  %v12782_v6 = vld [vmem:[#allocation3 + $0x48] sm:$0xff]  ;;  %v15515_v10 = vld [vmem:[%s25742_s13 + $0x80] sm:$0xff] }
 0x8ac   : > { %v11068_v51 = vpop.f32.mrf.mxu0  ;;  %v9890_v30 = vpop.f32.mrf.mxu1  ;;  %v12783_v1 = vld [vmem:[#allocation3 + $0x50] sm:$0xff] }
 0x8ad   : > { %26547 = vst [vmem:[#allocation98_spill] sm:$0xff] %v24645_v32  ;;  %v24647_v37 = vadd.f32 %v18047_v17, %v9930_v18  ;;  %v9929_v8 = vadd.f32 %v9890_v30, %v24367_v58 }
 0x8ae   : > { %v18109_v54 = vpop.f32.mrf.mxu0  ;;  %18420 = vmatmul.mubr.msk.f32.gmra.mxu0 %vm4166_vm1, %v24396_v45  ;;  %v18054_v55 = vpop.f32.mrf.mxu1  ;;  %18365 = vmatmul.mubr.msk.f32.vlgmr.msra.gmra.mxu1 %vm4166_vm1, %v12781_v2 }
 0x8af   : > { %26548 = vst [vmem:[#allocation49_spill] sm:$0xff] %v24647_v37  ;;  %v24656_v41 = vadd.f32 %v10278_v9, %v9929_v8  ;;  %18422 = vmatprep.mubr.msk.f32.mxu0 %vm4166_vm1, %v24403_v43  ;;  %v24660_v36 = vadd.f32 %v18106_v46, %v18054_v55  ;;  %18367 = vmatprep.mubr.msk.f32.mxu1 %vm4166_vm1, %v12782_v6  ;;  %v12784_v43 = vld [vmem:[#allocation3 + $0x60] sm:$0xff]  ;;  %v12786_v8 = vld [vmem:[#allocation3 + $0x78] sm:$0xff] }
 0x8b0   : > { %v11078_v58 = vpop.f32.mrf.mxu0  ;;  %v10747_v17 = vpop.f32.mrf.mxu1  ;;  %18465 = vmatpush3.msra.mxu1 %v24384_v47 }
 0x8b1   : > { %26549 = vst [vmem:[#allocation99_spill] sm:$0xff] %v24656_v41  ;;  %v24664_v45 = vadd.f32 %v11068_v51, %v10747_v17  ;;  %18466 = vmatprep.subr.mxu1 %v15515_v10  ;;  %v12785_v51 = vld [vmem:[#allocation3 + $0x68] sm:$0xff]  ;;  %v12788_v17 = vld [vmem:[#allocation3 + $0x90] sm:$0xff] }
 0x8b2   : > { %v18112_v44 = vpop.f32.mrf.mxu0  ;;  %18423 = vmatmul.mubr.msk.f32.gmra.mxu0 %vm4166_vm1, %v24413_v48  ;;  %v18057_v9 = vpop.f32.mrf.mxu1  ;;  %18368 = vmatmul.mubr.msk.f32.gmra.mxu1 %vm4166_vm1, %v12783_v1 }
 0x8b3   : > { %18425 = vmatprep.mubr.msk.f32.mxu0 %vm4166_vm1, %v24421_v24  ;;  %v24671_v55 = vadd.f32 %v18109_v54, %v18057_v9  ;;  %18370 = vmatprep.mubr.msk.f32.mxu1 %vm4166_vm1, %v12784_v43  ;;  %v12789_v43 = vld [vmem:[#allocation3 + $0x98] sm:$0xff] }
 0x8b4   : > { %v11088_v47 = vpop.f32.mrf.mxu0  ;;  %v10757_v46 = vpop.f32.mrf.mxu1  ;;  %18467 = vmatpush3.msra.mxu1 %v15515_v10  ;;  %v12787_v10 = vld [vmem:[#allocation3 + $0x80] sm:$0xff] }
 0x8b5   : > { %v24674_v18 = vadd.f32 %v11078_v58, %v10757_v46  ;;  %v12790_v46 = vld [vmem:[#allocation3 + $0xa8] sm:$0xff] }
 0x8b6   : > { %v18115_v30 = vpop.f32.mrf.mxu0  ;;  %18426 = vmatmul.mubr.msk.f32.gmra.mxu0 %vm4166_vm1, %v24433_v11  ;;  %v18060_v48 = vpop.f32.mrf.mxu1  ;;  %18371 = vmatmul.mubr.msk.f32.gmra.mxu1 %vm4166_vm1, %v12785_v51 }
 0x8b7   : > { %18428 = vmatprep.mubr.msk.f32.mxu0 %vm4166_vm1, %v24444_v21  ;;  %v24681_v24 = vadd.f32 %v18112_v44, %v18060_v48  ;;  %18373 = vmatprep.mubr.msk.f32.mxu1 %vm4166_vm1, %v12786_v8  ;;  %v12791_v8 = vld [vmem:[#allocation3 + $0xb0] sm:$0xff] }
 0x8b8   : > { %v11098_v54 = vpop.f32.mrf.mxu0  ;;  %v10767_v2 = vpop.f32.mrf.mxu1 }
 0x8b9   : > { %v24684_v6 = vadd.f32 %v11088_v47, %v10767_v2  ;;  %v12792_v2 = vld [vmem:[#allocation3 + $0xc0] sm:$0xff] }
 0x8ba   : > { %v18118_v58 = vpop.f32.mrf.mxu0  ;;  %18429 = vmatmul.mubr.msk.f32.gmra.mxu0 %vm4166_vm1, %v24450_v31  ;;  %v18063_v11 = vpop.f32.mrf.mxu1  ;;  %18374 = vmatmul.mubr.msk.f32.gmra.mxu1 %vm4166_vm1, %v12787_v10 }
 0x8bb   : > { %18431 = vmatprep.mubr.msk.f32.mxu0 %vm4166_vm1, %v24457_v0  ;;  %v24691_v21 = vadd.f32 %v18115_v30, %v18063_v11  ;;  %18376 = vmatprep.mubr.msk.f32.mxu1 %vm4166_vm1, %v12788_v17  ;;  %v12793_v17 = vld [vmem:[#allocation3 + $0xc8] sm:$0xff] }
 0x8bc   : > { %v11108_v1 = vpop.f32.mrf.mxu0  ;;  %v10777_v44 = vpop.f32.mrf.mxu1 }
 0x8bd   : > { %v24694_v9 = vadd.f32 %v11098_v54, %v10777_v44  ;;  %v12794_v44 = vld [vmem:[#allocation3 + $0xd8] sm:$0xff] }
 0x8be   : > { %v18121_v47 = vpop.f32.mrf.mxu0  ;;  %18432 = vmatmul.mubr.msk.f32.gmra.mxu0 %vm4166_vm1, %v24469_v56  ;;  %v18066_v31 = vpop.f32.mrf.mxu1  ;;  %18377 = vmatmul.mubr.msk.f32.gmra.mxu1 %vm4166_vm1, %v12789_v43 }
 0x8bf   : > { %18434 = vmatprep.mubr.msk.f32.mxu0 %vm4166_vm1, %v24475_v15  ;;  %v24701_v0 = vadd.f32 %v18118_v58, %v18066_v31  ;;  %18379 = vmatprep.mubr.msk.f32.mxu1 %vm4166_vm1, %v12790_v46  ;;  %v12795_v46 = vld [vmem:[#allocation3 + $0xe0] sm:$0xff] }
 0x8c0   : > { %v11118_v51 = vpop.f32.mrf.mxu0  ;;  %v10787_v30 = vpop.f32.mrf.mxu1 }
 0x8c1   : > { %v24704_v48 = vadd.f32 %v11108_v1, %v10787_v30  ;;  %v12796_v30 = vld [vmem:[#allocation3 + $0xf0] sm:$0xff] }
 0x8c2   : > { %v18124_v54 = vpop.f32.mrf.mxu0  ;;  %18435 = vmatmul.mubr.msk.f32.gmra.mxu0 %vm4166_vm1, %v24487_v13  ;;  %v18069_v56 = vpop.f32.mrf.mxu1  ;;  %18380 = vmatmul.mubr.msk.f32.gmra.mxu1 %vm4166_vm1, %v12791_v8 }
 0x8c3   : > { %18437 = vmatprep.mubr.msk.f32.mxu0 %vm4166_vm1, %v24493_v3  ;;  %v24711_v15 = vadd.f32 %v18121_v47, %v18069_v56  ;;  %18382 = vmatprep.mubr.msk.f32.mxu1 %vm4166_vm1, %v12792_v2  ;;  %v12797_v2 = vld [vmem:[#allocation3 + $0xf8] sm:$0xff] }
 0x8c4   : > { %v11128_v10 = vpop.f32.mrf.mxu0  ;;  %v10797_v58 = vpop.f32.mrf.mxu1 }
 0x8c5   : > { %v24714_v11 = vadd.f32 %v11118_v51, %v10797_v58  ;;  %v12798_v58 = vld [vmem:[#allocation3 + $0x108] sm:$0xff] }
 0x8c6   : > { %v18127_v1 = vpop.f32.mrf.mxu0  ;;  %18438 = vmatmul.mubr.msk.f32.gmra.mxu0 %vm4166_vm1, %v24503_v19  ;;  %v18072_v13 = vpop.f32.mrf.mxu1  ;;  %18383 = vmatmul.mubr.msk.f32.gmra.mxu1 %vm4166_vm1, %v12793_v17 }
 0x8c7   : > { %18440 = vmatprep.mubr.msk.f32.mxu0 %vm4166_vm1, %v24511_v29  ;;  %v24721_v3 = vadd.f32 %v18124_v54, %v18072_v13  ;;  %18385 = vmatprep.mubr.msk.f32.mxu1 %vm4166_vm1, %v12794_v44  ;;  %v12799_v44 = vld [vmem:[#allocation3 + $0x110] sm:$0xff] }
 0x8c8   : > { %v11138_v43 = vpop.f32.mrf.mxu0  ;;  %v10807_v47 = vpop.f32.mrf.mxu1 }
 0x8c9   : > { %v24724_v31 = vadd.f32 %v11128_v10, %v10807_v47  ;;  %v12800_v47 = vld [vmem:[#allocation3 + $0x120] sm:$0xff] }
 0x8ca   : > { %v18130_v51 = vpop.f32.mrf.mxu0  ;;  %18441 = vmatmul.mubr.msk.f32.gmra.mxu0 %vm4166_vm1, %v24523_v34  ;;  %v18075_v19 = vpop.f32.mrf.mxu1  ;;  %18386 = vmatmul.mubr.msk.f32.gmra.mxu1 %vm4166_vm1, %v12795_v46 }
 0x8cb   : > { %18443 = vmatprep.mubr.msk.f32.mxu0 %vm4166_vm1, %v24534_v60  ;;  %v24731_v29 = vadd.f32 %v18127_v1, %v18075_v19  ;;  %18388 = vmatprep.mubr.msk.f32.mxu1 %vm4166_vm1, %v12796_v30  ;;  %v12801_v30 = vld [vmem:[#allocation3 + $0x128] sm:$0xff] }
 0x8cc   : > { %v11148_v8 = vpop.f32.mrf.mxu0  ;;  %v10817_v54 = vpop.f32.mrf.mxu1 }
 0x8cd   : > { %v24734_v56 = vadd.f32 %v11138_v43, %v10817_v54  ;;  %v12802_v54 = vld [vmem:[#allocation3 + $0x138] sm:$0xff] }
 0x8ce   : > { %v18133_v10 = vpop.f32.mrf.mxu0  ;;  %18444 = vmatmul.mubr.msk.f32.gmra.mxu0 %vm4166_vm1, %v24540_v33  ;;  %v18078_v34 = vpop.f32.mrf.mxu1  ;;  %18389 = vmatmul.mubr.msk.f32.gmra.mxu1 %vm4166_vm1, %v12797_v2 }
 0x8cf   : > { %18446 = vmatprep.mubr.msk.f32.mxu0 %vm4166_vm1, %v24547_v7  ;;  %v24741_v60 = vadd.f32 %v18130_v51, %v18078_v34  ;;  %18391 = vmatprep.mubr.msk.f32.mxu1 %vm4166_vm1, %v12798_v58  ;;  %v12803_v58 = vld [vmem:[#allocation3 + $0x140] sm:$0xff] }
 0x8d0   : > { %v11158_v17 = vpop.f32.mrf.mxu0  ;;  %v10827_v1 = vpop.f32.mrf.mxu1 }
 0x8d1   : > { %v24744_v13 = vadd.f32 %v11148_v8, %v10827_v1  ;;  %v12804_v1 = vld [vmem:[#allocation3 + $0x150] sm:$0xff] }
 0x8d2   : > { %v18136_v43 = vpop.f32.mrf.mxu0  ;;  %18447 = vmatmul.mubr.msk.f32.gmra.mxu0 %vm4166_vm1, %v24559_v61  ;;  %v18081_v33 = vpop.f32.mrf.mxu1  ;;  %18392 = vmatmul.mubr.msk.f32.gmra.mxu1 %vm4166_vm1, %v12799_v44 }
 0x8d3   : > { %18449 = vmatprep.mubr.msk.f32.mxu0 %vm4166_vm1, %v24565_v38  ;;  %v24751_v7 = vadd.f32 %v18133_v10, %v18081_v33  ;;  %18394 = vmatprep.mubr.msk.f32.mxu1 %vm4166_vm1, %v12800_v47  ;;  %v12805_v47 = vld [vmem:[#allocation3 + $0x158] sm:$0xff] }
 0x8d4   : > { %v11168_v46 = vpop.f32.mrf.mxu0  ;;  %v10837_v51 = vpop.f32.mrf.mxu1 }
 0x8d5   : > { %v24754_v19 = vadd.f32 %v11158_v17, %v10837_v51  ;;  %v12806_v51 = vld [vmem:[#allocation3 + $0x168] sm:$0xff] }
 0x8d6   : > { %v18139_v8 = vpop.f32.mrf.mxu0  ;;  %18450 = vmatmul.mubr.msk.f32.gmra.mxu0 %vm4166_vm1, %v24577_v23  ;;  %v18084_v61 = vpop.f32.mrf.mxu1  ;;  %18395 = vmatmul.mubr.msk.f32.gmra.mxu1 %vm4166_vm1, %v12801_v30 }
 0x8d7   : > { %18452 = vmatprep.mubr.msk.f32.mxu0 %vm4166_vm1, %v24583_v16  ;;  %v24761_v38 = vadd.f32 %v18136_v43, %v18084_v61  ;;  %18397 = vmatprep.mubr.msk.f32.mxu1 %vm4166_vm1, %v12802_v54  ;;  %v13198_v61 = vld [vmem:[#allocation3 + $0x199] sm:$0xff] }
 0x8d8   : > { %v11178_v2 = vpop.f32.mrf.mxu0  ;;  %v10847_v10 = vpop.f32.mrf.mxu1 }
 0x8d9   : > { %v24764_v34 = vadd.f32 %v11168_v46, %v10847_v10 }
 0x8da   : > { %v18142_v17 = vpop.f32.mrf.mxu0  ;;  %18453 = vmatmul.mubr.msk.f32.gmra.mxu0 %vm4166_vm1, %v24593_v20  ;;  %v18087_v23 = vpop.f32.mrf.mxu1  ;;  %18398 = vmatmul.mubr.msk.f32.gmra.mxu1 %vm4166_vm1, %v12803_v58  ;;  %v12808_v58 = vld [vmem:[#allocation3 + $0x180] sm:$0xff] }
 0x8db   : > { %18455 = vmatprep.mubr.msk.f32.mxu0 %vm4166_vm1, %v24603_v26  ;;  %v24771_v16 = vadd.f32 %v18139_v8, %v18087_v23  ;;  %18400 = vmatprep.mubr.msk.f32.mxu1 %vm4166_vm1, %v12804_v1 }
 0x8dc   : > { %v11188_v44 = vpop.f32.mrf.mxu0  ;;  %v10857_v43 = vpop.f32.mrf.mxu1 }
 0x8dd   : > { %v24774_v33 = vadd.f32 %v11178_v2, %v10857_v43  ;;  %v12807_v2 = vld [vmem:[#allocation3 + $0x170] sm:$0xff] }
 0x8de   : > { %v18145_v46 = vpop.f32.mrf.mxu0  ;;  %18456 = vmatmul.mubr.msk.f32.gmra.mxu0 %vm4166_vm1, %v24617_v28  ;;  %v18090_v20 = vpop.f32.mrf.mxu1  ;;  %18401 = vmatmul.mubr.msk.f32.gmra.mxu1 %vm4166_vm1, %v12805_v47  ;;  %v12809_v47 = vld [vmem:[#allocation3 + $0x188] sm:$0xff] }
 0x8df   : > { %18458 = vmatprep.mubr.msk.f32.mxu0 %vm4166_vm1, %v24628_v39  ;;  %v24781_v26 = vadd.f32 %v18142_v17, %v18090_v20  ;;  %18403 = vmatprep.mubr.msk.f32.mxu1 %vm4166_vm1, %v12806_v51  ;;  %v13199_v39 = vld [vmem:[#allocation3 + $0x1a1] sm:$0xff] }
 0x8e0   : > { %v11198_v30 = vpop.f32.mrf.mxu0  ;;  %v10867_v8 = vpop.f32.mrf.mxu1 }
 0x8e1   : > { %v24784_v54 = vadd.f32 %v11188_v44, %v10867_v8  ;;  %v12810_v44 = vld [vmem:[#allocation3 + $0x198] sm:$0xff] }
 0x8e2   : > { %v18148_v10 = vpop.f32.mrf.mxu0  ;;  %18459 = vmatmul.mubr.msk.f32.gmra.mxu0 %vm4166_vm1, %v24634_v59  ;;  %v18093_v28 = vpop.f32.mrf.mxu1  ;;  %18404 = vmatmul.mubr.msk.f32.gmra.mxu1 %vm4166_vm1, %v12807_v2 }
 0x8e3   : > { %v24789_v23 = vadd.f32 %v18145_v46, %v18093_v28  ;;  %18406 = vmatprep.mubr.msk.f32.mxu1 %vm4166_vm1, %v12808_v58  ;;  %18461 = vmatprep.mubr.msk.f32.mxu0 %vm4166_vm1, %v13198_v61  ;;  %v12811_v46 = vld [vmem:[#allocation3 + $0x1a0] sm:$0xff] }
 0x8e4   : > { %v11208_v17 = vpop.f32.mrf.mxu0  ;;  %v10877_v1 = vpop.f32.mrf.mxu1 }
 0x8e5   : > { %v24793_v43 = vadd.f32 %v11198_v30, %v10877_v1  ;;  %v13556_v30 = vld [vmem:[#allocation3 + $0x32] sm:$0xff] }
 0x8e6   : > { %v18151_v20 = vpop.f32.mrf.mxu0  ;;  %v18096_v51 = vpop.f32.mrf.mxu1  ;;  %18407 = vmatmul.mubr.msk.f32.gmra.mxu1 %vm4166_vm1, %v12809_v47  ;;  %18462 = vmatmul.mubr.msk.f32.gmra.mxu0 %vm4166_vm1, %v13199_v39 }
 0x8e7   : > { %v24797_v59 = vadd.f32 %v18148_v10, %v18096_v51  ;;  %18409 = vmatprep.mubr.msk.f32.mxu1 %vm4166_vm1, %v12810_v44  ;;  %v13557_v51 = vld [vmem:[#allocation3 + $0x3a] sm:$0xff] }
 0x8e8   : > { %v11218_v8 = vpop.f32.mrf.mxu0  ;;  %v10887_v61 = vpop.f32.mrf.mxu1 }
 0x8e9   : > { %v24800_v2 = vadd.f32 %v11208_v17, %v10887_v61  ;;  %v13558_v17 = vld [vmem:[#allocation3 + $0x4a] sm:$0xff] }
 0x8ea   : > { %v18210_v28 = vpop.f32.mrf.mxu0  ;;  %v18099_v58 = vpop.f32.mrf.mxu1  ;;  %18410 = vmatmul.mubr.msk.f32.gmra.mxu1 %vm4166_vm1, %v12811_v46 }
 0x8eb   : > { %v24803_v1 = vadd.f32 %v18151_v20, %v18099_v58  ;;  %18468 = vmatprep.mubr.msk.f32.mxu1 %vm4166_vm1, %v13556_v30  ;;  %v13559_v58 = vld [vmem:[#allocation3 + $0x52] sm:$0xff] }
 0x8ec   : > { %v11812_v47 = vpop.f32.mrf.mxu0  ;;  %v10897_v39 = vpop.f32.mrf.mxu1 }
 0x8ed   : > { %v24806_v10 = vadd.f32 %v11218_v8, %v10897_v39  ;;  %v13560_v39 = vld [vmem:[#allocation3 + $0x62] sm:$0xff] }
 0x8ee   : > { %v18213_v44 = vpop.f32.mrf.mxu0  ;;  %v18158_v41 = vpop.f32.mrf.mxu1  ;;  %18469 = vmatmul.mubr.msk.f32.vlgmr.msra.gmra.mxu1 %vm4166_vm1, %v13557_v51 }
 0x8ef   : > { %v11584_v61 = vadd.f32 %v18158_v41, %v24660_v36  ;;  %18471 = vmatprep.mubr.msk.f32.mxu1 %vm4166_vm1, %v13558_v17 }
 0x8f0   : > { %v11822_v46 = vpop.f32.mrf.mxu0  ;;  %v11424_v37 = vpop.f32.mrf.mxu1 }
 0x8f1   : > { %v11583_v20 = vadd.f32 %v11424_v37, %v24664_v45  ;;  %v24812_v30 = vadd.f32 %v18210_v28, %v11584_v61  ;;  %v13562_v61 = vld [vmem:[#allocation3 + $0x7a] sm:$0xff] }
 0x8f2   : > { %v18216_v32 = vpop.f32.mrf.mxu0  ;;  %v18161_v8 = vpop.f32.mrf.mxu1  ;;  %18472 = vmatmul.mubr.msk.f32.gmra.mxu1 %vm4166_vm1, %v13559_v58 }
 0x8f3   : > { %v11586_v27 = vadd.f32 %v18161_v8, %v24671_v55  ;;  %18474 = vmatprep.mubr.msk.f32.mxu1 %vm4166_vm1, %v13560_v39  ;;  %v24817_v51 = vadd.f32 %v11812_v47, %v11583_v20  ;;  %v13563_v39 = vld [vmem:[#allocation3 + $0x82] sm:$0xff] }
 0x8f4   : > { %v11832_v41 = vpop.f32.mrf.mxu0  ;;  %v11434_v36 = vpop.f32.mrf.mxu1 }
 0x8f5   : > { %v11585_v17 = vadd.f32 %v11434_v36, %v24674_v18  ;;  %v24820_v37 = vadd.f32 %v18213_v44, %v11586_v27  ;;  %v13564_v36 = vld [vmem:[#allocation3 + $0x92] sm:$0xff] }
 0x8f6   : > { %v18219_v45 = vpop.f32.mrf.mxu0  ;;  %v18164_v28 = vpop.f32.mrf.mxu1  ;;  %18475 = vmatmul.mubr.msk.f32.gmra.mxu1 %vm4166_vm1, %v13561_v35 }
 0x8f7   : > { %v11588_v58 = vadd.f32 %v18164_v28, %v24681_v24  ;;  %18477 = vmatprep.mubr.msk.f32.mxu1 %vm4166_vm1, %v13562_v61  ;;  %v24825_v55 = vadd.f32 %v11822_v46, %v11585_v17  ;;  %v13565_v61 = vld [vmem:[#allocation3 + $0x9a] sm:$0xff] }
 0x8f8   : > { %v11842_v47 = vpop.f32.mrf.mxu0  ;;  %v11444_v20 = vpop.f32.mrf.mxu1 }
 0x8f9   : > { %v11587_v8 = vadd.f32 %v11444_v20, %v24684_v6  ;;  %v24828_v18 = vadd.f32 %v18216_v32, %v11588_v58  ;;  %v13566_v20 = vld [vmem:[#allocation3 + $0xaa] sm:$0xff] }
 0x8fa   : > { %v18222_v27 = vpop.f32.mrf.mxu0  ;;  %v18167_v44 = vpop.f32.mrf.mxu1  ;;  %18478 = vmatmul.mubr.msk.f32.gmra.mxu1 %vm4166_vm1, %v13563_v39 }
 0x8fb   : > { %v11590_v35 = vadd.f32 %v18167_v44, %v24691_v21  ;;  %18480 = vmatprep.mubr.msk.f32.mxu1 %vm4166_vm1, %v13564_v36  ;;  %v24833_v24 = vadd.f32 %v11832_v41, %v11587_v8  ;;  %v13567_v36 = vld [vmem:[#allocation3 + $0xb2] sm:$0xff] }
 0x8fc   : > { %v11852_v46 = vpop.f32.mrf.mxu0  ;;  %v11454_v17 = vpop.f32.mrf.mxu1 }
 0x8fd   : > { %v11589_v28 = vadd.f32 %v11454_v17, %v24694_v9  ;;  %v24836_v6 = vadd.f32 %v18219_v45, %v11590_v35  ;;  %v13568_v17 = vld [vmem:[#allocation3 + $0xc2] sm:$0xff] }
 0x8fe   : > { %v18225_v32 = vpop.f32.mrf.mxu0  ;;  %v18170_v58 = vpop.f32.mrf.mxu1  ;;  %18481 = vmatmul.mubr.msk.f32.gmra.mxu1 %vm4166_vm1, %v13565_v61 }
 0x8ff   : > { %v11592_v39 = vadd.f32 %v18170_v58, %v24701_v0  ;;  %18483 = vmatprep.mubr.msk.f32.mxu1 %vm4166_vm1, %v13566_v20  ;;  %v24841_v21 = vadd.f32 %v11842_v47, %v11589_v28  ;;  %v13569_v20 = vld [vmem:[#allocation3 + $0xca] sm:$0xff] }
 0x900   : > { %v11862_v41 = vpop.f32.mrf.mxu0  ;;  %v11464_v8 = vpop.f32.mrf.mxu1 }
 0x901   : > { %v11591_v44 = vadd.f32 %v11464_v8, %v24704_v48  ;;  %v24844_v9 = vadd.f32 %v18222_v27, %v11592_v39  ;;  %v13570_v8 = vld [vmem:[#allocation3 + $0xda] sm:$0xff] }
 0x902   : > { %v18228_v45 = vpop.f32.mrf.mxu0  ;;  %v18173_v35 = vpop.f32.mrf.mxu1  ;;  %18484 = vmatmul.mubr.msk.f32.gmra.mxu1 %vm4166_vm1, %v13567_v36 }
 0x903   : > { %v11594_v61 = vadd.f32 %v18173_v35, %v24711_v15  ;;  %18486 = vmatprep.mubr.msk.f32.mxu1 %vm4166_vm1, %v13568_v17  ;;  %v24849_v0 = vadd.f32 %v11852_v46, %v11591_v44  ;;  %v13571_v17 = vld [vmem:[#allocation3 + $0xe2] sm:$0xff] }
 0x904   : > { %v11872_v47 = vpop.f32.mrf.mxu0  ;;  %v11474_v28 = vpop.f32.mrf.mxu1 }
 0x905   : > { %v11593_v58 = vadd.f32 %v11474_v28, %v24714_v11  ;;  %v24852_v48 = vadd.f32 %v18225_v32, %v11594_v61  ;;  %v13572_v28 = vld [vmem:[#allocation3 + $0xf2] sm:$0xff] }
 0x906   : > { %v18231_v27 = vpop.f32.mrf.mxu0  ;;  %v18176_v39 = vpop.f32.mrf.mxu1  ;;  %18487 = vmatmul.mubr.msk.f32.gmra.mxu1 %vm4166_vm1, %v13569_v20 }
 0x907   : > { %v11596_v36 = vadd.f32 %v18176_v39, %v24721_v3  ;;  %18489 = vmatprep.mubr.msk.f32.mxu1 %vm4166_vm1, %v13570_v8  ;;  %v24857_v15 = vadd.f32 %v11862_v41, %v11593_v58  ;;  %v13573_v8 = vld [vmem:[#allocation3 + $0xfa] sm:$0xff] }
 0x908   : > { %v11882_v46 = vpop.f32.mrf.mxu0  ;;  %v11484_v44 = vpop.f32.mrf.mxu1 }
 0x909   : > { %v11595_v35 = vadd.f32 %v11484_v44, %v24724_v31  ;;  %v24860_v11 = vadd.f32 %v18228_v45, %v11596_v36  ;;  %v13574_v44 = vld [vmem:[#allocation3 + $0x10a] sm:$0xff] }
 0x90a   : > { %v18234_v32 = vpop.f32.mrf.mxu0  ;;  %v18179_v61 = vpop.f32.mrf.mxu1  ;;  %18490 = vmatmul.mubr.msk.f32.gmra.mxu1 %vm4166_vm1, %v13571_v17 }
 0x90b   : > { %v11598_v20 = vadd.f32 %v18179_v61, %v24731_v29  ;;  %18492 = vmatprep.mubr.msk.f32.mxu1 %vm4166_vm1, %v13572_v28  ;;  %v24865_v3 = vadd.f32 %v11872_v47, %v11595_v35  ;;  %v13575_v28 = vld [vmem:[#allocation3 + $0x112] sm:$0xff] }
 0x90c   : > { %v11892_v41 = vpop.f32.mrf.mxu0  ;;  %v11494_v58 = vpop.f32.mrf.mxu1 }
 0x90d   : > { %v11597_v39 = vadd.f32 %v11494_v58, %v24734_v56  ;;  %v24868_v31 = vadd.f32 %v18231_v27, %v11598_v20  ;;  %v13576_v58 = vld [vmem:[#allocation3 + $0x122] sm:$0xff] }
 0x90e   : > { %v18237_v45 = vpop.f32.mrf.mxu0  ;;  %v18182_v36 = vpop.f32.mrf.mxu1  ;;  %18493 = vmatmul.mubr.msk.f32.gmra.mxu1 %vm4166_vm1, %v13573_v8 }
 0x90f   : > { %v11600_v17 = vadd.f32 %v18182_v36, %v24741_v60  ;;  %18495 = vmatprep.mubr.msk.f32.mxu1 %vm4166_vm1, %v13574_v44  ;;  %v24873_v29 = vadd.f32 %v11882_v46, %v11597_v39  ;;  %v13577_v44 = vld [vmem:[#allocation3 + $0x12a] sm:$0xff] }
 0x910   : > { %v11902_v47 = vpop.f32.mrf.mxu0  ;;  %v11504_v35 = vpop.f32.mrf.mxu1 }
 0x911   : > { %v11599_v61 = vadd.f32 %v11504_v35, %v24744_v13  ;;  %v24876_v56 = vadd.f32 %v18234_v32, %v11600_v17  ;;  %v13578_v35 = vld [vmem:[#allocation3 + $0x13a] sm:$0xff] }
 0x912   : > { %v18240_v27 = vpop.f32.mrf.mxu0  ;;  %v18185_v20 = vpop.f32.mrf.mxu1  ;;  %18496 = vmatmul.mubr.msk.f32.gmra.mxu1 %vm4166_vm1, %v13575_v28 }
 0x913   : > { %v11602_v8 = vadd.f32 %v18185_v20, %v24751_v7  ;;  %18498 = vmatprep.mubr.msk.f32.mxu1 %vm4166_vm1, %v13576_v58  ;;  %v24881_v60 = vadd.f32 %v11892_v41, %v11599_v61  ;;  %v13579_v58 = vld [vmem:[#allocation3 + $0x142] sm:$0xff] }
 0x914   : > { %v11912_v46 = vpop.f32.mrf.mxu0  ;;  %v11514_v39 = vpop.f32.mrf.mxu1 }
 0x915   : > { %v11601_v36 = vadd.f32 %v11514_v39, %v24754_v19  ;;  %v24884_v13 = vadd.f32 %v18237_v45, %v11602_v8  ;;  %v13580_v39 = vld [vmem:[#allocation3 + $0x152] sm:$0xff] }
 0x916   : > { %v18243_v32 = vpop.f32.mrf.mxu0  ;;  %v18188_v17 = vpop.f32.mrf.mxu1  ;;  %18499 = vmatmul.mubr.msk.f32.gmra.mxu1 %vm4166_vm1, %v13577_v44 }
 0x917   : > { %v11604_v28 = vadd.f32 %v18188_v17, %v24761_v38  ;;  %18501 = vmatprep.mubr.msk.f32.mxu1 %vm4166_vm1, %v13578_v35  ;;  %v24889_v7 = vadd.f32 %v11902_v47, %v11601_v36  ;;  %v13581_v35 = vld [vmem:[#allocation3 + $0x15a] sm:$0xff] }
 0x918   : > { %v11922_v41 = vpop.f32.mrf.mxu0  ;;  %v11524_v61 = vpop.f32.mrf.mxu1 }
 0x919   : > { %v11603_v20 = vadd.f32 %v11524_v61, %v24764_v34  ;;  %v24892_v19 = vadd.f32 %v18240_v27, %v11604_v28  ;;  %v13582_v61 = vld [vmem:[#allocation3 + $0x16a] sm:$0xff] }
 0x91a   : > { %v18246_v45 = vpop.f32.mrf.mxu0  ;;  %v18191_v8 = vpop.f32.mrf.mxu1  ;;  %18502 = vmatmul.mubr.msk.f32.gmra.mxu1 %vm4166_vm1, %v13579_v58 }
 0x91b   : > { %v11606_v44 = vadd.f32 %v18191_v8, %v24771_v16  ;;  %18504 = vmatprep.mubr.msk.f32.mxu1 %vm4166_vm1, %v13580_v39  ;;  %v24897_v38 = vadd.f32 %v11912_v46, %v11603_v20  ;;  %v13583_v39 = vld [vmem:[#allocation3 + $0x172] sm:$0xff] }
 0x91c   : > { %v11932_v47 = vpop.f32.mrf.mxu0  ;;  %v11534_v36 = vpop.f32.mrf.mxu1 }
 0x91d   : > { %v11605_v17 = vadd.f32 %v11534_v36, %v24774_v33  ;;  %v24900_v34 = vadd.f32 %v18243_v32, %v11606_v44 }
 0x91e   : > { %v18249_v27 = vpop.f32.mrf.mxu0  ;;  %v18194_v28 = vpop.f32.mrf.mxu1  ;;  %18505 = vmatmul.mubr.msk.f32.gmra.mxu1 %vm4166_vm1, %v13581_v35  ;;  %v13586_v35 = vld [vmem:[#allocation3 + $0x19a] sm:$0xff] }
 0x91f   : > { %v11608_v58 = vadd.f32 %v18194_v28, %v24781_v26  ;;  %18507 = vmatprep.mubr.msk.f32.mxu1 %vm4166_vm1, %v13582_v61  ;;  %v24905_v16 = vadd.f32 %v11922_v41, %v11605_v17 }
 0x920   : > { %v11942_v46 = vpop.f32.mrf.mxu0  ;;  %v11544_v20 = vpop.f32.mrf.mxu1 }
 0x921   : > { %v11607_v8 = vadd.f32 %v11544_v20, %v24784_v54  ;;  %v24908_v33 = vadd.f32 %v18246_v45, %v11608_v58 }
 0x922   : > { %v18252_v32 = vpop.f32.mrf.mxu0  ;;  %v18197_v44 = vpop.f32.mrf.mxu1  ;;  %18508 = vmatmul.mubr.msk.f32.gmra.mxu1 %vm4166_vm1, %v13583_v39 }
 0x923   : > { %v11610_v36 = vadd.f32 %v18197_v44, %v24789_v23  ;;  %18510 = vmatprep.mubr.msk.f32.mxu1 %vm4166_vm1, %v24599_v4  ;;  %v24914_v26 = vadd.f32 %v11932_v47, %v11607_v8  ;;  %v13587_v23 = vld [vmem:[#allocation3 + $0x1a2] sm:$0xff] }
 0x924   : > { %v11952_v41 = vpop.f32.mrf.mxu0  ;;  %v11554_v17 = vpop.f32.mrf.mxu1 }
 0x925   : > { %v11609_v28 = vadd.f32 %v11554_v17, %v24793_v43  ;;  %v24917_v54 = vadd.f32 %v18249_v27, %v11610_v36 }
 0x926   : > { %v18255_v45 = vpop.f32.mrf.mxu0  ;;  %v18200_v61 = vpop.f32.mrf.mxu1  ;;  %18511 = vmatmul.mubr.msk.f32.gmra.mxu1 %vm4166_vm1, %v24615_v63 }
 0x927   : > { %v11612_v58 = vadd.f32 %v18200_v61, %v24797_v59  ;;  %18513 = vmatprep.mubr.msk.f32.mxu1 %vm4166_vm1, %v13586_v35  ;;  %v24923_v4 = vadd.f32 %v11942_v46, %v11609_v28 }
 0x928   : > { %v11962_v47 = vpop.f32.mrf.mxu0  ;;  %v11564_v20 = vpop.f32.mrf.mxu1 }
 0x929   : > { %v11611_v8 = vadd.f32 %v11564_v20, %v24800_v2  ;;  %v24926_v39 = vadd.f32 %v18252_v32, %v11612_v58 }
 0x92a   : > { %v24928_v43 = vpop.f32.mrf.mxu0  ;;  %v18203_v27 = vpop.f32.mrf.mxu1  ;;  %18514 = vmatmul.mubr.msk.f32.gmra.mxu1 %vm4166_vm1, %v13587_v23 }
 0x92b   : > { %v11614_v63 = vadd.f32 %v18203_v27, %v24803_v1  ;;  %v24932_v44 = vadd.f32 %v11952_v41, %v11611_v8 }
 0x92c   : > { %v24934_v59 = vpop.f32.mrf.mxu0  ;;  %v11574_v36 = vpop.f32.mrf.mxu1 }
 0x92d   : > { %v11613_v46 = vadd.f32 %v11574_v36, %v24806_v10  ;;  %v24937_v17 = vadd.f32 %v18255_v45, %v11614_v63 }
 0x92e   : > { %v24939_v35 = vpop.f32.mrf.mxu0  ;;  %v18262_v2 = vpop.f32.mrf.mxu1 }
 0x92f   : > { %v24942_v32 = vadd.f32 %v18262_v2, %v24812_v30  ;;  %v24944_v28 = vadd.f32 %v11962_v47, %v11613_v46 }
 0x930   : > { %v24946_v61 = vpop.f32.mrf.mxu0  ;;  %v12200_v1 = vpop.f32.mrf.mxu1 }
 0x931   : > { %v24949_v41 = vadd.f32 %v12200_v1, %v24817_v51 }
 0x932   : > { %v24951_v58 = vpop.f32.mrf.mxu0  ;;  %v18265_v23 = vpop.f32.mrf.mxu1 }
 0x933   : > { %v24954_v10 = vadd.f32 %v18265_v23, %v24820_v37 }
 0x934   : > { %v24956_v45 = vpop.f32.mrf.mxu0  ;;  %v12210_v20 = vpop.f32.mrf.mxu1 }
 0x935   : > { %v24959_v30 = vadd.f32 %v12210_v20, %v24825_v55 }
 0x936   : > { %v24961_v47 = vpop.f32.mrf.mxu0  ;;  %v18268_v8 = vpop.f32.mrf.mxu1 }
 0x937   : > { %v24964_v27 = vadd.f32 %v18268_v8, %v24828_v18 }
 0x938   : > { %v24966_v51 = vpop.f32.mrf.mxu0  ;;  %v12220_v63 = vpop.f32.mrf.mxu1 }
 0x939   : > { %v24969_v36 = vadd.f32 %v12220_v63, %v24833_v24 }
 0x93a   : > { %v24971_v37 = vpop.f32.mrf.mxu0  ;;  %v18271_v46 = vpop.f32.mrf.mxu1 }
 0x93b   : > { %26550 = vst [vmem:[#allocation87_spill] sm:$0xff] %v24971_v37  ;;  %v24974_v2 = vadd.f32 %v18271_v46, %v24836_v6 }
 0x93c   : > { %v24976_v55 = vpop.f32.mrf.mxu0  ;;  %v12230_v1 = vpop.f32.mrf.mxu1 }
 0x93d   : > { %26551 = vst [vmem:[#allocation67_spill] sm:$0xff] %v24976_v55  ;;  %v24979_v23 = vadd.f32 %v12230_v1, %v24841_v21 }
 0x93e   : > { %v24981_v18 = vpop.f32.mrf.mxu0  ;;  %v18274_v20 = vpop.f32.mrf.mxu1 }
 0x93f   : > { %26552 = vst [vmem:[#allocation84_spill] sm:$0xff] %v24981_v18  ;;  %v24984_v8 = vadd.f32 %v18274_v20, %v24844_v9 }
 0x940   : > { %v24986_v24 = vpop.f32.mrf.mxu0  ;;  %v12240_v63 = vpop.f32.mrf.mxu1 }
 0x941   : > { %26553 = vst [vmem:[#allocation100_spill] sm:$0xff] %v24986_v24  ;;  %v24989_v37 = vadd.f32 %v12240_v63, %v24849_v0 }
 0x942   : > { %v24991_v6 = vpop.f32.mrf.mxu0  ;;  %v18277_v46 = vpop.f32.mrf.mxu1 }
 0x943   : > { %26554 = vst [vmem:[#allocation80_spill] sm:$0xff] %v24991_v6  ;;  %v24994_v55 = vadd.f32 %v18277_v46, %v24852_v48 }
 0x944   : > { %v24996_v21 = vpop.f32.mrf.mxu0  ;;  %v12250_v1 = vpop.f32.mrf.mxu1 }
 0x945   : > { %26555 = vst [vmem:[#allocation70_spill] sm:$0xff] %v24996_v21  ;;  %v24999_v18 = vadd.f32 %v12250_v1, %v24857_v15 }
 0x946   : > { %v25001_v9 = vpop.f32.mrf.mxu0  ;;  %v18280_v20 = vpop.f32.mrf.mxu1 }
 0x947   : > { %26556 = vst [vmem:[#allocation33_spill] sm:$0xff] %v25001_v9  ;;  %v25004_v24 = vadd.f32 %v18280_v20, %v24860_v11 }
 0x948   : > { %v25006_v0 = vpop.f32.mrf.mxu0  ;;  %v12260_v63 = vpop.f32.mrf.mxu1 }
 0x949   : > { %26557 = vst [vmem:[#allocation53_spill] sm:$0xff] %v25004_v24  ;;  %26558 = vst [vmem:[#allocation48_spill] sm:$0xff] %v25006_v0  ;;  %v25009_v6 = vadd.f32 %v12260_v63, %v24865_v3 }
 0x94a   : > { %v25011_v48 = vpop.f32.mrf.mxu0  ;;  %v18283_v46 = vpop.f32.mrf.mxu1 }
 0x94b   : > { %26559 = vst [vmem:[#allocation66_spill] sm:$0xff] %v25009_v6  ;;  %26560 = vst [vmem:[#allocation34_spill] sm:$0xff] %v25011_v48  ;;  %v25014_v21 = vadd.f32 %v18283_v46, %v24868_v31 }
 0x94c   : > { %v25016_v15 = vpop.f32.mrf.mxu0  ;;  %v12270_v1 = vpop.f32.mrf.mxu1 }
 0x94d   : > { %26561 = vst [vmem:[#allocation102_spill] sm:$0xff] %v25014_v21  ;;  %26562 = vst [vmem:[#allocation82_spill] sm:$0xff] %v25016_v15  ;;  %v25019_v9 = vadd.f32 %v12270_v1, %v24873_v29 }
 0x94e   : > { %v25021_v11 = vpop.f32.mrf.mxu0  ;;  %v18286_v20 = vpop.f32.mrf.mxu1 }
 0x94f   : > { %26563 = vst [vmem:[#allocation56_spill] sm:$0xff] %v25019_v9  ;;  %26564 = vst [vmem:[#allocation93_spill] sm:$0xff] %v25021_v11  ;;  %v25024_v0 = vadd.f32 %v18286_v20, %v24876_v56 }
 0x950   : > { %v25026_v3 = vpop.f32.mrf.mxu0  ;;  %v12280_v63 = vpop.f32.mrf.mxu1 }
 0x951   : > { %26565 = vst [vmem:[#allocation59_spill] sm:$0xff] %v25024_v0  ;;  %26566 = vst [vmem:[#allocation36_spill] sm:$0xff] %v25026_v3  ;;  %v25029_v48 = vadd.f32 %v12280_v63, %v24881_v60 }
 0x952   : > { %v25031_v31 = vpop.f32.mrf.mxu0  ;;  %v18289_v46 = vpop.f32.mrf.mxu1 }
 0x953   : > { %26567 = vst [vmem:[#allocation69_spill] sm:$0xff] %v25029_v48  ;;  %26568 = vst [vmem:[#allocation54_spill] sm:$0xff] %v25031_v31  ;;  %v25034_v15 = vadd.f32 %v18289_v46, %v24884_v13 }
 0x954   : > { %v25036_v29 = vpop.f32.mrf.mxu0  ;;  %v12290_v1 = vpop.f32.mrf.mxu1 }
 0x955   : > { %26569 = vst [vmem:[#allocation103_spill] sm:$0xff] %v25034_v15  ;;  %26570 = vst [vmem:[#allocation37_spill] sm:$0xff] %v25036_v29  ;;  %v25039_v11 = vadd.f32 %v12290_v1, %v24889_v7 }
 0x956   : > { %v25041_v56 = vpop.f32.mrf.mxu0  ;;  %v18292_v20 = vpop.f32.mrf.mxu1 }
 0x957   : > { %26571 = vst [vmem:[#allocation62_spill] sm:$0xff] %v25039_v11  ;;  %26572 = vst [vmem:[#allocation39_spill] sm:$0xff] %v25041_v56  ;;  %v25044_v3 = vadd.f32 %v18292_v20, %v24892_v19 }
 0x958   : > { %v25046_v60 = vpop.f32.mrf.mxu0  ;;  %v12300_v63 = vpop.f32.mrf.mxu1 }
 0x959   : > { %26573 = vst [vmem:[#allocation73_spill] sm:$0xff] %v25044_v3  ;;  %26574 = vst [vmem:[#allocation101_spill] sm:$0xff] %v25046_v60  ;;  %v25049_v31 = vadd.f32 %v12300_v63, %v24897_v38 }
 0x95a   : > { %v25051_v13 = vpop.f32.mrf.mxu0  ;;  %v18295_v46 = vpop.f32.mrf.mxu1 }
 0x95b   : > { %26575 = vst [vmem:[#allocation105_spill] sm:$0xff] %v25049_v31  ;;  %26576 = vst [vmem:[#allocation107_spill] sm:$0xff] %v25051_v13  ;;  %v25054_v29 = vadd.f32 %v18295_v46, %v24900_v34 }
 0x95c   : > { %v25056_v7 = vpop.f32.mrf.mxu0  ;;  %v12310_v1 = vpop.f32.mrf.mxu1 }
 0x95d   : > { %26577 = vst [vmem:[#allocation72_spill] sm:$0xff] %v25054_v29  ;;  %26578 = vst [vmem:[#allocation40_spill] sm:$0xff] %v25056_v7  ;;  %v25059_v56 = vadd.f32 %v12310_v1, %v24905_v16 }
 0x95e   : > { %v25061_v19 = vpop.f32.mrf.mxu0  ;;  %v18298_v20 = vpop.f32.mrf.mxu1 }
 0x95f   : > { %26579 = vst [vmem:[#allocation65_spill] sm:$0xff] %v25059_v56  ;;  %26580 = vst [vmem:[#allocation90_spill] sm:$0xff] %v25061_v19  ;;  %v25064_v60 = vadd.f32 %v18298_v20, %v24908_v33 }
 0x960   : > { %v25066_v38 = vpop.f32.mrf.mxu0  ;;  %v12320_v63 = vpop.f32.mrf.mxu1 }
 0x961   : > { %26581 = vst [vmem:[#allocation106_spill] sm:$0xff] %v25064_v60  ;;  %26582 = vst [vmem:[#allocation35_spill] sm:$0xff] %v25066_v38  ;;  %v25069_v13 = vadd.f32 %v12320_v63, %v24914_v26 }
 0x962   : > { %v25071_v34 = vpop.f32.mrf.mxu0  ;;  %v18301_v46 = vpop.f32.mrf.mxu1 }
 0x963   : > { %26583 = vst [vmem:[#allocation76_spill] sm:$0xff] %v25069_v13  ;;  %26584 = vst [vmem:[#allocation83_spill] sm:$0xff] %v25071_v34  ;;  %v25074_v7 = vadd.f32 %v18301_v46, %v24917_v54 }
 0x964   : > { %v25076_v16 = vpop.f32.mrf.mxu0  ;;  %v12330_v1 = vpop.f32.mrf.mxu1 }
 0x965   : > { %26585 = vst [vmem:[#allocation68_spill] sm:$0xff] %v25074_v7  ;;  %26586 = vst [vmem:[#allocation77_spill] sm:$0xff] %v25076_v16  ;;  %v25079_v19 = vadd.f32 %v12330_v1, %v24923_v4 }
 0x966   : > { %v25081_v33 = vpop.f32.mrf.mxu0  ;;  %v18304_v20 = vpop.f32.mrf.mxu1 }
 0x967   : > { %26587 = vst [vmem:[#allocation108_spill] sm:$0xff] %v25079_v19  ;;  %26588 = vst [vmem:[#allocation52_spill] sm:$0xff] %v25081_v33  ;;  %v25084_v38 = vadd.f32 %v18304_v20, %v24926_v39 }
 0x968   : > { %v12340_v26 = vpop.f32.mrf.mxu1  ;;  %v25086_v63 = vpop.f32.mrf.mxu0 }
 0x969   : > { %26589 = vst [vmem:[#allocation71_spill] sm:$0xff] %v25084_v38  ;;  %26590 = vst [vmem:[#allocation51_spill] sm:$0xff] %v25086_v63  ;;  %v25089_v34 = vadd.f32 %v12340_v26, %v24932_v44 }
 0x96a   : > { %v18307_v54 = vpop.f32.mrf.mxu1  ;;  %v25094_v7 = vpop.f32.mrf.mxu0 }
 0x96b   : > { %26591 = vst [vmem:[#allocation75_spill] sm:$0xff] %v25089_v34  ;;  %v25092_v46 = vadd.f32 %v18307_v54, %v24937_v17 }
 0x96c   : > { %v12350_v16 = vpop.f32.mrf.mxu1  ;;  %v25103_v20 = vpop.f32.mrf.mxu0 }
 0x96d   : > { %26592 = vst [vmem:[#allocation85_spill] sm:$0xff] %v25092_v46  ;;  %v25097_v4 = vadd.f32 %v12350_v16, %v24944_v28 }
 0x96e   : > { %v25099_v1 = vpop.f32.mrf.mxu1  ;;  %v25109_v26 = vpop.f32.mrf.mxu0 }
 0x96f   : > { %26593 = vst [vmem:[#allocation96_spill] sm:$0xff] %v25097_v4 }
 0x970   : > { %v25101_v39 = vpop.f32.mrf.mxu1  ;;  %v25115_v33 = vpop.f32.mrf.mxu0 }
 0x972   : > { %v25105_v63 = vpop.f32.mrf.mxu1  ;;  %v25121_v4 = vpop.f32.mrf.mxu0 }
 0x974   : > { %v25107_v44 = vpop.f32.mrf.mxu1  ;;  %v25127_v38 = vpop.f32.mrf.mxu0 }
 0x976   : > { %v25111_v17 = vpop.f32.mrf.mxu1  ;;  %v25133_v60 = vpop.f32.mrf.mxu0 }
 0x978   : > { %v25113_v54 = vpop.f32.mrf.mxu1  ;;  %v25139_v31 = vpop.f32.mrf.mxu0 }
 0x97a   : > { %v25117_v28 = vpop.f32.mrf.mxu1  ;;  %v25145_v15 = vpop.f32.mrf.mxu0 }
 0x97b   : > { %26601 = vst [vmem:[#allocation58_spill] sm:$0xff] %v25145_v15 }
 0x97c   : > { %v25119_v16 = vpop.f32.mrf.mxu1  ;;  %v25151_v9 = vpop.f32.mrf.mxu0 }
 0x97d   : > { %26604 = vst [vmem:[#allocation41_spill] sm:$0xff] %v25151_v9 }
 0x97e   : > { %v25123_v46 = vpop.f32.mrf.mxu1 }
 0x980   : > { %v25125_v34 = vpop.f32.mrf.mxu1 }
 0x981   : > { %26594 = vst [vmem:[#allocation86_spill] sm:$0xff] %v25125_v34 }
 0x982   : > { %v25129_v19 = vpop.f32.mrf.mxu1 }
 0x983   : > { %26595 = vst [vmem:[#allocation55_spill] sm:$0xff] %v25129_v19 }
 0x984   : > { %v25131_v13 = vpop.f32.mrf.mxu1 }
 0x985   : > { %26596 = vst [vmem:[#allocation91_spill] sm:$0xff] %v25131_v13 }
 0x986   : > { %v25135_v56 = vpop.f32.mrf.mxu1 }
 0x987   : > { %26597 = vst [vmem:[#allocation38_spill] sm:$0xff] %v25135_v56 }
 0x988   : > { %v25137_v29 = vpop.f32.mrf.mxu1 }
 0x989   : > { %26598 = vst [vmem:[#allocation74_spill] sm:$0xff] %v25137_v29  ;;  %v25158_v29 = vld [vmem:[%s25740_s11] ss:$0 sm:$0xff] }
 0x98a   : > { %v25141_v3 = vpop.f32.mrf.mxu1  ;;  %v10329_v9 = vmul.f32 %v25158_v29, %v24393_v12  ;;  %v10330_v6 = vmul.f32 %v25158_v29, %v24423_v57  ;;  %v10333_v24 = vmul.f32 %v25158_v29, %v24430_v22  ;;  %v10334_v22 = vmul.f32 %v25158_v29, %v24464_v49 }
 0x98b   : > { %26599 = vst [vmem:[#allocation88_spill] sm:$0xff] %v25141_v3  ;;  %v25162_v3 = vpop.f32.mrf.mxu0 }
 0x98c   : > { %v25143_v11 = vpop.f32.mrf.mxu1  ;;  %26607 = vst [vmem:[#allocation61_spill] sm:$0xff] %v25162_v3 }
 0x98d   : > { %26600 = vst [vmem:[#allocation89_spill] sm:$0xff] %v25143_v11 }
 0x98e   : > { %v25147_v48 = vpop.f32.mrf.mxu1 }
 0x98f   : > { %26602 = vst [vmem:[#allocation57_spill] sm:$0xff] %v25147_v48  ;;  %v10327_v48 = vmul.f32 %v25158_v29, %v24370_v14  ;;  %v10331_v14 = vmul.f32 %v25158_v29, %v24415_v42 }
 0x990   : > { %v25149_v0 = vpop.f32.mrf.mxu1 }
 0x991   : > { %26603 = vst [vmem:[#allocation104_spill] sm:$0xff] %v25149_v0  ;;  %v25171_v0 = vld [vmem:[%s25741_s12] ss:$0 sm:$0xff] }
 0x992   : > { %v25153_v21 = vpop.f32.mrf.mxu1  ;;  %v25192_v12 = vadd.f32 %v25171_v0, %v10327_v48  ;;  %v25202_v42 = vadd.f32 %v25171_v0, %v10329_v9  ;;  %v25220_v9 = vadd.f32 %v25171_v0, %v10331_v14  ;;  %v25226_v49 = vadd.f32 %v25171_v0, %v10333_v24  ;;  %v26621_v14 = vld [vmem:[#allocation26_spill] sm:$0xff] }
 0x993   : > { %26605 = vst [vmem:[#allocation92_spill] sm:$0xff] %v25153_v21  ;;  %v10326_v21 = vmul.f32 %v25158_v29, %v24386_v52 }
 0x994   : > { %v25160_v56 = vpop.f32.mrf.mxu1  ;;  %26616 = vst [vmem:[#allocation15_spill] sm:$0xff] %v25226_v49  ;;  %v26633_v49 = vld [vmem:[#allocation78_spill] sm:$0xff] }
 0x995   : > { %26606 = vst [vmem:[#allocation60_spill] sm:$0xff] %v25160_v56  ;;  %v10328_v56 = vmul.f32 %v25158_v29, %v24405_v25  ;;  %v10332_v25 = vmul.f32 %v25158_v29, %v24439_v62  ;;  %v10337_v62 = vmul.f32 %v25158_v29, %v24466_v53 }
 0x996   : > { %v25164_v11 = vpop.f32.mrf.mxu1 }
 0x997   : > { %26608 = vst [vmem:[#allocation94_spill] sm:$0xff] %v25164_v11  ;;  %v25181_v11 = vpop.f32.mrf.mxu0  ;;  %v25205_v57 = vadd.f32 %v25171_v0, %v10328_v56  ;;  %v25223_v56 = vadd.f32 %v25171_v0, %v10330_v6  ;;  %v10341_v6 = vmul.f32 %v25158_v29, %v26621_v14  ;;  %v26626_v14 = vld [vmem:[#allocation29_spill] sm:$0xff] }
 0x998   : > { %v25179_v3 = vpop.f32.mrf.mxu1  ;;  %26610 = vst [vmem:[#allocation44_spill] sm:$0xff] %v25181_v11  ;;  %v25199_v11 = vadd.f32 %v25171_v0, %v10326_v21  ;;  %v10339_v21 = vmul.f32 %v25158_v29, %v24484_v50  ;;  %v25234_v50 = vadd.f32 %v25171_v0, %v10332_v25  ;;  %v25250_v25 = vadd.f32 %v25171_v0, %v10337_v62 }
 0x999   : > { %26609 = vst [vmem:[#allocation42_spill] sm:$0xff] %v25179_v3  ;;  %v10335_v3 = vmul.f32 %v25158_v29, %v24448_v40  ;;  %26612 = vst [vmem:[#allocation63_spill] sm:$0xff] %v25205_v57  ;;  %v10336_v40 = vmul.f32 %v25158_v29, %v24477_v5  ;;  %v10340_v15 = vmul.f32 %v25158_v29, %v26626_v14  ;;  %v26631_v14 = vld [vmem:[#allocation43_spill] sm:$0xff] }
 0x99a   : > { %v25189_v52 = vpop.f32.mrf.mxu1  ;;  %26615 = vst [vmem:[#allocation8_spill] sm:$0xff] %v25223_v56  ;;  %26619 = vst [vmem:[#allocation9_spill] sm:$0xff] %v25234_v50  ;;  %v25256_v5 = vadd.f32 %v25171_v0, %v10339_v21  ;;  %v25273_v34 = vadd.f32 %v25171_v0, %v10341_v6  ;;  %v26634_v56 = vld [vmem:[#allocation31_spill] sm:$0xff]  ;;  %v26637_v50 = vld [vmem:[#allocation81_spill] sm:$0xff] }
 0x99b   : > { %26611 = vst [vmem:[#allocation95_spill] sm:$0xff] %v25189_v52  ;;  %v25217_v52 = vpop.f32.mrf.mxu0  ;;  %26624 = vst [vmem:[#allocation16_spill] sm:$0xff] %v25250_v25  ;;  %v26640_v6 = vld [vmem:[#allocation45_spill] sm:$0xff] }
 0x99c   : > { %v25209_v48 = vpop.f32.mrf.mxu1  ;;  %26614 = vst [vmem:[#allocation13_spill] sm:$0xff] %v25217_v52  ;;  %v25237_v52 = vadd.f32 %v25171_v0, %v10335_v3  ;;  %v25253_v3 = vadd.f32 %v25171_v0, %v10336_v40  ;;  %26625 = vst [vmem:[#allocation17_spill] sm:$0xff] %v25256_v5  ;;  %v10348_v5 = vmul.f32 %v25158_v29, %v26640_v6  ;;  %v26643_v6 = vld [vmem:[#allocation64_spill] sm:$0xff] }
 0x99d   : > { %26613 = vst [vmem:[#allocation7_spill] sm:$0xff] %v25209_v48  ;;  %v26617_v48 = vld [vmem:[#allocation25_spill] sm:$0xff]  ;;  %v25260_v24 = vpop.f32.mrf.mxu0  ;;  %26630 = vst [vmem:[#allocation19_spill] sm:$0xff] %v25273_v34 }
 0x99e   : > { %v10338_v53 = vmul.f32 %v25158_v29, %v26617_v48  ;;  %v25230_v13 = vpop.f32.mrf.mxu1  ;;  %26620 = vst [vmem:[#allocation11_spill] sm:$0xff] %v25237_v52  ;;  %v25245_v48 = vadd.f32 %v25171_v0, %v10334_v22  ;;  %26627 = vst [vmem:[#allocation18_spill] sm:$0xff] %v25260_v24  ;;  %v10343_v24 = vmul.f32 %v25158_v29, %v26631_v14  ;;  %v26632_v22 = vld [vmem:[#allocation30_spill] sm:$0xff]  ;;  %v26644_v34 = vld [vmem:[#allocation97_spill] sm:$0xff] }
 0x99f   : > { %26618 = vst [vmem:[#allocation10_spill] sm:$0xff] %v25230_v13  ;;  %v25290_v14 = vadd.f32 %v25171_v0, %v10340_v15  ;;  %v25292_v19 = vpop.f32.mrf.mxu0 }
 0x9a0   : > { %26622 = vst [vmem:[#allocation12_spill] sm:$0xff] %v25245_v48  ;;  %v25247_v13 = vpop.f32.mrf.mxu1  ;;  %v25266_v62 = vadd.f32 %v25171_v0, %v10338_v53  ;;  %v10345_v53 = vmul.f32 %v25158_v29, %v26633_v49  ;;  %v26636_v48 = vld [vmem:[#allocation46_spill] sm:$0xff]  ;;  %v25305_v15 = vadd.f32 %v25171_v0, %v10343_v24 }
 0x9a1   : > { %26623 = vst [vmem:[#allocation14_spill] sm:$0xff] %v25247_v13  ;;  %v10342_v13 = vmul.f32 %v25158_v29, %v26632_v22  ;;  %v10347_v49 = vmul.f32 %v25158_v29, %v26636_v48  ;;  %v12748_v22 = vadd.f32 %v24928_v43, %v24942_v32  ;;  %v12747_v32 = vadd.f32 %v24934_v59, %v24949_v41 }
 0x9a2   : > { %26628 = vst [vmem:[#allocation27_spill] sm:$0xff] %v25266_v62  ;;  %v25268_v57 = vpop.f32.mrf.mxu1  ;;  %v10350_v62 = vmul.f32 %v25158_v29, %v26643_v6  ;;  %v25347_v59 = vadd.f32 %v25171_v0, %v10348_v5 }
 0x9a3   : > { %26629 = vst [vmem:[#allocation21_spill] sm:$0xff] %v25268_v57  ;;  %v10344_v57 = vmul.f32 %v25158_v29, %v26634_v56  ;;  %v10346_v56 = vmul.f32 %v25158_v29, %v26637_v50  ;;  %v25312_v48 = vadd.f32 %v25171_v0, %v10342_v13  ;;  %v25315_v50 = vadd.f32 %v25171_v0, %v10345_v53  ;;  %v25330_v13 = vpop.f32.mrf.mxu0 }
 0x9a4   : > { %v25284_v40 = vpop.f32.mrf.mxu1  ;;  %v13137_v43 = vadd.f32 %v25099_v1, %v12748_v22  ;;  %v13136_v41 = vadd.f32 %v25101_v39, %v12747_v32  ;;  %v12750_v22 = vadd.f32 %v24939_v35, %v24954_v10  ;;  %v25361_v1 = vadd.f32 %v25171_v0, %v10350_v62 }
 0x9a5   : > { %26635 = vst [vmem:[#allocation20_spill] sm:$0xff] %v25284_v40  ;;  %v26638_v40 = vld [vmem:[#allocation79_spill] sm:$0xff]  ;;  %v25336_v53 = vadd.f32 %v25171_v0, %v10346_v56  ;;  %v12749_v39 = vadd.f32 %v24946_v61, %v24959_v30  ;;  %v25366_v35 = vpop.f32.mrf.mxu0  ;;  %v12751_v32 = vadd.f32 %v24956_v45, %v24969_v36  ;;  %v12754_v36 = vadd.f32 %v24961_v47, %v24974_v2 }
 0x9a6   : > { %v10349_v21 = vmul.f32 %v25158_v29, %v26638_v40  ;;  %v25301_v25 = vpop.f32.mrf.mxu1  ;;  %v25318_v40 = vadd.f32 %v25171_v0, %v10344_v57  ;;  %v25333_v57 = vadd.f32 %v25171_v0, %v10347_v49  ;;  %v13139_v5 = vadd.f32 %v25105_v63, %v12750_v22  ;;  %v25378_v63 = vld [vmem:[%s25743_s14] ss:$0 sm:$0xff] }
 0x9a7   : > { %26639 = vst [vmem:[#allocation23_spill] sm:$0xff] %v25301_v25  ;;  %v26641_v25 = vld [vmem:[#allocation32_spill] sm:$0xff]  ;;  %v13525_v10 = vadd.f32 %v25094_v7, %v13137_v43  ;;  %v13138_v30 = vadd.f32 %v25107_v44, %v12749_v39  ;;  %v13524_v43 = vadd.f32 %v25103_v20, %v13136_v41  ;;  %v26646_v56 = vld [vmem:[#allocation47_spill] sm:$0xff]  ;;  %v25396_v41 = vpop.f32.mrf.mxu0  ;;  %v13140_v45 = vadd.f32 %v25113_v54, %v12751_v32 }
 0x9a8   : > { %v10351_v52 = vmul.f32 %v25158_v29, %v26641_v25  ;;  %v25322_v24 = vpop.f32.mrf.mxu1  ;;  %v25339_v25 = vadd.f32 %v25171_v0, %v10349_v21  ;;  %v25393_v61 = vld [vmem:[%s25744_s15] ss:$0 sm:$0xff]  ;;  %v13143_v54 = vadd.f32 %v25117_v28, %v12754_v36  ;;  %v12753_v47 = vadd.f32 %v24966_v51, %v24979_v23 }
 0x9a9   : > { %26642 = vst [vmem:[#allocation22_spill] sm:$0xff] %v25322_v24  ;;  %v10353_v24 = vmul.f32 %v25158_v29, %v26644_v34  ;;  %v25419_v32 = vpop.f32.mrf.mxu0  ;;  %v13528_v28 = vadd.f32 %v25127_v38, %v13140_v45  ;;  %v26651_v38 = vmax.f32 %v25199_v11, 0.0  ;;  %v26654_v11 = vmax.f32 %v25202_v42, 0.0  ;;  %v26658_v42 = vld [vmem:[#allocation63_spill] sm:$0xff] }
 0x9aa   : > { %v25343_v6 = vpop.f32.mrf.mxu1  ;;  %v25356_v34 = vadd.f32 %v25171_v0, %v10351_v52  ;;  %v12752_v52 = vadd.f32 %v24951_v58, %v24964_v27 }
 0x9ab   : > { %26645 = vst [vmem:[#allocation24_spill] sm:$0xff] %v25343_v6  ;;  %v25373_v21 = vadd.f32 %v25171_v0, %v10353_v24  ;;  %v10352_v24 = vmul.f32 %v25158_v29, %v26646_v56  ;;  %v13527_v56 = vadd.f32 %v25109_v26, %v13139_v5  ;;  %v26647_v5 = vld [vmem:[#allocation50_spill] sm:$0xff] }
 0x9ac   : > { %v25358_v6 = vpop.f32.mrf.mxu1  ;;  %v13141_v27 = vadd.f32 %v25111_v17, %v12752_v52  ;;  %v25414_v17 = vmul.f32 %v25158_v29, %v26647_v5 }
 0x9ad   : > { %v10424_v58 = vmax.f32 %v25373_v21, 0.0  ;;  %v25410_v26 = vadd.f32 %v25171_v0, %v10352_v24  ;;  %v13142_v24 = vadd.f32 %v25119_v16, %v12753_v47 }
 0x9ae   : > { %v18470_v62 = vpop.f32.mrf.mxu1  ;;  %v13529_v51 = vadd.f32 %v25121_v4, %v13141_v27  ;;  %v13531_v4 = vadd.f32 %v25133_v60, %v13143_v54  ;;  %v25441_v27 = vpop.f32.mrf.mxu0 }
 0x9af   : > { %v13913_v7 = vadd.f32 %v18470_v62, %v13525_v10 }
 0x9b0   : > { %v13753_v44 = vpop.f32.mrf.mxu1 }
 0x9b1   : > { %v13952_v39 = vmul.f32 %v25378_v63, %v13913_v7  ;;  %v13912_v10 = vadd.f32 %v13753_v44, %v13524_v43  ;;  %v13526_v7 = vadd.f32 %v25115_v33, %v13138_v30  ;;  %v26648_v44 = vld [vmem:[#allocation87_spill] sm:$0xff] }
 0x9b2   : > { %v18473_v62 = vpop.f32.mrf.mxu1 }
 0x9b3   : > { %v13991_v20 = vadd.f32 %v25393_v61, %v13952_v39  ;;  %v13951_v22 = vmul.f32 %v25378_v63, %v13912_v10  ;;  %v13915_v49 = vadd.f32 %v18473_v62, %v13527_v56  ;;  %v12756_v39 = vadd.f32 %v26648_v44, %v24984_v8  ;;  %v26650_v56 = vld [vmem:[#allocation67_spill] sm:$0xff] }
 0x9b4   : > { %v13763_v2 = vpop.f32.mrf.mxu1  ;;  %v12755_v36 = vadd.f32 %v26650_v56, %v24989_v37  ;;  %v26653_v37 = vld [vmem:[#allocation100_spill] sm:$0xff] }
 0x9b5   : > { %v14023_v52 = vmax.f32 %v13991_v20, 0.0  ;;  %v13990_v43 = vadd.f32 %v25393_v61, %v13951_v22  ;;  %v13954_v33 = vmul.f32 %v25378_v63, %v13915_v49  ;;  %v13914_v30 = vadd.f32 %v13763_v2, %v13526_v7 }
 0x9b6   : > { %v18476_v23 = vpop.f32.mrf.mxu1  ;;  %v26649_v22 = vmax.f32 %v25192_v12, 0.0  ;;  %v13145_v8 = vadd.f32 %v25123_v46, %v12756_v39  ;;  %v26652_v46 = vld [vmem:[#allocation84_spill] sm:$0xff] }
 0x9b7   : > { %v14022_v20 = vmax.f32 %v13990_v43, 0.0  ;;  %v13993_v16 = vadd.f32 %v25393_v61, %v13954_v33  ;;  %v13953_v10 = vmul.f32 %v25378_v63, %v13914_v30  ;;  %v13917_v62 = vadd.f32 %v18476_v23, %v13529_v51  ;;  %v26655_v51 = vld [vmem:[#allocation86_spill] sm:$0xff]  ;;  %v26656_v23 = vld [vmem:[#allocation55_spill] sm:$0xff] }
 0x9b8   : > { %v14055_v49 = vadd.f32 %v14023_v52, %v26649_v22  ;;  %v13773_v7 = vpop.f32.mrf.mxu1  ;;  %v12758_v2 = vadd.f32 %v26652_v46, %v24994_v55  ;;  %v12757_v52 = vadd.f32 %v26653_v37, %v24999_v18  ;;  %v13530_v43 = vadd.f32 %v25139_v31, %v13142_v24  ;;  %v25463_v31 = vpop.f32.mrf.mxu0 }
 0x9b9   : > { %v14054_v12 = vadd.f32 %v14022_v20, %v26651_v38  ;;  %v14025_v45 = vmax.f32 %v13993_v16, 0.0  ;;  %v13992_v5 = vadd.f32 %v25393_v61, %v13953_v10  ;;  %v13916_v47 = vadd.f32 %v13773_v7, %v13528_v28  ;;  %v26662_v38 = vld [vmem:[#allocation80_spill] sm:$0xff] }
 0x9ba   : > { %14087 = vst.msk [vmem:[%s25429_s21 + $0x8] sm:$0xff] %vm4166_vm1, %v14055_v49  ;;  %v13956_v60 = vmul.f32 %v25378_v63, %v13917_v62  ;;  %v18479_v54 = vpop.f32.mrf.mxu1  ;;  %v13144_v55 = vadd.f32 %v26655_v51, %v12755_v36  ;;  %v13147_v28 = vadd.f32 %v26656_v23, %v12758_v2  ;;  %v26657_v49 = vld [vmem:[#allocation58_spill] sm:$0xff]  ;;  %v26659_v24 = vmax.f32 %v26658_v42, 0.0  ;;  %v26660_v62 = vld [vmem:[#allocation91_spill] sm:$0xff]  ;;  %v26668_v51 = vld [vmem:[#allocation61_spill] sm:$0xff] }
 0x9bb   : > { %14086 = vst.msk [vmem:[%s25429_s21] sm:$0xff] %vm4166_vm1, %v14054_v12  ;;  %v14057_v33 = vadd.f32 %v14025_v45, %v26654_v11  ;;  %v14024_v30 = vmax.f32 %v13992_v5, 0.0  ;;  %v13955_v44 = vmul.f32 %v25378_v63, %v13916_v47  ;;  %v13919_v39 = vadd.f32 %v18479_v54, %v13531_v4  ;;  %v26661_v4 = vld [vmem:[#allocation53_spill] sm:$0xff]  ;;  %v26663_v45 = vld [vmem:[#allocation66_spill] sm:$0xff] }
 0x9bc   : > { %v13995_v18 = vadd.f32 %v25393_v61, %v13956_v60  ;;  %v13783_v22 = vpop.f32.mrf.mxu1  ;;  %v13533_v20 = vadd.f32 %v26657_v49, %v13145_v8  ;;  %v13146_v7 = vadd.f32 %v26660_v62, %v12757_v52  ;;  %v12760_v12 = vadd.f32 %v26662_v38, %v26661_v4  ;;  %v26664_v5 = vld [vmem:[#allocation70_spill] sm:$0xff]  ;;  %v26674_v4 = vld [vmem:[#allocation44_spill] sm:$0xff] }
 0x9bd   : > { %14089 = vst.msk [vmem:[%s25429_s21 + $0x18] sm:$0xff] %vm4166_vm1, %v14057_v33  ;;  %v14056_v16 = vadd.f32 %v14024_v30, %v26659_v24  ;;  %v13994_v10 = vadd.f32 %v25393_v61, %v13955_v44  ;;  %v13958_v56 = vmul.f32 %v25378_v63, %v13919_v39  ;;  %v13918_v36 = vadd.f32 %v13783_v22, %v13530_v43  ;;  %v26665_v43 = vld [vmem:[#allocation38_spill] sm:$0xff]  ;;  %v26667_v30 = vld [vmem:[#allocation41_spill] sm:$0xff]  ;;  %v26669_v22 = vld [vmem:[#allocation8_spill] sm:$0xff] }
 0x9be   : > { %v12759_v8 = vadd.f32 %v26664_v5, %v26663_v45  ;;  %v14027_v47 = vmax.f32 %v13995_v18, 0.0  ;;  %v18482_v46 = vpop.f32.mrf.mxu1  ;;  %v13149_v11 = vadd.f32 %v26665_v43, %v12760_v12  ;;  %v26666_v52 = vmax.f32 %v25220_v9, 0.0  ;;  %v25485_v18 = vpop.f32.mrf.mxu0  ;;  %v26672_v9 = vld [vmem:[#allocation102_spill] sm:$0xff]  ;;  %v26675_v12 = vld [vmem:[#allocation15_spill] sm:$0xff] }
 0x9bf   : > { %14088 = vst.msk [vmem:[%s25429_s21 + $0x10] sm:$0xff] %vm4166_vm1, %v14056_v16  ;;  %v14026_v2 = vmax.f32 %v13994_v10, 0.0  ;;  %v13997_v37 = vadd.f32 %v25393_v61, %v13958_v56  ;;  %v13957_v60 = vmul.f32 %v25378_v63, %v13918_v36  ;;  %v13921_v54 = vadd.f32 %v18482_v46, %v13533_v20  ;;  %v26671_v10 = vld [vmem:[#allocation74_spill] sm:$0xff]  ;;  %v26673_v36 = vld [vmem:[#allocation33_spill] sm:$0xff] }
 0x9c0   : > { %v14059_v33 = vadd.f32 %v14027_v47, %v26666_v52  ;;  %v13532_v44 = vadd.f32 %v26667_v30, %v13144_v55  ;;  %v13793_v39 = vpop.f32.mrf.mxu1  ;;  %v13535_v23 = vadd.f32 %v26668_v51, %v13147_v28  ;;  %v26670_v49 = vmax.f32 %v26669_v22, 0.0  ;;  %v26680_v43 = vld [vmem:[#allocation34_spill] sm:$0xff]  ;;  %v26682_v51 = vld [vmem:[#allocation9_spill] sm:$0xff] }
 0x9c1   : > { %v14029_v24 = vmax.f32 %v13997_v37, 0.0  ;;  %v13996_v16 = vadd.f32 %v25393_v61, %v13957_v60  ;;  %v13960_v20 = vmul.f32 %v25378_v63, %v13921_v54  ;;  %v13148_v56 = vadd.f32 %v26671_v10, %v12759_v8  ;;  %v26677_v8 = vld [vmem:[#allocation56_spill] sm:$0xff]  ;;  %v26679_v54 = vld [vmem:[#allocation59_spill] sm:$0xff]  ;;  %v26685_v10 = vld [vmem:[#allocation89_spill] sm:$0xff] }
 0x9c2   : > { %v14058_v42 = vadd.f32 %v14026_v2, %v26670_v49  ;;  %v12762_v62 = vadd.f32 %v26673_v36, %v26672_v9  ;;  %14091 = vst.msk [vmem:[%s25429_s21 + $0x28] sm:$0xff] %vm4166_vm1, %v14059_v33  ;;  %v13920_v55 = vadd.f32 %v13793_v39, %v13532_v44  ;;  %v18485_v28 = vpop.f32.mrf.mxu1  ;;  %v13534_v38 = vadd.f32 %v26674_v4, %v13146_v7  ;;  %v26678_v37 = vld [vmem:[#allocation48_spill] sm:$0xff]  ;;  %v26681_v7 = vld [vmem:[#allocation13_spill] sm:$0xff]  ;;  %v25508_v39 = vpop.f32.mrf.mxu0  ;;  %v26687_v4 = vld [vmem:[#allocation11_spill] sm:$0xff] }
 0x9c3   : > { %v26676_v45 = vmax.f32 %v26675_v12, 0.0  ;;  %v14028_v47 = vmax.f32 %v13996_v16, 0.0  ;;  %v13999_v46 = vadd.f32 %v25393_v61, %v13960_v20  ;;  %v13923_v2 = vadd.f32 %v18485_v28, %v13535_v23  ;;  %v26684_v16 = vld [vmem:[#allocation88_spill] sm:$0xff] }
 0x9c4   : > { %14090 = vst.msk [vmem:[%s25429_s21 + $0x20] sm:$0xff] %vm4166_vm1, %v14058_v42  ;;  %v12761_v60 = vadd.f32 %v26678_v37, %v26677_v8  ;;  %v12764_v52 = vadd.f32 %v26680_v43, %v26679_v54  ;;  %v13959_v33 = vmul.f32 %v25378_v63, %v13920_v55  ;;  %v13803_v30 = vpop.f32.mrf.mxu1  ;;  %v13537_v44 = vadd.f32 %v26681_v7, %v13149_v11  ;;  %v26686_v11 = vld [vmem:[#allocation18_spill] sm:$0xff]  ;;  %v26693_v54 = vld [vmem:[#allocation93_spill] sm:$0xff] }
 0x9c5   : > { %v14061_v5 = vadd.f32 %v14029_v24, %v26676_v45  ;;  %v26683_v22 = vmax.f32 %v26682_v51, 0.0  ;;  %v14031_v23 = vmax.f32 %v13999_v46, 0.0  ;;  %v13962_v42 = vmul.f32 %v25378_v63, %v13923_v2  ;;  %v26689_v46 = vld [vmem:[#allocation57_spill] sm:$0xff]  ;;  %v26691_v8 = vld [vmem:[#allocation82_spill] sm:$0xff] }
 0x9c6   : > { %v13922_v24 = vadd.f32 %v13803_v30, %v13534_v38  ;;  %v13151_v20 = vadd.f32 %v26684_v16, %v12762_v62  ;;  %v13150_v9 = vadd.f32 %v26685_v10, %v12761_v60  ;;  %v13998_v36 = vadd.f32 %v25393_v61, %v13959_v33  ;;  %v18488_v55 = vpop.f32.mrf.mxu1  ;;  %v26690_v2 = vld [vmem:[#allocation69_spill] sm:$0xff]  ;;  %v26692_v60 = vld [vmem:[#allocation103_spill] sm:$0xff]  ;;  %v25530_v30 = vpop.f32.mrf.mxu0 }
 0x9c7   : > { %14093 = vst.msk [vmem:[%s25429_s21 + $0x38] sm:$0xff] %vm4166_vm1, %v14061_v5  ;;  %v14060_v49 = vadd.f32 %v14028_v47, %v26683_v22  ;;  %v13536_v28 = vadd.f32 %v26686_v11, %v13148_v56  ;;  %v26688_v12 = vmax.f32 %v26687_v4, 0.0  ;;  %v14001_v5 = vadd.f32 %v25393_v61, %v13962_v42 }
 0x9c8   : > { %v13961_v47 = vmul.f32 %v25378_v63, %v13922_v24  ;;  %v13925_v38 = vadd.f32 %v18488_v55, %v13537_v44  ;;  %v13153_v62 = vadd.f32 %v26689_v46, %v12764_v52  ;;  %v12763_v37 = vadd.f32 %v26691_v8, %v26690_v2  ;;  %v13813_v56 = vpop.f32.mrf.mxu1  ;;  %v26694_v52 = vld [vmem:[#allocation104_spill] sm:$0xff] }
 0x9c9   : > { %14092 = vst.msk [vmem:[%s25429_s21 + $0x30] sm:$0xff] %vm4166_vm1, %v14060_v49  ;;  %v14063_v45 = vadd.f32 %v14031_v23, %v26688_v12  ;;  %v12766_v43 = vadd.f32 %v26693_v54, %v26692_v60  ;;  %v14030_v33 = vmax.f32 %v13998_v36, 0.0  ;;  %v14033_v7 = vmax.f32 %v14001_v5, 0.0  ;;  %v26695_v23 = vld [vmem:[#allocation12_spill] sm:$0xff] }
 0x9ca   : > { %v14000_v51 = vadd.f32 %v25393_v61, %v13961_v47  ;;  %v13964_v44 = vmul.f32 %v25378_v63, %v13925_v38  ;;  %v13924_v22 = vadd.f32 %v13813_v56, %v13536_v28  ;;  %v13152_v49 = vadd.f32 %v26694_v52, %v12763_v37  ;;  %v18491_v10 = vpop.f32.mrf.mxu1  ;;  %v26697_v55 = vld [vmem:[#allocation16_spill] sm:$0xff]  ;;  %v26700_v38 = vld [vmem:[#allocation62_spill] sm:$0xff] }
 0x9cb   : > { %14095 = vst.msk [vmem:[%s25429_s21 + $0x48] sm:$0xff] %vm4166_vm1, %v14063_v45  ;;  %v26696_v42 = vmax.f32 %v26695_v23, 0.0  ;;  %v13539_v16 = vadd.f32 %v25292_v19, %v13151_v20  ;;  %v13538_v36 = vadd.f32 %v25330_v13, %v13150_v9  ;;  %v26698_v11 = vmax.f32 %v26697_v55, 0.0  ;;  %v26699_v28 = vld [vmem:[#allocation92_spill] sm:$0xff]  ;;  %v25551_v9 = vpop.f32.mrf.mxu0  ;;  %v26704_v56 = vld [vmem:[#allocation54_spill] sm:$0xff] }
 0x9cc   : > { %v14032_v12 = vmax.f32 %v14000_v51, 0.0  ;;  %v14003_v45 = vadd.f32 %v25393_v61, %v13964_v44  ;;  %v13963_v5 = vmul.f32 %v25378_v63, %v13924_v22  ;;  %v13155_v47 = vadd.f32 %v26699_v28, %v12766_v43  ;;  %v26701_v46 = vld [vmem:[#allocation36_spill] sm:$0xff]  ;;  %v13823_v20 = vpop.f32.mrf.mxu1  ;;  %v26705_v51 = vld [vmem:[#allocation105_spill] sm:$0xff] }
 0x9cd   : > { %v14062_v24 = vadd.f32 %v14030_v33, %v26696_v42  ;;  %v14065_v4 = vadd.f32 %v14033_v7, %v26698_v11  ;;  %v12765_v2 = vadd.f32 %v26701_v46, %v26700_v38  ;;  %v13927_v19 = vadd.f32 %v18491_v10, %v13539_v16  ;;  %v26703_v33 = vld [vmem:[#allocation73_spill] sm:$0xff]  ;;  %v26710_v11 = vld [vmem:[#allocation94_spill] sm:$0xff] }
 0x9ce   : > { %v13541_v13 = vadd.f32 %v25366_v35, %v13153_v62  ;;  %v26702_v8 = vmax.f32 %v25253_v3, 0.0  ;;  %v14035_v60 = vmax.f32 %v14003_v45, 0.0  ;;  %v14002_v54 = vadd.f32 %v25393_v61, %v13963_v5  ;;  %v26706_v44 = vld [vmem:[#allocation37_spill] sm:$0xff]  ;;  %v18494_v62 = vpop.f32.mrf.mxu1 }
 0x9cf   : > { %14094 = vst.msk [vmem:[%s25429_s21 + $0x40] sm:$0xff] %vm4166_vm1, %v14062_v24  ;;  %14097 = vst.msk [vmem:[%s25429_s21 + $0x58] sm:$0xff] %vm4166_vm1, %v14065_v4  ;;  %v13926_v43 = vadd.f32 %v13823_v20, %v13538_v36  ;;  %v12768_v7 = vadd.f32 %v26704_v56, %v26703_v33  ;;  %v12767_v22 = vadd.f32 %v26706_v44, %v26705_v51  ;;  %v26707_v3 = vld [vmem:[#allocation17_spill] sm:$0xff]  ;;  %v26709_v36 = vld [vmem:[#allocation60_spill] sm:$0xff] }
 0x9d0   : > { %v14064_v37 = vadd.f32 %v14032_v12, %v26702_v8  ;;  %v13966_v35 = vmul.f32 %v25378_v63, %v13927_v19  ;;  %v13540_v52 = vadd.f32 %v25396_v41, %v13152_v49  ;;  %v26708_v23 = vmax.f32 %v26707_v3, 0.0  ;;  %v13833_v45 = vpop.f32.mrf.mxu1  ;;  %v25573_v41 = vpop.f32.mrf.mxu0  ;;  %v26711_v49 = vld [vmem:[#allocation27_spill] sm:$0xff]  ;;  %v26713_v20 = vld [vmem:[#allocation42_spill] sm:$0xff]  ;;  %v26714_v8 = vld [vmem:[#allocation72_spill] sm:$0xff] }
 0x9d1   : > { %v14034_v24 = vmax.f32 %v14002_v54, 0.0  ;;  %v13965_v16 = vmul.f32 %v25378_v63, %v13926_v43  ;;  %v13929_v10 = vadd.f32 %v18494_v62, %v13541_v13  ;;  %v13154_v55 = vadd.f32 %v26709_v36, %v12765_v2  ;;  %v26716_v54 = vld [vmem:[#allocation65_spill] sm:$0xff] }
 0x9d2   : > { %14096 = vst.msk [vmem:[%s25429_s21 + $0x50] sm:$0xff] %vm4166_vm1, %v14064_v37  ;;  %v14067_v42 = vadd.f32 %v14035_v60, %v26708_v23  ;;  %v13157_v4 = vadd.f32 %v26710_v11, %v12768_v7  ;;  %v14005_v12 = vadd.f32 %v25393_v61, %v13966_v35  ;;  %v13543_v5 = vadd.f32 %v25419_v32, %v13155_v47  ;;  %v26715_v37 = vld [vmem:[#allocation39_spill] sm:$0xff]  ;;  %v26717_v43 = vld [vmem:[#allocation101_spill] sm:$0xff]  ;;  %v18497_v33 = vpop.f32.mrf.mxu1 }
 0x9d3   : > { %v26712_v28 = vmax.f32 %v26711_v49, 0.0  ;;  %v14004_v46 = vadd.f32 %v25393_v61, %v13965_v16  ;;  %v13968_v19 = vmul.f32 %v25378_v63, %v13929_v10  ;;  %v13928_v2 = vadd.f32 %v13833_v45, %v13540_v52  ;;  %v26718_v35 = vld [vmem:[#allocation95_spill] sm:$0xff]  ;;  %v18457_v16 = vpop.f32.mrf.mxu0 }
 0x9d4   : > { %14099 = vst.msk [vmem:[%s25429_s21 + $0x68] sm:$0xff] %vm4166_vm1, %v14067_v42  ;;  %v13156_v13 = vadd.f32 %v26713_v20, %v12767_v22  ;;  %v12770_v60 = vadd.f32 %v26715_v37, %v26714_v8  ;;  %v12769_v32 = vadd.f32 %v26717_v43, %v26716_v54  ;;  %v14037_v47 = vmax.f32 %v14005_v12, 0.0  ;;  %v26719_v22 = vld [vmem:[#allocation19_spill] sm:$0xff]  ;;  %v13843_v42 = vpop.f32.mrf.mxu1  ;;  %v26726_v8 = vld [vmem:[#allocation76_spill] sm:$0xff]  ;;  %v26729_v43 = vld [vmem:[#allocation90_spill] sm:$0xff] }
 0x9d5   : > { %v14066_v38 = vadd.f32 %v14034_v24, %v26712_v28  ;;  %v14036_v56 = vmax.f32 %v14004_v46, 0.0  ;;  %v14007_v7 = vadd.f32 %v25393_v61, %v13968_v19  ;;  %v13967_v51 = vmul.f32 %v25378_v63, %v13928_v2  ;;  %v26723_v28 = vld [vmem:[#allocation106_spill] sm:$0xff]  ;;  %v26727_v37 = vld [vmem:[#allocation40_spill] sm:$0xff] }
 0x9d6   : > { %v13931_v44 = vadd.f32 %v18497_v33, %v13543_v5  ;;  %v13159_v62 = vadd.f32 %v26718_v35, %v12770_v60  ;;  %v26720_v52 = vmax.f32 %v26719_v22, 0.0  ;;  %v13542_v23 = vadd.f32 %v25441_v27, %v13154_v55  ;;  %v26722_v5 = vld [vmem:[#allocation7_spill] sm:$0xff]  ;;  %v18500_v55 = vpop.f32.mrf.mxu1  ;;  %v26728_v54 = vld [vmem:[#allocation68_spill] sm:$0xff]  ;;  %v26731_v35 = vld [vmem:[#allocation10_spill] sm:$0xff] }
 0x9d7   : > { %14098 = vst.msk [vmem:[%s25429_s21 + $0x60] sm:$0xff] %vm4166_vm1, %v14066_v38  ;;  %v13545_v24 = vadd.f32 %v25463_v31, %v13157_v4  ;;  %v26721_v10 = vmax.f32 %v25290_v14, 0.0  ;;  %v14039_v11 = vmax.f32 %v14007_v7, 0.0  ;;  %v14006_v12 = vadd.f32 %v25393_v61, %v13967_v51  ;;  %v26724_v38 = vld [vmem:[#allocation107_spill] sm:$0xff] }
 0x9d8   : > { %v14069_v3 = vadd.f32 %v14037_v47, %v26720_v52  ;;  %v13970_v45 = vmul.f32 %v25378_v63, %v13931_v44  ;;  %v13158_v49 = vadd.f32 %v26722_v5, %v12769_v32  ;;  %v12772_v46 = vadd.f32 %v26724_v38, %v26723_v28  ;;  %v13853_v33 = vpop.f32.mrf.mxu1  ;;  %v26732_v52 = vld [vmem:[#allocation14_spill] sm:$0xff]  ;;  %v26736_v5 = vld [vmem:[#allocation35_spill] sm:$0xff] }
 0x9d9   : > { %v14068_v36 = vadd.f32 %v14036_v56, %v26721_v10  ;;  %v13930_v27 = vadd.f32 %v13843_v42, %v13542_v23  ;;  %v13544_v31 = vadd.f32 %v25485_v18, %v13156_v13  ;;  %v26725_v14 = vmax.f32 %v25305_v15, 0.0  ;;  %v13495_v13 = vpop.f32.mrf.mxu0  ;;  %v26737_v38 = vld [vmem:[#allocation71_spill] sm:$0xff] }
 0x9da   : > { %14101 = vst.msk [vmem:[%s25429_s21 + $0x78] sm:$0xff] %vm4166_vm1, %v14069_v3  ;;  %v14038_v19 = vmax.f32 %v14006_v12, 0.0  ;;  %v14009_v2 = vadd.f32 %v25393_v61, %v13970_v45  ;;  %v13933_v20 = vadd.f32 %v18500_v55, %v13545_v24  ;;  %v12771_v60 = vadd.f32 %v26727_v37, %v26726_v8  ;;  %v18503_v42 = vpop.f32.mrf.mxu1  ;;  %v26735_v45 = vld [vmem:[#allocation108_spill] sm:$0xff] }
 0x9db   : > { %14100 = vst.msk [vmem:[%s25429_s21 + $0x70] sm:$0xff] %vm4166_vm1, %v14068_v36  ;;  %v14071_v4 = vadd.f32 %v14039_v11, %v26725_v14  ;;  %v12774_v32 = vadd.f32 %v26729_v43, %v26728_v54  ;;  %v13969_v47 = vmul.f32 %v25378_v63, %v13930_v27  ;;  %v13547_v18 = vadd.f32 %v25508_v39, %v13159_v62  ;;  %v26734_v11 = vld [vmem:[#allocation21_spill] sm:$0xff] }
 0x9dc   : > { %v26730_v15 = vmax.f32 %v25312_v48, 0.0  ;;  %v14041_v7 = vmax.f32 %v14009_v2, 0.0  ;;  %v13972_v51 = vmul.f32 %v25378_v63, %v13933_v20  ;;  %v13932_v44 = vadd.f32 %v13853_v33, %v13544_v31 }
 0x9dd   : > { %14103 = vst.msk [vmem:[%s25429_s21 + $0x88] sm:$0xff] %vm4166_vm1, %v14071_v4  ;;  %v13161_v22 = vadd.f32 %v26731_v35, %v12772_v46  ;;  %v13160_v3 = vadd.f32 %v26732_v52, %v12771_v60  ;;  %v14008_v23 = vadd.f32 %v25393_v61, %v13969_v47  ;;  %v13546_v39 = vadd.f32 %v25530_v30, %v13158_v49  ;;  %v26738_v46 = vld [vmem:[#allocation83_spill] sm:$0xff]  ;;  %v13863_v30 = vpop.f32.mrf.mxu1  ;;  %v18460_v49 = vpop.f32.mrf.mxu0 }
 0x9de   : > { %v14070_v56 = vadd.f32 %v14038_v19, %v26730_v15  ;;  %v26733_v62 = vmax.f32 %v25315_v50, 0.0  ;;  %v14011_v24 = vadd.f32 %v25393_v61, %v13972_v51  ;;  %v13971_v10 = vmul.f32 %v25378_v63, %v13932_v44  ;;  %v26739_v19 = vld [vmem:[#allocation20_spill] sm:$0xff]  ;;  %v26742_v15 = vld [vmem:[#allocation23_spill] sm:$0xff]  ;;  %v26744_v51 = vld [vmem:[#allocation77_spill] sm:$0xff] }
 0x9df   : > { %v13935_v36 = vadd.f32 %v18503_v42, %v13547_v18  ;;  %v13163_v12 = vadd.f32 %v26734_v11, %v12774_v32  ;;  %v12773_v28 = vadd.f32 %v26736_v5, %v26735_v45  ;;  %v12776_v27 = vadd.f32 %v26738_v46, %v26737_v38  ;;  %v18506_v60 = vpop.f32.mrf.mxu1  ;;  %v26746_v42 = vld [vmem:[#allocation85_spill] sm:$0xff]  ;;  %v26751_v46 = vld [vmem:[#allocation22_spill] sm:$0xff] }
 0x9e0   : > { %14102 = vst.msk [vmem:[%s25429_s21 + $0x80] sm:$0xff] %vm4166_vm1, %v14070_v56  ;;  %v14073_v48 = vadd.f32 %v14041_v7, %v26733_v62  ;;  %v14040_v55 = vmax.f32 %v14008_v23, 0.0  ;;  %v14043_v50 = vmax.f32 %v14011_v24, 0.0  ;;  %v14010_v31 = vadd.f32 %v25393_v61, %v13971_v10  ;;  %v26743_v7 = vld [vmem:[#allocation75_spill] sm:$0xff] }
 0x9e1   : > { %v13974_v14 = vmul.f32 %v25378_v63, %v13935_v36  ;;  %v13934_v4 = vadd.f32 %v13863_v30, %v13546_v39  ;;  %v13162_v2 = vadd.f32 %v26739_v19, %v12773_v28  ;;  %v26740_v20 = vmax.f32 %v25318_v40, 0.0  ;;  %v13873_v44 = vpop.f32.mrf.mxu1  ;;  %v26747_v39 = vld [vmem:[#allocation52_spill] sm:$0xff]  ;;  %v26749_v24 = vld [vmem:[#allocation51_spill] sm:$0xff] }
 0x9e2   : > { %14105 = vst.msk [vmem:[%s25429_s21 + $0x98] sm:$0xff] %vm4166_vm1, %v14073_v48  ;;  %v13549_v37 = vadd.f32 %v25551_v9, %v13161_v22  ;;  %v13548_v54 = vadd.f32 %v25573_v41, %v13160_v3  ;;  %v26741_v43 = vmax.f32 %v25333_v57, 0.0  ;;  %v14042_v47 = vmax.f32 %v14010_v31, 0.0  ;;  %v13505_v41 = vpop.f32.mrf.mxu0  ;;  %v26748_v48 = vld [vmem:[#allocation96_spill] sm:$0xff] }
 0x9e3   : > { %v14072_v8 = vadd.f32 %v14040_v55, %v26740_v20  ;;  %v14013_v33 = vadd.f32 %v25393_v61, %v13974_v14  ;;  %v13973_v18 = vmul.f32 %v25378_v63, %v13934_v4  ;;  %v13165_v56 = vadd.f32 %v26742_v15, %v12776_v27  ;;  %v26752_v55 = vld [vmem:[#allocation24_spill] sm:$0xff] }
 0x9e4   : > { %v14075_v32 = vadd.f32 %v14043_v50, %v26741_v43  ;;  %v12775_v40 = vadd.f32 %v26744_v51, %v26743_v7  ;;  %v13937_v9 = vadd.f32 %v18506_v60, %v13549_v37  ;;  %v13551_v35 = vadd.f32 %v18457_v16, %v13163_v12  ;;  %v18509_v16 = vpop.f32.mrf.mxu1  ;;  %v18463_v12 = vpop.f32.mrf.mxu0 }
 0x9e5   : > { %14104 = vst.msk [vmem:[%s25429_s21 + $0x90] sm:$0xff] %vm4166_vm1, %v14072_v8  ;;  %v26745_v57 = vmax.f32 %v25336_v53, 0.0  ;;  %v14045_v52 = vmax.f32 %v14013_v33, 0.0  ;;  %v14012_v3 = vadd.f32 %v25393_v61, %v13973_v18  ;;  %v13936_v23 = vadd.f32 %v13873_v44, %v13548_v54  ;;  %v26754_v8 = vld [vmem:[#allocation98_spill] sm:$0xff]  ;;  %v26755_v18 = vld [vmem:[#allocation49_spill] sm:$0xff] }
 0x9e6   : > { %14107 = vst.msk [vmem:[%s25429_s21 + $0xa8] sm:$0xff] %vm4166_vm1, %v14075_v32  ;;  %v12778_v62 = vadd.f32 %v26747_v39, %v26746_v42  ;;  %v12777_v10 = vadd.f32 %v26749_v24, %v26748_v48  ;;  %v13976_v36 = vmul.f32 %v25378_v63, %v13937_v9  ;;  %v13550_v11 = vadd.f32 %v13495_v13, %v13162_v2  ;;  %v13883_v31 = vpop.f32.mrf.mxu1  ;;  %v13515_v43 = vpop.f32.mrf.mxu0 }
 0x9e7   : > { %v14074_v22 = vadd.f32 %v14042_v47, %v26745_v57  ;;  %v26750_v53 = vmax.f32 %v25339_v25, 0.0  ;;  %v14044_v5 = vmax.f32 %v14012_v3, 0.0  ;;  %v13975_v28 = vmul.f32 %v25378_v63, %v13936_v23 }
 0x9e8   : > { %v13939_v38 = vadd.f32 %v18509_v16, %v13551_v35  ;;  %v13164_v27 = vadd.f32 %v26751_v46, %v12775_v40  ;;  %v13167_v30 = vadd.f32 %v26752_v55, %v12778_v62  ;;  %v14015_v50 = vadd.f32 %v25393_v61, %v13976_v36 }
 0x9e9   : > { %14106 = vst.msk [vmem:[%s25429_s21 + $0xa0] sm:$0xff] %vm4166_vm1, %v14074_v22  ;;  %v14077_v45 = vadd.f32 %v14045_v52, %v26750_v53  ;;  %v13553_v14 = vadd.f32 %v18460_v49, %v13165_v56  ;;  %v26753_v13 = vmax.f32 %v25347_v59, 0.0  ;;  %v14014_v25 = vadd.f32 %v25393_v61, %v13975_v28  ;;  %v18512_v49 = vpop.f32.mrf.mxu1  ;;  %v26758_v52 = vld [vmem:[#allocation99_spill] sm:$0xff] }
 0x9ea   : > { %v13978_v19 = vmul.f32 %v25378_v63, %v13939_v38  ;;  %v13938_v2 = vadd.f32 %v13883_v31, %v13550_v11  ;;  %v10394_v20 = vadd.f32 %v25171_v0, %v25414_v17  ;;  %v10354_v37 = vmul.f32 %v25158_v29, %v26754_v8 }
 0x9eb   : > { %14109 = vst.msk [vmem:[%s25429_s21 + $0xb8] sm:$0xff] %vm4166_vm1, %v14077_v45  ;;  %v14076_v4 = vadd.f32 %v14044_v5, %v26753_v13  ;;  %v13166_v60 = vadd.f32 %v25358_v6, %v12777_v10  ;;  %v14047_v54 = vmax.f32 %v14015_v50, 0.0  ;;  %v14046_v59 = vmax.f32 %v14014_v25, 0.0  ;;  %v13893_v51 = vpop.f32.mrf.mxu1 }
 0x9ec   : > { %v14017_v32 = vadd.f32 %v25393_v61, %v13978_v19  ;;  %v13977_v47 = vmul.f32 %v25378_v63, %v13938_v2  ;;  %v13941_v33 = vadd.f32 %v18512_v49, %v13553_v14  ;;  %v10357_v17 = vmul.f32 %v25158_v29, %v26755_v18 }
 0x9ed   : > { %14108 = vst.msk [vmem:[%s25429_s21 + $0xb0] sm:$0xff] %vm4166_vm1, %v14076_v4  ;;  %v13555_v15 = vadd.f32 %v18463_v12, %v13167_v30  ;;  %v26756_v56 = vmax.f32 %v25356_v34, 0.0  ;;  %v13552_v7 = vadd.f32 %v13505_v41, %v13164_v27  ;;  %v26757_v40 = vmax.f32 %v25361_v1, 0.0  ;;  %v18515_v41 = vpop.f32.mrf.mxu1 }
 0x9ee   : > { %v14049_v44 = vmax.f32 %v14017_v32, 0.0  ;;  %v14016_v35 = vadd.f32 %v25393_v61, %v13977_v47  ;;  %v13980_v57 = vmul.f32 %v25378_v63, %v13941_v33  ;;  %v10423_v22 = vmax.f32 %v25410_v26, 0.0 }
 0x9ef   : > { %v14079_v6 = vadd.f32 %v14047_v54, %v26756_v56  ;;  %v14078_v9 = vadd.f32 %v14046_v59, %v26757_v40  ;;  %v10356_v3 = vmul.f32 %v25158_v29, %v26758_v52  ;;  %v13554_v23 = vadd.f32 %v13515_v43, %v13166_v60  ;;  %v13903_v10 = vpop.f32.mrf.mxu1 }
 0x9f0   : > { %v13940_v34 = vadd.f32 %v13893_v51, %v13552_v7  ;;  %v14081_v1 = vadd.f32 %v14049_v44, %v10424_v58  ;;  %v14048_v42 = vmax.f32 %v14016_v35, 0.0  ;;  %v14019_v39 = vadd.f32 %v25393_v61, %v13980_v57 }
 0x9f1   : > { %14111 = vst.msk [vmem:[%s25429_s21 + $0xc8] sm:$0xff] %vm4166_vm1, %v14079_v6  ;;  %14110 = vst.msk [vmem:[%s25429_s21 + $0xc0] sm:$0xff] %vm4166_vm1, %v14078_v9  ;;  %v13943_v62 = vadd.f32 %v18515_v41, %v13555_v15  ;;  %v10426_v26 = vmax.f32 %v10394_v20, 0.0  ;;  %v10393_v48 = vadd.f32 %v25171_v0, %v10354_v37  ;;  %v10396_v29 = vadd.f32 %v25171_v0, %v10357_v17 }
 0x9f2   : > { %v13979_v24 = vmul.f32 %v25378_v63, %v13940_v34  ;;  %14113 = vst.msk [vmem:[%s25429_s21 + $0xd8] sm:$0xff] %vm4166_vm1, %v14081_v1  ;;  %v14080_v36 = vadd.f32 %v14048_v42, %v10423_v22  ;;  %v14051_v16 = vmax.f32 %v14019_v39, 0.0  ;;  %v13942_v58 = vadd.f32 %v13903_v10, %v13554_v23 }
 0x9f3   : > { %v13982_v21 = vmul.f32 %v25378_v63, %v13943_v62  ;;  %v10395_v12 = vadd.f32 %v25171_v0, %v10356_v3  ;;  %v10425_v28 = vmax.f32 %v10393_v48, 0.0  ;;  %v10428_v46 = vmax.f32 %v10396_v29, 0.0 }
 0x9f4   : > { %v14018_v11 = vadd.f32 %v25393_v61, %v13979_v24  ;;  %14112 = vst.msk [vmem:[%s25429_s21 + $0xd0] sm:$0xff] %vm4166_vm1, %v14080_v36  ;;  %v14083_v53 = vadd.f32 %v14051_v16, %v10426_v26  ;;  %v13981_v5 = vmul.f32 %v25378_v63, %v13942_v58 }
 0x9f5   : > { %v14021_v45 = vadd.f32 %v25393_v61, %v13982_v21  ;;  %v10427_v50 = vmax.f32 %v10395_v12, 0.0 }
 0x9f6   : > { %v14050_v38 = vmax.f32 %v14018_v11, 0.0  ;;  %14115 = vst.msk [vmem:[%s25429_s21 + $0xe8] sm:$0xff] %vm4166_vm1, %v14083_v53  ;;  %v14020_v55 = vadd.f32 %v25393_v61, %v13981_v5 }
 0x9f7   : > { %v14053_v27 = vmax.f32 %v14021_v45, 0.0 }
 0x9f8   : > { %v14082_v30 = vadd.f32 %v14050_v38, %v10425_v28  ;;  %v14052_v31 = vmax.f32 %v14020_v55, 0.0 }
 0x9f9   : > { %v14085_v0 = vadd.f32 %v14053_v27, %v10428_v46 }
 0x9fa   : > { %14114 = vst.msk [vmem:[%s25429_s21 + $0xe0] sm:$0xff] %vm4166_vm1, %v14082_v30  ;;  %v14084_v14 = vadd.f32 %v14052_v31, %v10427_v50 }
 0x9fb   : > { %14117 = vst.msk [vmem:[%s25429_s21 + $0xf8] sm:$0xff] %vm4166_vm1, %v14085_v0 }
 0x9fc   : > { %14116 = vst.msk [vmem:[%s25429_s21 + $0xf0] sm:$0xff] %vm4166_vm1, %v14084_v14 }
 0x9fd PF: > { %s28_s24 = sadd.s32 1, %s18821_s24  }
 0x9fe   : > { %p25_p1 = scmp.ge.s32.totalorder %s28_s24, 4  }
 0xa00   :  { %27 = sbr.rel (!%p25_p1) target bundleno = 4 (0x4), region = 153 }
 0xa05   :  { %14139 = vsyncpa [#allocation5], 1 }
 0xa06   :  { %14141 = vsyncpa [#allocation5 + $0x1], 1 }

</bundles_post_ra>
